<compile_context>
chip_gen: v7x
topology: tpu7x:2x2x1
jax: 0.10.0
libtpu: 0.0.40
codegen_flags: <defaults>
</compile_context>

<pallas_src>
import math

import numpy as np

import jax
import jax.numpy as jnp
from jax import lax
from jax.experimental import pallas as pl
from jax.experimental.pallas import tpu as pltpu

EPS = 1e-5
MXU_DTYPE = jnp.bfloat16      # matmul-input / inter-stage storage dtype
TILE_M = 512                  # row tile for the 1x1-conv stages

_VMEM_LIMIT_CACHE = None


def _vmem_limit_bytes():
    """Generation-aware VMEM budget: ~48 MiB on v7x (64 MiB/TC), ~96 MiB on v5e/v6e."""
    global _VMEM_LIMIT_CACHE
    if _VMEM_LIMIT_CACHE is None:
        try:
            cap = int(pltpu.get_tpu_info().vmem_capacity_bytes)
        except Exception:
            cap = 64 * 1024 * 1024
        _VMEM_LIMIT_CACHE = int(min((cap * 3) // 4, 100 * 1024 * 1024))
    return _VMEM_LIMIT_CACHE


# ----------------------------- small helpers --------------------------------
def _fold_bn(gamma, beta, sum_, sumsq, count):
    """Fold training-mode BN (biased var) into per-channel scale/shift (f32)."""
    mu = sum_ / count
    var = jnp.maximum(sumsq / count - mu * mu, 0.0)
    scale = gamma * lax.rsqrt(var + EPS)
    shift = beta - mu * scale
    return scale.astype(jnp.float32), shift.astype(jnp.float32)


def _stats_rows(t):
    """(rows, C) f32 -> (8, C): row0 = per-channel sum, row1 = sum of squares."""
    s = jnp.sum(t, axis=0, keepdims=True)
    sq = jnp.sum(t * t, axis=0, keepdims=True)
    row = lax.broadcasted_iota(jnp.int32, (8, t.shape[1]), 0)
    return jnp.where(row == 0, s, 0.0) + jnp.where(row == 1, sq, 0.0)


def _conv3x3_masks(H, W):
    """Host-side constant: 9 border masks (one per 3x3 tap), shape (9, H*W, 1) f32."""
    HW = H * W
    idx = np.arange(HW)
    hh, ww = idx // W, idx % W
    m = []
    for oh in (-1, 0, 1):
        for ow in (-1, 0, 1):
            ok = (hh + oh >= 0) & (hh + oh < H) & (ww + ow >= 0) & (ww + ow < W)
            m.append(ok)
    return jnp.asarray(np.stack(m).astype(np.float32).reshape(9, HW, 1))


# ------------------------------- kernels -------------------------------------
def _make_stage1_kernel(M, tile_m):
    # bn1-apply + relu + conv1 (1x1 == matmul); emit bn2 partial stats (f32).
    need_mask = (M % tile_m) != 0

    def kernel(x_ref, sc1_ref, sh1_ref, w1_ref, t1_ref, st_ref):
        a = jnp.maximum(x_ref[...] * sc1_ref[...] + sh1_ref[...], 0.0)
        t1 = jnp.dot(a.astype(MXU_DTYPE), w1_ref[...],
                     preferred_element_type=jnp.float32)
        t1_ref[...] = t1.astype(t1_ref.dtype)          # bf16 inter-stage store
        if need_mask:                                   # edge tile of the cdiv grid
            row = (pl.program_id(0) * tile_m
                   + lax.broadcasted_iota(jnp.int32, (tile_m, 1), 0))
            t1 = jnp.where(row < M, t1, 0.0)
        st_ref[0] = _stats_rows(t1)                     # stats from f32, pre-cast

    return kernel


def _make_stage2_kernel(H, W):
    # bn2-apply + relu + conv2 (3x3, stride 1, pad 1): 9 rolled+masked matmuls
    # on the in-register activation of one image; emit bn3 partial stats.
    HW = H * W

    def kernel(t1_ref, sc2_ref, sh2_ref, w2_ref, mask_ref, t2_ref, st_ref):
        a = jnp.maximum(t1_ref[0].astype(jnp.float32) * sc2_ref[...]
                        + sh2_ref[...], 0.0)            # (HW, Cp) f32
        acc = jnp.zeros((HW, w2_ref.shape[2]), jnp.float32)
        k = 0
        for oh in (-1, 0, 1):
            for ow in (-1, 0, 1):
                d = oh * W + ow
                # tap[r] = a[r + d] for valid r; wrapped / cross-row elements
                # are exactly the ones killed by the precomputed border mask.
                shifted = a if d == 0 else pltpu.roll(a, shift=(-d) % HW, axis=0)
                tap = jnp.where(mask_ref[k] != 0.0, shifted, 0.0).astype(MXU_DTYPE)
                acc = acc + jnp.dot(tap, w2_ref[k],
                                    preferred_element_type=jnp.float32)
                k += 1
        st_ref[0] = _stats_rows(acc)                    # stats from f32, pre-cast
        t2_ref[0] = acc.astype(t2_ref.dtype)            # bf16 inter-stage store

    return kernel


def _stage3_kernel(t2_ref, x_ref, sc3_ref, sh3_ref, w3_ref, o_ref):
    # bn3-apply + relu + conv3 (1x1) + residual add.
    a = jnp.maximum(t2_ref[...].astype(jnp.float32) * sc3_ref[...]
                    + sh3_ref[...], 0.0)
    o_ref[...] = (jnp.dot(a.astype(MXU_DTYPE), w3_ref[...],
                          preferred_element_type=jnp.float32) + x_ref[...])


# ------------------------------- wrapper --------------------------------------
def preact_bottleneck(x_nchw, p):
    N, Cin, H, W = x_nchw.shape
    Cp = p["w1"].shape[1]
    Cout = p["w3"].shape[1]
    assert Cout == Cin, "stride=1 / downsample=None requires inplanes == planes*4"
    HW = H * W
    M = N * HW
    assert HW % 8 == 0

    # Row tiling for the 1x1 stages: 512-row tiles, cdiv grid (no tiny fallback).
    tile_m = min(TILE_M, M)
    grid_m = pl.cdiv(M, tile_m)

    # Small weights only get cast/reshaped; activations stay unpadded.
    w1 = p["w1"].astype(MXU_DTYPE)                      # (Cin, Cp)
    w2 = p["w2"].reshape(9, Cp, Cp).astype(MXU_DTYPE)   # (3,3,Cp,Cp) -> (9,Cp,Cp)
    w3 = p["w3"].astype(MXU_DTYPE)                      # (Cp, Cout)

    cparams = pltpu.CompilerParams(dimension_semantics=("parallel",),
                                   vmem_limit_bytes=_vmem_limit_bytes())

    # bn1 stats straight from the NCHW input (no padded / transposed stats copy).
    xf = x_nchw.astype(jnp.float32)
    s1 = jnp.sum(xf, axis=(0, 2, 3)).reshape(1, Cin)
    q1 = jnp.sum(xf * xf, axis=(0, 2, 3)).reshape(1, Cin)
    sc1, sh1 = _fold_bn(p["g1"], p["b1"], s1, q1, M)

    # Layout for the matmul stages: NCHW -> NHWC -> (M, Cin), unpadded.
    x2d = jnp.transpose(xf, (0, 2, 3, 1)).reshape(M, Cin)

    # ---- kernel 1: bn1 + relu + conv1 (tiled over M) -------------------------
    t1, st1 = pl.pallas_call(
        _make_stage1_kernel(M, tile_m),
        out_shape=(jax.ShapeDtypeStruct((M, Cp), MXU_DTYPE),
                   jax.ShapeDtypeStruct((grid_m, 8, Cp), jnp.float32)),
        grid=(grid_m,),
        in_specs=[pl.BlockSpec((tile_m, Cin), lambda i: (i, 0)),
                  pl.BlockSpec((1, Cin), lambda i: (0, 0)),
                  pl.BlockSpec((1, Cin), lambda i: (0, 0)),
                  pl.BlockSpec((Cin, Cp), lambda i: (0, 0))],
        out_specs=(pl.BlockSpec((tile_m, Cp), lambda i: (i, 0)),
                   pl.BlockSpec((1, 8, Cp), lambda i: (i, 0, 0))),
        compiler_params=cparams,
    )(x2d, sc1, sh1, w1)

    tot1 = jnp.sum(st1, axis=0)
    sc2, sh2 = _fold_bn(p["g2"], p["b2"], tot1[0:1], tot1[1:2], M)

    # ---- kernel 2: bn2 + relu + conv2 3x3 (one image per grid step) ----------
    masks = _conv3x3_masks(H, W)                        # constant, (9, HW, 1) f32
    t2, st2 = pl.pallas_call(
        _make_stage2_kernel(H, W),
        out_shape=(jax.ShapeDtypeStruct((N, HW, Cp), MXU_DTYPE),
                   jax.ShapeDtypeStruct((N, 8, Cp), jnp.float32)),
        grid=(N,),
        in_specs=[pl.BlockSpec((1, HW, Cp), lambda n: (n, 0, 0)),
                  pl.BlockSpec((1, Cp), lambda n: (0, 0)),
                  pl.BlockSpec((1, Cp), lambda n: (0, 0)),
                  pl.BlockSpec((9, Cp, Cp), lambda n: (0, 0, 0)),
                  pl.BlockSpec((9, HW, 1), lambda n: (0, 0, 0))],
        out_specs=(pl.BlockSpec((1, HW, Cp), lambda n: (n, 0, 0)),
                   pl.BlockSpec((1, 8, Cp), lambda n: (n, 0, 0))),
        compiler_params=cparams,
    )(t1.reshape(N, HW, Cp), sc2, sh2, w2, masks)

    tot2 = jnp.sum(st2, axis=0)
    sc3, sh3 = _fold_bn(p["g3"], p["b3"], tot2[0:1], tot2[1:2], M)

    # ---- kernel 3: bn3 + relu + conv3 + residual (tiled over M) --------------
    out2d = pl.pallas_call(
        _stage3_kernel,
        out_shape=jax.ShapeDtypeStruct((M, Cout), jnp.float32),
        grid=(grid_m,),
        in_specs=[pl.BlockSpec((tile_m, Cp), lambda i: (i, 0)),
                  pl.BlockSpec((tile_m, Cin), lambda i: (i, 0)),
                  pl.BlockSpec((1, Cp), lambda i: (0, 0)),
                  pl.BlockSpec((1, Cp), lambda i: (0, 0)),
                  pl.BlockSpec((Cp, Cout), lambda i: (0, 0))],
        out_specs=pl.BlockSpec((tile_m, Cout), lambda i: (i, 0)),
        compiler_params=cparams,
    )(t2.reshape(M, Cp), x2d, sc3, sh3, w3)

    out = out2d.reshape(N, H, W, Cout)
    return jnp.transpose(out, (0, 3, 1, 2))


# ------------------------------ params / reference ---------------------------
def init_params(key, inplanes, planes):
    exp = 4
    ks = jax.random.split(key, 9)
    w1 = jax.random.normal(ks[0], (inplanes, planes), jnp.float32) / math.sqrt(inplanes)
    w2 = jax.random.normal(ks[1], (3, 3, planes, planes), jnp.float32) / math.sqrt(9 * planes)
    w3 = jax.random.normal(ks[2], (planes, planes * exp), jnp.float32) / math.sqrt(planes)
    g1 = 1.0 + 0.1 * jax.random.normal(ks[3], (1, inplanes), jnp.float32)
    b1 = 0.1 * jax.random.normal(ks[4], (1, inplanes), jnp.float32)
    g2 = 1.0 + 0.1 * jax.random.normal(ks[5], (1, planes), jnp.float32)
    b2 = 0.1 * jax.random.normal(ks[6], (1, planes), jnp.float32)
    g3 = 1.0 + 0.1 * jax.random.normal(ks[7], (1, planes), jnp.float32)
    b3 = 0.1 * jax.random.normal(ks[8], (1, planes), jnp.float32)
    return dict(w1=w1, w2=w2, w3=w3, g1=g1, b1=b1, g2=g2, b2=b2, g3=g3, b3=b3)


def reference(x_nchw, p):
    """Pure-JAX reference with the same mixed-precision policy as the kernels:
    bf16 MXU inputs, f32 accumulation, f32 training-mode BN whose stats are
    taken from the f32 conv outputs, and bf16 inter-stage storage."""
    bf = MXU_DTYPE
    x = jnp.transpose(x_nchw, (0, 2, 3, 1)).astype(jnp.float32)  # NHWC

    def stats(t):
        mu = jnp.mean(t, axis=(0, 1, 2), keepdims=True)
        var = jnp.mean(jnp.square(t - mu), axis=(0, 1, 2), keepdims=True)
        return mu, var

    def bn_relu(t, mu, var, g, b):
        t = (t - mu) * (g.reshape(1, 1, 1, -1) * lax.rsqrt(var + EPS)) + b.reshape(1, 1, 1, -1)
        return jnp.maximum(t, 0.0)

    mu1, var1 = stats(x)
    a = bn_relu(x, mu1, var1, p["g1"], p["b1"])
    t1 = jnp.einsum("nhwc,co->nhwo", a.astype(bf), p["w1"].astype(bf),
                    preferred_element_type=jnp.float32)
    mu2, var2 = stats(t1)                               # stats from f32 (like kernel)
    t1 = t1.astype(bf).astype(jnp.float32)              # bf16 inter-stage storage
    a = bn_relu(t1, mu2, var2, p["g2"], p["b2"])
    t2 = lax.conv_general_dilated(a.astype(bf), p["w2"].astype(bf), (1, 1), "SAME",
                                  dimension_numbers=("NHWC", "HWIO", "NHWC"),
                                  preferred_element_type=jnp.float32)
    mu3, var3 = stats(t2)
    t2 = t2.astype(bf).astype(jnp.float32)
    a = bn_relu(t2, mu3, var3, p["g3"], p["b3"])
    t3 = jnp.einsum("nhwc,co->nhwo", a.astype(bf), p["w3"].astype(bf),
                    preferred_element_type=jnp.float32)
    return jnp.transpose(t3 + x, (0, 3, 1, 2))


if __name__ == "__main__":
    key = jax.random.PRNGKey(0)
    k_x, k_p = jax.random.split(key)

    planes = 4
    inplanes = planes * 4          # expansion = 4, downsample=None, stride=1
    N, H, W = 2, 16, 16

    x = jax.random.normal(k_x, (N, inplanes, H, W), jnp.float32)   # NCHW, like PyTorch
    params = init_params(k_p, inplanes, planes)

    out = jax.block_until_ready(jax.jit(preact_bottleneck)(x, params))
    ref = jax.block_until_ready(reference(x, params))

    assert out.shape == (N, inplanes, H, W)
    err = jnp.max(jnp.abs(out - ref))
    assert jnp.allclose(out, ref, atol=2e-2, rtol=2e-2), \
        f"mismatch: max abs err {err}"

    print("KERNEL_OK")
</pallas_src>

<mosaic_0001>
module attributes {stable_mosaic.version = 11 : i64} {
  func.func @kernel(%arg0: i32, %arg1: memref<1x256x4xbf16, #tpu.memory_space<vmem>>, %arg2: memref<1x4xf32, #tpu.memory_space<vmem>>, %arg3: memref<1x4xf32, #tpu.memory_space<vmem>>, %arg4: memref<9x4x4xbf16, #tpu.memory_space<vmem>>, %arg5: memref<9x256x1xf32, #tpu.memory_space<vmem>>, %arg6: memref<1x256x4xbf16, #tpu.memory_space<vmem>>, %arg7: memref<1x8x4xf32, #tpu.memory_space<vmem>>) attributes {dimension_semantics = [#tpu.dimension_semantics<parallel>], iteration_bounds = array<i64: 2>, scalar_prefetch = 0 : i64, scratch_operands = 0 : i64, tpu.core_type = #tpu.core_type<tc>, window_params = [{transform_indices = @transform_0, window_bounds = array<i64: 1, 256, 4>}, {pipeline_mode = #tpu.pipeline_mode<synchronous>, transform_indices = @transform_1, window_bounds = array<i64: 1, 4>}, {pipeline_mode = #tpu.pipeline_mode<synchronous>, transform_indices = @transform_2, window_bounds = array<i64: 1, 4>}, {pipeline_mode = #tpu.pipeline_mode<synchronous>, transform_indices = @transform_3, window_bounds = array<i64: 9, 4, 4>}, {pipeline_mode = #tpu.pipeline_mode<synchronous>, transform_indices = @transform_4, window_bounds = array<i64: 9, 256, 1>}, {transform_indices = @transform_5, window_bounds = array<i64: 1, 256, 4>}, {transform_indices = @transform_6, window_bounds = array<i64: 1, 8, 4>}]} {
    %c0 = arith.constant 0 : index
    %c0_0 = arith.constant 0 : index
    %c0_1 = arith.constant 0 : index
    %0 = vector.load %arg1[%c0, %c0_0, %c0_1] : memref<1x256x4xbf16, #tpu.memory_space<vmem>>, vector<1x256x4xbf16>
    %1 = vector.shape_cast %0 : vector<1x256x4xbf16> to vector<256x4xbf16>
    %2 = arith.extf %1 : vector<256x4xbf16> to vector<256x4xf32>
    %c0_2 = arith.constant 0 : index
    %c0_3 = arith.constant 0 : index
    %3 = vector.load %arg2[%c0_2, %c0_3] : memref<1x4xf32, #tpu.memory_space<vmem>>, vector<1x4xf32>
    %4 = vector.broadcast %3 : vector<1x4xf32> to vector<256x4xf32>
    %5 = arith.mulf %2, %4 : vector<256x4xf32>
    %c0_4 = arith.constant 0 : index
    %c0_5 = arith.constant 0 : index
    %6 = vector.load %arg3[%c0_4, %c0_5] : memref<1x4xf32, #tpu.memory_space<vmem>>, vector<1x4xf32>
    %7 = vector.broadcast %6 : vector<1x4xf32> to vector<256x4xf32>
    %8 = arith.addf %5, %7 : vector<256x4xf32>
    %cst = arith.constant 0.000000e+00 : f32
    %9 = vector.broadcast %cst : f32 to vector<256x4xf32>
    %10 = arith.maximumf %8, %9 : vector<256x4xf32>
    %cst_6 = arith.constant 0.000000e+00 : f32
    %11 = vector.broadcast %cst_6 : f32 to vector<256x4xf32>
    %c17_i32 = arith.constant 17 : i32
    %12 = tpu.dynamic_rotate %10 by %c17_i32 dim 0 : vector<256x4xf32>, i32 -> vector<256x4xf32>
    %c0_7 = arith.constant 0 : index
    %c0_8 = arith.constant 0 : index
    %c0_9 = arith.constant 0 : index
    %13 = vector.load %arg5[%c0_7, %c0_8, %c0_9] : memref<9x256x1xf32, #tpu.memory_space<vmem>>, vector<1x256x1xf32>
    %14 = vector.shape_cast %13 : vector<1x256x1xf32> to vector<256x1xf32>
    %cst_10 = arith.constant 0.000000e+00 : f32
    %15 = vector.broadcast %cst_10 : f32 to vector<256x1xf32>
    %16 = arith.cmpf one, %14, %15 : vector<256x1xf32>
    %cst_11 = arith.constant 0.000000e+00 : f32
    %17 = vector.shape_cast %16 : vector<256x1xi1> to vector<256x1xi1>
    %18 = vector.broadcast %17 : vector<256x1xi1> to vector<256x4xi1>
    %19 = vector.broadcast %cst_11 : f32 to vector<256x4xf32>
    %20 = arith.select %18, %12, %19 : vector<256x4xi1>, vector<256x4xf32>
    %21 = arith.truncf %20 : vector<256x4xf32> to vector<256x4xbf16>
    %c0_12 = arith.constant 0 : index
    %c0_13 = arith.constant 0 : index
    %c0_14 = arith.constant 0 : index
    %22 = vector.load %arg4[%c0_12, %c0_13, %c0_14] : memref<9x4x4xbf16, #tpu.memory_space<vmem>>, vector<1x4x4xbf16>
    %23 = vector.shape_cast %22 : vector<1x4x4xbf16> to vector<4x4xbf16>
    %cst_15 = arith.constant dense<0.000000e+00> : vector<256x4xf32>
    %24 = tpu.matmul %21, %23, %cst_15 {dimension_numbers = #tpu.dot_dimension_numbers<[1], [0], [0], [1], [0, 0, 1, 1], [], []>} : vector<256x4xbf16>, vector<4x4xbf16>, vector<256x4xf32> -> vector<256x4xf32>
    %25 = arith.addf %11, %24 : vector<256x4xf32>
    %c16_i32 = arith.constant 16 : i32
    %26 = tpu.dynamic_rotate %10 by %c16_i32 dim 0 : vector<256x4xf32>, i32 -> vector<256x4xf32>
    %c1 = arith.constant 1 : index
    %c0_16 = arith.constant 0 : index
    %c0_17 = arith.constant 0 : index
    %27 = vector.load %arg5[%c1, %c0_16, %c0_17] : memref<9x256x1xf32, #tpu.memory_space<vmem>>, vector<1x256x1xf32>
    %28 = vector.shape_cast %27 : vector<1x256x1xf32> to vector<256x1xf32>
    %cst_18 = arith.constant 0.000000e+00 : f32
    %29 = vector.broadcast %cst_18 : f32 to vector<256x1xf32>
    %30 = arith.cmpf one, %28, %29 : vector<256x1xf32>
    %cst_19 = arith.constant 0.000000e+00 : f32
    %31 = vector.shape_cast %30 : vector<256x1xi1> to vector<256x1xi1>
    %32 = vector.broadcast %31 : vector<256x1xi1> to vector<256x4xi1>
    %33 = vector.broadcast %cst_19 : f32 to vector<256x4xf32>
    %34 = arith.select %32, %26, %33 : vector<256x4xi1>, vector<256x4xf32>
    %35 = arith.truncf %34 : vector<256x4xf32> to vector<256x4xbf16>
    %c1_20 = arith.constant 1 : index
    %c0_21 = arith.constant 0 : index
    %c0_22 = arith.constant 0 : index
    %36 = vector.load %arg4[%c1_20, %c0_21, %c0_22] : memref<9x4x4xbf16, #tpu.memory_space<vmem>>, vector<1x4x4xbf16>
    %37 = vector.shape_cast %36 : vector<1x4x4xbf16> to vector<4x4xbf16>
    %cst_23 = arith.constant dense<0.000000e+00> : vector<256x4xf32>
    %38 = tpu.matmul %35, %37, %cst_23 {dimension_numbers = #tpu.dot_dimension_numbers<[1], [0], [0], [1], [0, 0, 1, 1], [], []>} : vector<256x4xbf16>, vector<4x4xbf16>, vector<256x4xf32> -> vector<256x4xf32>
    %39 = arith.addf %25, %38 : vector<256x4xf32>
    %c15_i32 = arith.constant 15 : i32
    %40 = tpu.dynamic_rotate %10 by %c15_i32 dim 0 : vector<256x4xf32>, i32 -> vector<256x4xf32>
    %c2 = arith.constant 2 : index
    %c0_24 = arith.constant 0 : index
    %c0_25 = arith.constant 0 : index
    %41 = vector.load %arg5[%c2, %c0_24, %c0_25] : memref<9x256x1xf32, #tpu.memory_space<vmem>>, vector<1x256x1xf32>
    %42 = vector.shape_cast %41 : vector<1x256x1xf32> to vector<256x1xf32>
    %cst_26 = arith.constant 0.000000e+00 : f32
    %43 = vector.broadcast %cst_26 : f32 to vector<256x1xf32>
    %44 = arith.cmpf one, %42, %43 : vector<256x1xf32>
    %cst_27 = arith.constant 0.000000e+00 : f32
    %45 = vector.shape_cast %44 : vector<256x1xi1> to vector<256x1xi1>
    %46 = vector.broadcast %45 : vector<256x1xi1> to vector<256x4xi1>
    %47 = vector.broadcast %cst_27 : f32 to vector<256x4xf32>
    %48 = arith.select %46, %40, %47 : vector<256x4xi1>, vector<256x4xf32>
    %49 = arith.truncf %48 : vector<256x4xf32> to vector<256x4xbf16>
    %c2_28 = arith.constant 2 : index
    %c0_29 = arith.constant 0 : index
    %c0_30 = arith.constant 0 : index
    %50 = vector.load %arg4[%c2_28, %c0_29, %c0_30] : memref<9x4x4xbf16, #tpu.memory_space<vmem>>, vector<1x4x4xbf16>
    %51 = vector.shape_cast %50 : vector<1x4x4xbf16> to vector<4x4xbf16>
    %cst_31 = arith.constant dense<0.000000e+00> : vector<256x4xf32>
    %52 = tpu.matmul %49, %51, %cst_31 {dimension_numbers = #tpu.dot_dimension_numbers<[1], [0], [0], [1], [0, 0, 1, 1], [], []>} : vector<256x4xbf16>, vector<4x4xbf16>, vector<256x4xf32> -> vector<256x4xf32>
    %53 = arith.addf %39, %52 : vector<256x4xf32>
    %c1_i32 = arith.constant 1 : i32
    %54 = tpu.dynamic_rotate %10 by %c1_i32 dim 0 : vector<256x4xf32>, i32 -> vector<256x4xf32>
    %c3 = arith.constant 3 : index
    %c0_32 = arith.constant 0 : index
    %c0_33 = arith.constant 0 : index
    %55 = vector.load %arg5[%c3, %c0_32, %c0_33] : memref<9x256x1xf32, #tpu.memory_space<vmem>>, vector<1x256x1xf32>
    %56 = vector.shape_cast %55 : vector<1x256x1xf32> to vector<256x1xf32>
    %cst_34 = arith.constant 0.000000e+00 : f32
    %57 = vector.broadcast %cst_34 : f32 to vector<256x1xf32>
    %58 = arith.cmpf one, %56, %57 : vector<256x1xf32>
    %cst_35 = arith.constant 0.000000e+00 : f32
    %59 = vector.shape_cast %58 : vector<256x1xi1> to vector<256x1xi1>
    %60 = vector.broadcast %59 : vector<256x1xi1> to vector<256x4xi1>
    %61 = vector.broadcast %cst_35 : f32 to vector<256x4xf32>
    %62 = arith.select %60, %54, %61 : vector<256x4xi1>, vector<256x4xf32>
    %63 = arith.truncf %62 : vector<256x4xf32> to vector<256x4xbf16>
    %c3_36 = arith.constant 3 : index
    %c0_37 = arith.constant 0 : index
    %c0_38 = arith.constant 0 : index
    %64 = vector.load %arg4[%c3_36, %c0_37, %c0_38] : memref<9x4x4xbf16, #tpu.memory_space<vmem>>, vector<1x4x4xbf16>
    %65 = vector.shape_cast %64 : vector<1x4x4xbf16> to vector<4x4xbf16>
    %cst_39 = arith.constant dense<0.000000e+00> : vector<256x4xf32>
    %66 = tpu.matmul %63, %65, %cst_39 {dimension_numbers = #tpu.dot_dimension_numbers<[1], [0], [0], [1], [0, 0, 1, 1], [], []>} : vector<256x4xbf16>, vector<4x4xbf16>, vector<256x4xf32> -> vector<256x4xf32>
    %67 = arith.addf %53, %66 : vector<256x4xf32>
    %c4 = arith.constant 4 : index
    %c0_40 = arith.constant 0 : index
    %c0_41 = arith.constant 0 : index
    %68 = vector.load %arg5[%c4, %c0_40, %c0_41] : memref<9x256x1xf32, #tpu.memory_space<vmem>>, vector<1x256x1xf32>
    %69 = vector.shape_cast %68 : vector<1x256x1xf32> to vector<256x1xf32>
    %cst_42 = arith.constant 0.000000e+00 : f32
    %70 = vector.broadcast %cst_42 : f32 to vector<256x1xf32>
    %71 = arith.cmpf one, %69, %70 : vector<256x1xf32>
    %cst_43 = arith.constant 0.000000e+00 : f32
    %72 = vector.shape_cast %71 : vector<256x1xi1> to vector<256x1xi1>
    %73 = vector.broadcast %72 : vector<256x1xi1> to vector<256x4xi1>
    %74 = vector.broadcast %cst_43 : f32 to vector<256x4xf32>
    %75 = arith.select %73, %10, %74 : vector<256x4xi1>, vector<256x4xf32>
    %76 = arith.truncf %75 : vector<256x4xf32> to vector<256x4xbf16>
    %c4_44 = arith.constant 4 : index
    %c0_45 = arith.constant 0 : index
    %c0_46 = arith.constant 0 : index
    %77 = vector.load %arg4[%c4_44, %c0_45, %c0_46] : memref<9x4x4xbf16, #tpu.memory_space<vmem>>, vector<1x4x4xbf16>
    %78 = vector.shape_cast %77 : vector<1x4x4xbf16> to vector<4x4xbf16>
    %cst_47 = arith.constant dense<0.000000e+00> : vector<256x4xf32>
    %79 = tpu.matmul %76, %78, %cst_47 {dimension_numbers = #tpu.dot_dimension_numbers<[1], [0], [0], [1], [0, 0, 1, 1], [], []>} : vector<256x4xbf16>, vector<4x4xbf16>, vector<256x4xf32> -> vector<256x4xf32>
    %80 = arith.addf %67, %79 : vector<256x4xf32>
    %c255_i32 = arith.constant 255 : i32
    %81 = tpu.dynamic_rotate %10 by %c255_i32 dim 0 : vector<256x4xf32>, i32 -> vector<256x4xf32>
    %c5 = arith.constant 5 : index
    %c0_48 = arith.constant 0 : index
    %c0_49 = arith.constant 0 : index
    %82 = vector.load %arg5[%c5, %c0_48, %c0_49] : memref<9x256x1xf32, #tpu.memory_space<vmem>>, vector<1x256x1xf32>
    %83 = vector.shape_cast %82 : vector<1x256x1xf32> to vector<256x1xf32>
    %cst_50 = arith.constant 0.000000e+00 : f32
    %84 = vector.broadcast %cst_50 : f32 to vector<256x1xf32>
    %85 = arith.cmpf one, %83, %84 : vector<256x1xf32>
    %cst_51 = arith.constant 0.000000e+00 : f32
    %86 = vector.shape_cast %85 : vector<256x1xi1> to vector<256x1xi1>
    %87 = vector.broadcast %86 : vector<256x1xi1> to vector<256x4xi1>
    %88 = vector.broadcast %cst_51 : f32 to vector<256x4xf32>
    %89 = arith.select %87, %81, %88 : vector<256x4xi1>, vector<256x4xf32>
    %90 = arith.truncf %89 : vector<256x4xf32> to vector<256x4xbf16>
    %c5_52 = arith.constant 5 : index
    %c0_53 = arith.constant 0 : index
    %c0_54 = arith.constant 0 : index
    %91 = vector.load %arg4[%c5_52, %c0_53, %c0_54] : memref<9x4x4xbf16, #tpu.memory_space<vmem>>, vector<1x4x4xbf16>
    %92 = vector.shape_cast %91 : vector<1x4x4xbf16> to vector<4x4xbf16>
    %cst_55 = arith.constant dense<0.000000e+00> : vector<256x4xf32>
    %93 = tpu.matmul %90, %92, %cst_55 {dimension_numbers = #tpu.dot_dimension_numbers<[1], [0], [0], [1], [0, 0, 1, 1], [], []>} : vector<256x4xbf16>, vector<4x4xbf16>, vector<256x4xf32> -> vector<256x4xf32>
    %94 = arith.addf %80, %93 : vector<256x4xf32>
    %c241_i32 = arith.constant 241 : i32
    %95 = tpu.dynamic_rotate %10 by %c241_i32 dim 0 : vector<256x4xf32>, i32 -> vector<256x4xf32>
    %c6 = arith.constant 6 : index
    %c0_56 = arith.constant 0 : index
    %c0_57 = arith.constant 0 : index
    %96 = vector.load %arg5[%c6, %c0_56, %c0_57] : memref<9x256x1xf32, #tpu.memory_space<vmem>>, vector<1x256x1xf32>
    %97 = vector.shape_cast %96 : vector<1x256x1xf32> to vector<256x1xf32>
    %cst_58 = arith.constant 0.000000e+00 : f32
    %98 = vector.broadcast %cst_58 : f32 to vector<256x1xf32>
    %99 = arith.cmpf one, %97, %98 : vector<256x1xf32>
    %cst_59 = arith.constant 0.000000e+00 : f32
    %100 = vector.shape_cast %99 : vector<256x1xi1> to vector<256x1xi1>
    %101 = vector.broadcast %100 : vector<256x1xi1> to vector<256x4xi1>
    %102 = vector.broadcast %cst_59 : f32 to vector<256x4xf32>
    %103 = arith.select %101, %95, %102 : vector<256x4xi1>, vector<256x4xf32>
    %104 = arith.truncf %103 : vector<256x4xf32> to vector<256x4xbf16>
    %c6_60 = arith.constant 6 : index
    %c0_61 = arith.constant 0 : index
    %c0_62 = arith.constant 0 : index
    %105 = vector.load %arg4[%c6_60, %c0_61, %c0_62] : memref<9x4x4xbf16, #tpu.memory_space<vmem>>, vector<1x4x4xbf16>
    %106 = vector.shape_cast %105 : vector<1x4x4xbf16> to vector<4x4xbf16>
    %cst_63 = arith.constant dense<0.000000e+00> : vector<256x4xf32>
    %107 = tpu.matmul %104, %106, %cst_63 {dimension_numbers = #tpu.dot_dimension_numbers<[1], [0], [0], [1], [0, 0, 1, 1], [], []>} : vector<256x4xbf16>, vector<4x4xbf16>, vector<256x4xf32> -> vector<256x4xf32>
    %108 = arith.addf %94, %107 : vector<256x4xf32>
    %c240_i32 = arith.constant 240 : i32
    %109 = tpu.dynamic_rotate %10 by %c240_i32 dim 0 : vector<256x4xf32>, i32 -> vector<256x4xf32>
    %c7 = arith.constant 7 : index
    %c0_64 = arith.constant 0 : index
    %c0_65 = arith.constant 0 : index
    %110 = vector.load %arg5[%c7, %c0_64, %c0_65] : memref<9x256x1xf32, #tpu.memory_space<vmem>>, vector<1x256x1xf32>
    %111 = vector.shape_cast %110 : vector<1x256x1xf32> to vector<256x1xf32>
    %cst_66 = arith.constant 0.000000e+00 : f32
    %112 = vector.broadcast %cst_66 : f32 to vector<256x1xf32>
    %113 = arith.cmpf one, %111, %112 : vector<256x1xf32>
    %cst_67 = arith.constant 0.000000e+00 : f32
    %114 = vector.shape_cast %113 : vector<256x1xi1> to vector<256x1xi1>
    %115 = vector.broadcast %114 : vector<256x1xi1> to vector<256x4xi1>
    %116 = vector.broadcast %cst_67 : f32 to vector<256x4xf32>
    %117 = arith.select %115, %109, %116 : vector<256x4xi1>, vector<256x4xf32>
    %118 = arith.truncf %117 : vector<256x4xf32> to vector<256x4xbf16>
    %c7_68 = arith.constant 7 : index
    %c0_69 = arith.constant 0 : index
    %c0_70 = arith.constant 0 : index
    %119 = vector.load %arg4[%c7_68, %c0_69, %c0_70] : memref<9x4x4xbf16, #tpu.memory_space<vmem>>, vector<1x4x4xbf16>
    %120 = vector.shape_cast %119 : vector<1x4x4xbf16> to vector<4x4xbf16>
    %cst_71 = arith.constant dense<0.000000e+00> : vector<256x4xf32>
    %121 = tpu.matmul %118, %120, %cst_71 {dimension_numbers = #tpu.dot_dimension_numbers<[1], [0], [0], [1], [0, 0, 1, 1], [], []>} : vector<256x4xbf16>, vector<4x4xbf16>, vector<256x4xf32> -> vector<256x4xf32>
    %122 = arith.addf %108, %121 : vector<256x4xf32>
    %c239_i32 = arith.constant 239 : i32
    %123 = tpu.dynamic_rotate %10 by %c239_i32 dim 0 : vector<256x4xf32>, i32 -> vector<256x4xf32>
    %c8 = arith.constant 8 : index
    %c0_72 = arith.constant 0 : index
    %c0_73 = arith.constant 0 : index
    %124 = vector.load %arg5[%c8, %c0_72, %c0_73] : memref<9x256x1xf32, #tpu.memory_space<vmem>>, vector<1x256x1xf32>
    %125 = vector.shape_cast %124 : vector<1x256x1xf32> to vector<256x1xf32>
    %cst_74 = arith.constant 0.000000e+00 : f32
    %126 = vector.broadcast %cst_74 : f32 to vector<256x1xf32>
    %127 = arith.cmpf one, %125, %126 : vector<256x1xf32>
    %cst_75 = arith.constant 0.000000e+00 : f32
    %128 = vector.shape_cast %127 : vector<256x1xi1> to vector<256x1xi1>
    %129 = vector.broadcast %128 : vector<256x1xi1> to vector<256x4xi1>
    %130 = vector.broadcast %cst_75 : f32 to vector<256x4xf32>
    %131 = arith.select %129, %123, %130 : vector<256x4xi1>, vector<256x4xf32>
    %132 = arith.truncf %131 : vector<256x4xf32> to vector<256x4xbf16>
    %c8_76 = arith.constant 8 : index
    %c0_77 = arith.constant 0 : index
    %c0_78 = arith.constant 0 : index
    %133 = vector.load %arg4[%c8_76, %c0_77, %c0_78] : memref<9x4x4xbf16, #tpu.memory_space<vmem>>, vector<1x4x4xbf16>
    %134 = vector.shape_cast %133 : vector<1x4x4xbf16> to vector<4x4xbf16>
    %cst_79 = arith.constant dense<0.000000e+00> : vector<256x4xf32>
    %135 = tpu.matmul %132, %134, %cst_79 {dimension_numbers = #tpu.dot_dimension_numbers<[1], [0], [0], [1], [0, 0, 1, 1], [], []>} : vector<256x4xbf16>, vector<4x4xbf16>, vector<256x4xf32> -> vector<256x4xf32>
    %136 = arith.addf %122, %135 : vector<256x4xf32>
    %cst_80 = arith.constant dense<0.000000e+00> : vector<4xf32>
    %137 = vector.multi_reduction <add>, %136, %cst_80 [0] : vector<256x4xf32> to vector<4xf32>
    %138 = vector.shape_cast %137 : vector<4xf32> to vector<1x4xf32>
    %139 = arith.mulf %136, %136 : vector<256x4xf32>
    %cst_81 = arith.constant dense<0.000000e+00> : vector<4xf32>
    %140 = vector.multi_reduction <add>, %139, %cst_81 [0] : vector<256x4xf32> to vector<4xf32>
    %141 = vector.shape_cast %140 : vector<4xf32> to vector<1x4xf32>
    %142 = tpu.iota {dimensions = array<i32: 0>} : vector<8x4xi32>
    %c0_i32 = arith.constant 0 : i32
    %143 = vector.broadcast %c0_i32 : i32 to vector<8x4xi32>
    %144 = arith.cmpi eq, %142, %143 : vector<8x4xi32>
    %cst_82 = arith.constant 0.000000e+00 : f32
    %145 = vector.shape_cast %138 : vector<1x4xf32> to vector<1x4xf32>
    %146 = vector.broadcast %145 : vector<1x4xf32> to vector<8x4xf32>
    %147 = vector.broadcast %cst_82 : f32 to vector<8x4xf32>
    %148 = arith.select %144, %146, %147 : vector<8x4xi1>, vector<8x4xf32>
    %c1_i32_83 = arith.constant 1 : i32
    %149 = vector.broadcast %c1_i32_83 : i32 to vector<8x4xi32>
    %150 = arith.cmpi eq, %142, %149 : vector<8x4xi32>
    %cst_84 = arith.constant 0.000000e+00 : f32
    %151 = vector.shape_cast %141 : vector<1x4xf32> to vector<1x4xf32>
    %152 = vector.broadcast %151 : vector<1x4xf32> to vector<8x4xf32>
    %153 = vector.broadcast %cst_84 : f32 to vector<8x4xf32>
    %154 = arith.select %150, %152, %153 : vector<8x4xi1>, vector<8x4xf32>
    %155 = arith.addf %148, %154 : vector<8x4xf32>
    %c0_85 = arith.constant 0 : index
    %c0_86 = arith.constant 0 : index
    %c0_87 = arith.constant 0 : index
    %156 = vector.load %arg7[%c0_85, %c0_86, %c0_87] : memref<1x8x4xf32, #tpu.memory_space<vmem>>, vector<1x8x4xf32>
    %157 = vector.shape_cast %156 : vector<1x8x4xf32> to vector<8x4xf32>
    %158 = vector.shape_cast %155 : vector<8x4xf32> to vector<1x8x4xf32>
    tpu.vector_store %arg7[%c0_85, %c0_86, %c0_87], %158 {strides = array<i32>} : memref<1x8x4xf32, #tpu.memory_space<vmem>>, vector<1x8x4xf32>,
    %159 = arith.truncf %136 : vector<256x4xf32> to vector<256x4xbf16>
    %c0_88 = arith.constant 0 : index
    %c0_89 = arith.constant 0 : index
    %c0_90 = arith.constant 0 : index
    %160 = vector.load %arg6[%c0_88, %c0_89, %c0_90] : memref<1x256x4xbf16, #tpu.memory_space<vmem>>, vector<1x256x4xbf16>
    %161 = vector.shape_cast %160 : vector<1x256x4xbf16> to vector<256x4xbf16>
    %162 = vector.shape_cast %159 : vector<256x4xbf16> to vector<1x256x4xbf16>
    tpu.vector_store %arg6[%c0_88, %c0_89, %c0_90], %162 {strides = array<i32>} : memref<1x256x4xbf16, #tpu.memory_space<vmem>>, vector<1x256x4xbf16>,
    return
  }
  func.func @transform_0(%arg0: i32) -> (i32, i32, i32) {
    %c0_i32 = arith.constant 0 : i32
    %c0_i32_0 = arith.constant 0 : i32
    %c0_i32_1 = arith.constant 0 : i32
    return %arg0, %c0_i32, %c0_i32_0 : i32, i32, i32
  }
  func.func @transform_1(%arg0: i32) -> (i32, i32) {
    %c0_i32 = arith.constant 0 : i32
    %c0_i32_0 = arith.constant 0 : i32
    %c0_i32_1 = arith.constant 0 : i32
    return %c0_i32, %c0_i32_0 : i32, i32
  }
  func.func @transform_2(%arg0: i32) -> (i32, i32) {
    %c0_i32 = arith.constant 0 : i32
    %c0_i32_0 = arith.constant 0 : i32
    %c0_i32_1 = arith.constant 0 : i32
    return %c0_i32, %c0_i32_0 : i32, i32
  }
  func.func @transform_3(%arg0: i32) -> (i32, i32, i32) {
    %c0_i32 = arith.constant 0 : i32
    %c0_i32_0 = arith.constant 0 : i32
    %c0_i32_1 = arith.constant 0 : i32
    %c0_i32_2 = arith.constant 0 : i32
    return %c0_i32, %c0_i32_0, %c0_i32_1 : i32, i32, i32
  }
  func.func @transform_4(%arg0: i32) -> (i32, i32, i32) {
    %c0_i32 = arith.constant 0 : i32
    %c0_i32_0 = arith.constant 0 : i32
    %c0_i32_1 = arith.constant 0 : i32
    %c0_i32_2 = arith.constant 0 : i32
    return %c0_i32, %c0_i32_0, %c0_i32_1 : i32, i32, i32
  }
  func.func @transform_5(%arg0: i32) -> (i32, i32, i32) {
    %c0_i32 = arith.constant 0 : i32
    %c0_i32_0 = arith.constant 0 : i32
    %c0_i32_1 = arith.constant 0 : i32
    return %arg0, %c0_i32, %c0_i32_0 : i32, i32, i32
  }
  func.func @transform_6(%arg0: i32) -> (i32, i32, i32) {
    %c0_i32 = arith.constant 0 : i32
    %c0_i32_0 = arith.constant 0 : i32
    %c0_i32_1 = arith.constant 0 : i32
    return %arg0, %c0_i32, %c0_i32_0 : i32, i32, i32
  }
}

module attributes {stable_mosaic.version = 11 : i64} {
  func.func @kernel(%arg0: i32, %arg1: memref<512x16xf32, #tpu.memory_space<vmem>>, %arg2: memref<1x16xf32, #tpu.memory_space<vmem>>, %arg3: memref<1x16xf32, #tpu.memory_space<vmem>>, %arg4: memref<16x4xbf16, #tpu.memory_space<vmem>>, %arg5: memref<512x4xbf16, #tpu.memory_space<vmem>>, %arg6: memref<1x8x4xf32, #tpu.memory_space<vmem>>) attributes {dimension_semantics = [#tpu.dimension_semantics<parallel>], iteration_bounds = array<i64: 1>, scalar_prefetch = 0 : i64, scratch_operands = 0 : i64, tpu.core_type = #tpu.core_type<tc>, window_params = [{transform_indices = @transform_0, window_bounds = array<i64: 512, 16>}, {pipeline_mode = #tpu.pipeline_mode<synchronous>, transform_indices = @transform_1, window_bounds = array<i64: 1, 16>}, {pipeline_mode = #tpu.pipeline_mode<synchronous>, transform_indices = @transform_2, window_bounds = array<i64: 1, 16>}, {pipeline_mode = #tpu.pipeline_mode<synchronous>, transform_indices = @transform_3, window_bounds = array<i64: 16, 4>}, {transform_indices = @transform_4, window_bounds = array<i64: 512, 4>}, {transform_indices = @transform_5, window_bounds = array<i64: 1, 8, 4>}]} {
    %c0 = arith.constant 0 : index
    %c0_0 = arith.constant 0 : index
    %0 = vector.load %arg1[%c0, %c0_0] : memref<512x16xf32, #tpu.memory_space<vmem>>, vector<512x16xf32>
    %c0_1 = arith.constant 0 : index
    %c0_2 = arith.constant 0 : index
    %1 = vector.load %arg2[%c0_1, %c0_2] : memref<1x16xf32, #tpu.memory_space<vmem>>, vector<1x16xf32>
    %2 = vector.broadcast %1 : vector<1x16xf32> to vector<512x16xf32>
    %3 = arith.mulf %0, %2 : vector<512x16xf32>
    %c0_3 = arith.constant 0 : index
    %c0_4 = arith.constant 0 : index
    %4 = vector.load %arg3[%c0_3, %c0_4] : memref<1x16xf32, #tpu.memory_space<vmem>>, vector<1x16xf32>
    %5 = vector.broadcast %4 : vector<1x16xf32> to vector<512x16xf32>
    %6 = arith.addf %3, %5 : vector<512x16xf32>
    %cst = arith.constant 0.000000e+00 : f32
    %7 = vector.broadcast %cst : f32 to vector<512x16xf32>
    %8 = arith.maximumf %6, %7 : vector<512x16xf32>
    %9 = arith.truncf %8 : vector<512x16xf32> to vector<512x16xbf16>
    %c0_5 = arith.constant 0 : index
    %c0_6 = arith.constant 0 : index
    %10 = vector.load %arg4[%c0_5, %c0_6] : memref<16x4xbf16, #tpu.memory_space<vmem>>, vector<16x4xbf16>
    %cst_7 = arith.constant dense<0.000000e+00> : vector<512x4xf32>
    %11 = tpu.matmul %9, %10, %cst_7 {dimension_numbers = #tpu.dot_dimension_numbers<[1], [0], [0], [1], [0, 0, 1, 1], [], []>} : vector<512x16xbf16>, vector<16x4xbf16>, vector<512x4xf32> -> vector<512x4xf32>
    %12 = arith.truncf %11 : vector<512x4xf32> to vector<512x4xbf16>
    %c0_8 = arith.constant 0 : index
    %c0_9 = arith.constant 0 : index
    %13 = vector.load %arg5[%c0_8, %c0_9] : memref<512x4xbf16, #tpu.memory_space<vmem>>, vector<512x4xbf16>
    tpu.vector_store %arg5[%c0_8, %c0_9], %12 {strides = array<i32>} : memref<512x4xbf16, #tpu.memory_space<vmem>>, vector<512x4xbf16>,
    %cst_10 = arith.constant dense<0.000000e+00> : vector<4xf32>
    %14 = vector.multi_reduction <add>, %11, %cst_10 [0] : vector<512x4xf32> to vector<4xf32>
    %15 = vector.shape_cast %14 : vector<4xf32> to vector<1x4xf32>
    %16 = arith.mulf %11, %11 : vector<512x4xf32>
    %cst_11 = arith.constant dense<0.000000e+00> : vector<4xf32>
    %17 = vector.multi_reduction <add>, %16, %cst_11 [0] : vector<512x4xf32> to vector<4xf32>
    %18 = vector.shape_cast %17 : vector<4xf32> to vector<1x4xf32>
    %19 = tpu.iota {dimensions = array<i32: 0>} : vector<8x4xi32>
    %c0_i32 = arith.constant 0 : i32
    %20 = vector.broadcast %c0_i32 : i32 to vector<8x4xi32>
    %21 = arith.cmpi eq, %19, %20 : vector<8x4xi32>
    %cst_12 = arith.constant 0.000000e+00 : f32
    %22 = vector.shape_cast %15 : vector<1x4xf32> to vector<1x4xf32>
    %23 = vector.broadcast %22 : vector<1x4xf32> to vector<8x4xf32>
    %24 = vector.broadcast %cst_12 : f32 to vector<8x4xf32>
    %25 = arith.select %21, %23, %24 : vector<8x4xi1>, vector<8x4xf32>
    %c1_i32 = arith.constant 1 : i32
    %26 = vector.broadcast %c1_i32 : i32 to vector<8x4xi32>
    %27 = arith.cmpi eq, %19, %26 : vector<8x4xi32>
    %cst_13 = arith.constant 0.000000e+00 : f32
    %28 = vector.shape_cast %18 : vector<1x4xf32> to vector<1x4xf32>
    %29 = vector.broadcast %28 : vector<1x4xf32> to vector<8x4xf32>
    %30 = vector.broadcast %cst_13 : f32 to vector<8x4xf32>
    %31 = arith.select %27, %29, %30 : vector<8x4xi1>, vector<8x4xf32>
    %32 = arith.addf %25, %31 : vector<8x4xf32>
    %c0_14 = arith.constant 0 : index
    %c0_15 = arith.constant 0 : index
    %c0_16 = arith.constant 0 : index
    %33 = vector.load %arg6[%c0_14, %c0_15, %c0_16] : memref<1x8x4xf32, #tpu.memory_space<vmem>>, vector<1x8x4xf32>
    %34 = vector.shape_cast %33 : vector<1x8x4xf32> to vector<8x4xf32>
    %35 = vector.shape_cast %32 : vector<8x4xf32> to vector<1x8x4xf32>
    tpu.vector_store %arg6[%c0_14, %c0_15, %c0_16], %35 {strides = array<i32>} : memref<1x8x4xf32, #tpu.memory_space<vmem>>, vector<1x8x4xf32>,
    return
  }
  func.func @transform_0(%arg0: i32) -> (i32, i32) {
    %c0_i32 = arith.constant 0 : i32
    %c0_i32_0 = arith.constant 0 : i32
    return %arg0, %c0_i32 : i32, i32
  }
  func.func @transform_1(%arg0: i32) -> (i32, i32) {
    %c0_i32 = arith.constant 0 : i32
    %c0_i32_0 = arith.constant 0 : i32
    %c0_i32_1 = arith.constant 0 : i32
    return %c0_i32, %c0_i32_0 : i32, i32
  }
  func.func @transform_2(%arg0: i32) -> (i32, i32) {
    %c0_i32 = arith.constant 0 : i32
    %c0_i32_0 = arith.constant 0 : i32
    %c0_i32_1 = arith.constant 0 : i32
    return %c0_i32, %c0_i32_0 : i32, i32
  }
  func.func @transform_3(%arg0: i32) -> (i32, i32) {
    %c0_i32 = arith.constant 0 : i32
    %c0_i32_0 = arith.constant 0 : i32
    %c0_i32_1 = arith.constant 0 : i32
    return %c0_i32, %c0_i32_0 : i32, i32
  }
  func.func @transform_4(%arg0: i32) -> (i32, i32) {
    %c0_i32 = arith.constant 0 : i32
    %c0_i32_0 = arith.constant 0 : i32
    return %arg0, %c0_i32 : i32, i32
  }
  func.func @transform_5(%arg0: i32) -> (i32, i32, i32) {
    %c0_i32 = arith.constant 0 : i32
    %c0_i32_0 = arith.constant 0 : i32
    %c0_i32_1 = arith.constant 0 : i32
    return %arg0, %c0_i32, %c0_i32_0 : i32, i32, i32
  }
}

module attributes {stable_mosaic.version = 11 : i64} {
  func.func @_stage3_kernel(%arg0: i32, %arg1: memref<512x4xbf16, #tpu.memory_space<vmem>>, %arg2: memref<512x16xf32, #tpu.memory_space<vmem>>, %arg3: memref<1x4xf32, #tpu.memory_space<vmem>>, %arg4: memref<1x4xf32, #tpu.memory_space<vmem>>, %arg5: memref<4x16xbf16, #tpu.memory_space<vmem>>, %arg6: memref<512x16xf32, #tpu.memory_space<vmem>>) attributes {dimension_semantics = [#tpu.dimension_semantics<parallel>], iteration_bounds = array<i64: 1>, scalar_prefetch = 0 : i64, scratch_operands = 0 : i64, tpu.core_type = #tpu.core_type<tc>, window_params = [{transform_indices = @transform_0, window_bounds = array<i64: 512, 4>}, {transform_indices = @transform_1, window_bounds = array<i64: 512, 16>}, {pipeline_mode = #tpu.pipeline_mode<synchronous>, transform_indices = @transform_2, window_bounds = array<i64: 1, 4>}, {pipeline_mode = #tpu.pipeline_mode<synchronous>, transform_indices = @transform_3, window_bounds = array<i64: 1, 4>}, {pipeline_mode = #tpu.pipeline_mode<synchronous>, transform_indices = @transform_4, window_bounds = array<i64: 4, 16>}, {transform_indices = @transform_5, window_bounds = array<i64: 512, 16>}]} {
    %c0 = arith.constant 0 : index
    %c0_0 = arith.constant 0 : index
    %0 = vector.load %arg1[%c0, %c0_0] : memref<512x4xbf16, #tpu.memory_space<vmem>>, vector<512x4xbf16>
    %1 = arith.extf %0 : vector<512x4xbf16> to vector<512x4xf32>
    %c0_1 = arith.constant 0 : index
    %c0_2 = arith.constant 0 : index
    %2 = vector.load %arg3[%c0_1, %c0_2] : memref<1x4xf32, #tpu.memory_space<vmem>>, vector<1x4xf32>
    %3 = vector.broadcast %2 : vector<1x4xf32> to vector<512x4xf32>
    %4 = arith.mulf %1, %3 : vector<512x4xf32>
    %c0_3 = arith.constant 0 : index
    %c0_4 = arith.constant 0 : index
    %5 = vector.load %arg4[%c0_3, %c0_4] : memref<1x4xf32, #tpu.memory_space<vmem>>, vector<1x4xf32>
    %6 = vector.broadcast %5 : vector<1x4xf32> to vector<512x4xf32>
    %7 = arith.addf %4, %6 : vector<512x4xf32>
    %cst = arith.constant 0.000000e+00 : f32
    %8 = vector.broadcast %cst : f32 to vector<512x4xf32>
    %9 = arith.maximumf %7, %8 : vector<512x4xf32>
    %10 = arith.truncf %9 : vector<512x4xf32> to vector<512x4xbf16>
    %c0_5 = arith.constant 0 : index
    %c0_6 = arith.constant 0 : index
    %11 = vector.load %arg5[%c0_5, %c0_6] : memref<4x16xbf16, #tpu.memory_space<vmem>>, vector<4x16xbf16>
    %cst_7 = arith.constant dense<0.000000e+00> : vector<512x16xf32>
    %12 = tpu.matmul %10, %11, %cst_7 {dimension_numbers = #tpu.dot_dimension_numbers<[1], [0], [0], [1], [0, 0, 1, 1], [], []>} : vector<512x4xbf16>, vector<4x16xbf16>, vector<512x16xf32> -> vector<512x16xf32>
    %c0_8 = arith.constant 0 : index
    %c0_9 = arith.constant 0 : index
    %13 = vector.load %arg2[%c0_8, %c0_9] : memref<512x16xf32, #tpu.memory_space<vmem>>, vector<512x16xf32>
    %14 = arith.addf %12, %13 : vector<512x16xf32>
    %c0_10 = arith.constant 0 : index
    %c0_11 = arith.constant 0 : index
    %15 = vector.load %arg6[%c0_10, %c0_11] : memref<512x16xf32, #tpu.memory_space<vmem>>, vector<512x16xf32>
    tpu.vector_store %arg6[%c0_10, %c0_11], %14 {strides = array<i32>} : memref<512x16xf32, #tpu.memory_space<vmem>>, vector<512x16xf32>,
    return
  }
  func.func @transform_0(%arg0: i32) -> (i32, i32) {
    %c0_i32 = arith.constant 0 : i32
    %c0_i32_0 = arith.constant 0 : i32
    return %arg0, %c0_i32 : i32, i32
  }
  func.func @transform_1(%arg0: i32) -> (i32, i32) {
    %c0_i32 = arith.constant 0 : i32
    %c0_i32_0 = arith.constant 0 : i32
    return %arg0, %c0_i32 : i32, i32
  }
  func.func @transform_2(%arg0: i32) -> (i32, i32) {
    %c0_i32 = arith.constant 0 : i32
    %c0_i32_0 = arith.constant 0 : i32
    %c0_i32_1 = arith.constant 0 : i32
    return %c0_i32, %c0_i32_0 : i32, i32
  }
  func.func @transform_3(%arg0: i32) -> (i32, i32) {
    %c0_i32 = arith.constant 0 : i32
    %c0_i32_0 = arith.constant 0 : i32
    %c0_i32_1 = arith.constant 0 : i32
    return %c0_i32, %c0_i32_0 : i32, i32
  }
  func.func @transform_4(%arg0: i32) -> (i32, i32) {
    %c0_i32 = arith.constant 0 : i32
    %c0_i32_0 = arith.constant 0 : i32
    %c0_i32_1 = arith.constant 0 : i32
    return %c0_i32, %c0_i32_0 : i32, i32
  }
  func.func @transform_5(%arg0: i32) -> (i32, i32) {
    %c0_i32 = arith.constant 0 : i32
    %c0_i32_0 = arith.constant 0 : i32
    return %arg0, %c0_i32 : i32, i32
  }
}

</mosaic_0001>

<bundles_post_ra>
// kernel: preact_bottleneck.5
= control target key start
LH: loop header
LB: loop body
LE: loop exit
PB: predicated region body
PF: predicated region fallthrough
CT: control target
= control target key end

     0   :  { %vm549_vm0 = vcmask 1041408   ;;  %vm452_vm1 = vcmask 31744   ;;  %vm842_vm2 = vcmask 130048   ;;  %s1954_s4 = inlined_call_operand.vmem [shape: bf16[4,16], index: 4, kind: input, shape index: {}]   ;;  %s1955_s0 = inlined_call_operand.vmem [shape: bf16[512,4], index: 0, kind: input, shape index: {}]   ;;  %s1956_s2 = inlined_call_operand.vmem [shape: f32[1,4], index: 2, kind: input, shape index: {}]   ;;  %s1957_s3 = inlined_call_operand.vmem [shape: f32[1,4], index: 3, kind: input, shape index: {}]   ;;  %s1958_s1 = inlined_call_operand.vmem [shape: f32[512,16], index: 1, kind: input, shape index: {}]   ;;  %s1959_s5 = inlined_call_operand.vmem [shape: f32[512,16], index: 5, kind: output, shape index: {}]  }
   0x1   :  { %v387_v0 = vld [vmem:[%s1954_s4] sm:$0x3]  ;;  %v1073_v7 = vld [vmem:[%s1955_s0 + $0x8] sm:$0xff]   ;;  %v1074_v30 = vld [vmem:[%s1955_s0 + $0x10] sm:$0xff]  }
   0x2   :  { %v946_v1 = vld [vmem:[%s1955_s0] sm:$0xff]   ;;  %1205 = vmatprep.subr.msk.bf16.mxu0 %vm549_vm0, %v387_v0  ;;  %1206 = vmatprep.subr.msk.bf16.mxu1 %vm549_vm0, %v387_v0  ;;  %v551_v3 = vsel %vm549_vm0, %v387_v0, 0  ;;  %v951_v11 = vunpack.c.l.bf16 %v1073_v7  ;;  %v952_v12 = vunpack.c.h.bf16 %v1073_v7  ;;  %v1089_v13 = vld [vmem:[%s1955_s0 + $0x88] sm:$0xff]   ;;  %v1090_v35 = vld [vmem:[%s1955_s0 + $0x90] sm:$0xff]   ;;  %v955_v44 = vunpack.c.l.bf16 %v1074_v30 }
   0x3   :  { %v1246_v2 = vld [vmem:[%s1956_s2] ss:$0 sm:$0xff]  ;;  %v947_v4 = vunpack.c.l.bf16 %v946_v1  ;;  %v948_v5 = vunpack.c.h.bf16 %v946_v1  ;;  %1138 = vmatpush3.bf16.msra.mxu0 %v551_v3  ;;  %1204 = vmatpush3.bf16.msra.mxu1 %v551_v3  ;;  %v1015_v16 = vunpack.c.l.bf16 %v1089_v13  ;;  %v1016_v17 = vunpack.c.h.bf16 %v1089_v13  ;;  %v1075_v40 = vld [vmem:[%s1955_s0 + $0x18] sm:$0xff]  }
   0x4   :  { %v1088_v6 = vld [vmem:[%s1955_s0 + $0x80] sm:$0xff]   ;;  %v158_v20 = vmul.f32 %v951_v11, %v1246_v2  ;;  %v159_v21 = vmul.f32 %v952_v12, %v1246_v2  ;;  %v1091_v45 = vld [vmem:[%s1955_s0 + $0x98] sm:$0xff]   ;;  %v956_v48 = vunpack.c.h.bf16 %v1074_v30  ;;  %v1019_v49 = vunpack.c.l.bf16 %v1090_v35 }
   0x5   :  { %v1257_v8 = vld [vmem:[%s1957_s3] ss:$0 sm:$0xff]  ;;  %v1011_v9 = vunpack.c.l.bf16 %v1088_v6  ;;  %v1012_v10 = vunpack.c.h.bf16 %v1088_v6  ;;  %v156_v14 = vmul.f32 %v947_v4, %v1246_v2  ;;  %v157_v15 = vmul.f32 %v948_v5, %v1246_v2 }
   0x6   :  { %v190_v24 = vmul.f32 %v1015_v16, %v1246_v2  ;;  %v191_v25 = vmul.f32 %v1016_v17, %v1246_v2  ;;  %v229_v28 = vadd.f32 %v1257_v8, %v158_v20  ;;  %v230_v29 = vadd.f32 %v1257_v8, %v159_v21  ;;  %v1076_v3 = vld [vmem:[%s1955_s0 + $0x20] sm:$0xff]  }
   0x7   :  { %v188_v18 = vmul.f32 %v1011_v9, %v1246_v2  ;;  %v189_v19 = vmul.f32 %v1012_v10, %v1246_v2  ;;  %v227_v22 = vadd.f32 %v1257_v8, %v156_v14  ;;  %v228_v23 = vadd.f32 %v1257_v8, %v157_v15  ;;  %v1092_v13 = vld [vmem:[%s1955_s0 + $0xa0] sm:$0xff]  }
   0x8   :  { %v261_v33 = vadd.f32 %v1257_v8, %v190_v24  ;;  %v262_v34 = vadd.f32 %v1257_v8, %v191_v25  ;;  %v293_v38 = vmax.f32 %v229_v28, 0.0  ;;  %v294_v39 = vmax.f32 %v230_v29, 0.0 }
   0x9   :  { %v259_v26 = vadd.f32 %v1257_v8, %v188_v18  ;;  %v260_v27 = vadd.f32 %v1257_v8, %v189_v19  ;;  %v291_v31 = vmax.f32 %v227_v22, 0.0  ;;  %v292_v32 = vmax.f32 %v228_v23, 0.0  ;;  %v1077_v18 = vld [vmem:[%s1955_s0 + $0x28] sm:$0xff]  }
   0xa   :  { %v325_v42 = vmax.f32 %v261_v33, 0.0  ;;  %v326_v43 = vmax.f32 %v262_v34, 0.0  ;;  %v356_v47 = vpack.c.bf16 %v294_v39, %v293_v38  ;;  %v160_v51 = vmul.f32 %v955_v44, %v1246_v2 }
   0xb   :  { %v323_v36 = vmax.f32 %v259_v26, 0.0  ;;  %v324_v37 = vmax.f32 %v260_v27, 0.0  ;;  %v355_v41 = vpack.c.bf16 %v292_v32, %v291_v31  ;;  %v1020_v52 = vunpack.c.h.bf16 %v1090_v35  ;;  %v1093_v27 = vld [vmem:[%s1955_s0 + $0xa8] sm:$0xff]  }
   0xc   :  { %v372_v50 = vpack.c.bf16 %v326_v43, %v325_v42  ;;  %v959_v53 = vunpack.c.l.bf16 %v1075_v40  ;;  %v161_v54 = vmul.f32 %v956_v48, %v1246_v2  ;;  %v192_v55 = vmul.f32 %v1019_v49, %v1246_v2 }
   0xd   :  { %v371_v46 = vpack.c.bf16 %v324_v37, %v323_v36  ;;  %1139 = vmatprep.mubr.msk.bf16.mxu0 %vm452_vm1, %v355_v41  ;;  %v960_v56 = vunpack.c.h.bf16 %v1075_v40  ;;  %v1023_v57 = vunpack.c.l.bf16 %v1091_v45  ;;  %v231_v58 = vadd.f32 %v1257_v8, %v160_v51  ;;  %v1078_v40 = vld [vmem:[%s1955_s0 + $0x30] sm:$0xff]  }
   0xe   :  { %1140 = vmatmul.mubr.msk.bf16.vlgmr.msra.gmra.mrb[0].mxu0 %vm452_vm1, %v356_v47  ;;  %v193_v59 = vmul.f32 %v1020_v52, %v1246_v2  ;;  %v162_v60 = vmul.f32 %v959_v53, %v1246_v2  ;;  %v1024_v61 = vunpack.c.h.bf16 %v1091_v45  ;;  %v232_v62 = vadd.f32 %v1257_v8, %v161_v54  ;;  %v1094_v53 = vld [vmem:[%s1955_s0 + $0xb0] sm:$0xff]  }
   0xf   :  { %1171 = vmatprep.mubr.msk.bf16.mxu1 %vm452_vm1, %v371_v46  ;;  %v263_v63 = vadd.f32 %v1257_v8, %v192_v55  ;;  %v163_v0 = vmul.f32 %v960_v56, %v1246_v2  ;;  %v194_v1 = vmul.f32 %v1023_v57, %v1246_v2  ;;  %v295_v4 = vmax.f32 %v231_v58, 0.0 }
  0x10   :  { %1172 = vmatmul.mubr.msk.bf16.vlgmr.msra.gmra.mrb[0].mxu1 %vm452_vm1, %v372_v50  ;;  %v264_v5 = vadd.f32 %v1257_v8, %v193_v59  ;;  %v233_v6 = vadd.f32 %v1257_v8, %v162_v60  ;;  %v195_v7 = vmul.f32 %v1024_v61, %v1246_v2  ;;  %v296_v9 = vmax.f32 %v232_v62, 0.0  ;;  %v1079_v62 = vld [vmem:[%s1955_s0 + $0x38] sm:$0xff]  }
  0x11   :  { %v327_v10 = vmax.f32 %v263_v63, 0.0  ;;  %v234_v11 = vadd.f32 %v1257_v8, %v163_v0  ;;  %v265_v12 = vadd.f32 %v1257_v8, %v194_v1  ;;  %v963_v17 = vunpack.c.l.bf16 %v1076_v3 }
  0x12   :  { %v328_v14 = vmax.f32 %v264_v5, 0.0  ;;  %v297_v15 = vmax.f32 %v233_v6, 0.0  ;;  %v266_v16 = vadd.f32 %v1257_v8, %v195_v7  ;;  %v357_v19 = vpack.c.bf16 %v296_v9, %v295_v4  ;;  %v1095_v4 = vld [vmem:[%s1955_s0 + $0xb8] sm:$0xff]  }
  0x13   :  { %v298_v20 = vmax.f32 %v234_v11, 0.0  ;;  %v329_v21 = vmax.f32 %v265_v12, 0.0  ;;  %v964_v22 = vunpack.c.h.bf16 %v1076_v3  ;;  %v164_v25 = vmul.f32 %v963_v17, %v1246_v2 }
  0x14   :  { %v373_v23 = vpack.c.bf16 %v328_v14, %v327_v10  ;;  %v330_v24 = vmax.f32 %v266_v16, 0.0  ;;  %v1027_v26 = vunpack.c.l.bf16 %v1092_v13  ;;  %1143 = vmatprep.mubr.msk.bf16.mxu0 %vm452_vm1, %v357_v19  ;;  %v1028_v30 = vunpack.c.h.bf16 %v1092_v13  ;;  %v1080_v14 = vld [vmem:[%s1955_s0 + $0x40] sm:$0xff]  }
  0x15   :  { %v358_v28 = vpack.c.bf16 %v298_v20, %v297_v15  ;;  %v165_v29 = vmul.f32 %v964_v22, %v1246_v2  ;;  %v967_v31 = vunpack.c.l.bf16 %v1077_v18  ;;  %v235_v33 = vadd.f32 %v1257_v8, %v164_v25 }
  0x16   :  { %1175 = vmatprep.mubr.msk.bf16.mxu1 %vm452_vm1, %v373_v23  ;;  %v374_v32 = vpack.c.bf16 %v330_v24, %v329_v21  ;;  %v196_v34 = vmul.f32 %v1027_v26, %v1246_v2  ;;  %v968_v35 = vunpack.c.h.bf16 %v1077_v18  ;;  %v197_v37 = vmul.f32 %v1028_v30, %v1246_v2 }
  0x17   :  { %1144 = vmatmul.mubr.msk.bf16.gmra.mrb[4].mxu0 %vm452_vm1, %v358_v28  ;;  %v236_v36 = vadd.f32 %v1257_v8, %v165_v29  ;;  %v166_v38 = vmul.f32 %v967_v31, %v1246_v2  ;;  %v1031_v39 = vunpack.c.l.bf16 %v1093_v27  ;;  %v299_v41 = vmax.f32 %v235_v33, 0.0  ;;  %v1096_v31 = vld [vmem:[%s1955_s0 + $0xc0] sm:$0xff]  }
  0x18   :  { %1176 = vmatmul.mubr.msk.bf16.gmra.mrb[4].mxu1 %vm452_vm1, %v374_v32  ;;  %v267_v42 = vadd.f32 %v1257_v8, %v196_v34  ;;  %v167_v43 = vmul.f32 %v968_v35, %v1246_v2  ;;  %v1032_v44 = vunpack.c.h.bf16 %v1093_v27  ;;  %v268_v46 = vadd.f32 %v1257_v8, %v197_v37 }
  0x19   :  { %v300_v45 = vmax.f32 %v236_v36, 0.0  ;;  %v237_v47 = vadd.f32 %v1257_v8, %v166_v38  ;;  %v198_v48 = vmul.f32 %v1031_v39, %v1246_v2  ;;  %v971_v52 = vunpack.c.l.bf16 %v1078_v40  ;;  %v1081_v36 = vld [vmem:[%s1955_s0 + $0x48] sm:$0xff]  }
  0x1a   :  { %v331_v49 = vmax.f32 %v267_v42, 0.0  ;;  %v238_v50 = vadd.f32 %v1257_v8, %v167_v43  ;;  %v199_v51 = vmul.f32 %v1032_v44, %v1246_v2  ;;  %v332_v55 = vmax.f32 %v268_v46, 0.0 }
  0x1b   :  { %v359_v54 = vpack.c.bf16 %v300_v45, %v299_v41  ;;  %v301_v56 = vmax.f32 %v237_v47, 0.0  ;;  %v269_v57 = vadd.f32 %v1257_v8, %v198_v48  ;;  %v972_v60 = vunpack.c.h.bf16 %v1078_v40  ;;  %v1097_v45 = vld [vmem:[%s1955_s0 + $0xc8] sm:$0xff]  }
  0x1c   :  { %v302_v58 = vmax.f32 %v238_v50, 0.0  ;;  %v270_v59 = vadd.f32 %v1257_v8, %v199_v51  ;;  %v168_v61 = vmul.f32 %v971_v52, %v1246_v2  ;;  %v375_v63 = vpack.c.bf16 %v332_v55, %v331_v49 }
  0x1d   :  { %1147 = vmatprep.mubr.msk.bf16.mxu0 %vm452_vm1, %v359_v54  ;;  %v333_v0 = vmax.f32 %v269_v57, 0.0  ;;  %v1035_v1 = vunpack.c.l.bf16 %v1094_v53  ;;  %v1036_v3 = vunpack.c.h.bf16 %v1094_v53  ;;  %v169_v7 = vmul.f32 %v972_v60, %v1246_v2 }
  0x1e   :  { %v360_v5 = vpack.c.bf16 %v302_v58, %v301_v56  ;;  %v334_v6 = vmax.f32 %v270_v59, 0.0  ;;  %v239_v9 = vadd.f32 %v1257_v8, %v168_v61  ;;  %1179 = vmatprep.mubr.msk.bf16.mxu1 %vm452_vm1, %v375_v63  ;;  %v975_v12 = vunpack.c.l.bf16 %v1079_v62  ;;  %v1082_v58 = vld [vmem:[%s1955_s0 + $0x50] sm:$0xff]  }
  0x1f   :  { %v200_v10 = vmul.f32 %v1035_v1, %v1246_v2  ;;  %v201_v11 = vmul.f32 %v1036_v3, %v1246_v2  ;;  %v976_v13 = vunpack.c.h.bf16 %v1079_v62  ;;  %v240_v16 = vadd.f32 %v1257_v8, %v169_v7 }
  0x20   :  { %1148 = vmatmul.mubr.msk.bf16.gmra.mrb[8].mxu0 %vm452_vm1, %v360_v5  ;;  %v376_v15 = vpack.c.bf16 %v334_v6, %v333_v0  ;;  %v303_v17 = vmax.f32 %v239_v9, 0.0  ;;  %v1039_v18 = vunpack.c.l.bf16 %v1095_v4  ;;  %v170_v21 = vmul.f32 %v975_v12, %v1246_v2 }
  0x21   :  { %v271_v19 = vadd.f32 %v1257_v8, %v200_v10  ;;  %v272_v20 = vadd.f32 %v1257_v8, %v201_v11  ;;  %v171_v22 = vmul.f32 %v976_v13, %v1246_v2  ;;  %v304_v23 = vmax.f32 %v240_v16, 0.0 }
  0x22   :  { %1180 = vmatmul.mubr.msk.bf16.gmra.mrb[8].mxu1 %vm452_vm1, %v376_v15  ;;  %v1040_v24 = vunpack.c.h.bf16 %v1095_v4  ;;  %v202_v25 = vmul.f32 %v1039_v18, %v1246_v2  ;;  %v979_v26 = vunpack.c.l.bf16 %v1080_v14  ;;  %v241_v29 = vadd.f32 %v1257_v8, %v170_v21  ;;  %v1098_v4 = vld [vmem:[%s1955_s0 + $0xd0] sm:$0xff]   ;;  %v1083_v18 = vld [vmem:[%s1955_s0 + $0x58] sm:$0xff]  }
  0x23   :  { %v335_v27 = vmax.f32 %v271_v19, 0.0  ;;  %v336_v28 = vmax.f32 %v272_v20, 0.0  ;;  %v242_v30 = vadd.f32 %v1257_v8, %v171_v22  ;;  %v361_v32 = vpack.c.bf16 %v304_v23, %v303_v17  ;;  %v1099_v23 = vld [vmem:[%s1955_s0 + $0xd8] sm:$0xff]  }
  0x24   :  { %v203_v33 = vmul.f32 %v1040_v24, %v1246_v2  ;;  %v273_v34 = vadd.f32 %v1257_v8, %v202_v25  ;;  %v980_v35 = vunpack.c.h.bf16 %v1080_v14  ;;  %v305_v38 = vmax.f32 %v241_v29, 0.0 }
  0x25   :  { %v377_v37 = vpack.c.bf16 %v336_v28, %v335_v27  ;;  %v306_v39 = vmax.f32 %v242_v30, 0.0  ;;  %v172_v40 = vmul.f32 %v979_v26, %v1246_v2  ;;  %1151 = vmatprep.mubr.msk.bf16.mxu0 %vm452_vm1, %v361_v32  ;;  %v1043_v44 = vunpack.c.l.bf16 %v1096_v31 }
  0x26   :  { %v274_v41 = vadd.f32 %v1257_v8, %v203_v33  ;;  %v337_v42 = vmax.f32 %v273_v34, 0.0  ;;  %v173_v43 = vmul.f32 %v980_v35, %v1246_v2  ;;  %v1044_v48 = vunpack.c.h.bf16 %v1096_v31 }
  0x27   :  { %1183 = vmatprep.mubr.msk.bf16.mxu1 %vm452_vm1, %v377_v37  ;;  %v362_v46 = vpack.c.bf16 %v306_v39, %v305_v38  ;;  %v243_v47 = vadd.f32 %v1257_v8, %v172_v40  ;;  %v983_v49 = vunpack.c.l.bf16 %v1081_v36  ;;  %v204_v52 = vmul.f32 %v1043_v44, %v1246_v2 }
  0x28   :  { %v338_v50 = vmax.f32 %v274_v41, 0.0  ;;  %v244_v51 = vadd.f32 %v1257_v8, %v173_v43  ;;  %v984_v53 = vunpack.c.h.bf16 %v1081_v36  ;;  %v205_v55 = vmul.f32 %v1044_v48, %v1246_v2  ;;  %v1084_v36 = vld [vmem:[%s1955_s0 + $0x60] sm:$0xff]  }
  0x29   :  { %1152 = vmatmul.mubr.msk.bf16.gmra.mrb[12].mxu0 %vm452_vm1, %v362_v46  ;;  %v307_v54 = vmax.f32 %v243_v47, 0.0  ;;  %v174_v56 = vmul.f32 %v983_v49, %v1246_v2  ;;  %v1047_v57 = vunpack.c.l.bf16 %v1097_v45  ;;  %v275_v61 = vadd.f32 %v1257_v8, %v204_v52  ;;  %v1100_v49 = vld [vmem:[%s1955_s0 + $0xe0] sm:$0xff]  }
  0x2a   :  { %v378_v59 = vpack.c.bf16 %v338_v50, %v337_v42  ;;  %v308_v60 = vmax.f32 %v244_v51, 0.0  ;;  %v175_v62 = vmul.f32 %v984_v53, %v1246_v2  ;;  %v276_v63 = vadd.f32 %v1257_v8, %v205_v55 }
  0x2b   :  { %v245_v0 = vadd.f32 %v1257_v8, %v174_v56  ;;  %v1048_v1 = vunpack.c.h.bf16 %v1097_v45  ;;  %v206_v3 = vmul.f32 %v1047_v57, %v1246_v2  ;;  %v339_v6 = vmax.f32 %v275_v61, 0.0 }
  0x2c   :  { %1184 = vmatmul.mubr.msk.bf16.gmra.mrb[12].mxu1 %vm452_vm1, %v378_v59  ;;  %v363_v5 = vpack.c.bf16 %v308_v60, %v307_v54  ;;  %v246_v7 = vadd.f32 %v1257_v8, %v175_v62  ;;  %v987_v9 = vunpack.c.l.bf16 %v1082_v58  ;;  %v340_v10 = vmax.f32 %v276_v63, 0.0  ;;  %v1085_v54 = vld [vmem:[%s1955_s0 + $0x68] sm:$0xff]  }
  0x2d   :  { %v309_v11 = vmax.f32 %v245_v0, 0.0  ;;  %v207_v12 = vmul.f32 %v1048_v1, %v1246_v2  ;;  %v277_v13 = vadd.f32 %v1257_v8, %v206_v3  ;;  %v988_v15 = vunpack.c.h.bf16 %v1082_v58  ;;  %v1101_v63 = vld [vmem:[%s1955_s0 + $0xe8] sm:$0xff]  }
  0x2e   :  { %1155 = vmatprep.mubr.msk.bf16.mxu0 %vm452_vm1, %v363_v5  ;;  %v310_v14 = vmax.f32 %v246_v7, 0.0  ;;  %v176_v16 = vmul.f32 %v987_v9, %v1246_v2  ;;  %v1051_v17 = vunpack.c.l.bf16 %v1098_v4  ;;  %v379_v19 = vpack.c.bf16 %v340_v10, %v339_v6 }
  0x2f   :  { %v278_v20 = vadd.f32 %v1257_v8, %v207_v12  ;;  %v341_v21 = vmax.f32 %v277_v13, 0.0  ;;  %v1052_v22 = vunpack.c.h.bf16 %v1098_v4  ;;  %v177_v25 = vmul.f32 %v988_v15, %v1246_v2 }
  0x30   :  { %v364_v24 = vpack.c.bf16 %v310_v14, %v309_v11  ;;  %v247_v26 = vadd.f32 %v1257_v8, %v176_v16  ;;  %v208_v27 = vmul.f32 %v1051_v17, %v1246_v2  ;;  %1187 = vmatprep.mubr.msk.bf16.mxu1 %vm452_vm1, %v379_v19  ;;  %v991_v30 = vunpack.c.l.bf16 %v1083_v18  ;;  %v1086_v14 = vld [vmem:[%s1955_s0 + $0x70] sm:$0xff]  }
  0x31   :  { %v342_v28 = vmax.f32 %v278_v20, 0.0  ;;  %v209_v29 = vmul.f32 %v1052_v22, %v1246_v2  ;;  %v992_v31 = vunpack.c.h.bf16 %v1083_v18  ;;  %v248_v32 = vadd.f32 %v1257_v8, %v177_v25 }
  0x32   :  { %1156 = vmatmul.mubr.msk.bf16.gmra.mrb[16].mxu0 %vm452_vm1, %v364_v24  ;;  %v311_v33 = vmax.f32 %v247_v26, 0.0  ;;  %v279_v34 = vadd.f32 %v1257_v8, %v208_v27  ;;  %v1055_v35 = vunpack.c.l.bf16 %v1099_v23  ;;  %v178_v39 = vmul.f32 %v991_v30, %v1246_v2 }
  0x33   :  { %v380_v37 = vpack.c.bf16 %v342_v28, %v341_v21  ;;  %v280_v38 = vadd.f32 %v1257_v8, %v209_v29  ;;  %v179_v40 = vmul.f32 %v992_v31, %v1246_v2  ;;  %v312_v41 = vmax.f32 %v248_v32, 0.0 }
  0x34   :  { %v343_v42 = vmax.f32 %v279_v34, 0.0  ;;  %v1056_v43 = vunpack.c.h.bf16 %v1099_v23  ;;  %v210_v44 = vmul.f32 %v1055_v35, %v1246_v2  ;;  %v249_v46 = vadd.f32 %v1257_v8, %v178_v39  ;;  %v1102_v23 = vld [vmem:[%s1955_s0 + $0xf0] sm:$0xff]  }
  0x35   :  { %1188 = vmatmul.mubr.msk.bf16.gmra.mrb[16].mxu1 %vm452_vm1, %v380_v37  ;;  %v344_v45 = vmax.f32 %v280_v38, 0.0  ;;  %v250_v47 = vadd.f32 %v1257_v8, %v179_v40  ;;  %v995_v48 = vunpack.c.l.bf16 %v1084_v36  ;;  %v365_v50 = vpack.c.bf16 %v312_v41, %v311_v33  ;;  %v1103_v41 = vld [vmem:[%s1955_s0 + $0xf8] sm:$0xff]  }
  0x36   :  { %v211_v51 = vmul.f32 %v1056_v43, %v1246_v2  ;;  %v281_v52 = vadd.f32 %v1257_v8, %v210_v44  ;;  %v996_v53 = vunpack.c.h.bf16 %v1084_v36  ;;  %v313_v56 = vmax.f32 %v249_v46, 0.0  ;;  %v1087_v36 = vld [vmem:[%s1955_s0 + $0x78] sm:$0xff]  }
  0x37   :  { %v381_v55 = vpack.c.bf16 %v344_v45, %v343_v42  ;;  %v314_v57 = vmax.f32 %v250_v47, 0.0  ;;  %v180_v58 = vmul.f32 %v995_v48, %v1246_v2  ;;  %1159 = vmatprep.mubr.msk.bf16.mxu0 %vm452_vm1, %v365_v50  ;;  %v1059_v62 = vunpack.c.l.bf16 %v1100_v49 }
  0x38   :  { %v282_v59 = vadd.f32 %v1257_v8, %v211_v51  ;;  %v345_v60 = vmax.f32 %v281_v52, 0.0  ;;  %v181_v61 = vmul.f32 %v996_v53, %v1246_v2  ;;  %v1060_v3 = vunpack.c.h.bf16 %v1100_v49 }
  0x39   :  { %1191 = vmatprep.mubr.msk.bf16.mxu1 %vm452_vm1, %v381_v55  ;;  %v366_v0 = vpack.c.bf16 %v314_v57, %v313_v56  ;;  %v251_v1 = vadd.f32 %v1257_v8, %v180_v58  ;;  %v999_v4 = vunpack.c.l.bf16 %v1085_v54  ;;  %v212_v7 = vmul.f32 %v1059_v62, %v1246_v2 }
  0x3a   :  { %v346_v5 = vmax.f32 %v282_v59, 0.0  ;;  %v252_v6 = vadd.f32 %v1257_v8, %v181_v61  ;;  %v1000_v9 = vunpack.c.h.bf16 %v1085_v54  ;;  %v213_v11 = vmul.f32 %v1060_v3, %v1246_v2 }
  0x3b   :  { %1160 = vmatmul.mubr.msk.bf16.gmra.mrb[20].mxu0 %vm452_vm1, %v366_v0  ;;  %v315_v10 = vmax.f32 %v251_v1, 0.0  ;;  %v182_v12 = vmul.f32 %v999_v4, %v1246_v2  ;;  %v1063_v13 = vunpack.c.l.bf16 %v1101_v63  ;;  %v283_v17 = vadd.f32 %v1257_v8, %v212_v7 }
  0x3c   :  { %v382_v15 = vpack.c.bf16 %v346_v5, %v345_v60  ;;  %v316_v16 = vmax.f32 %v252_v6, 0.0  ;;  %v183_v18 = vmul.f32 %v1000_v9, %v1246_v2  ;;  %v284_v19 = vadd.f32 %v1257_v8, %v213_v11 }
  0x3d   :  { %v253_v20 = vadd.f32 %v1257_v8, %v182_v12  ;;  %v1064_v21 = vunpack.c.h.bf16 %v1101_v63  ;;  %v214_v22 = vmul.f32 %v1063_v13, %v1246_v2  ;;  %v347_v25 = vmax.f32 %v283_v17, 0.0  ;;  %v391_v17 = vld [vmem:[%s1958_s1 + $0x18] sm:$0xff] }
  0x3e   :  { %1192 = vmatmul.mubr.msk.bf16.gmra.mrb[20].mxu1 %vm452_vm1, %v382_v15  ;;  %v367_v24 = vpack.c.bf16 %v316_v16, %v315_v10  ;;  %v254_v26 = vadd.f32 %v1257_v8, %v183_v18  ;;  %v1003_v27 = vunpack.c.l.bf16 %v1086_v14  ;;  %v348_v28 = vmax.f32 %v284_v19, 0.0  ;;  %v420_v16 = vld [vmem:[%s1958_s1 + $0x100] sm:$0xff] }
  0x3f   :  { %v317_v29 = vmax.f32 %v253_v20, 0.0  ;;  %v215_v30 = vmul.f32 %v1064_v21, %v1246_v2  ;;  %v285_v31 = vadd.f32 %v1257_v8, %v214_v22  ;;  %v1004_v33 = vunpack.c.h.bf16 %v1086_v14  ;;  %v422_v14 = vld [vmem:[%s1958_s1 + $0x110] sm:$0xff]  ;;  %v423_v21 = vld [vmem:[%s1958_s1 + $0x118] sm:$0xff]  ;;  %v389_v22 = vld [vmem:[%s1958_s1 + $0x8] sm:$0xff] }
  0x40   :  { %1163 = vmatprep.mubr.msk.bf16.mxu0 %vm452_vm1, %v367_v24  ;;  %v318_v32 = vmax.f32 %v254_v26, 0.0  ;;  %v184_v34 = vmul.f32 %v1003_v27, %v1246_v2  ;;  %v1067_v35 = vunpack.c.l.bf16 %v1102_v23  ;;  %v383_v37 = vpack.c.bf16 %v348_v28, %v347_v25  ;;  %v421_v27 = vld [vmem:[%s1958_s1 + $0x108] sm:$0xff] }
  0x41   :  { %v286_v38 = vadd.f32 %v1257_v8, %v215_v30  ;;  %v349_v39 = vmax.f32 %v285_v31, 0.0  ;;  %v1068_v40 = vunpack.c.h.bf16 %v1102_v23  ;;  %v185_v43 = vmul.f32 %v1004_v33, %v1246_v2 }
  0x42   :  { %v368_v42 = vpack.c.bf16 %v318_v32, %v317_v29  ;;  %v255_v44 = vadd.f32 %v1257_v8, %v184_v34  ;;  %v216_v45 = vmul.f32 %v1067_v35, %v1246_v2  ;;  %1195 = vmatprep.mubr.msk.bf16.mxu1 %vm452_vm1, %v383_v37  ;;  %v1007_v48 = vunpack.c.l.bf16 %v1087_v36  ;;  %v426_v37 = vld [vmem:[%s1958_s1 + $0x130] sm:$0xff] }
  0x43   :  { %v350_v46 = vmax.f32 %v286_v38, 0.0  ;;  %v217_v47 = vmul.f32 %v1068_v40, %v1246_v2  ;;  %v1008_v49 = vunpack.c.h.bf16 %v1087_v36  ;;  %v256_v50 = vadd.f32 %v1257_v8, %v185_v43  ;;  %v394_v36 = vld [vmem:[%s1958_s1 + $0x30] sm:$0xff]  ;;  %v392_v38 = vld [vmem:[%s1958_s1 + $0x20] sm:$0xff] }
  0x44   :  { %1164 = vmatmul.mubr.msk.bf16.gmra.mrb[24].mxu0 %vm452_vm1, %v368_v42  ;;  %v319_v51 = vmax.f32 %v255_v44, 0.0  ;;  %v287_v52 = vadd.f32 %v1257_v8, %v216_v45  ;;  %v1071_v53 = vunpack.c.l.bf16 %v1103_v41  ;;  %v186_v56 = vmul.f32 %v1007_v48, %v1246_v2  ;;  %v424_v40 = vld [vmem:[%s1958_s1 + $0x120] sm:$0xff]  ;;  %v427_v45 = vld [vmem:[%s1958_s1 + $0x138] sm:$0xff] }
  0x45   :  { %v384_v54 = vpack.c.bf16 %v350_v46, %v349_v39  ;;  %v288_v55 = vadd.f32 %v1257_v8, %v217_v47  ;;  %v187_v57 = vmul.f32 %v1008_v49, %v1246_v2  ;;  %v320_v58 = vmax.f32 %v256_v50, 0.0  ;;  %v393_v46 = vld [vmem:[%s1958_s1 + $0x28] sm:$0xff] }
  0x46   :  { %v351_v59 = vmax.f32 %v287_v52, 0.0  ;;  %v1072_v60 = vunpack.c.h.bf16 %v1103_v41  ;;  %v218_v61 = vmul.f32 %v1071_v53, %v1246_v2  ;;  %v257_v63 = vadd.f32 %v1257_v8, %v186_v56  ;;  %v395_v41 = vld [vmem:[%s1958_s1 + $0x38] sm:$0xff] }
  0x47   :  { %1196 = vmatmul.mubr.msk.bf16.gmra.mrb[24].mxu1 %vm452_vm1, %v384_v54  ;;  %v352_v62 = vmax.f32 %v288_v55, 0.0  ;;  %v258_v0 = vadd.f32 %v1257_v8, %v187_v57  ;;  %v369_v1 = vpack.c.bf16 %v320_v58, %v319_v51  ;;  %v425_v51 = vld [vmem:[%s1958_s1 + $0x128] sm:$0xff] }
  0x48   :  { %v219_v3 = vmul.f32 %v1072_v60, %v1246_v2  ;;  %v289_v4 = vadd.f32 %v1257_v8, %v218_v61  ;;  %v321_v6 = vmax.f32 %v257_v63, 0.0  ;;  %v390_v2 = vld [vmem:[%s1958_s1 + $0x10] sm:$0xff]  ;;  %v396_v61 = vld [vmem:[%s1958_s1 + $0x40] sm:$0xff] }
  0x49   :  { %v385_v5 = vpack.c.bf16 %v352_v62, %v351_v59  ;;  %v322_v7 = vmax.f32 %v258_v0, 0.0  ;;  %1167 = vmatprep.mubr.msk.bf16.mxu0 %vm452_vm1, %v369_v1  ;;  %v398_v60 = vld [vmem:[%s1958_s1 + $0x50] sm:$0xff]  ;;  %v399_v0 = vld [vmem:[%s1958_s1 + $0x58] sm:$0xff] }
  0x4a   :  { %v290_v9 = vadd.f32 %v1257_v8, %v219_v3  ;;  %v353_v10 = vmax.f32 %v289_v4, 0.0  ;;  %v388_v8 = vld [vmem:[%s1958_s1] sm:$0xff]  ;;  %v430_v63 = vld [vmem:[%s1958_s1 + $0x150] sm:$0xff] }
  0x4b   :  { %1199 = vmatprep.mubr.msk.bf16.mxu1 %vm452_vm1, %v385_v5  ;;  %v370_v11 = vpack.c.bf16 %v322_v7, %v321_v6  ;;  %v428_v4 = vld [vmem:[%s1958_s1 + $0x140] sm:$0xff]  ;;  %v397_v5 = vld [vmem:[%s1958_s1 + $0x48] sm:$0xff] }
  0x4c   :  { %v354_v12 = vmax.f32 %v290_v9, 0.0 }
  0x4d   :  { %1168 = vmatmul.mubr.msk.bf16.gmra.mrb[28].mxu0 %vm452_vm1, %v370_v11 }
  0x4e   :  { %v386_v13 = vpack.c.bf16 %v354_v12, %v353_v10  ;;  %v431_v10 = vld [vmem:[%s1958_s1 + $0x158] sm:$0xff] }
  0x50   :  { %1200 = vmatmul.mubr.msk.bf16.gmra.mrb[28].mxu1 %vm452_vm1, %v386_v13 }
  0xe1   :  { %v1141_v15 = vpop.f32.mrb[0].mxu0 }
  0xe2   :  { %v596_v18 = vadd.f32 %v1141_v15, %v390_v2  ;;  %v587_v20 = vpop.f32.mrb[1].mxu0 }
  0xe3   :  { %v1173_v19 = vpop.f32.mrb[0].mxu1  ;;  %v588_v24 = vadd.f32 %v587_v20, %v388_v8  ;;  %v1142_v26 = vpop.f32.mrb[2].mxu0  ;;  %v402_v20 = vld [vmem:[%s1958_s1 + $0x70] sm:$0xff] }
  0xe4   :  { %v724_v23 = vadd.f32 %v1173_v19, %v422_v14  ;;  %v715_v25 = vpop.f32.mrb[1].mxu1  ;;  %845 = vst.msk [vmem:[%s1959_s5 + $0x10] sm:$0xff] %vm842_vm2, %v596_v18  ;;  %v599_v29 = vadd.f32 %v1142_v26, %v391_v17  ;;  %v590_v31 = vpop.f32.mrb[3].mxu0  ;;  %v429_v14 = vld [vmem:[%s1958_s1 + $0x148] sm:$0xff] }
  0xe5   :  { %v716_v28 = vadd.f32 %v715_v25, %v420_v16  ;;  %v1174_v30 = vpop.f32.mrb[2].mxu1  ;;  %843 = vst.msk [vmem:[%s1959_s5] sm:$0xff] %vm842_vm2, %v588_v24  ;;  %v591_v33 = vadd.f32 %v590_v31, %v389_v22  ;;  %v434_v25 = vld [vmem:[%s1958_s1 + $0x170] sm:$0xff] }
  0xe6   :  { %877 = vst.msk [vmem:[%s1959_s5 + $0x110] sm:$0xff] %vm842_vm2, %v724_v23  ;;  %v727_v32 = vadd.f32 %v1174_v30, %v423_v21  ;;  %v718_v34 = vpop.f32.mrb[3].mxu1  ;;  %846 = vst.msk [vmem:[%s1959_s5 + $0x18] sm:$0xff] %vm842_vm2, %v599_v29  ;;  %v400_v21 = vld [vmem:[%s1958_s1 + $0x60] sm:$0xff]  ;;  %v403_v23 = vld [vmem:[%s1958_s1 + $0x78] sm:$0xff] }
  0xe7   :  { %875 = vst.msk [vmem:[%s1959_s5 + $0x100] sm:$0xff] %vm842_vm2, %v716_v28  ;;  %v719_v35 = vadd.f32 %v718_v34, %v421_v27  ;;  %844 = vst.msk [vmem:[%s1959_s5 + $0x8] sm:$0xff] %vm842_vm2, %v591_v33  ;;  %v401_v27 = vld [vmem:[%s1958_s1 + $0x68] sm:$0xff]  ;;  %v432_v29 = vld [vmem:[%s1958_s1 + $0x160] sm:$0xff] }
  0xe8   :  { %878 = vst.msk [vmem:[%s1959_s5 + $0x118] sm:$0xff] %vm842_vm2, %v727_v32  ;;  %v435_v33 = vld [vmem:[%s1958_s1 + $0x178] sm:$0xff] }
  0xe9   :  { %876 = vst.msk [vmem:[%s1959_s5 + $0x108] sm:$0xff] %vm842_vm2, %v719_v35 }
  0xea   :  { %v1145_v39 = vpop.f32.mrb[4].mxu0 }
  0xeb   :  { %v612_v42 = vadd.f32 %v1145_v39, %v394_v36  ;;  %v1177_v43 = vpop.f32.mrb[4].mxu1  ;;  %v603_v44 = vpop.f32.mrb[5].mxu0 }
  0xec   :  { %v740_v47 = vadd.f32 %v1177_v43, %v426_v37  ;;  %v604_v48 = vadd.f32 %v603_v44, %v392_v38  ;;  %v731_v49 = vpop.f32.mrb[5].mxu1  ;;  %v1146_v50 = vpop.f32.mrb[6].mxu0  ;;  %v433_v38 = vld [vmem:[%s1958_s1 + $0x168] sm:$0xff]  ;;  %v406_v44 = vld [vmem:[%s1958_s1 + $0x90] sm:$0xff] }
  0xed   :  { %849 = vst.msk [vmem:[%s1959_s5 + $0x30] sm:$0xff] %vm842_vm2, %v612_v42  ;;  %v732_v52 = vadd.f32 %v731_v49, %v424_v40  ;;  %v615_v53 = vadd.f32 %v1146_v50, %v395_v41  ;;  %v1178_v54 = vpop.f32.mrb[6].mxu1  ;;  %v606_v55 = vpop.f32.mrb[7].mxu0  ;;  %v438_v49 = vld [vmem:[%s1958_s1 + $0x190] sm:$0xff] }
  0xee   :  { %881 = vst.msk [vmem:[%s1959_s5 + $0x130] sm:$0xff] %vm842_vm2, %v740_v47  ;;  %847 = vst.msk [vmem:[%s1959_s5 + $0x20] sm:$0xff] %vm842_vm2, %v604_v48  ;;  %v743_v56 = vadd.f32 %v1178_v54, %v427_v45  ;;  %v607_v57 = vadd.f32 %v606_v55, %v393_v46  ;;  %v734_v58 = vpop.f32.mrb[7].mxu1  ;;  %v404_v45 = vld [vmem:[%s1958_s1 + $0x80] sm:$0xff]  ;;  %v407_v47 = vld [vmem:[%s1958_s1 + $0x98] sm:$0xff] }
  0xef   :  { %879 = vst.msk [vmem:[%s1959_s5 + $0x120] sm:$0xff] %vm842_vm2, %v732_v52  ;;  %850 = vst.msk [vmem:[%s1959_s5 + $0x38] sm:$0xff] %vm842_vm2, %v615_v53  ;;  %v735_v59 = vadd.f32 %v734_v58, %v425_v51  ;;  %v405_v51 = vld [vmem:[%s1958_s1 + $0x88] sm:$0xff]  ;;  %v436_v53 = vld [vmem:[%s1958_s1 + $0x180] sm:$0xff] }
  0xf0   :  { %882 = vst.msk [vmem:[%s1959_s5 + $0x138] sm:$0xff] %vm842_vm2, %v743_v56  ;;  %848 = vst.msk [vmem:[%s1959_s5 + $0x28] sm:$0xff] %vm842_vm2, %v607_v57  ;;  %v439_v57 = vld [vmem:[%s1958_s1 + $0x198] sm:$0xff] }
  0xf1   :  { %880 = vst.msk [vmem:[%s1959_s5 + $0x128] sm:$0xff] %vm842_vm2, %v735_v59 }
  0xf3   :  { %v1149_v62 = vpop.f32.mrb[8].mxu0 }
  0xf4   :  { %v628_v1 = vadd.f32 %v1149_v62, %v398_v60  ;;  %v619_v3 = vpop.f32.mrb[9].mxu0  ;;  %v437_v62 = vld [vmem:[%s1958_s1 + $0x188] sm:$0xff] }
  0xf5   :  { %v1181_v6 = vpop.f32.mrb[8].mxu1  ;;  %v620_v7 = vadd.f32 %v619_v3, %v396_v61  ;;  %v1150_v9 = vpop.f32.mrb[10].mxu0 }
  0xf6   :  { %853 = vst.msk [vmem:[%s1959_s5 + $0x50] sm:$0xff] %vm842_vm2, %v628_v1  ;;  %v756_v11 = vadd.f32 %v1181_v6, %v430_v63  ;;  %v747_v12 = vpop.f32.mrb[9].mxu1  ;;  %v631_v13 = vadd.f32 %v1150_v9, %v399_v0  ;;  %v622_v2 = vpop.f32.mrb[11].mxu0  ;;  %v408_v6 = vld [vmem:[%s1958_s1 + $0xa0] sm:$0xff]  ;;  %v411_v9 = vld [vmem:[%s1958_s1 + $0xb8] sm:$0xff] }
  0xf7   :  { %851 = vst.msk [vmem:[%s1959_s5 + $0x40] sm:$0xff] %vm842_vm2, %v620_v7  ;;  %v748_v8 = vadd.f32 %v747_v12, %v428_v4  ;;  %v1182_v15 = vpop.f32.mrb[10].mxu1  ;;  %v623_v16 = vadd.f32 %v622_v2, %v397_v5  ;;  %v410_v5 = vld [vmem:[%s1958_s1 + $0xb0] sm:$0xff] }
  0xf8   :  { %885 = vst.msk [vmem:[%s1959_s5 + $0x150] sm:$0xff] %vm842_vm2, %v756_v11  ;;  %854 = vst.msk [vmem:[%s1959_s5 + $0x58] sm:$0xff] %vm842_vm2, %v631_v13  ;;  %v759_v17 = vadd.f32 %v1182_v15, %v431_v10  ;;  %v750_v18 = vpop.f32.mrb[11].mxu1  ;;  %v442_v11 = vld [vmem:[%s1958_s1 + $0x1b0] sm:$0xff]  ;;  %v409_v13 = vld [vmem:[%s1958_s1 + $0xa8] sm:$0xff] }
  0xf9   :  { %883 = vst.msk [vmem:[%s1959_s5 + $0x140] sm:$0xff] %vm842_vm2, %v748_v8  ;;  %852 = vst.msk [vmem:[%s1959_s5 + $0x48] sm:$0xff] %vm842_vm2, %v623_v16  ;;  %v751_v19 = vadd.f32 %v750_v18, %v429_v14  ;;  %v440_v14 = vld [vmem:[%s1958_s1 + $0x1a0] sm:$0xff] }
  0xfa   :  { %886 = vst.msk [vmem:[%s1959_s5 + $0x158] sm:$0xff] %vm842_vm2, %v759_v17  ;;  %v443_v17 = vld [vmem:[%s1958_s1 + $0x1b8] sm:$0xff] }
  0xfb   :  { %884 = vst.msk [vmem:[%s1959_s5 + $0x148] sm:$0xff] %vm842_vm2, %v751_v19 }
  0xfc   :  { %v1153_v22 = vpop.f32.mrb[12].mxu0 }
  0xfd   :  { %v644_v24 = vadd.f32 %v1153_v22, %v402_v20  ;;  %v635_v26 = vpop.f32.mrb[13].mxu0  ;;  %v441_v22 = vld [vmem:[%s1958_s1 + $0x1a8] sm:$0xff] }
  0xfe   :  { %v636_v28 = vadd.f32 %v635_v26, %v400_v21  ;;  %v1154_v30 = vpop.f32.mrb[14].mxu0 }
  0xff   :  { %857 = vst.msk [vmem:[%s1959_s5 + $0x70] sm:$0xff] %vm842_vm2, %v644_v24  ;;  %v1185_v31 = vpop.f32.mrb[12].mxu1  ;;  %v647_v32 = vadd.f32 %v1154_v30, %v403_v23  ;;  %v638_v34 = vpop.f32.mrb[15].mxu0 }
 0x100   :  { %v772_v35 = vadd.f32 %v1185_v31, %v434_v25  ;;  %855 = vst.msk [vmem:[%s1959_s5 + $0x60] sm:$0xff] %vm842_vm2, %v636_v28  ;;  %v763_v36 = vpop.f32.mrb[13].mxu1  ;;  %v639_v37 = vadd.f32 %v638_v34, %v401_v27  ;;  %v414_v28 = vld [vmem:[%s1958_s1 + $0xd0] sm:$0xff]  ;;  %v415_v31 = vld [vmem:[%s1958_s1 + $0xd8] sm:$0xff] }
 0x101   :  { %v764_v39 = vadd.f32 %v763_v36, %v432_v29  ;;  %858 = vst.msk [vmem:[%s1959_s5 + $0x78] sm:$0xff] %vm842_vm2, %v647_v32  ;;  %v1186_v40 = vpop.f32.mrb[14].mxu1  ;;  %v412_v29 = vld [vmem:[%s1958_s1 + $0xc0] sm:$0xff] }
 0x102   :  { %889 = vst.msk [vmem:[%s1959_s5 + $0x170] sm:$0xff] %vm842_vm2, %v772_v35  ;;  %v775_v41 = vadd.f32 %v1186_v40, %v435_v33  ;;  %856 = vst.msk [vmem:[%s1959_s5 + $0x68] sm:$0xff] %vm842_vm2, %v639_v37  ;;  %v766_v42 = vpop.f32.mrb[15].mxu1  ;;  %v446_v33 = vld [vmem:[%s1958_s1 + $0x1d0] sm:$0xff]  ;;  %v413_v35 = vld [vmem:[%s1958_s1 + $0xc8] sm:$0xff] }
 0x103   :  { %887 = vst.msk [vmem:[%s1959_s5 + $0x160] sm:$0xff] %vm842_vm2, %v764_v39  ;;  %v767_v43 = vadd.f32 %v766_v42, %v433_v38  ;;  %v444_v37 = vld [vmem:[%s1958_s1 + $0x1c0] sm:$0xff] }
 0x104   :  { %890 = vst.msk [vmem:[%s1959_s5 + $0x178] sm:$0xff] %vm842_vm2, %v775_v41  ;;  %v447_v41 = vld [vmem:[%s1958_s1 + $0x1d8] sm:$0xff] }
 0x105   :  { %888 = vst.msk [vmem:[%s1959_s5 + $0x168] sm:$0xff] %vm842_vm2, %v767_v43  ;;  %v1157_v46 = vpop.f32.mrb[16].mxu0 }
 0x106   :  { %v660_v48 = vadd.f32 %v1157_v46, %v406_v44  ;;  %v651_v50 = vpop.f32.mrb[17].mxu0  ;;  %v445_v46 = vld [vmem:[%s1958_s1 + $0x1c8] sm:$0xff] }
 0x107   :  { %v652_v52 = vadd.f32 %v651_v50, %v404_v45  ;;  %v1158_v54 = vpop.f32.mrb[18].mxu0 }
 0x108   :  { %861 = vst.msk [vmem:[%s1959_s5 + $0x90] sm:$0xff] %vm842_vm2, %v660_v48  ;;  %v1189_v55 = vpop.f32.mrb[16].mxu1  ;;  %v663_v56 = vadd.f32 %v1158_v54, %v407_v47  ;;  %v654_v58 = vpop.f32.mrb[19].mxu0 }
 0x109   :  { %v788_v59 = vadd.f32 %v1189_v55, %v438_v49  ;;  %859 = vst.msk [vmem:[%s1959_s5 + $0x80] sm:$0xff] %vm842_vm2, %v652_v52  ;;  %v779_v60 = vpop.f32.mrb[17].mxu1  ;;  %v655_v61 = vadd.f32 %v654_v58, %v405_v51  ;;  %v418_v52 = vld [vmem:[%s1958_s1 + $0xf0] sm:$0xff]  ;;  %v419_v55 = vld [vmem:[%s1958_s1 + $0xf8] sm:$0xff] }
 0x10a   :  { %v780_v63 = vadd.f32 %v779_v60, %v436_v53  ;;  %862 = vst.msk [vmem:[%s1959_s5 + $0x98] sm:$0xff] %vm842_vm2, %v663_v56  ;;  %v1190_v0 = vpop.f32.mrb[18].mxu1  ;;  %v416_v53 = vld [vmem:[%s1958_s1 + $0xe0] sm:$0xff] }
 0x10b   :  { %893 = vst.msk [vmem:[%s1959_s5 + $0x190] sm:$0xff] %vm842_vm2, %v788_v59  ;;  %v791_v1 = vadd.f32 %v1190_v0, %v439_v57  ;;  %860 = vst.msk [vmem:[%s1959_s5 + $0x88] sm:$0xff] %vm842_vm2, %v655_v61  ;;  %v782_v3 = vpop.f32.mrb[19].mxu1  ;;  %v450_v57 = vld [vmem:[%s1958_s1 + $0x1f0] sm:$0xff]  ;;  %v417_v59 = vld [vmem:[%s1958_s1 + $0xe8] sm:$0xff] }
 0x10c   :  { %891 = vst.msk [vmem:[%s1959_s5 + $0x180] sm:$0xff] %vm842_vm2, %v780_v63  ;;  %v783_v4 = vadd.f32 %v782_v3, %v437_v62  ;;  %v448_v61 = vld [vmem:[%s1958_s1 + $0x1e0] sm:$0xff] }
 0x10d   :  { %894 = vst.msk [vmem:[%s1959_s5 + $0x198] sm:$0xff] %vm842_vm2, %v791_v1  ;;  %v451_v1 = vld [vmem:[%s1958_s1 + $0x1f8] sm:$0xff] }
 0x10e   :  { %892 = vst.msk [vmem:[%s1959_s5 + $0x188] sm:$0xff] %vm842_vm2, %v783_v4  ;;  %v1161_v7 = vpop.f32.mrb[20].mxu0 }
 0x10f   :  { %v676_v10 = vadd.f32 %v1161_v7, %v410_v5  ;;  %v667_v12 = vpop.f32.mrb[21].mxu0  ;;  %v449_v7 = vld [vmem:[%s1958_s1 + $0x1e8] sm:$0xff] }
 0x110   :  { %v668_v2 = vadd.f32 %v667_v12, %v408_v6  ;;  %v1162_v8 = vpop.f32.mrb[22].mxu0 }
 0x111   :  { %865 = vst.msk [vmem:[%s1959_s5 + $0xb0] sm:$0xff] %vm842_vm2, %v676_v10  ;;  %v1193_v15 = vpop.f32.mrb[20].mxu1  ;;  %v679_v16 = vadd.f32 %v1162_v8, %v411_v9  ;;  %v670_v18 = vpop.f32.mrb[23].mxu0 }
 0x112   :  { %v804_v19 = vadd.f32 %v1193_v15, %v442_v11  ;;  %863 = vst.msk [vmem:[%s1959_s5 + $0xa0] sm:$0xff] %vm842_vm2, %v668_v2  ;;  %v795_v20 = vpop.f32.mrb[21].mxu1  ;;  %v671_v21 = vadd.f32 %v670_v18, %v409_v13 }
 0x113   :  { %v796_v23 = vadd.f32 %v795_v20, %v440_v14  ;;  %866 = vst.msk [vmem:[%s1959_s5 + $0xb8] sm:$0xff] %vm842_vm2, %v679_v16  ;;  %v1194_v24 = vpop.f32.mrb[22].mxu1 }
 0x114   :  { %897 = vst.msk [vmem:[%s1959_s5 + $0x1b0] sm:$0xff] %vm842_vm2, %v804_v19  ;;  %v807_v25 = vadd.f32 %v1194_v24, %v443_v17  ;;  %864 = vst.msk [vmem:[%s1959_s5 + $0xa8] sm:$0xff] %vm842_vm2, %v671_v21  ;;  %v798_v26 = vpop.f32.mrb[23].mxu1 }
 0x115   :  { %895 = vst.msk [vmem:[%s1959_s5 + $0x1a0] sm:$0xff] %vm842_vm2, %v796_v23  ;;  %v799_v27 = vadd.f32 %v798_v26, %v441_v22 }
 0x116   :  { %898 = vst.msk [vmem:[%s1959_s5 + $0x1b8] sm:$0xff] %vm842_vm2, %v807_v25 }
 0x117   :  { %896 = vst.msk [vmem:[%s1959_s5 + $0x1a8] sm:$0xff] %vm842_vm2, %v799_v27  ;;  %v1165_v30 = vpop.f32.mrb[24].mxu0 }
 0x118   :  { %v692_v32 = vadd.f32 %v1165_v30, %v414_v28  ;;  %v683_v34 = vpop.f32.mrb[25].mxu0 }
 0x119   :  { %v684_v36 = vadd.f32 %v683_v34, %v412_v29  ;;  %v1166_v38 = vpop.f32.mrb[26].mxu0 }
 0x11a   :  { %869 = vst.msk [vmem:[%s1959_s5 + $0xd0] sm:$0xff] %vm842_vm2, %v692_v32  ;;  %v1197_v39 = vpop.f32.mrb[24].mxu1  ;;  %v695_v40 = vadd.f32 %v1166_v38, %v415_v31  ;;  %v686_v42 = vpop.f32.mrb[27].mxu0 }
 0x11b   :  { %v820_v43 = vadd.f32 %v1197_v39, %v446_v33  ;;  %867 = vst.msk [vmem:[%s1959_s5 + $0xc0] sm:$0xff] %vm842_vm2, %v684_v36  ;;  %v811_v44 = vpop.f32.mrb[25].mxu1  ;;  %v687_v45 = vadd.f32 %v686_v42, %v413_v35 }
 0x11c   :  { %v812_v47 = vadd.f32 %v811_v44, %v444_v37  ;;  %870 = vst.msk [vmem:[%s1959_s5 + $0xd8] sm:$0xff] %vm842_vm2, %v695_v40  ;;  %v1198_v48 = vpop.f32.mrb[26].mxu1 }
 0x11d   :  { %901 = vst.msk [vmem:[%s1959_s5 + $0x1d0] sm:$0xff] %vm842_vm2, %v820_v43  ;;  %v823_v49 = vadd.f32 %v1198_v48, %v447_v41  ;;  %868 = vst.msk [vmem:[%s1959_s5 + $0xc8] sm:$0xff] %vm842_vm2, %v687_v45  ;;  %v814_v50 = vpop.f32.mrb[27].mxu1 }
 0x11e   :  { %899 = vst.msk [vmem:[%s1959_s5 + $0x1c0] sm:$0xff] %vm842_vm2, %v812_v47  ;;  %v815_v51 = vadd.f32 %v814_v50, %v445_v46 }
 0x11f   :  { %902 = vst.msk [vmem:[%s1959_s5 + $0x1d8] sm:$0xff] %vm842_vm2, %v823_v49 }
 0x120   :  { %900 = vst.msk [vmem:[%s1959_s5 + $0x1c8] sm:$0xff] %vm842_vm2, %v815_v51  ;;  %v1169_v54 = vpop.f32.mrb[28].mxu0 }
 0x121   :  { %v708_v56 = vadd.f32 %v1169_v54, %v418_v52  ;;  %v699_v58 = vpop.f32.mrb[29].mxu0 }
 0x122   :  { %v700_v60 = vadd.f32 %v699_v58, %v416_v53  ;;  %v1170_v62 = vpop.f32.mrb[30].mxu0 }
 0x123   :  { %873 = vst.msk [vmem:[%s1959_s5 + $0xf0] sm:$0xff] %vm842_vm2, %v708_v56  ;;  %v1201_v63 = vpop.f32.mrb[28].mxu1  ;;  %v711_v0 = vadd.f32 %v1170_v62, %v419_v55  ;;  %v702_v3 = vpop.f32.mrb[31].mxu0 }
 0x124   :  { %v836_v4 = vadd.f32 %v1201_v63, %v450_v57  ;;  %871 = vst.msk [vmem:[%s1959_s5 + $0xe0] sm:$0xff] %vm842_vm2, %v700_v60  ;;  %v827_v5 = vpop.f32.mrb[29].mxu1  ;;  %v703_v6 = vadd.f32 %v702_v3, %v417_v59 }
 0x125   :  { %v828_v9 = vadd.f32 %v827_v5, %v448_v61  ;;  %874 = vst.msk [vmem:[%s1959_s5 + $0xf8] sm:$0xff] %vm842_vm2, %v711_v0  ;;  %v1202_v10 = vpop.f32.mrb[30].mxu1 }
 0x126   :  { %905 = vst.msk [vmem:[%s1959_s5 + $0x1f0] sm:$0xff] %vm842_vm2, %v836_v4  ;;  %v839_v11 = vadd.f32 %v1202_v10, %v451_v1  ;;  %872 = vst.msk [vmem:[%s1959_s5 + $0xe8] sm:$0xff] %vm842_vm2, %v703_v6  ;;  %v830_v12 = vpop.f32.mrb[31].mxu1 }
 0x127   :  { %903 = vst.msk [vmem:[%s1959_s5 + $0x1e0] sm:$0xff] %vm842_vm2, %v828_v9  ;;  %v831_v13 = vadd.f32 %v830_v12, %v449_v7 }
 0x128   :  { %906 = vst.msk [vmem:[%s1959_s5 + $0x1f8] sm:$0xff] %vm842_vm2, %v839_v11 }
 0x129   :  { %904 = vst.msk [vmem:[%s1959_s5 + $0x1e8] sm:$0xff] %vm842_vm2, %v831_v13 }

// kernel: preact_bottleneck.3
= control target key start
LH: loop header
LB: loop body
LE: loop exit
PB: predicated region body
PF: predicated region fallthrough
CT: control target
= control target key end

     0   :  { %vm330_vm0 = vcmask 130048   ;;  %vm972_vm1 = vcmask 27648   ;;  %vm1037_vm2 = vcmask 31744   ;;  %s2723_s3 = inlined_call_operand.vmem [shape: bf16[16,4], index: 3, kind: input, shape index: {}]   ;;  %s2724_s0 = inlined_call_operand.vmem [shape: f32[512,16], index: 0, kind: input, shape index: {}]   ;;  %s2725_s1 = inlined_call_operand.vmem [shape: f32[1,16], index: 1, kind: input, shape index: {}]   ;;  %s2726_s2 = inlined_call_operand.vmem [shape: f32[1,16], index: 2, kind: input, shape index: {}]   ;;  %s2727_s4 = inlined_call_operand.vmem [shape: bf16[512,4], index: 4, kind: output, shape index: {0}]   ;;  %s2728_s5 = inlined_call_operand.vmem [shape: f32[1,8,4], index: 5, kind: output, shape index: {1}]  }
   0x1   :  { %v1648_v0 = vld [vmem:[%s2723_s3] sm:$0xff]   ;;  %v21_v2 = vld [vmem:[%s2724_s0 + $0x8] sm:$0xff]  ;;  %v22_v7 = vld [vmem:[%s2724_s0 + $0x10] sm:$0xff] }
   0x2   :  { %v20_v1 = vld [vmem:[%s2724_s0] sm:$0xff]  ;;  %1580 = vmatprep.subr.bf16.mxu0 %v1648_v0  ;;  %v23_v8 = vld [vmem:[%s2724_s0 + $0x18] sm:$0xff]  ;;  %1646 = vmatprep.subr.bf16.mxu1 %v1648_v0  ;;  %v25_v12 = vld [vmem:[%s2724_s0 + $0x28] sm:$0xff] }
   0x3   :  { %v1691_v3 = vld [vmem:[%s2725_s1] ss:$0 sm:$0xff]  ;;  %1581 = vmatpush3.bf16.msra.mxu0 %v1648_v0  ;;  %v26_v13 = vld [vmem:[%s2724_s0 + $0x30] sm:$0xff]  ;;  %1647 = vmatpush3.bf16.msra.mxu1 %v1648_v0  ;;  %v27_v18 = vld [vmem:[%s2724_s0 + $0x38] sm:$0xff] }
   0x4   :  { %v91_v4 = vmul.f32 %v1691_v3, %v20_v1  ;;  %v92_v5 = vmul.f32 %v1691_v3, %v21_v2  ;;  %v1698_v6 = vld [vmem:[%s2726_s2] ss:$0 sm:$0xff]  ;;  %v93_v9 = vmul.f32 %v1691_v3, %v22_v7  ;;  %v94_v10 = vmul.f32 %v1691_v3, %v23_v8  ;;  %v29_v28 = vld [vmem:[%s2724_s0 + $0x48] sm:$0xff]  ;;  %v30_v33 = vld [vmem:[%s2724_s0 + $0x50] sm:$0xff] }
   0x5   :  { %v24_v11 = vld [vmem:[%s2724_s0 + $0x20] sm:$0xff]  ;;  %v96_v17 = vmul.f32 %v1691_v3, %v25_v12  ;;  %v97_v21 = vmul.f32 %v1691_v3, %v26_v13  ;;  %v98_v22 = vmul.f32 %v1691_v3, %v27_v18  ;;  %v31_v34 = vld [vmem:[%s2724_s0 + $0x58] sm:$0xff]  ;;  %v33_v40 = vld [vmem:[%s2724_s0 + $0x68] sm:$0xff]  ;;  %v100_v43 = vmul.f32 %v1691_v3, %v29_v28 }
   0x6   :  { %v162_v14 = vadd.f32 %v1698_v6, %v91_v4  ;;  %v163_v15 = vadd.f32 %v1698_v6, %v92_v5  ;;  %v95_v16 = vmul.f32 %v1691_v3, %v24_v11  ;;  %v164_v19 = vadd.f32 %v1698_v6, %v93_v9  ;;  %v28_v23 = vld [vmem:[%s2724_s0 + $0x40] sm:$0xff]  ;;  %v34_v48 = vld [vmem:[%s2724_s0 + $0x70] sm:$0xff]  ;;  %v35_v53 = vld [vmem:[%s2724_s0 + $0x78] sm:$0xff] }
   0x7   :  { %v165_v20 = vadd.f32 %v1698_v6, %v94_v10  ;;  %v167_v27 = vadd.f32 %v1698_v6, %v96_v17  ;;  %v168_v31 = vadd.f32 %v1698_v6, %v97_v21  ;;  %v169_v32 = vadd.f32 %v1698_v6, %v98_v22  ;;  %v32_v39 = vld [vmem:[%s2724_s0 + $0x60] sm:$0xff]  ;;  %v37_v61 = vld [vmem:[%s2724_s0 + $0x88] sm:$0xff]  ;;  %v38_v0 = vld [vmem:[%s2724_s0 + $0x90] sm:$0xff] }
   0x8   :  { %v226_v24 = vmax.f32 %v162_v14, 0.0  ;;  %v227_v25 = vmax.f32 %v163_v15, 0.0  ;;  %v166_v26 = vadd.f32 %v1698_v6, %v95_v16  ;;  %v228_v29 = vmax.f32 %v164_v19, 0.0  ;;  %v36_v57 = vld [vmem:[%s2724_s0 + $0x80] sm:$0xff]  ;;  %v39_v1 = vld [vmem:[%s2724_s0 + $0x98] sm:$0xff]  ;;  %v41_v7 = vld [vmem:[%s2724_s0 + $0xa8] sm:$0xff] }
   0x9   :  { %v229_v30 = vmax.f32 %v165_v20, 0.0  ;;  %v231_v37 = vmax.f32 %v167_v27, 0.0  ;;  %v99_v38 = vmul.f32 %v1691_v3, %v28_v23  ;;  %v232_v42 = vmax.f32 %v168_v31, 0.0  ;;  %v40_v5 = vld [vmem:[%s2724_s0 + $0xa0] sm:$0xff]  ;;  %v42_v16 = vld [vmem:[%s2724_s0 + $0xb0] sm:$0xff]  ;;  %v43_v21 = vld [vmem:[%s2724_s0 + $0xb8] sm:$0xff] }
   0xa   :  { %v290_v35 = vpack.c.bf16 %v227_v25, %v226_v24  ;;  %v230_v36 = vmax.f32 %v166_v26, 0.0  ;;  %v101_v46 = vmul.f32 %v1691_v3, %v30_v33  ;;  %v102_v47 = vmul.f32 %v1691_v3, %v31_v34  ;;  %v44_v22 = vld [vmem:[%s2724_s0 + $0xc0] sm:$0xff] }
   0xb   :  { %v291_v41 = vpack.c.bf16 %v229_v30, %v228_v29  ;;  %v170_v45 = vadd.f32 %v1698_v6, %v99_v38  ;;  %v233_v49 = vmax.f32 %v169_v32, 0.0  ;;  %v171_v50 = vadd.f32 %v1698_v6, %v100_v43  ;;  %v45_v30 = vld [vmem:[%s2724_s0 + $0xc8] sm:$0xff]  ;;  %v47_v38 = vld [vmem:[%s2724_s0 + $0xd8] sm:$0xff] }
   0xc   :  { %1582 = vmatprep.mubr.msk.bf16.mxu0 %vm330_vm0, %v290_v35  ;;  %v292_v44 = vpack.c.bf16 %v231_v37, %v230_v36  ;;  %v103_v51 = vmul.f32 %v1691_v3, %v32_v39  ;;  %v104_v52 = vmul.f32 %v1691_v3, %v33_v40  ;;  %v172_v55 = vadd.f32 %v1698_v6, %v101_v46  ;;  %v46_v37 = vld [vmem:[%s2724_s0 + $0xd0] sm:$0xff] }
   0xd   :  { %1583 = vmatmul.mubr.msk.bf16.vlgmr.msra.gmra.mrb[0].mxu0 %vm330_vm0, %v291_v41  ;;  %v234_v54 = vmax.f32 %v170_v45, 0.0  ;;  %v173_v56 = vadd.f32 %v1698_v6, %v102_v47  ;;  %v235_v58 = vmax.f32 %v171_v50, 0.0  ;;  %v105_v60 = vmul.f32 %v1691_v3, %v34_v48  ;;  %v48_v47 = vld [vmem:[%s2724_s0 + $0xe0] sm:$0xff]  ;;  %v49_v48 = vld [vmem:[%s2724_s0 + $0xe8] sm:$0xff] }
   0xe   :  { %1586 = vmatprep.mubr.msk.bf16.mxu0 %vm330_vm0, %v292_v44  ;;  %v174_v59 = vadd.f32 %v1698_v6, %v103_v51  ;;  %v175_v62 = vadd.f32 %v1698_v6, %v104_v52  ;;  %v106_v63 = vmul.f32 %v1691_v3, %v35_v53  ;;  %v293_v2 = vpack.c.bf16 %v233_v49, %v232_v42  ;;  %v52_v53 = vld [vmem:[%s2724_s0 + $0x100] sm:$0xff] }
   0xf   :  { %v107_v4 = vmul.f32 %v1691_v3, %v36_v57  ;;  %v294_v8 = vpack.c.bf16 %v235_v58, %v234_v54  ;;  %v236_v9 = vmax.f32 %v172_v55, 0.0  ;;  %v237_v10 = vmax.f32 %v173_v56, 0.0 }
  0x10   :  { %v108_v11 = vmul.f32 %v1691_v3, %v37_v61  ;;  %v238_v12 = vmax.f32 %v174_v59, 0.0  ;;  %v176_v13 = vadd.f32 %v1698_v6, %v105_v60  ;;  %v109_v14 = vmul.f32 %v1691_v3, %v38_v0  ;;  %v50_v59 = vld [vmem:[%s2724_s0 + $0xf0] sm:$0xff]  ;;  %v53_v60 = vld [vmem:[%s2724_s0 + $0x108] sm:$0xff] }
  0x11   :  { %v110_v15 = vmul.f32 %v1691_v3, %v39_v1  ;;  %v239_v17 = vmax.f32 %v175_v62, 0.0  ;;  %v177_v18 = vadd.f32 %v1698_v6, %v106_v63  ;;  %v111_v19 = vmul.f32 %v1691_v3, %v40_v5  ;;  %v54_v1 = vld [vmem:[%s2724_s0 + $0x110] sm:$0xff] }
  0x12   :  { %v112_v20 = vmul.f32 %v1691_v3, %v41_v7  ;;  %v178_v23 = vadd.f32 %v1698_v6, %v107_v4  ;;  %v179_v24 = vadd.f32 %v1698_v6, %v108_v11  ;;  %v180_v25 = vadd.f32 %v1698_v6, %v109_v14 }
  0x13   :  { %v181_v26 = vadd.f32 %v1698_v6, %v110_v15  ;;  %v182_v27 = vadd.f32 %v1698_v6, %v111_v19  ;;  %v113_v29 = vmul.f32 %v1691_v3, %v42_v16  ;;  %v114_v31 = vmul.f32 %v1691_v3, %v43_v21  ;;  %v58_v16 = vld [vmem:[%s2724_s0 + $0x130] sm:$0xff]  ;;  %v59_v21 = vld [vmem:[%s2724_s0 + $0x138] sm:$0xff] }
  0x14   :  { %v183_v28 = vadd.f32 %v1698_v6, %v112_v20  ;;  %v115_v32 = vmul.f32 %v1691_v3, %v44_v22  ;;  %v295_v33 = vpack.c.bf16 %v237_v10, %v236_v9  ;;  %v296_v34 = vpack.c.bf16 %v239_v17, %v238_v12  ;;  %v56_v9 = vld [vmem:[%s2724_s0 + $0x120] sm:$0xff]  ;;  %v57_v10 = vld [vmem:[%s2724_s0 + $0x128] sm:$0xff]  ;;  %v51_v12 = vld [vmem:[%s2724_s0 + $0xf8] sm:$0xff] }
  0x15   :  { %1587 = vmatmul.mubr.msk.bf16.gmra.mrb[4].mxu0 %vm330_vm0, %v293_v2  ;;  %v240_v35 = vmax.f32 %v176_v13, 0.0  ;;  %v241_v36 = vmax.f32 %v177_v18, 0.0  ;;  %v242_v39 = vmax.f32 %v178_v23, 0.0  ;;  %v243_v40 = vmax.f32 %v179_v24, 0.0  ;;  %v55_v2 = vld [vmem:[%s2724_s0 + $0x118] sm:$0xff] }
  0x16   :  { %1590 = vmatprep.mubr.msk.bf16.mxu0 %vm330_vm0, %v294_v8  ;;  %v244_v41 = vmax.f32 %v180_v25, 0.0  ;;  %v116_v42 = vmul.f32 %v1691_v3, %v45_v30  ;;  %v245_v43 = vmax.f32 %v181_v26, 0.0  ;;  %v246_v44 = vmax.f32 %v182_v27, 0.0  ;;  %v60_v26 = vld [vmem:[%s2724_s0 + $0x140] sm:$0xff] }
  0x17   :  { %v247_v45 = vmax.f32 %v183_v28, 0.0  ;;  %v1830_v46 = vadd.f32 %v1698_v6, %v113_v29  ;;  %v1839_v49 = vadd.f32 %v1698_v6, %v114_v31  ;;  %v1842_v50 = vadd.f32 %v1698_v6, %v115_v32 }
  0x18   :  { %v117_v51 = vmul.f32 %v1691_v3, %v46_v37  ;;  %v118_v52 = vmul.f32 %v1691_v3, %v47_v38  ;;  %v1850_v54 = vadd.f32 %v1698_v6, %v116_v42  ;;  %v297_v55 = vpack.c.bf16 %v241_v36, %v240_v35  ;;  %v61_v35 = vld [vmem:[%s2724_s0 + $0x148] sm:$0xff] }
  0x19   :  { %v298_v56 = vpack.c.bf16 %v243_v40, %v242_v39  ;;  %v119_v57 = vmul.f32 %v1691_v3, %v48_v47  ;;  %v120_v58 = vmul.f32 %v1691_v3, %v49_v48  ;;  %v1862_v61 = vpack.c.bf16 %v245_v43, %v244_v41  ;;  %v62_v40 = vld [vmem:[%s2724_s0 + $0x150] sm:$0xff]  ;;  %v63_v41 = vld [vmem:[%s2724_s0 + $0x158] sm:$0xff]  ;;  %v64_v47 = vld [vmem:[%s2724_s0 + $0x160] sm:$0xff] }
  0x1a   :  { %v1864_v62 = vpack.c.bf16 %v247_v45, %v246_v44  ;;  %v248_v63 = vmax.f32 %v1830_v46, 0.0  ;;  %v123_v0 = vmul.f32 %v1691_v3, %v52_v53  ;;  %v249_v4 = vmax.f32 %v1839_v49, 0.0  ;;  %v65_v48 = vld [vmem:[%s2724_s0 + $0x168] sm:$0xff] }
  0x1b   :  { %v250_v5 = vmax.f32 %v1842_v50, 0.0  ;;  %v1877_v7 = vadd.f32 %v1698_v6, %v117_v51  ;;  %v1880_v8 = vadd.f32 %v1698_v6, %v118_v52  ;;  %v251_v11 = vmax.f32 %v1850_v54, 0.0  ;;  %v76_v50 = vld [vmem:[%s2724_s0 + $0x1c0] sm:$0xff] }
  0x1c   :  { %v1893_v13 = vmul.f32 %v1691_v3, %v50_v59  ;;  %v124_v14 = vmul.f32 %v1691_v3, %v53_v60  ;;  %v194_v15 = vadd.f32 %v1698_v6, %v123_v0  ;;  %v1901_v17 = vadd.f32 %v1698_v6, %v119_v57  ;;  %v67_v0 = vld [vmem:[%s2724_s0 + $0x178] sm:$0xff] }
  0x1d   :  { %1591 = vmatmul.mubr.msk.bf16.gmra.mrb[8].mxu0 %vm330_vm0, %v295_v33  ;;  %v1904_v18 = vadd.f32 %v1698_v6, %v120_v58  ;;  %v125_v19 = vmul.f32 %v1691_v3, %v54_v1  ;;  %v126_v20 = vmul.f32 %v1691_v3, %v55_v2  ;;  %v127_v24 = vmul.f32 %v1691_v3, %v56_v9 }
  0x1e   :  { %1594 = vmatprep.mubr.msk.bf16.mxu0 %vm330_vm0, %v296_v34  ;;  %v195_v22 = vadd.f32 %v1698_v6, %v124_v14  ;;  %v258_v23 = vmax.f32 %v194_v15, 0.0  ;;  %v128_v25 = vmul.f32 %v1691_v3, %v57_v10  ;;  %v1918_v27 = vmul.f32 %v1691_v3, %v51_v12  ;;  %v68_v10 = vld [vmem:[%s2724_s0 + $0x180] sm:$0xff] }
  0x1f   :  { %v196_v28 = vadd.f32 %v1698_v6, %v125_v19  ;;  %v197_v29 = vadd.f32 %v1698_v6, %v126_v20  ;;  %v129_v30 = vmul.f32 %v1691_v3, %v58_v16  ;;  %v198_v32 = vadd.f32 %v1698_v6, %v127_v24 }
  0x20   :  { %v259_v31 = vmax.f32 %v195_v22, 0.0  ;;  %v199_v33 = vadd.f32 %v1698_v6, %v128_v25  ;;  %v130_v34 = vmul.f32 %v1691_v3, %v59_v21  ;;  %v131_v39 = vmul.f32 %v1691_v3, %v60_v26 }
  0x21   :  { %v260_v36 = vmax.f32 %v196_v28, 0.0  ;;  %v261_v37 = vmax.f32 %v197_v29, 0.0  ;;  %v200_v38 = vadd.f32 %v1698_v6, %v129_v30  ;;  %v262_v43 = vmax.f32 %v198_v32, 0.0 }
  0x22   :  { %v306_v42 = vpack.c.bf16 %v259_v31, %v258_v23  ;;  %v263_v44 = vmax.f32 %v199_v33, 0.0  ;;  %v201_v45 = vadd.f32 %v1698_v6, %v130_v34  ;;  %v252_v51 = vmax.f32 %v1877_v7, 0.0 }
  0x23   :  { %v307_v52 = vpack.c.bf16 %v261_v37, %v260_v36  ;;  %v132_v53 = vmul.f32 %v1691_v3, %v61_v35  ;;  %v264_v58 = vmax.f32 %v200_v38, 0.0  ;;  %v133_v59 = vmul.f32 %v1691_v3, %v62_v40  ;;  %v72_v40 = vld [vmem:[%s2724_s0 + $0x1a0] sm:$0xff] }
  0x24   :  { %1614 = vmatprep.mubr.msk.bf16.mxu1 %vm330_vm0, %v306_v42  ;;  %v308_v57 = vpack.c.bf16 %v263_v44, %v262_v43  ;;  %v134_v60 = vmul.f32 %v1691_v3, %v63_v41  ;;  %v265_v1 = vmax.f32 %v201_v45, 0.0  ;;  %v135_v7 = vmul.f32 %v1691_v3, %v64_v47  ;;  %v77_v42 = vld [vmem:[%s2724_s0 + $0x1c8] sm:$0xff] }
  0x25   :  { %1595 = vmatmul.mubr.msk.bf16.gmra.mrb[12].mxu0 %vm330_vm0, %v297_v55  ;;  %v202_v55 = vadd.f32 %v1698_v6, %v131_v39  ;;  %1615 = vmatmul.mubr.msk.bf16.vlgmr.msra.gmra.mrb[0].mxu1 %vm330_vm0, %v307_v52  ;;  %v203_v2 = vadd.f32 %v1698_v6, %v132_v53  ;;  %v136_v9 = vmul.f32 %v1691_v3, %v65_v48  ;;  %v253_v23 = vmax.f32 %v1880_v8, 0.0  ;;  %v69_v8 = vld [vmem:[%s2724_s0 + $0x188] sm:$0xff]  ;;  %v79_v52 = vld [vmem:[%s2724_s0 + $0x1d8] sm:$0xff] }
  0x26   :  { %1598 = vmatprep.mubr.msk.bf16.mxu0 %vm330_vm0, %v298_v56  ;;  %v66_v56 = vld [vmem:[%s2724_s0 + $0x170] sm:$0xff]  ;;  %1618 = vmatprep.mubr.msk.bf16.mxu1 %vm330_vm0, %v308_v57  ;;  %v204_v14 = vadd.f32 %v1698_v6, %v133_v59  ;;  %v205_v15 = vadd.f32 %v1698_v6, %v134_v60  ;;  %v206_v20 = vadd.f32 %v1698_v6, %v135_v7  ;;  %v254_v24 = vmax.f32 %v1901_v17, 0.0  ;;  %v73_v45 = vld [vmem:[%s2724_s0 + $0x1a8] sm:$0xff] }
  0x27   :  { %v266_v12 = vmax.f32 %v202_v55, 0.0  ;;  %v137_v16 = vmul.f32 %v1691_v3, %v66_v56  ;;  %v267_v19 = vmax.f32 %v203_v2, 0.0  ;;  %v207_v21 = vadd.f32 %v1698_v6, %v136_v9  ;;  %v81_v59 = vld [vmem:[%s2724_s0 + $0x1e8] sm:$0xff]  ;;  %v82_v7 = vld [vmem:[%s2724_s0 + $0x1f0] sm:$0xff] }
  0x28   :  { %v138_v22 = vmul.f32 %v1691_v3, %v67_v0  ;;  %v1976_v25 = vadd.f32 %v1698_v6, %v1893_v13  ;;  %v139_v26 = vmul.f32 %v1691_v3, %v68_v10  ;;  %v255_v28 = vmax.f32 %v1904_v18, 0.0 }
  0x29   :  { %v309_v29 = vpack.c.bf16 %v265_v1, %v264_v58  ;;  %v268_v30 = vmax.f32 %v204_v14, 0.0  ;;  %v269_v31 = vmax.f32 %v205_v15, 0.0  ;;  %v310_v17 = vpack.c.bf16 %v267_v19, %v266_v12  ;;  %v80_v58 = vld [vmem:[%s2724_s0 + $0x1e0] sm:$0xff]  ;;  %v83_v15 = vld [vmem:[%s2724_s0 + $0x1f8] sm:$0xff] }
  0x2a   :  { %v270_v13 = vmax.f32 %v206_v20, 0.0  ;;  %v271_v32 = vmax.f32 %v207_v21, 0.0  ;;  %v1988_v33 = vadd.f32 %v1698_v6, %v137_v16  ;;  %v301_v18 = vpack.c.bf16 %v249_v4, %v248_v63  ;;  %v70_v63 = vld [vmem:[%s2724_s0 + $0x190] sm:$0xff] }
  0x2b   :  { %v1998_v34 = vadd.f32 %v1698_v6, %v138_v22  ;;  %v302_v35 = vpack.c.bf16 %v251_v11, %v250_v5  ;;  %v2009_v36 = vadd.f32 %v1698_v6, %v1918_v27  ;;  %v140_v46 = vmul.f32 %v1691_v3, %v69_v8  ;;  %v71_v11 = vld [vmem:[%s2724_s0 + $0x198] sm:$0xff] }
  0x2c   :  { %v2013_v49 = vadd.f32 %v1698_v6, %v139_v26  ;;  %v2021_v4 = vpack.c.bf16 %v253_v23, %v252_v51  ;;  %v2023_v54 = vpack.c.bf16 %v255_v28, %v254_v24  ;;  %v256_v5 = vmax.f32 %v1976_v25, 0.0  ;;  %v78_v51 = vld [vmem:[%s2724_s0 + $0x1d0] sm:$0xff] }
  0x2d   :  { %1599 = vmatmul.mubr.msk.bf16.gmra.mrb[16].mxu0 %vm330_vm0, %v1862_v61  ;;  %v74_v61 = vld [vmem:[%s2724_s0 + $0x1b0] sm:$0xff]  ;;  %1619 = vmatmul.mubr.msk.bf16.gmra.mrb[4].mxu1 %vm330_vm0, %v309_v29  ;;  %v311_v37 = vpack.c.bf16 %v269_v31, %v268_v30  ;;  %v312_v38 = vpack.c.bf16 %v271_v32, %v270_v13  ;;  %v272_v39 = vmax.f32 %v1988_v33, 0.0  ;;  %v273_v43 = vmax.f32 %v1998_v34, 0.0 }
  0x2e   :  { %1602 = vmatprep.mubr.msk.bf16.mxu0 %vm330_vm0, %v1864_v62  ;;  %v75_v62 = vld [vmem:[%s2724_s0 + $0x1b8] sm:$0xff]  ;;  %v145_v27 = vmul.f32 %v1691_v3, %v74_v61  ;;  %1622 = vmatprep.mubr.msk.bf16.mxu1 %vm330_vm0, %v310_v17  ;;  %v141_v44 = vmul.f32 %v1691_v3, %v70_v63  ;;  %v147_v48 = vmul.f32 %v1691_v3, %v76_v50  ;;  %v274_v55 = vmax.f32 %v2013_v49, 0.0 }
  0x2f   :  { %v146_v41 = vmul.f32 %v1691_v3, %v75_v62  ;;  %v211_v53 = vadd.f32 %v1698_v6, %v140_v46  ;;  %v142_v56 = vmul.f32 %v1691_v3, %v71_v11  ;;  %v143_v60 = vmul.f32 %v1691_v3, %v72_v40 }
  0x30   :  { %v216_v47 = vadd.f32 %v1698_v6, %v145_v27  ;;  %v148_v1 = vmul.f32 %v1691_v3, %v77_v42  ;;  %v218_v2 = vadd.f32 %v1698_v6, %v147_v48  ;;  %v144_v9 = vmul.f32 %v1691_v3, %v73_v45 }
  0x31   :  { %v217_v57 = vadd.f32 %v1698_v6, %v146_v41  ;;  %v149_v12 = vmul.f32 %v1691_v3, %v78_v51  ;;  %v150_v14 = vmul.f32 %v1691_v3, %v79_v52  ;;  %v151_v20 = vmul.f32 %v1691_v3, %v80_v58 }
  0x32   :  { %v280_v0 = vmax.f32 %v216_v47, 0.0  ;;  %v219_v16 = vadd.f32 %v1698_v6, %v148_v1  ;;  %v282_v19 = vmax.f32 %v218_v2, 0.0  ;;  %v152_v21 = vmul.f32 %v1691_v3, %v81_v59 }
  0x33   :  { %v281_v10 = vmax.f32 %v217_v57, 0.0  ;;  %v220_v23 = vadd.f32 %v1698_v6, %v149_v12  ;;  %v221_v24 = vadd.f32 %v1698_v6, %v150_v14  ;;  %v153_v26 = vmul.f32 %v1691_v3, %v82_v7 }
  0x34   :  { %v283_v28 = vmax.f32 %v219_v16, 0.0  ;;  %v222_v29 = vadd.f32 %v1698_v6, %v151_v20  ;;  %v223_v30 = vadd.f32 %v1698_v6, %v152_v21  ;;  %v154_v31 = vmul.f32 %v1691_v3, %v83_v15 }
  0x35   :  { %1603 = vmatmul.mubr.msk.bf16.gmra.mrb[20].mxu0 %vm330_vm0, %v301_v18  ;;  %v317_v22 = vpack.c.bf16 %v281_v10, %v280_v0  ;;  %1623 = vmatmul.mubr.msk.bf16.gmra.mrb[8].mxu1 %vm330_vm0, %v311_v37  ;;  %v275_v8 = vmax.f32 %v211_v53, 0.0  ;;  %v284_v17 = vmax.f32 %v220_v23, 0.0  ;;  %v285_v13 = vmax.f32 %v221_v24, 0.0 }
  0x36   :  { %1606 = vmatprep.mubr.msk.bf16.mxu0 %vm330_vm0, %v302_v35  ;;  %1626 = vmatprep.mubr.msk.bf16.mxu1 %vm330_vm0, %v312_v38  ;;  %v224_v32 = vadd.f32 %v1698_v6, %v153_v26  ;;  %v318_v33 = vpack.c.bf16 %v283_v28, %v282_v19  ;;  %v286_v61 = vmax.f32 %v222_v29, 0.0  ;;  %v287_v18 = vmax.f32 %v223_v30, 0.0 }
  0x37   :  { %v225_v34 = vadd.f32 %v1698_v6, %v154_v31  ;;  %v257_v62 = vmax.f32 %v2009_v36, 0.0  ;;  %v313_v35 = vpack.c.bf16 %v273_v43, %v272_v39  ;;  %v319_v46 = vpack.c.bf16 %v285_v13, %v284_v17 }
  0x38   :  { %v288_v49 = vmax.f32 %v224_v32, 0.0  ;;  %v212_v3 = vadd.f32 %v1698_v6, %v141_v44  ;;  %v213_v63 = vadd.f32 %v1698_v6, %v142_v56  ;;  %v320_v50 = vpack.c.bf16 %v287_v18, %v286_v61 }
  0x39   :  { %v289_v11 = vmax.f32 %v225_v34, 0.0  ;;  %v314_v27 = vpack.c.bf16 %v275_v8, %v274_v55  ;;  %v214_v37 = vadd.f32 %v1698_v6, %v143_v60  ;;  %v215_v36 = vadd.f32 %v1698_v6, %v144_v9 }
  0x3a   :  { %v305_v39 = vpack.c.bf16 %v257_v62, %v256_v5  ;;  %v277_v40 = vmax.f32 %v213_v63, 0.0 }
  0x3b   :  { %v321_v38 = vpack.c.bf16 %v289_v11, %v288_v49  ;;  %v278_v41 = vmax.f32 %v214_v37, 0.0  ;;  %v279_v42 = vmax.f32 %v215_v36, 0.0 }
  0x3d   :  { %1607 = vmatmul.mubr.msk.bf16.gmra.mrb[24].mxu0 %vm330_vm0, %v2021_v4  ;;  %1627 = vmatmul.mubr.msk.bf16.gmra.mrb[12].mxu1 %vm330_vm0, %v313_v35  ;;  %v276_v4 = vmax.f32 %v212_v3, 0.0  ;;  %v316_v43 = vpack.c.bf16 %v279_v42, %v278_v41 }
  0x3e   :  { %1610 = vmatprep.mubr.msk.bf16.mxu0 %vm330_vm0, %v2023_v54  ;;  %1630 = vmatprep.mubr.msk.bf16.mxu1 %vm330_vm0, %v314_v27 }
  0x3f   :  { %v315_v54 = vpack.c.bf16 %v277_v40, %v276_v4 }
  0x45   :  { %1611 = vmatmul.mubr.msk.bf16.gmra.mrb[28].mxu0 %vm330_vm0, %v305_v39  ;;  %1631 = vmatmul.mubr.msk.bf16.gmra.mrb[16].mxu1 %vm330_vm0, %v315_v54 }
  0x46   :  { %1634 = vmatprep.mubr.msk.bf16.mxu1 %vm330_vm0, %v316_v43 }
  0x4d   :  { %1635 = vmatmul.mubr.msk.bf16.gmra.mrb[20].mxu1 %vm330_vm0, %v317_v22 }
  0x4e   :  { %1638 = vmatprep.mubr.msk.bf16.mxu1 %vm330_vm0, %v318_v33 }
  0x55   :  { %1639 = vmatmul.mubr.msk.bf16.gmra.mrb[24].mxu1 %vm330_vm0, %v319_v46 }
  0x56   :  { %1642 = vmatprep.mubr.msk.bf16.mxu1 %vm330_vm0, %v320_v50 }
  0x5d   :  { %1643 = vmatmul.mubr.msk.bf16.gmra.mrb[28].mxu1 %vm330_vm0, %v321_v38 }
  0xe0   :  { %v1584_v6 = vpop.f32.mrb[0].mxu0 }
  0xe1   :  { %v1485_v25 = vpack.c.bf16 %v1584_v6, %v1584_v6  ;;  %v461_v5 = vpop.f32.mrb[1].mxu0  ;;  %v1173_v48 = vmul.f32 %v1584_v6, %v1584_v6  ;;  %v1041_v60 = vsel %vm1037_vm2, %v1584_v6, 0.0 }
  0xe2   :  { %v1483_v44 = vpack.c.bf16 %v461_v5, %v461_v5  ;;  %v1171_v45 = vmul.f32 %v461_v5, %v461_v5  ;;  %v1585_v47 = vpop.f32.mrb[2].mxu0  ;;  %v1038_v53 = vsel %vm1037_vm2, %v461_v5, 0.0 }
  0xe3   :  { %975 = vst.msk [vmem:[%s2727_s4 + $0x8] sm:$0xf] %vm972_vm1, %v1485_v25  ;;  %v1486_v51 = vpack.c.bf16 %v1585_v47, %v1585_v47  ;;  %v464_v52 = vpop.f32.mrb[3].mxu0  ;;  %v1174_v58 = vmul.f32 %v1585_v47, %v1585_v47  ;;  %v1238_v9 = vsel %vm1037_vm2, %v1173_v48, 0.0  ;;  %v1043_v12 = vsel %vm1037_vm2, %v1585_v47, 0.0 }
  0xe4   :  { %973 = vst.msk [vmem:[%s2727_s4] sm:$0xf] %vm972_vm1, %v1483_v44  ;;  %v1484_v55 = vpack.c.bf16 %v464_v52, %v464_v52  ;;  %v1039_v56 = vsel %vm1037_vm2, %v464_v52, 0.0  ;;  %v1172_v57 = vmul.f32 %v464_v52, %v464_v52  ;;  %v1235_v0 = vsel %vm1037_vm2, %v1171_v45, 0.0 }
  0xe5   :  { %976 = vst.msk [vmem:[%s2727_s4 + $0xc] sm:$0xf] %vm972_vm1, %v1486_v51  ;;  %v1040_v59 = vadd.f32 %v1039_v56, %v1038_v53  ;;  %v1240_v14 = vsel %vm1037_vm2, %v1174_v58, 0.0 }
  0xe6   :  { %974 = vst.msk [vmem:[%s2727_s4 + $0x4] sm:$0xf] %vm972_vm1, %v1484_v55  ;;  %v1236_v1 = vsel %vm1037_vm2, %v1172_v57, 0.0 }
  0xe7   :  { %v1042_v2 = vadd.f32 %v1041_v60, %v1040_v59  ;;  %v1237_v7 = vadd.f32 %v1236_v1, %v1235_v0 }
  0xe8   :  { %v1588_v10 = vpop.f32.mrb[4].mxu0 }
  0xe9   :  { %v1239_v15 = vadd.f32 %v1238_v9, %v1237_v7  ;;  %v1489_v16 = vpack.c.bf16 %v1588_v10, %v1588_v10  ;;  %v477_v19 = vpop.f32.mrb[5].mxu0  ;;  %v1044_v21 = vadd.f32 %v1043_v12, %v1042_v2  ;;  %v1177_v17 = vmul.f32 %v1588_v10, %v1588_v10 }
  0xea   :  { %v1487_v20 = vpack.c.bf16 %v477_v19, %v477_v19  ;;  %v1045_v22 = vsel %vm1037_vm2, %v477_v19, 0.0  ;;  %v1175_v23 = vmul.f32 %v477_v19, %v477_v19  ;;  %v1589_v24 = vpop.f32.mrb[6].mxu0  ;;  %v1049_v18 = vsel %vm1037_vm2, %v1588_v10, 0.0 }
  0xeb   :  { %979 = vst.msk [vmem:[%s2727_s4 + $0x18] sm:$0xf] %vm972_vm1, %v1489_v16  ;;  %v1241_v26 = vadd.f32 %v1240_v14, %v1239_v15  ;;  %v1490_v28 = vpack.c.bf16 %v1589_v24, %v1589_v24  ;;  %v480_v29 = vpop.f32.mrb[7].mxu0  ;;  %v1046_v30 = vadd.f32 %v1045_v22, %v1044_v21  ;;  %v1178_v34 = vmul.f32 %v1589_v24, %v1589_v24 }
  0xec   :  { %977 = vst.msk [vmem:[%s2727_s4 + $0x10] sm:$0xf] %vm972_vm1, %v1487_v20  ;;  %v1242_v31 = vsel %vm1037_vm2, %v1175_v23, 0.0  ;;  %v1488_v8 = vpack.c.bf16 %v480_v29, %v480_v29  ;;  %v1047_v32 = vsel %vm1037_vm2, %v480_v29, 0.0  ;;  %v1176_v33 = vmul.f32 %v480_v29, %v480_v29 }
  0xed   :  { %v1243_v13 = vadd.f32 %v1242_v31, %v1241_v26  ;;  %980 = vst.msk [vmem:[%s2727_s4 + $0x1c] sm:$0xf] %vm972_vm1, %v1490_v28  ;;  %v1048_v61 = vadd.f32 %v1047_v32, %v1046_v30  ;;  %v1246_v3 = vsel %vm1037_vm2, %v1177_v17, 0.0  ;;  %v1051_v63 = vsel %vm1037_vm2, %v1589_v24, 0.0 }
  0xee   :  { %978 = vst.msk [vmem:[%s2727_s4 + $0x14] sm:$0xf] %vm972_vm1, %v1488_v8  ;;  %v1244_v62 = vsel %vm1037_vm2, %v1176_v33, 0.0  ;;  %v1248_v4 = vsel %vm1037_vm2, %v1178_v34, 0.0 }
  0xef   :  { %v1050_v35 = vadd.f32 %v1049_v18, %v1048_v61  ;;  %v1245_v46 = vadd.f32 %v1244_v62, %v1243_v13 }
  0xf0   :  { %v1592_v49 = vpop.f32.mrb[8].mxu0 }
  0xf1   :  { %v1493_v50 = vpack.c.bf16 %v1592_v49, %v1592_v49  ;;  %v493_v11 = vpop.f32.mrb[9].mxu0  ;;  %v1247_v27 = vadd.f32 %v1246_v3, %v1245_v46  ;;  %v1052_v36 = vadd.f32 %v1051_v63, %v1050_v35  ;;  %v1181_v25 = vmul.f32 %v1592_v49, %v1592_v49 }
  0xf2   :  { %v1491_v37 = vpack.c.bf16 %v493_v11, %v493_v11  ;;  %v1053_v38 = vsel %vm1037_vm2, %v493_v11, 0.0  ;;  %v1593_v39 = vpop.f32.mrb[10].mxu0  ;;  %v1179_v40 = vmul.f32 %v493_v11, %v493_v11  ;;  %v1057_v51 = vsel %vm1037_vm2, %v1592_v49, 0.0 }
  0xf3   :  { %983 = vst.msk [vmem:[%s2727_s4 + $0x28] sm:$0xf] %vm972_vm1, %v1493_v50  ;;  %v1494_v41 = vpack.c.bf16 %v1593_v39, %v1593_v39  ;;  %v496_v42 = vpop.f32.mrb[11].mxu0  ;;  %v1054_v54 = vadd.f32 %v1053_v38, %v1052_v36  ;;  %v1249_v43 = vadd.f32 %v1248_v4, %v1247_v27  ;;  %v1182_v52 = vmul.f32 %v1593_v39, %v1593_v39 }
  0xf4   :  { %981 = vst.msk [vmem:[%s2727_s4 + $0x20] sm:$0xf] %vm972_vm1, %v1491_v37  ;;  %v1492_v6 = vpack.c.bf16 %v496_v42, %v496_v42  ;;  %v1250_v5 = vsel %vm1037_vm2, %v1179_v40, 0.0  ;;  %v1055_v44 = vsel %vm1037_vm2, %v496_v42, 0.0  ;;  %v1180_v45 = vmul.f32 %v496_v42, %v496_v42 }
  0xf5   :  { %984 = vst.msk [vmem:[%s2727_s4 + $0x2c] sm:$0xf] %vm972_vm1, %v1494_v41  ;;  %v1251_v47 = vadd.f32 %v1250_v5, %v1249_v43  ;;  %v1056_v48 = vadd.f32 %v1055_v44, %v1054_v54  ;;  %v1254_v58 = vsel %vm1037_vm2, %v1181_v25, 0.0  ;;  %v1059_v59 = vsel %vm1037_vm2, %v1593_v39, 0.0 }
  0xf6   :  { %982 = vst.msk [vmem:[%s2727_s4 + $0x24] sm:$0xf] %vm972_vm1, %v1492_v6  ;;  %v1252_v53 = vsel %vm1037_vm2, %v1180_v45, 0.0  ;;  %v1256_v12 = vsel %vm1037_vm2, %v1182_v52, 0.0 }
  0xf7   :  { %v1058_v55 = vadd.f32 %v1057_v51, %v1056_v48  ;;  %v1253_v56 = vadd.f32 %v1252_v53, %v1251_v47 }
  0xf8   :  { %v1596_v57 = vpop.f32.mrb[12].mxu0  ;;  %v2192_v23 = vpop.f32.mrb[0].mxu1 }
  0xf9   :  { %v1497_v60 = vpack.c.bf16 %v1596_v57, %v1596_v57  ;;  %v509_v0 = vpop.f32.mrb[13].mxu0  ;;  %v1255_v1 = vadd.f32 %v1254_v58, %v1253_v56  ;;  %v1060_v7 = vadd.f32 %v1059_v59, %v1058_v55  ;;  %v1185_v19 = vmul.f32 %v1596_v57, %v1596_v57  ;;  %v2202_v30 = vpop.f32.mrb[1].mxu1 }
  0xfa   :  { %v1495_v2 = vpack.c.bf16 %v509_v0, %v509_v0  ;;  %v1061_v9 = vsel %vm1037_vm2, %v509_v0, 0.0  ;;  %v1597_v10 = vpop.f32.mrb[14].mxu0  ;;  %v1183_v14 = vmul.f32 %v509_v0, %v509_v0  ;;  %v1517_v29 = vpack.c.bf16 %v2192_v23, %v2192_v23  ;;  %v2208_v17 = vpop.f32.mrb[2].mxu1 }
  0xfb   :  { %987 = vst.msk [vmem:[%s2727_s4 + $0x38] sm:$0xf] %vm972_vm1, %v1497_v60  ;;  %v1498_v15 = vpack.c.bf16 %v1597_v10, %v1597_v10  ;;  %v512_v16 = vpop.f32.mrb[15].mxu0  ;;  %v1062_v20 = vadd.f32 %v1061_v9, %v1060_v7  ;;  %v1257_v21 = vadd.f32 %v1256_v12, %v1255_v1  ;;  %v1065_v13 = vsel %vm1037_vm2, %v1596_v57, 0.0  ;;  %v2218_v18 = vpop.f32.mrb[3].mxu1 }
  0xfc   :  { %985 = vst.msk [vmem:[%s2727_s4 + $0x30] sm:$0xf] %vm972_vm1, %v1495_v2  ;;  %v1496_v22 = vpack.c.bf16 %v512_v16, %v512_v16  ;;  %v1258_v24 = vsel %vm1037_vm2, %v1183_v14, 0.0  ;;  %v1063_v26 = vsel %vm1037_vm2, %v512_v16, 0.0  ;;  %v1184_v28 = vmul.f32 %v512_v16, %v512_v16  ;;  %1007 = vst.msk [vmem:[%s2727_s4 + $0x88] sm:$0xf] %vm972_vm1, %v1517_v29 }
  0xfd   :  { %988 = vst.msk [vmem:[%s2727_s4 + $0x3c] sm:$0xf] %vm972_vm1, %v1498_v15  ;;  %v1259_v31 = vadd.f32 %v1258_v24, %v1257_v21  ;;  %v1064_v8 = vadd.f32 %v1063_v26, %v1062_v20  ;;  %v1186_v32 = vmul.f32 %v1597_v10, %v1597_v10  ;;  %v1515_v61 = vpack.c.bf16 %v2202_v30, %v2202_v30 }
  0xfe   :  { %986 = vst.msk [vmem:[%s2727_s4 + $0x34] sm:$0xf] %vm972_vm1, %v1496_v22  ;;  %v1260_v33 = vsel %vm1037_vm2, %v1184_v28, 0.0  ;;  %v1518_v46 = vpack.c.bf16 %v2208_v17, %v2208_v17  ;;  %v1262_v49 = vsel %vm1037_vm2, %v1185_v19, 0.0  ;;  %v1067_v3 = vsel %vm1037_vm2, %v1597_v10, 0.0 }
  0xff   :  { %v1066_v34 = vadd.f32 %v1065_v13, %v1064_v8  ;;  %v1261_v62 = vadd.f32 %v1260_v33, %v1259_v31  ;;  %1005 = vst.msk [vmem:[%s2727_s4 + $0x80] sm:$0xf] %vm972_vm1, %v1515_v61  ;;  %v1264_v39 = vsel %vm1037_vm2, %v1186_v32, 0.0  ;;  %v1516_v57 = vpack.c.bf16 %v2218_v18, %v2218_v18 }
 0x100   :  { %v1600_v35 = vpop.f32.mrb[16].mxu0  ;;  %1008 = vst.msk [vmem:[%s2727_s4 + $0x8c] sm:$0xf] %vm972_vm1, %v1518_v46  ;;  %v2242_v6 = vpop.f32.mrb[4].mxu1 }
 0x101   :  { %v1501_v63 = vpack.c.bf16 %v1600_v35, %v1600_v35  ;;  %v525_v50 = vpop.f32.mrb[17].mxu0  ;;  %v1263_v11 = vadd.f32 %v1262_v49, %v1261_v62  ;;  %v1068_v37 = vadd.f32 %v1067_v3, %v1066_v34  ;;  %v1189_v25 = vmul.f32 %v1600_v35, %v1600_v35  ;;  %v2250_v47 = vpop.f32.mrb[5].mxu1  ;;  %1006 = vst.msk [vmem:[%s2727_s4 + $0x84] sm:$0xf] %vm972_vm1, %v1516_v57 }
 0x102   :  { %v1499_v27 = vpack.c.bf16 %v525_v50, %v525_v50  ;;  %v1069_v36 = vsel %vm1037_vm2, %v525_v50, 0.0  ;;  %v1601_v38 = vpop.f32.mrb[18].mxu0  ;;  %v1187_v4 = vmul.f32 %v525_v50, %v525_v50  ;;  %v2256_v52 = vpop.f32.mrb[6].mxu1  ;;  %v1073_v53 = vsel %vm1037_vm2, %v1600_v35, 0.0 }
 0x103   :  { %991 = vst.msk [vmem:[%s2727_s4 + $0x48] sm:$0xf] %vm972_vm1, %v1501_v63  ;;  %v1502_v40 = vpack.c.bf16 %v1601_v38, %v1601_v38  ;;  %v528_v41 = vpop.f32.mrb[19].mxu0  ;;  %v1070_v42 = vadd.f32 %v1069_v36, %v1068_v37  ;;  %v1265_v54 = vadd.f32 %v1264_v39, %v1263_v11  ;;  %v1190_v55 = vmul.f32 %v1601_v38, %v1601_v38  ;;  %v2262_v58 = vpop.f32.mrb[7].mxu1 }
 0x104   :  { %989 = vst.msk [vmem:[%s2727_s4 + $0x40] sm:$0xf] %vm972_vm1, %v1499_v27  ;;  %v1500_v43 = vpack.c.bf16 %v528_v41, %v528_v41  ;;  %v1266_v5 = vsel %vm1037_vm2, %v1187_v4, 0.0  ;;  %v1071_v44 = vsel %vm1037_vm2, %v528_v41, 0.0  ;;  %v1188_v45 = vmul.f32 %v528_v41, %v528_v41 }
 0x105   :  { %992 = vst.msk [vmem:[%s2727_s4 + $0x4c] sm:$0xf] %vm972_vm1, %v1502_v40  ;;  %v1267_v48 = vadd.f32 %v1266_v5, %v1265_v54  ;;  %v1072_v51 = vadd.f32 %v1071_v44, %v1070_v42  ;;  %v1521_v1 = vpack.c.bf16 %v2242_v6, %v2242_v6  ;;  %v1270_v2 = vsel %vm1037_vm2, %v1189_v25, 0.0 }
 0x106   :  { %990 = vst.msk [vmem:[%s2727_s4 + $0x44] sm:$0xf] %vm972_vm1, %v1500_v43  ;;  %v1268_v56 = vsel %vm1037_vm2, %v1188_v45, 0.0  ;;  %v1075_v7 = vsel %vm1037_vm2, %v1601_v38, 0.0  ;;  %v1272_v20 = vsel %vm1037_vm2, %v1190_v55, 0.0  ;;  %v1519_v63 = vpack.c.bf16 %v2250_v47, %v2250_v47 }
 0x107   :  { %v1074_v59 = vadd.f32 %v1073_v53, %v1072_v51  ;;  %v1269_v60 = vadd.f32 %v1268_v56, %v1267_v48  ;;  %1011 = vst.msk [vmem:[%s2727_s4 + $0x98] sm:$0xf] %vm972_vm1, %v1521_v1  ;;  %v1522_v36 = vpack.c.bf16 %v2256_v52, %v2256_v52 }
 0x108   :  { %v1604_v0 = vpop.f32.mrb[20].mxu0  ;;  %v2286_v31 = vpop.f32.mrb[8].mxu1  ;;  %1009 = vst.msk [vmem:[%s2727_s4 + $0x90] sm:$0xf] %vm972_vm1, %v1519_v63 }
 0x109   :  { %v1505_v9 = vpack.c.bf16 %v1604_v0, %v1604_v0  ;;  %v541_v10 = vpop.f32.mrb[21].mxu0  ;;  %v1271_v12 = vadd.f32 %v1270_v2, %v1269_v60  ;;  %v1076_v15 = vadd.f32 %v1075_v7, %v1074_v59  ;;  %v1193_v8 = vmul.f32 %v1604_v0, %v1604_v0  ;;  %v2294_v61 = vpop.f32.mrb[9].mxu1  ;;  %1012 = vst.msk [vmem:[%s2727_s4 + $0x9c] sm:$0xf] %vm972_vm1, %v1522_v36 }
 0x10a   :  { %v1503_v14 = vpack.c.bf16 %v541_v10, %v541_v10  ;;  %v1077_v16 = vsel %vm1037_vm2, %v541_v10, 0.0  ;;  %v1605_v19 = vpop.f32.mrb[22].mxu0  ;;  %v1191_v21 = vmul.f32 %v541_v10, %v541_v10  ;;  %v2300_v35 = vpop.f32.mrb[10].mxu1  ;;  %v1081_v46 = vsel %vm1037_vm2, %v1604_v0, 0.0 }
 0x10b   :  { %995 = vst.msk [vmem:[%s2727_s4 + $0x58] sm:$0xf] %vm972_vm1, %v1505_v9  ;;  %v1506_v22 = vpack.c.bf16 %v1605_v19, %v1605_v19  ;;  %v544_v24 = vpop.f32.mrb[23].mxu0  ;;  %v1078_v26 = vadd.f32 %v1077_v16, %v1076_v15  ;;  %v1273_v28 = vadd.f32 %v1272_v20, %v1271_v12  ;;  %v1194_v49 = vmul.f32 %v1605_v19, %v1605_v19  ;;  %v2306_v50 = vpop.f32.mrb[11].mxu1 }
 0x10c   :  { %993 = vst.msk [vmem:[%s2727_s4 + $0x50] sm:$0xf] %vm972_vm1, %v1503_v14  ;;  %v1504_v29 = vpack.c.bf16 %v544_v24, %v544_v24  ;;  %v1274_v13 = vsel %vm1037_vm2, %v1191_v21, 0.0  ;;  %v1079_v32 = vsel %vm1037_vm2, %v544_v24, 0.0  ;;  %v1192_v33 = vmul.f32 %v544_v24, %v544_v24 }
 0x10d   :  { %996 = vst.msk [vmem:[%s2727_s4 + $0x5c] sm:$0xf] %vm972_vm1, %v1506_v22  ;;  %v1275_v34 = vadd.f32 %v1274_v13, %v1273_v28  ;;  %v1080_v62 = vadd.f32 %v1079_v32, %v1078_v26  ;;  %v1278_v38 = vsel %vm1037_vm2, %v1193_v8, 0.0  ;;  %v1083_v39 = vsel %vm1037_vm2, %v1605_v19, 0.0 }
 0x10e   :  { %994 = vst.msk [vmem:[%s2727_s4 + $0x54] sm:$0xf] %vm972_vm1, %v1504_v29  ;;  %v1276_v3 = vsel %vm1037_vm2, %v1192_v33, 0.0  ;;  %v1280_v5 = vsel %vm1037_vm2, %v1194_v49, 0.0  ;;  %v1520_v15 = vpack.c.bf16 %v2262_v58, %v2262_v58  ;;  %v1525_v22 = vpack.c.bf16 %v2286_v31, %v2286_v31 }
 0x10f   :  { %v1082_v11 = vadd.f32 %v1081_v46, %v1080_v62  ;;  %v1277_v27 = vadd.f32 %v1276_v3, %v1275_v34 }
 0x110   :  { %v1608_v37 = vpop.f32.mrb[24].mxu0  ;;  %v2330_v56 = vpop.f32.mrb[12].mxu1  ;;  %1010 = vst.msk [vmem:[%s2727_s4 + $0x94] sm:$0xf] %vm972_vm1, %v1520_v15  ;;  %1015 = vst.msk [vmem:[%s2727_s4 + $0xa8] sm:$0xf] %vm972_vm1, %v1525_v22  ;;  %v1205_v22 = vmul.f32 %v2192_v23, %v2192_v23 }
 0x111   :  { %v1509_v4 = vpack.c.bf16 %v1608_v37, %v1608_v37  ;;  %v557_v40 = vpop.f32.mrb[25].mxu0  ;;  %v1279_v41 = vadd.f32 %v1278_v38, %v1277_v27  ;;  %v1084_v54 = vadd.f32 %v1083_v39, %v1082_v11  ;;  %v1197_v57 = vmul.f32 %v1608_v37, %v1608_v37  ;;  %v2338_v1 = vpop.f32.mrb[13].mxu1 }
 0x112   :  { %v1507_v42 = vpack.c.bf16 %v557_v40, %v557_v40  ;;  %v1085_v43 = vsel %vm1037_vm2, %v557_v40, 0.0  ;;  %v1609_v25 = vpop.f32.mrb[26].mxu0  ;;  %v1195_v44 = vmul.f32 %v557_v40, %v557_v40  ;;  %v2344_v9 = vpop.f32.mrb[14].mxu1  ;;  %v1089_v10 = vsel %vm1037_vm2, %v1608_v37, 0.0 }
 0x113   :  { %999 = vst.msk [vmem:[%s2727_s4 + $0x68] sm:$0xf] %vm972_vm1, %v1509_v4  ;;  %v1510_v45 = vpack.c.bf16 %v1609_v25, %v1609_v25  ;;  %v560_v48 = vpop.f32.mrb[27].mxu0  ;;  %v1086_v51 = vadd.f32 %v1085_v43, %v1084_v54  ;;  %v1281_v53 = vadd.f32 %v1280_v5, %v1279_v41  ;;  %v1198_v12 = vmul.f32 %v1609_v25, %v1609_v25  ;;  %v2350_v16 = vpop.f32.mrb[15].mxu1 }
 0x114   :  { %997 = vst.msk [vmem:[%s2727_s4 + $0x60] sm:$0xf] %vm972_vm1, %v1507_v42  ;;  %v1508_v55 = vpack.c.bf16 %v560_v48, %v560_v48  ;;  %v1282_v59 = vsel %vm1037_vm2, %v1195_v44, 0.0  ;;  %v1087_v60 = vsel %vm1037_vm2, %v560_v48, 0.0  ;;  %v1196_v0 = vmul.f32 %v560_v48, %v560_v48 }
 0x115   :  { %1000 = vst.msk [vmem:[%s2727_s4 + $0x6c] sm:$0xf] %vm972_vm1, %v1510_v45  ;;  %v1283_v2 = vadd.f32 %v1282_v59, %v1281_v53  ;;  %v1088_v7 = vadd.f32 %v1087_v60, %v1086_v51  ;;  %v1286_v24 = vsel %vm1037_vm2, %v1197_v57, 0.0  ;;  %v1091_v26 = vsel %vm1037_vm2, %v1609_v25, 0.0 }
 0x116   :  { %998 = vst.msk [vmem:[%s2727_s4 + $0x64] sm:$0xf] %vm972_vm1, %v1508_v55  ;;  %v1284_v14 = vsel %vm1037_vm2, %v1196_v0, 0.0  ;;  %v1288_v62 = vsel %vm1037_vm2, %v1198_v12, 0.0  ;;  %v1203_v54 = vmul.f32 %v2202_v30, %v2202_v30  ;;  %v1523_v45 = vpack.c.bf16 %v2294_v61, %v2294_v61 }
 0x117   :  { %v1090_v19 = vadd.f32 %v1089_v10, %v1088_v7  ;;  %v1285_v20 = vadd.f32 %v1284_v14, %v1283_v2  ;;  %v1526_v55 = vpack.c.bf16 %v2300_v35, %v2300_v35  ;;  %v1101_v60 = vsel %vm1037_vm2, %v2202_v30, 0.0 }
 0x118   :  { %v1612_v21 = vpop.f32.mrb[28].mxu0  ;;  %v2374_v37 = vpop.f32.mrb[16].mxu1  ;;  %1013 = vst.msk [vmem:[%s2727_s4 + $0xa0] sm:$0xf] %vm972_vm1, %v1523_v45  ;;  %v1524_v0 = vpack.c.bf16 %v2306_v50, %v2306_v50  ;;  %v1298_v12 = vsel %vm1037_vm2, %v1203_v54, 0.0  ;;  %v1204_v30 = vmul.f32 %v2218_v18, %v2218_v18  ;;  %v1529_v14 = vpack.c.bf16 %v2330_v56, %v2330_v56 }
 0x119   :  { %v1513_v28 = vpack.c.bf16 %v1612_v21, %v1612_v21  ;;  %v573_v29 = vpop.f32.mrb[29].mxu0  ;;  %v1287_v8 = vadd.f32 %v1286_v24, %v1285_v20  ;;  %v1092_v32 = vadd.f32 %v1091_v26, %v1090_v19  ;;  %v1201_v36 = vmul.f32 %v1612_v21, %v1612_v21  ;;  %v2382_v40 = vpop.f32.mrb[17].mxu1  ;;  %1016 = vst.msk [vmem:[%s2727_s4 + $0xac] sm:$0xf] %vm972_vm1, %v1526_v55 }
 0x11a   :  { %v1511_v13 = vpack.c.bf16 %v573_v29, %v573_v29  ;;  %v1093_v33 = vsel %vm1037_vm2, %v573_v29, 0.0  ;;  %v1613_v34 = vpop.f32.mrb[30].mxu0  ;;  %v1199_v46 = vmul.f32 %v573_v29, %v573_v29  ;;  %v2390_v43 = vpop.f32.mrb[18].mxu1  ;;  %v1097_v25 = vsel %vm1037_vm2, %v1612_v21, 0.0  ;;  %1014 = vst.msk [vmem:[%s2727_s4 + $0xa4] sm:$0xf] %vm972_vm1, %v1524_v0 }
 0x11b   :  { %1003 = vst.msk [vmem:[%s2727_s4 + $0x78] sm:$0xf] %vm972_vm1, %v1513_v28  ;;  %v1514_v49 = vpack.c.bf16 %v1613_v34, %v1613_v34  ;;  %v576_v3 = vpop.f32.mrb[31].mxu0  ;;  %v1094_v63 = vadd.f32 %v1093_v33, %v1092_v32  ;;  %v1289_v11 = vadd.f32 %v1288_v62, %v1287_v8  ;;  %v1202_v5 = vmul.f32 %v1613_v34, %v1613_v34  ;;  %v2396_v48 = vpop.f32.mrb[19].mxu1 }
 0x11c   :  { %1001 = vst.msk [vmem:[%s2727_s4 + $0x70] sm:$0xf] %vm972_vm1, %v1511_v13  ;;  %v1512_v27 = vpack.c.bf16 %v576_v3, %v576_v3  ;;  %v1290_v38 = vsel %vm1037_vm2, %v1199_v46, 0.0  ;;  %v1095_v39 = vsel %vm1037_vm2, %v576_v3, 0.0  ;;  %v1200_v4 = vmul.f32 %v576_v3, %v576_v3  ;;  %1019 = vst.msk [vmem:[%s2727_s4 + $0xb8] sm:$0xf] %vm972_vm1, %v1529_v14 }
 0x11d   :  { %1004 = vst.msk [vmem:[%s2727_s4 + $0x7c] sm:$0xf] %vm972_vm1, %v1514_v49  ;;  %v1291_v41 = vadd.f32 %v1290_v38, %v1289_v11  ;;  %v1096_v42 = vadd.f32 %v1095_v39, %v1094_v63  ;;  %v1294_v57 = vsel %vm1037_vm2, %v1201_v36, 0.0  ;;  %v1099_v59 = vsel %vm1037_vm2, %v1613_v34, 0.0 }
 0x11e   :  { %1002 = vst.msk [vmem:[%s2727_s4 + $0x74] sm:$0xf] %vm972_vm1, %v1512_v27  ;;  %v1292_v44 = vsel %vm1037_vm2, %v1200_v4, 0.0  ;;  %v1296_v10 = vsel %vm1037_vm2, %v1202_v5, 0.0  ;;  %v1527_v20 = vpack.c.bf16 %v2338_v1, %v2338_v1  ;;  %v1103_v24 = vsel %vm1037_vm2, %v2218_v18, 0.0 }
 0x11f   :  { %v1098_v51 = vadd.f32 %v1097_v25, %v1096_v42  ;;  %v1293_v53 = vadd.f32 %v1292_v44, %v1291_v41  ;;  %v1530_v26 = vpack.c.bf16 %v2344_v9, %v2344_v9  ;;  %v1105_v29 = vsel %vm1037_vm2, %v2192_v23, 0.0 }
 0x120   :  { %v2426_v21 = vpop.f32.mrb[20].mxu1  ;;  %1017 = vst.msk [vmem:[%s2727_s4 + $0xb0] sm:$0xf] %vm972_vm1, %v1527_v20  ;;  %v1206_v32 = vmul.f32 %v2208_v17, %v2208_v17  ;;  %v1300_v33 = vsel %vm1037_vm2, %v1204_v30, 0.0  ;;  %v1207_v34 = vmul.f32 %v2250_v47, %v2250_v47  ;;  %v1528_v23 = vpack.c.bf16 %v2350_v16, %v2350_v16 }
 0x121   :  { %v1295_v2 = vadd.f32 %v1294_v57, %v1293_v53  ;;  %v1100_v7 = vadd.f32 %v1099_v59, %v1098_v51  ;;  %v2438_v28 = vpop.f32.mrb[21].mxu1  ;;  %1020 = vst.msk [vmem:[%s2727_s4 + $0xbc] sm:$0xf] %vm972_vm1, %v1530_v26  ;;  %v1533_v3 = vpack.c.bf16 %v2374_v37, %v2374_v37  ;;  %v1302_v63 = vsel %vm1037_vm2, %v1205_v22, 0.0 }
 0x122   :  { %v2446_v18 = vpop.f32.mrb[22].mxu1  ;;  %v1107_v11 = vsel %vm1037_vm2, %v2208_v17, 0.0  ;;  %v1109_v27 = vsel %vm1037_vm2, %v2250_v47, 0.0  ;;  %1018 = vst.msk [vmem:[%s2727_s4 + $0xb4] sm:$0xf] %vm972_vm1, %v1528_v23  ;;  %v1531_v36 = vpack.c.bf16 %v2382_v40, %v2382_v40  ;;  %v1304_v17 = vsel %vm1037_vm2, %v1206_v32, 0.0 }
 0x123   :  { %v1102_v15 = vadd.f32 %v1101_v60, %v1100_v7  ;;  %v1297_v19 = vadd.f32 %v1296_v10, %v1295_v2  ;;  %v2459_v62 = vpop.f32.mrb[23].mxu1  ;;  %1023 = vst.msk [vmem:[%s2727_s4 + $0xc8] sm:$0xf] %vm972_vm1, %v1533_v3  ;;  %v1306_v4 = vsel %vm1037_vm2, %v1207_v34, 0.0  ;;  %v1208_v47 = vmul.f32 %v2262_v58, %v2262_v58 }
 0x124   :  { %1021 = vst.msk [vmem:[%s2727_s4 + $0xc0] sm:$0xf] %vm972_vm1, %v1531_v36  ;;  %v1534_v41 = vpack.c.bf16 %v2390_v43, %v2390_v43  ;;  %v1532_v25 = vpack.c.bf16 %v2396_v48, %v2396_v48  ;;  %v1209_v44 = vmul.f32 %v2242_v6, %v2242_v6  ;;  %v1111_v45 = vsel %vm1037_vm2, %v2262_v58, 0.0 }
 0x125   :  { %v1299_v8 = vadd.f32 %v1298_v12, %v1297_v19  ;;  %v1104_v13 = vadd.f32 %v1103_v24, %v1102_v15  ;;  %v1537_v51 = vpack.c.bf16 %v2426_v21, %v2426_v21  ;;  %v1113_v55 = vsel %vm1037_vm2, %v2242_v6, 0.0 }
 0x126   :  { %1024 = vst.msk [vmem:[%s2727_s4 + $0xcc] sm:$0xf] %vm972_vm1, %v1534_v41  ;;  %1022 = vst.msk [vmem:[%s2727_s4 + $0xc4] sm:$0xf] %vm972_vm1, %v1532_v25  ;;  %v1210_v60 = vmul.f32 %v2256_v52, %v2256_v52  ;;  %v1308_v0 = vsel %vm1037_vm2, %v1208_v47, 0.0  ;;  %v1211_v2 = vmul.f32 %v2294_v61, %v2294_v61  ;;  %v1535_v6 = vpack.c.bf16 %v2438_v28, %v2438_v28 }
 0x127   :  { %v1106_v46 = vadd.f32 %v1105_v29, %v1104_v13  ;;  %v1301_v49 = vadd.f32 %v1300_v33, %v1299_v8  ;;  %1027 = vst.msk [vmem:[%s2727_s4 + $0xd8] sm:$0xf] %vm972_vm1, %v1537_v51  ;;  %v1538_v30 = vpack.c.bf16 %v2446_v18, %v2446_v18  ;;  %v1310_v14 = vsel %vm1037_vm2, %v1209_v44, 0.0 }
 0x128   :  { %v2490_v5 = vpop.f32.mrb[24].mxu1  ;;  %v1115_v15 = vsel %vm1037_vm2, %v2256_v52, 0.0  ;;  %v1117_v19 = vsel %vm1037_vm2, %v2294_v61, 0.0  ;;  %1025 = vst.msk [vmem:[%s2727_s4 + $0xd0] sm:$0xf] %vm972_vm1, %v1535_v6  ;;  %v1536_v20 = vpack.c.bf16 %v2459_v62, %v2459_v62  ;;  %v1312_v52 = vsel %vm1037_vm2, %v1210_v60, 0.0 }
 0x129   :  { %v1303_v38 = vadd.f32 %v1302_v63, %v1301_v49  ;;  %v1108_v39 = vadd.f32 %v1107_v11, %v1106_v46  ;;  %v2502_v53 = vpop.f32.mrb[25].mxu1  ;;  %1028 = vst.msk [vmem:[%s2727_s4 + $0xdc] sm:$0xf] %vm972_vm1, %v1538_v30  ;;  %v1314_v26 = vsel %vm1037_vm2, %v1211_v2, 0.0  ;;  %v1212_v61 = vmul.f32 %v2306_v50, %v2306_v50 }
 0x12a   :  { %v2510_v58 = vpop.f32.mrb[26].mxu1  ;;  %1026 = vst.msk [vmem:[%s2727_s4 + $0xd4] sm:$0xf] %vm972_vm1, %v1536_v20  ;;  %v1541_v29 = vpack.c.bf16 %v2490_v5, %v2490_v5  ;;  %v1539_v32 = vpack.c.bf16 %v2502_v53, %v2502_v53  ;;  %v1213_v34 = vmul.f32 %v2286_v31, %v2286_v31  ;;  %v1119_v23 = vsel %vm1037_vm2, %v2306_v50, 0.0 }
 0x12b   :  { %v1110_v42 = vadd.f32 %v1109_v27, %v1108_v39  ;;  %v1305_v54 = vadd.f32 %v1304_v17, %v1303_v38  ;;  %v2523_v7 = vpop.f32.mrb[27].mxu1  ;;  %v1542_v46 = vpack.c.bf16 %v2510_v58, %v2510_v58  ;;  %v1121_v3 = vsel %vm1037_vm2, %v2286_v31, 0.0 }
 0x12c   :  { %1031 = vst.msk [vmem:[%s2727_s4 + $0xe8] sm:$0xf] %vm972_vm1, %v1541_v29  ;;  %1029 = vst.msk [vmem:[%s2727_s4 + $0xe0] sm:$0xf] %vm972_vm1, %v1539_v32  ;;  %v1214_v27 = vmul.f32 %v2300_v35, %v2300_v35  ;;  %v1316_v36 = vsel %vm1037_vm2, %v1212_v61, 0.0  ;;  %v1215_v38 = vmul.f32 %v2338_v1, %v2338_v1  ;;  %v1540_v31 = vpack.c.bf16 %v2523_v7, %v2523_v7 }
 0x12d   :  { %v1307_v57 = vadd.f32 %v1306_v4, %v1305_v54  ;;  %v1112_v59 = vadd.f32 %v1111_v45, %v1110_v42  ;;  %1032 = vst.msk [vmem:[%s2727_s4 + $0xec] sm:$0xf] %vm972_vm1, %v1542_v46  ;;  %v1318_v41 = vsel %vm1037_vm2, %v1213_v34, 0.0  ;;  %v1123_v42 = vsel %vm1037_vm2, %v2300_v35, 0.0 }
 0x12e   :  { %v1125_v54 = vsel %vm1037_vm2, %v2338_v1, 0.0  ;;  %1030 = vst.msk [vmem:[%s2727_s4 + $0xe4] sm:$0xf] %vm972_vm1, %v1540_v31  ;;  %v1320_v35 = vsel %vm1037_vm2, %v1214_v27, 0.0  ;;  %v1322_v51 = vsel %vm1037_vm2, %v1215_v38, 0.0  ;;  %v1216_v1 = vmul.f32 %v2350_v16, %v2350_v16 }
 0x12f   :  { %v1114_v10 = vadd.f32 %v1113_v55, %v1112_v59  ;;  %v1309_v12 = vadd.f32 %v1308_v0, %v1307_v57  ;;  %v1217_v0 = vmul.f32 %v2330_v56, %v2330_v56  ;;  %v1127_v2 = vsel %vm1037_vm2, %v2350_v16, 0.0 }
 0x130   :  { %v2554_v33 = vpop.f32.mrb[28].mxu1  ;;  %v1218_v30 = vmul.f32 %v2344_v9, %v2344_v9  ;;  %v1324_v16 = vsel %vm1037_vm2, %v1216_v1, 0.0  ;;  %v1220_v29 = vmul.f32 %v2396_v48, %v2396_v48  ;;  %v1221_v32 = vmul.f32 %v2374_v37, %v2374_v37 }
 0x131   :  { %v1311_v22 = vadd.f32 %v1310_v14, %v1309_v12  ;;  %v1116_v24 = vadd.f32 %v1115_v15, %v1114_v10  ;;  %v2566_v49 = vpop.f32.mrb[29].mxu1  ;;  %v1545_v47 = vpack.c.bf16 %v2554_v33, %v2554_v33  ;;  %v1129_v12 = vsel %vm1037_vm2, %v2330_v56, 0.0 }
 0x132   :  { %v2574_v50 = vpop.f32.mrb[30].mxu1  ;;  %v1543_v25 = vpack.c.bf16 %v2566_v49, %v2566_v49  ;;  %v1219_v14 = vmul.f32 %v2382_v40, %v2382_v40  ;;  %v1326_v20 = vsel %vm1037_vm2, %v1217_v0, 0.0  ;;  %v1222_v46 = vmul.f32 %v2390_v43, %v2390_v43 }
 0x133   :  { %v1118_v8 = vadd.f32 %v1117_v19, %v1116_v24  ;;  %v1313_v13 = vadd.f32 %v1312_v52, %v1311_v22  ;;  %v2587_v39 = vpop.f32.mrb[31].mxu1  ;;  %1035 = vst.msk [vmem:[%s2727_s4 + $0xf8] sm:$0xf] %vm972_vm1, %v1545_v47  ;;  %v1546_v55 = vpack.c.bf16 %v2574_v50, %v2574_v50  ;;  %v1131_v22 = vsel %vm1037_vm2, %v2344_v9, 0.0 }
 0x134   :  { %1033 = vst.msk [vmem:[%s2727_s4 + $0xf0] sm:$0xf] %vm972_vm1, %v1543_v25  ;;  %v1544_v60 = vpack.c.bf16 %v2587_v39, %v2587_v39  ;;  %v1133_v24 = vsel %vm1037_vm2, %v2382_v40, 0.0  ;;  %v1330_v61 = vsel %vm1037_vm2, %v1219_v14, 0.0  ;;  %v1135_v9 = vsel %vm1037_vm2, %v2396_v48, 0.0 }
 0x135   :  { %v1315_v63 = vadd.f32 %v1314_v26, %v1313_v13  ;;  %v1120_v11 = vadd.f32 %v1119_v23, %v1118_v8  ;;  %1036 = vst.msk [vmem:[%s2727_s4 + $0xfc] sm:$0xf] %vm972_vm1, %v1546_v55  ;;  %v1328_v26 = vsel %vm1037_vm2, %v1218_v30, 0.0  ;;  %v1137_v40 = vsel %vm1037_vm2, %v2374_v37, 0.0 }
 0x136   :  { %1034 = vst.msk [vmem:[%s2727_s4 + $0xf4] sm:$0xf] %vm972_vm1, %v1544_v60  ;;  %v1139_v48 = vsel %vm1037_vm2, %v2390_v43, 0.0  ;;  %v1141_v38 = vsel %vm1037_vm2, %v2438_v28, 0.0  ;;  %v1224_v47 = vmul.f32 %v2459_v62, %v2459_v62  ;;  %v1143_v43 = vsel %vm1037_vm2, %v2459_v62, 0.0 }
 0x137   :  { %v1122_v17 = vadd.f32 %v1121_v3, %v1120_v11  ;;  %v1317_v4 = vadd.f32 %v1316_v36, %v1315_v63  ;;  %v1332_v3 = vsel %vm1037_vm2, %v1220_v29, 0.0  ;;  %v1223_v63 = vmul.f32 %v2438_v28, %v2438_v28 }
 0x138   :  { %v1334_v36 = vsel %vm1037_vm2, %v1221_v32, 0.0  ;;  %v1145_v28 = vsel %vm1037_vm2, %v2426_v21, 0.0  ;;  %v1147_v62 = vsel %vm1037_vm2, %v2446_v18, 0.0  ;;  %v1229_v30 = vmul.f32 %v2490_v5, %v2490_v5 }
 0x139   :  { %v1319_v44 = vadd.f32 %v1318_v41, %v1317_v4  ;;  %v1124_v45 = vadd.f32 %v1123_v42, %v1122_v17  ;;  %v1336_v17 = vsel %vm1037_vm2, %v1222_v46, 0.0  ;;  %v1338_v4 = vsel %vm1037_vm2, %v1223_v63, 0.0 }
 0x13b   :  { %v1126_v57 = vadd.f32 %v1125_v54, %v1124_v45  ;;  %v1321_v59 = vadd.f32 %v1320_v35, %v1319_v44  ;;  %v1225_v54 = vmul.f32 %v2426_v21, %v2426_v21  ;;  %v1226_v45 = vmul.f32 %v2446_v18, %v2446_v18 }
 0x13c   :  { %v1340_v35 = vsel %vm1037_vm2, %v1224_v47, 0.0  ;;  %v1151_v18 = vsel %vm1037_vm2, %v2523_v7, 0.0 }
 0x13d   :  { %v1323_v6 = vadd.f32 %v1322_v51, %v1321_v59  ;;  %v1128_v10 = vadd.f32 %v1127_v2, %v1126_v57  ;;  %v1227_v51 = vmul.f32 %v2502_v53, %v2502_v53  ;;  %v1342_v57 = vsel %vm1037_vm2, %v1225_v54, 0.0 }
 0x13e   :  { %v1149_v59 = vsel %vm1037_vm2, %v2502_v53, 0.0  ;;  %v1344_v0 = vsel %vm1037_vm2, %v1226_v45, 0.0  ;;  %v1153_v53 = vsel %vm1037_vm2, %v2490_v5, 0.0 }
 0x13f   :  { %v1130_v15 = vadd.f32 %v1129_v12, %v1128_v10  ;;  %v1325_v19 = vadd.f32 %v1324_v16, %v1323_v6  ;;  %v1346_v2 = vsel %vm1037_vm2, %v1227_v51, 0.0  ;;  %v1228_v6 = vmul.f32 %v2523_v7, %v2523_v7 }
 0x140   :  { %v1155_v7 = vsel %vm1037_vm2, %v2510_v58, 0.0 }
 0x141   :  { %v1327_v52 = vadd.f32 %v1326_v20, %v1325_v19  ;;  %v1132_v56 = vadd.f32 %v1131_v22, %v1130_v15  ;;  %v1230_v15 = vmul.f32 %v2510_v58, %v2510_v58  ;;  %v1348_v19 = vsel %vm1037_vm2, %v1228_v6, 0.0 }
 0x142   :  { %v1231_v20 = vmul.f32 %v2566_v49, %v2566_v49  ;;  %v1159_v58 = vsel %vm1037_vm2, %v2587_v39, 0.0 }
 0x143   :  { %v1134_v8 = vadd.f32 %v1133_v24, %v1132_v56  ;;  %v1329_v13 = vadd.f32 %v1328_v26, %v1327_v52  ;;  %v1350_v52 = vsel %vm1037_vm2, %v1229_v30, 0.0  ;;  %v1157_v56 = vsel %vm1037_vm2, %v2566_v49, 0.0 }
 0x144   :  { %v1354_v29 = vsel %vm1037_vm2, %v1231_v20, 0.0  ;;  %v1161_v49 = vsel %vm1037_vm2, %v2554_v33, 0.0 }
 0x145   :  { %v1331_v34 = vadd.f32 %v1330_v61, %v1329_v13  ;;  %v1136_v23 = vadd.f32 %v1135_v9, %v1134_v8  ;;  %v1352_v61 = vsel %vm1037_vm2, %v1230_v15, 0.0  ;;  %v1232_v8 = vmul.f32 %v2587_v39, %v2587_v39 }
 0x146   :  { %v1233_v9 = vmul.f32 %v2554_v33, %v2554_v33 }
 0x147   :  { %v1138_v11 = vadd.f32 %v1137_v40, %v1136_v23  ;;  %v1333_v27 = vadd.f32 %v1332_v3, %v1331_v34  ;;  %v1234_v40 = vmul.f32 %v2574_v50, %v2574_v50  ;;  %v1356_v46 = vsel %vm1037_vm2, %v1232_v8, 0.0 }
 0x149   :  { %v1335_v31 = vadd.f32 %v1334_v36, %v1333_v27  ;;  %v1140_v37 = vadd.f32 %v1139_v48, %v1138_v11  ;;  %v1358_v11 = vsel %vm1037_vm2, %v1233_v9, 0.0  ;;  %v1163_v27 = vsel %vm1037_vm2, %v2574_v50, 0.0 }
 0x14a   :  { %v1360_v39 = vsel %vm1037_vm2, %v1234_v40, 0.0 }
 0x14b   :  { %v1142_v41 = vadd.f32 %v1141_v38, %v1140_v37  ;;  %v1337_v42 = vadd.f32 %v1336_v17, %v1335_v31  ;;  %v1368_v17 = vlaneseq }
 0x14d   :  { %v1339_v25 = vadd.f32 %v1338_v4, %v1337_v42  ;;  %v1144_v44 = vadd.f32 %v1143_v43, %v1142_v41  ;;  %v1369_v54 = vshrl.u32 %v1368_v17, 7 }
 0x14f   :  { %v1146_v1 = vadd.f32 %v1145_v28, %v1144_v44  ;;  %v1341_v55 = vadd.f32 %v1340_v35, %v1339_v25  ;;  %vm1370_vm3 = vcmp.eq.s32.totalorder %v1369_v54, 0  ;;  %vm1372_vm4 = vcmp.eq.s32.totalorder %v1369_v54, 1 }
 0x151   :  { %v1343_v60 = vadd.f32 %v1342_v57, %v1341_v55  ;;  %v1148_v21 = vadd.f32 %v1147_v62, %v1146_v1 }
 0x153   :  { %v1150_v10 = vadd.f32 %v1149_v59, %v1148_v21  ;;  %v1345_v12 = vadd.f32 %v1344_v0, %v1343_v60 }
 0x155   :  { %v1347_v16 = vadd.f32 %v1346_v2, %v1345_v12  ;;  %v1152_v14 = vadd.f32 %v1151_v18, %v1150_v10 }
 0x157   :  { %v1154_v22 = vadd.f32 %v1153_v53, %v1152_v14  ;;  %v1349_v24 = vadd.f32 %v1348_v19, %v1347_v16 }
 0x159   :  { %v1351_v26 = vadd.f32 %v1350_v52, %v1349_v24  ;;  %v1156_v5 = vadd.f32 %v1155_v7, %v1154_v22 }
 0x15b   :  { %v1158_v13 = vadd.f32 %v1157_v56, %v1156_v5  ;;  %v1353_v32 = vadd.f32 %v1352_v61, %v1351_v26 }
 0x15d   :  { %v1355_v34 = vadd.f32 %v1354_v29, %v1353_v32  ;;  %v1160_v23 = vadd.f32 %v1159_v58, %v1158_v13 }
 0x15f   :  { %v1162_v3 = vadd.f32 %v1161_v49, %v1160_v23  ;;  %v1357_v63 = vadd.f32 %v1356_v46, %v1355_v34 }
 0x161   :  { %v1164_v36 = vadd.f32 %v1163_v27, %v1162_v3  ;;  %v1359_v48 = vadd.f32 %v1358_v11, %v1357_v63 }
 0x163   :  { %v1165_v38 = vrot.slane %v1164_v36, 4  ;;  %v1361_v31 = vadd.f32 %v1360_v39, %v1359_v48 }
 0x165   :  { %v1166_v37 = vadd.f32 %v1165_v38, %v1164_v36  ;;  %v1362_v33 = vrot.slane %v1361_v31, 4 }
 0x167   :  { %v1167_v4 = vrot.slane %v1166_v37, 2  ;;  %v1363_v47 = vadd.f32 %v1362_v33, %v1361_v31 }
 0x169   :  { %v1168_v41 = vadd.f32 %v1167_v4, %v1166_v37  ;;  %v1364_v42 = vrot.slane %v1363_v47, 2 }
 0x16b   :  { %v1169_v43 = vrot.slane %v1168_v41, 1  ;;  %v1365_v25 = vadd.f32 %v1364_v42, %v1363_v47 }
 0x16d   :  { %v1170_v44 = vadd.f32 %v1169_v43, %v1168_v41  ;;  %v1366_v28 = vrot.slane %v1365_v25, 1 }
 0x16f   :  { %v1367_v50 = vadd.f32 %v1366_v28, %v1365_v25  ;;  %v1371_v45 = vsel %vm1370_vm3, %v1170_v44, 0.0 }
 0x171   :  { %v1373_v35 = vsel %vm1372_vm4, %v1367_v50, 0.0 }
 0x172   :  { %v1374_v51 = vadd.f32 %v1373_v35, %v1371_v45 }
 0x174   :  { %1375 = vst.msk [vmem:[%s2728_s5] sm:$0xff] %vm1037_vm2, %v1374_v51 }

// kernel: preact_bottleneck.4
= control target key start
LH: loop header
LB: loop body
LE: loop exit
PB: predicated region body
PF: predicated region fallthrough
CT: control target
= control target key end

     0   :  { %12 = vsyncpa [#allocation3], 0  ;;  %s6770_s21 = smov 0   ;;  %s8923_s0 = inlined_call_operand.vmem [shape: bf16[2,256,4], index: 0, kind: input, shape index: {}]   ;;  %s8924_s1 = inlined_call_operand.vmem [shape: f32[1,4], index: 1, kind: input, shape index: {}]   ;;  %s8925_s2 = inlined_call_operand.vmem [shape: f32[1,4], index: 2, kind: input, shape index: {}]   ;;  %s8926_s3 = inlined_call_operand.vmem [shape: bf16[9,4,4], index: 3, kind: input, shape index: {}]   ;;  %s8927_s4 = inlined_call_operand.hbm [shape: f32[9,256,1], index: 4, kind: input, shape index: {}]   ;;  %s8928_s5 = inlined_call_operand.vmem [shape: bf16[2,256,4], index: 5, kind: output, shape index: {0}]   ;;  %s8929_s6 = inlined_call_operand.vmem [shape: f32[2,8,4], index: 6, kind: output, shape index: {1}]  }
   0x1 LB: > { %s6776_s22 = sadd.s32 4294967295, %s6729_s21   ;;  %p5629_p0 = scmp.ge.s32.totalorder %s6729_s21, 1  ;;  %s6729_s21 = sphi %s6770_s21, %s18_s21  }
   0x2   : > { %p185_p1 = scmp.lt.s32.totalorder %s6729_s21, 3  ;;  %s6731_s23 = smov [#allocation2]  }
   0x3   : > { %s206_s24 = sshll.u32 %s6731_s23, 4  ;;  %p8930_p3 = scmp.eq.s32.totalorder %s6776_s22, 0  ;;  %s207_s24 = int_to_ptr.vmem [resolvable:$true] %s206_s24 }
   0x4   : > { %p6780_p2 = pnand %p5629_p0, %p185_p1  ;;  %s6691_s29 = scalar_lea.hbm %s8927_s4, 36864 }
   0x5   : > { %p6692_p6 = scmp.ne.s32.totalorder %s8927_s4, %s6691_s29  ;;  %p6698_p10 = scmp.lt.u32.totalorder %s6691_s29, %s8927_s4 }
   0x6   : > { %s9139_s25 = scalar_select %p6780_p2, 1, 0 }
   0x7   : > { %p6671_p4 = pneg %p6780_p2 }
   0x9   : > { %p6789_p5 = pnand %p8930_p3, %p6671_p4 }
   0xb   : > { %p6693_p7 = pneg %p6789_p5 }
   0xd   : > { %p6694_p8 = pnand %p6693_p7, %p6692_p6 }
   0xf   : > { %p6695_p9 = pneg %p6694_p8 }
  0x11   : > { %p6700_p11 = pnand %p6698_p10, %p6695_p9 }
  0x13   : > { %6703 = shalt.err (!%p6700_p11)
}
  0x14   : > { %s6704_s10 = scalar_lea.vmem %s207_s24, 36864  ;;  %p6712_p1 = scmp.lt.s32.totalorder %s207_s24, %s207_s24 }
  0x15   : > { %p6705_p12 = scmp.ne.s32.totalorder %s207_s24, %s6704_s10  ;;  %p6713_p4 = scmp.lt.s32.totalorder %s6704_s10, %s6704_s10 }
  0x17   : > { %p6707_p13 = pnand %p6705_p12, %p6693_p7  ;;  %p6714_p3 = por %p6713_p4, %p6712_p1 }
  0x19   : > { %p6708_p0 = pneg %p6707_p13 }
  0x1b   : > { %p6715_p2 = pnand %p6714_p3, %p6708_p0 }
  0x1d   : > { %6718 = shalt.err (!%p6715_p2)
}
  0x1e   : > { %s6732_s11 = smov 128   ;;  %s6733_s12 = smov 8  }
  0x1f   : > { %6674 = dma.hbm_to_vmem [thread:$0]  (!%p6789_p5), %s8927_s4, 36864, %s207_s24, [#allocation3], %s6732_s11, %s6732_s11, %s6733_s12  }
  0x20   : > { %p9141_p6 = scmp.ne.s32.totalorder %s9139_s25, 0 }
  0x22   : > { %230 = sbr.rel (%p9141_p6) target bundleno = 994 (0x3e2), region = 40 }
  0x29   : > { %p9142_p8 = scmp.eq.s32.totalorder %s6776_s22, 0 }
  0x2b   : > { %6724 = dma.done.wait (%p9142_p8), [#allocation3], 36864   ;;  %p9143_p7 = pmov %p9142_p8 }
  0x2c   : > { %v8932_v0 = vmov 0   ;;  %v522_v1 = vld [vmem:[#allocation2 + $0x10] sm:$0xff]  ;;  %v520_v2 = vld [vmem:[#allocation2] sm:$0xff]  ;;  %v523_v3 = vld [vmem:[#allocation2 + $0x18] sm:$0xff]  ;;  %p264_p2 = scmp.lt.s32.totalorder %s6776_s22, 1 }
  0x2d   : > { %6726 = vsyncadd (%p9143_p7), [#allocation3], 4294930432  ;;  %6690 = vset.pattern.permute.xlu1 %v8932_v0  ;;  %6689 = vset.pattern.permute.xlu0 %v8932_v0  ;;  %vm554_vm0 = vcmp.ne.f32.partialorder %v522_v1, 0.0  ;;  %vm552_vm1 = vcmp.ne.f32.partialorder %v520_v2, 0.0  ;;  %vm555_vm2 = vcmp.ne.f32.partialorder %v523_v3, 0.0  ;;  %v521_v4 = vld [vmem:[#allocation2 + $0x8] sm:$0xff] }
  0x2e   : > { %v586_v5 = vsel %vm554_vm0, 1, %v8932_v0  ;;  %v584_v6 = vsel %vm552_vm1, 1, %v8932_v0  ;;  %vm553_vm3 = vcmp.ne.f32.partialorder %v521_v4, 0.0  ;;  %v525_v7 = vld [vmem:[#allocation2 + $0x28] sm:$0xff]  ;;  %v524_v8 = vld [vmem:[#allocation2 + $0x20] sm:$0xff]  ;;  %v587_v9 = vsel %vm555_vm2, 1, %v8932_v0 }
  0x2f   : > { %623 = vperm.xlu1 %6690, %v586_v5   ;;  %617 = vperm.xlu0 %6689, %v584_v6   ;;  %v585_v10 = vsel %vm553_vm3, 1, %v8932_v0  ;;  %vm557_vm4 = vcmp.ne.f32.partialorder %v525_v7, 0.0  ;;  %vm556_vm5 = vcmp.ne.f32.partialorder %v524_v8, 0.0  ;;  %v527_v11 = vld [vmem:[#allocation2 + $0x38] sm:$0xff]  ;;  %v526_v12 = vld [vmem:[#allocation2 + $0x30] sm:$0xff]  ;;  %v529_v15 = vld [vmem:[#allocation2 + $0x48] sm:$0xff] }
  0x30   : > { %v589_v13 = vsel %vm557_vm4, 1, %v8932_v0  ;;  %v588_v14 = vsel %vm556_vm5, 1, %v8932_v0  ;;  %vm559_vm6 = vcmp.ne.f32.partialorder %v527_v11, 0.0  ;;  %vm558_vm7 = vcmp.ne.f32.partialorder %v526_v12, 0.0  ;;  %v528_v16 = vld [vmem:[#allocation2 + $0x40] sm:$0xff]  ;;  %v531_v19 = vld [vmem:[#allocation2 + $0x58] sm:$0xff] }
  0x31   : > { %v591_v17 = vsel %vm559_vm6, 1, %v8932_v0  ;;  %v590_v18 = vsel %vm558_vm7, 1, %v8932_v0  ;;  %vm561_vm8 = vcmp.ne.f32.partialorder %v529_v15, 0.0  ;;  %vm560_vm9 = vcmp.ne.f32.partialorder %v528_v16, 0.0  ;;  %v530_v20 = vld [vmem:[#allocation2 + $0x50] sm:$0xff]  ;;  %v533_v23 = vld [vmem:[#allocation2 + $0x68] sm:$0xff] }
  0x32   : > { %v593_v21 = vsel %vm561_vm8, 1, %v8932_v0  ;;  %v592_v22 = vsel %vm560_vm9, 1, %v8932_v0  ;;  %vm563_vm10 = vcmp.ne.f32.partialorder %v531_v19, 0.0  ;;  %vm562_vm11 = vcmp.ne.f32.partialorder %v530_v20, 0.0  ;;  %v532_v24 = vld [vmem:[#allocation2 + $0x60] sm:$0xff]  ;;  %v535_v27 = vld [vmem:[#allocation2 + $0x78] sm:$0xff] }
  0x33   : > { %626 = vperm.xlu1 %6690, %v587_v9   ;;  %620 = vperm.xlu0 %6689, %v585_v10   ;;  %v595_v25 = vsel %vm563_vm10, 1, %v8932_v0  ;;  %v594_v26 = vsel %vm562_vm11, 1, %v8932_v0  ;;  %vm565_vm12 = vcmp.ne.f32.partialorder %v533_v23, 0.0  ;;  %vm564_vm13 = vcmp.ne.f32.partialorder %v532_v24, 0.0  ;;  %v534_v28 = vld [vmem:[#allocation2 + $0x70] sm:$0xff]  ;;  %v537_v31 = vld [vmem:[#allocation2 + $0x88] sm:$0xff] }
  0x34   : > { %v597_v29 = vsel %vm565_vm12, 1, %v8932_v0  ;;  %v596_v30 = vsel %vm564_vm13, 1, %v8932_v0  ;;  %vm567_vm14 = vcmp.ne.f32.partialorder %v535_v27, 0.0  ;;  %vm566_vm15 = vcmp.ne.f32.partialorder %v534_v28, 0.0  ;;  %v536_v32 = vld [vmem:[#allocation2 + $0x80] sm:$0xff]  ;;  %v539_v35 = vld [vmem:[#allocation2 + $0x98] sm:$0xff] }
  0x35   : > { %v599_v33 = vsel %vm567_vm14, 1, %v8932_v0  ;;  %v598_v34 = vsel %vm566_vm15, 1, %v8932_v0  ;;  %vm569_vm0 = vcmp.ne.f32.partialorder %v537_v31, 0.0  ;;  %vm568_vm1 = vcmp.ne.f32.partialorder %v536_v32, 0.0  ;;  %v538_v36 = vld [vmem:[#allocation2 + $0x90] sm:$0xff]  ;;  %v541_v39 = vld [vmem:[#allocation2 + $0xa8] sm:$0xff] }
  0x36   : > { %v601_v37 = vsel %vm569_vm0, 1, %v8932_v0  ;;  %v600_v38 = vsel %vm568_vm1, 1, %v8932_v0  ;;  %vm571_vm2 = vcmp.ne.f32.partialorder %v539_v35, 0.0  ;;  %vm570_vm3 = vcmp.ne.f32.partialorder %v538_v36, 0.0  ;;  %v540_v40 = vld [vmem:[#allocation2 + $0xa0] sm:$0xff]  ;;  %v543_v43 = vld [vmem:[#allocation2 + $0xb8] sm:$0xff] }
  0x37   : > { %632 = vperm.xlu1 %6690, %v589_v13   ;;  %629 = vperm.xlu0 %6689, %v588_v14   ;;  %v603_v41 = vsel %vm571_vm2, 1, %v8932_v0  ;;  %v602_v42 = vsel %vm570_vm3, 1, %v8932_v0  ;;  %vm573_vm4 = vcmp.ne.f32.partialorder %v541_v39, 0.0  ;;  %vm572_vm5 = vcmp.ne.f32.partialorder %v540_v40, 0.0  ;;  %v542_v44 = vld [vmem:[#allocation2 + $0xb0] sm:$0xff]  ;;  %v545_v47 = vld [vmem:[#allocation2 + $0xc8] sm:$0xff] }
  0x38   : > { %v605_v45 = vsel %vm573_vm4, 1, %v8932_v0  ;;  %v604_v46 = vsel %vm572_vm5, 1, %v8932_v0  ;;  %vm575_vm6 = vcmp.ne.f32.partialorder %v543_v43, 0.0  ;;  %vm574_vm7 = vcmp.ne.f32.partialorder %v542_v44, 0.0  ;;  %v544_v48 = vld [vmem:[#allocation2 + $0xc0] sm:$0xff]  ;;  %v547_v51 = vld [vmem:[#allocation2 + $0xd8] sm:$0xff] }
  0x39   : > { %v607_v49 = vsel %vm575_vm6, 1, %v8932_v0  ;;  %v606_v50 = vsel %vm574_vm7, 1, %v8932_v0  ;;  %vm577_vm8 = vcmp.ne.f32.partialorder %v545_v47, 0.0  ;;  %vm576_vm9 = vcmp.ne.f32.partialorder %v544_v48, 0.0  ;;  %v546_v52 = vld [vmem:[#allocation2 + $0xd0] sm:$0xff]  ;;  %v549_v55 = vld [vmem:[#allocation2 + $0xe8] sm:$0xff] }
  0x3a   : > { %v609_v53 = vsel %vm577_vm8, 1, %v8932_v0  ;;  %v608_v54 = vsel %vm576_vm9, 1, %v8932_v0  ;;  %vm579_vm10 = vcmp.ne.f32.partialorder %v547_v51, 0.0  ;;  %vm578_vm11 = vcmp.ne.f32.partialorder %v546_v52, 0.0  ;;  %v548_v56 = vld [vmem:[#allocation2 + $0xe0] sm:$0xff]  ;;  %v551_v59 = vld [vmem:[#allocation2 + $0xf8] sm:$0xff] }
  0x3b   : > { %638 = vperm.xlu1 %6690, %v591_v17   ;;  %635 = vperm.xlu0 %6689, %v590_v18   ;;  %v611_v57 = vsel %vm579_vm10, 1, %v8932_v0  ;;  %v610_v58 = vsel %vm578_vm11, 1, %v8932_v0  ;;  %vm581_vm12 = vcmp.ne.f32.partialorder %v549_v55, 0.0  ;;  %vm580_vm13 = vcmp.ne.f32.partialorder %v548_v56, 0.0  ;;  %v550_v60 = vld [vmem:[#allocation2 + $0xf0] sm:$0xff]  ;;  %v795_v63 = vld [vmem:[#allocation2 + $0x108] sm:$0xff] }
  0x3c   : > { %v613_v61 = vsel %vm581_vm12, 1, %v8932_v0  ;;  %v612_v62 = vsel %vm580_vm13, 1, %v8932_v0  ;;  %vm583_vm14 = vcmp.ne.f32.partialorder %v551_v59, 0.0  ;;  %vm582_vm15 = vcmp.ne.f32.partialorder %v550_v60, 0.0  ;;  %v794_v1 = vld [vmem:[#allocation2 + $0x100] sm:$0xff]  ;;  %v797_v4 = vld [vmem:[#allocation2 + $0x118] sm:$0xff] }
  0x3d   : > { %v615_v2 = vsel %vm583_vm14, 1, %v8932_v0  ;;  %v614_v3 = vsel %vm582_vm15, 1, %v8932_v0  ;;  %vm827_vm0 = vcmp.ne.f32.partialorder %v795_v63, 0.0  ;;  %vm826_vm1 = vcmp.ne.f32.partialorder %v794_v1, 0.0  ;;  %v796_v5 = vld [vmem:[#allocation2 + $0x110] sm:$0xff]  ;;  %v799_v8 = vld [vmem:[#allocation2 + $0x128] sm:$0xff] }
  0x3e   : > { %v859_v6 = vsel %vm827_vm0, 1, %v8932_v0  ;;  %v858_v7 = vsel %vm826_vm1, 1, %v8932_v0  ;;  %vm829_vm2 = vcmp.ne.f32.partialorder %v797_v4, 0.0  ;;  %vm828_vm3 = vcmp.ne.f32.partialorder %v796_v5, 0.0  ;;  %v798_v9 = vld [vmem:[#allocation2 + $0x120] sm:$0xff]  ;;  %v801_v12 = vld [vmem:[#allocation2 + $0x138] sm:$0xff] }
  0x3f   : > { %644 = vperm.xlu1 %6690, %v593_v21   ;;  %641 = vperm.xlu0 %6689, %v592_v22   ;;  %v861_v10 = vsel %vm829_vm2, 1, %v8932_v0  ;;  %v860_v11 = vsel %vm828_vm3, 1, %v8932_v0  ;;  %vm831_vm4 = vcmp.ne.f32.partialorder %v799_v8, 0.0  ;;  %vm830_vm5 = vcmp.ne.f32.partialorder %v798_v9, 0.0  ;;  %v800_v13 = vld [vmem:[#allocation2 + $0x130] sm:$0xff]  ;;  %v803_v16 = vld [vmem:[#allocation2 + $0x148] sm:$0xff] }
  0x40   : > { %v863_v14 = vsel %vm831_vm4, 1, %v8932_v0  ;;  %v862_v15 = vsel %vm830_vm5, 1, %v8932_v0  ;;  %vm833_vm6 = vcmp.ne.f32.partialorder %v801_v12, 0.0  ;;  %vm832_vm7 = vcmp.ne.f32.partialorder %v800_v13, 0.0  ;;  %v802_v17 = vld [vmem:[#allocation2 + $0x140] sm:$0xff]  ;;  %v805_v20 = vld [vmem:[#allocation2 + $0x158] sm:$0xff] }
  0x41   : > { %v865_v18 = vsel %vm833_vm6, 1, %v8932_v0  ;;  %v864_v19 = vsel %vm832_vm7, 1, %v8932_v0  ;;  %vm835_vm8 = vcmp.ne.f32.partialorder %v803_v16, 0.0  ;;  %vm834_vm9 = vcmp.ne.f32.partialorder %v802_v17, 0.0  ;;  %v804_v21 = vld [vmem:[#allocation2 + $0x150] sm:$0xff]  ;;  %v807_v24 = vld [vmem:[#allocation2 + $0x168] sm:$0xff] }
  0x42   : > { %v867_v22 = vsel %vm835_vm8, 1, %v8932_v0  ;;  %v866_v23 = vsel %vm834_vm9, 1, %v8932_v0  ;;  %vm837_vm10 = vcmp.ne.f32.partialorder %v805_v20, 0.0  ;;  %vm836_vm11 = vcmp.ne.f32.partialorder %v804_v21, 0.0  ;;  %v809_v28 = vld [vmem:[#allocation2 + $0x178] sm:$0xff]  ;;  %v811_v32 = vld [vmem:[#allocation2 + $0x188] sm:$0xff] }
  0x43   : > { %650 = vperm.xlu1 %6690, %v595_v25   ;;  %647 = vperm.xlu0 %6689, %v594_v26   ;;  %v806_v25 = vld [vmem:[#allocation2 + $0x160] sm:$0xff]  ;;  %v869_v26 = vsel %vm837_vm10, 1, %v8932_v0  ;;  %v868_v27 = vsel %vm836_vm11, 1, %v8932_v0  ;;  %vm839_vm12 = vcmp.ne.f32.partialorder %v807_v24, 0.0  ;;  %vm841_vm14 = vcmp.ne.f32.partialorder %v809_v28, 0.0  ;;  %v813_v36 = vld [vmem:[#allocation2 + $0x198] sm:$0xff] }
  0x44   : > { %vm838_vm13 = vcmp.ne.f32.partialorder %v806_v25, 0.0  ;;  %vm843_vm0 = vcmp.ne.f32.partialorder %v811_v32, 0.0  ;;  %vm1117_vm2 = vcmask 1041408   ;;  %vm845_vm3 = vcmp.ne.f32.partialorder %v813_v36, 0.0  ;;  %v816_v47 = vld [vmem:[#allocation2 + $0x1b0] sm:$0xff]  ;;  %v818_v51 = vld [vmem:[#allocation2 + $0x1c0] sm:$0xff] }
  0x45   : > { %v870_v31 = vsel %vm838_vm13, 1, %v8932_v0  ;;  %v875_v39 = vsel %vm843_vm0, 1, %v8932_v0  ;;  %v877_v44 = vsel %vm845_vm3, 1, %v8932_v0  ;;  %vm848_vm8 = vcmp.ne.f32.partialorder %v816_v47, 0.0  ;;  %v820_v55 = vld [vmem:[#allocation2 + $0x1d0] sm:$0xff]  ;;  %v822_v59 = vld [vmem:[#allocation2 + $0x1e0] sm:$0xff] }
  0x46   : > { %vm850_vm10 = vcmp.ne.f32.partialorder %v818_v51, 0.0  ;;  %v824_v63 = vld [vmem:[#allocation2 + $0x1f0] sm:$0xff]  ;;  %v1560_v4 = vld [vmem:[#allocation2 + $0x200] sm:$0xff]  ;;  %v1565_v13 = vld [vmem:[#allocation2 + $0x228] sm:$0xff]  ;;  %s9442_s22 = smov (!%p264_p2, %s6776_s22), 1 }
  0x47   : > { %656 = vperm.xlu1 %6690, %v597_v29   ;;  %653 = vperm.xlu0 %6689, %v596_v30   ;;  %v808_v29 = vld [vmem:[#allocation2 + $0x170] sm:$0xff]  ;;  %v871_v30 = vsel %vm839_vm12, 1, %v8932_v0  ;;  %vm852_vm12 = vcmp.ne.f32.partialorder %v820_v55, 0.0  ;;  %vm856_vm0 = vcmp.ne.f32.partialorder %v824_v63, 0.0  ;;  %vm1592_vm3 = vcmp.ne.f32.partialorder %v1560_v4, 0.0  ;;  %v1571_v32 = vld [vmem:[#allocation2 + $0x258] sm:$0xff] }
  0x48   : > { %vm840_vm15 = vcmp.ne.f32.partialorder %v808_v29, 0.0  ;;  %v1562_v8 = vld [vmem:[#allocation2 + $0x210] sm:$0xff]  ;;  %v6901_v21 = vld [vmem:[%s8926_s3] sm:$0x3]  ;;  %s5827_s19 = sshll.u32 %s9442_s22, 7 }
  0x49   : > { %v872_v35 = vsel %vm840_vm15, 1, %v8932_v0  ;;  %v1566_v20 = vld [vmem:[#allocation2 + $0x230] sm:$0xff]  ;;  %v1576_v51 = vld [vmem:[#allocation2 + $0x280] sm:$0xff]  ;;  %s6971_s24 = scalar_lea.vmem %s8923_s0, %s5827_s19 }
  0x4a   : > { %v1580_v63 = vld [vmem:[#allocation2 + $0x2a0] sm:$0xff] }
  0x4b   : > { %662 = vperm.xlu1 %6690, %v599_v33   ;;  %659 = vperm.xlu0 %6689, %v598_v34   ;;  %v810_v33 = vld [vmem:[#allocation2 + $0x180] sm:$0xff]  ;;  %v873_v34 = vsel %vm841_vm14, 1, %v8932_v0  ;;  %vm854_vm14 = vcmp.ne.f32.partialorder %v822_v59, 0.0 }
  0x4c   : > { %vm842_vm1 = vcmp.ne.f32.partialorder %v810_v33, 0.0  ;;  %v1570_v33 = vld [vmem:[#allocation2 + $0x250] sm:$0xff] }
  0x4d   : > { %v874_v40 = vsel %vm842_vm1, 1, %v8932_v0 }
  0x4f   : > { %668 = vperm.xlu1 %6690, %v601_v37   ;;  %665 = vperm.xlu0 %6689, %v600_v38   ;;  %v812_v37 = vld [vmem:[#allocation2 + $0x190] sm:$0xff]  ;;  %v5641_v38 = vld [vmem:[%s8926_s3 + $0x2] sm:$0x3] }
  0x50   : > { %vm844_vm4 = vcmp.ne.f32.partialorder %v812_v37, 0.0  ;;  %6657 = vmatprep.subr.msk.bf16.mxu1 %vm1117_vm2, %v5641_v38  ;;  %v1119_v43 = vsel %vm1117_vm2, %v5641_v38, 0  ;;  %v1573_v38 = vld [vmem:[#allocation2 + $0x268] sm:$0xff] }
  0x51   : > { %6094 = vmatpush3.bf16.msra.mxu1 %v1119_v43 }
  0x52   : > { %6658 = vmatprep.subr.msk.bf16.mxu1 %vm1117_vm2, %v6901_v21 }
  0x53   : > { %674 = vperm.xlu1 %6690, %v603_v41   ;;  %671 = vperm.xlu0 %6689, %v602_v42   ;;  %v815_v41 = vld [vmem:[#allocation2 + $0x1a8] sm:$0xff]  ;;  %v814_v42 = vld [vmem:[#allocation2 + $0x1a0] sm:$0xff] }
  0x54   : > { %vm847_vm5 = vcmp.ne.f32.partialorder %v815_v41, 0.0  ;;  %vm846_vm6 = vcmp.ne.f32.partialorder %v814_v42, 0.0 }
  0x55   : > { %v879_v48 = vsel %vm847_vm5, 1, %v8932_v0  ;;  %vm1594_vm5 = vcmp.ne.f32.partialorder %v1562_v8, 0.0 }
  0x56   : > { %v1626_v16 = vsel %vm1594_vm5, 1, %v8932_v0 }
  0x57   : > { %680 = vperm.xlu1 %6690, %v605_v45   ;;  %677 = vperm.xlu0 %6689, %v604_v46   ;;  %v876_v45 = vsel %vm844_vm4, 1, %v8932_v0  ;;  %v817_v46 = vld [vmem:[#allocation2 + $0x1b8] sm:$0xff] }
  0x58   : > { %vm849_vm7 = vcmp.ne.f32.partialorder %v817_v46, 0.0 }
  0x59   : > { %v881_v52 = vsel %vm849_vm7, 1, %v8932_v0 }
  0x5b   : > { %686 = vperm.xlu1 %6690, %v607_v49   ;;  %683 = vperm.xlu0 %6689, %v606_v50   ;;  %v878_v49 = vsel %vm846_vm6, 1, %v8932_v0  ;;  %v819_v50 = vld [vmem:[#allocation2 + $0x1c8] sm:$0xff]  ;;  %vm1597_vm6 = vcmp.ne.f32.partialorder %v1565_v13, 0.0 }
  0x5c   : > { %vm851_vm9 = vcmp.ne.f32.partialorder %v819_v50, 0.0  ;;  %v1577_v50 = vld [vmem:[#allocation2 + $0x288] sm:$0xff] }
  0x5d   : > { %v883_v56 = vsel %vm851_vm9, 1, %v8932_v0  ;;  %vm1598_vm9 = vcmp.ne.f32.partialorder %v1566_v20, 0.0  ;;  %v1585_v13 = vld [vmem:[#allocation2 + $0x2c8] sm:$0xff] }
  0x5e   : > { %v1630_v29 = vsel %vm1598_vm9, 1, %v8932_v0 }
  0x5f   : > { %692 = vperm.xlu1 %6690, %v609_v53   ;;  %689 = vperm.xlu0 %6689, %v608_v54   ;;  %v880_v53 = vsel %vm848_vm8, 1, %v8932_v0  ;;  %v821_v54 = vld [vmem:[#allocation2 + $0x1d8] sm:$0xff] }
  0x60   : > { %vm853_vm11 = vcmp.ne.f32.partialorder %v821_v54, 0.0 }
  0x61   : > { %v885_v60 = vsel %vm853_vm11, 1, %v8932_v0 }
  0x63   : > { %698 = vperm.xlu1 %6690, %v611_v57   ;;  %695 = vperm.xlu0 %6689, %v610_v58   ;;  %v882_v57 = vsel %vm850_vm10, 1, %v8932_v0  ;;  %v823_v58 = vld [vmem:[#allocation2 + $0x1e8] sm:$0xff] }
  0x64   : > { %vm855_vm13 = vcmp.ne.f32.partialorder %v823_v58, 0.0 }
  0x65   : > { %v887_v1 = vsel %vm855_vm13, 1, %v8932_v0  ;;  %vm1602_vm13 = vcmp.ne.f32.partialorder %v1570_v33, 0.0 }
  0x66   : > { %v1634_v41 = vsel %vm1602_vm13, 1, %v8932_v0 }
  0x67   : > { %704 = vperm.xlu1 %6690, %v613_v61   ;;  %701 = vperm.xlu0 %6689, %v612_v62   ;;  %v884_v61 = vsel %vm852_vm12, 1, %v8932_v0  ;;  %v825_v62 = vld [vmem:[#allocation2 + $0x1f8] sm:$0xff]  ;;  %vm1603_vm12 = vcmp.ne.f32.partialorder %v1571_v32, 0.0  ;;  %v5925_v32 = vld [vmem:[%s6971_s24 + $0x8] sm:$0xff]  }
  0x68   : > { %vm857_vm15 = vcmp.ne.f32.partialorder %v825_v62, 0.0  ;;  %v1581_v62 = vld [vmem:[#allocation2 + $0x2a8] sm:$0xff] }
  0x69   : > { %v889_v5 = vsel %vm857_vm15, 1, %v8932_v0 }
  0x6b   : > { %710 = vperm.xlu1 %6690, %v615_v2   ;;  %707 = vperm.xlu0 %6689, %v614_v3   ;;  %v886_v2 = vsel %vm854_vm14, 1, %v8932_v0  ;;  %v1561_v3 = vld [vmem:[#allocation2 + $0x208] sm:$0xff]  ;;  %vm1605_vm14 = vcmp.ne.f32.partialorder %v1573_v38, 0.0  ;;  %v1588_v38 = vld [vmem:[#allocation2 + $0x2e0] sm:$0xff] }
  0x6c   : > { %vm1593_vm1 = vcmp.ne.f32.partialorder %v1561_v3, 0.0  ;;  %v1637_v46 = vsel %vm1605_vm14, 1, %v8932_v0 }
  0x6d   : > { %v1625_v9 = vsel %vm1593_vm1, 1, %v8932_v0 }
  0x6f   : > { %894 = vperm.xlu1 %6690, %v859_v6   ;;  %891 = vperm.xlu0 %6689, %v858_v7   ;;  %v888_v6 = vsel %vm856_vm0, 1, %v8932_v0  ;;  %v1563_v7 = vld [vmem:[#allocation2 + $0x218] sm:$0xff] }
  0x70   : > { %vm1595_vm4 = vcmp.ne.f32.partialorder %v1563_v7, 0.0 }
  0x73   : > { %900 = vperm.xlu1 %6690, %v861_v10   ;;  %897 = vperm.xlu0 %6689, %v860_v11   ;;  %v1624_v10 = vsel %vm1592_vm3, 1, %v8932_v0  ;;  %vm1609_vm3 = vcmp.ne.f32.partialorder %v1577_v50, 0.0 }
  0x74   : > { %v1641_v58 = vsel %vm1609_vm3, 1, %v8932_v0 }
  0x77   : > { %906 = vperm.xlu1 %6690, %v863_v14   ;;  %903 = vperm.xlu0 %6689, %v862_v15   ;;  %v1564_v14 = vld [vmem:[#allocation2 + $0x220] sm:$0xff]  ;;  %v1627_v15 = vsel %vm1595_vm4, 1, %v8932_v0  ;;  %vm1608_vm4 = vcmp.ne.f32.partialorder %v1576_v51, 0.0  ;;  %v5867_v51 = vunpack.c.l.bf16 %v5925_v32 }
  0x78   : > { %vm1596_vm7 = vcmp.ne.f32.partialorder %v1564_v14, 0.0  ;;  %v1640_v59 = vsel %vm1608_vm4, 1, %v8932_v0  ;;  %v1584_v14 = vld [vmem:[#allocation2 + $0x2c0] sm:$0xff] }
  0x7b   : > { %912 = vperm.xlu1 %6690, %v865_v18   ;;  %909 = vperm.xlu0 %6689, %v864_v19   ;;  %v1567_v19 = vld [vmem:[#allocation2 + $0x238] sm:$0xff] }
  0x7c   : > { %vm1599_vm8 = vcmp.ne.f32.partialorder %v1567_v19, 0.0 }
  0x7d   : > { %v1631_v28 = vsel %vm1599_vm8, 1, %v8932_v0  ;;  %vm1612_vm8 = vcmp.ne.f32.partialorder %v1580_v63, 0.0 }
  0x7e   : > { %v1644_v8 = vsel %vm1612_vm8, 1, %v8932_v0 }
  0x7f   : > { %918 = vperm.xlu1 %6690, %v867_v22   ;;  %915 = vperm.xlu0 %6689, %v866_v23   ;;  %v1629_v22 = vsel %vm1597_vm6, 1, %v8932_v0  ;;  %v1628_v23 = vsel %vm1596_vm7, 1, %v8932_v0  ;;  %vm1613_vm7 = vcmp.ne.f32.partialorder %v1581_v62, 0.0 }
  0x80   : > { %v1645_v7 = vsel %vm1613_vm7, 1, %v8932_v0 }
  0x83   : > { %924 = vperm.xlu1 %6690, %v869_v26   ;;  %921 = vperm.xlu0 %6689, %v868_v27   ;;  %v1569_v26 = vld [vmem:[#allocation2 + $0x248] sm:$0xff]  ;;  %v1568_v27 = vld [vmem:[#allocation2 + $0x240] sm:$0xff] }
  0x84   : > { %vm1601_vm10 = vcmp.ne.f32.partialorder %v1569_v26, 0.0  ;;  %vm1600_vm11 = vcmp.ne.f32.partialorder %v1568_v27, 0.0  ;;  %v5862_v26 = vld [vmem:[%s6971_s24] sm:$0xff]   ;;  %v5939_v27 = vld [vmem:[%s6971_s24 + $0x78] sm:$0xff]  }
  0x87   : > { %930 = vperm.xlu1 %6690, %v871_v30   ;;  %927 = vperm.xlu0 %6689, %v870_v31  }
  0x8b   : > { %936 = vperm.xlu1 %6690, %v873_v34   ;;  %933 = vperm.xlu0 %6689, %v872_v35   ;;  %v1633_v34 = vsel %vm1601_vm10, 1, %v8932_v0  ;;  %v1632_v35 = vsel %vm1600_vm11, 1, %v8932_v0  ;;  %vm1617_vm11 = vcmp.ne.f32.partialorder %v1585_v13, 0.0 }
  0x8f   : > { %942 = vperm.xlu1 %6690, %v875_v39   ;;  %939 = vperm.xlu0 %6689, %v874_v40   ;;  %v1572_v39 = vld [vmem:[#allocation2 + $0x260] sm:$0xff]  ;;  %v1635_v40 = vsel %vm1603_vm12, 1, %v8932_v0  ;;  %vm1616_vm12 = vcmp.ne.f32.partialorder %v1584_v14, 0.0 }
  0x90   : > { %vm1604_vm15 = vcmp.ne.f32.partialorder %v1572_v39, 0.0  ;;  %v5863_v39 = vunpack.c.l.bf16 %v5862_v26 }
  0x91   : > { %v1636_v47 = vsel %vm1604_vm15, 1, %v8932_v0 }
  0x93   : > { %948 = vperm.xlu1 %6690, %v877_v44   ;;  %945 = vperm.xlu0 %6689, %v876_v45   ;;  %v1575_v44 = vld [vmem:[#allocation2 + $0x278] sm:$0xff]  ;;  %v1574_v45 = vld [vmem:[#allocation2 + $0x270] sm:$0xff] }
  0x94   : > { %vm1607_vm0 = vcmp.ne.f32.partialorder %v1575_v44, 0.0  ;;  %vm1606_vm1 = vcmp.ne.f32.partialorder %v1574_v45, 0.0  ;;  %v6992_v44 = vld [vmem:[%s6971_s24 + $0x70] sm:$0xff]   ;;  %v5923_v45 = vunpack.c.l.bf16 %v5939_v27 }
  0x95   : > { %v5920_v63 = vunpack.c.h.bf16 %v6992_v44 }
  0x97   : > { %954 = vperm.xlu1 %6690, %v879_v48   ;;  %951 = vperm.xlu0 %6689, %v878_v49  }
  0x9b   : > { %960 = vperm.xlu1 %6690, %v881_v52   ;;  %957 = vperm.xlu0 %6689, %v880_v53   ;;  %v1639_v52 = vsel %vm1607_vm0, 1, %v8932_v0  ;;  %v1638_v53 = vsel %vm1606_vm1, 1, %v8932_v0  ;;  %vm1620_vm0 = vcmp.ne.f32.partialorder %v1588_v38, 0.0 }
  0x9f   : > { %966 = vperm.xlu1 %6690, %v883_v56   ;;  %963 = vperm.xlu0 %6689, %v882_v57   ;;  %v1579_v56 = vld [vmem:[#allocation2 + $0x298] sm:$0xff]  ;;  %v1578_v57 = vld [vmem:[#allocation2 + $0x290] sm:$0xff] }
  0xa0   : > { %vm1611_vm5 = vcmp.ne.f32.partialorder %v1579_v56, 0.0  ;;  %vm1610_vm6 = vcmp.ne.f32.partialorder %v1578_v57, 0.0  ;;  %v1591_v57 = vld [vmem:[#allocation2 + $0x2f8] sm:$0xff] }
  0xa1   : > { %vm1623_vm1 = vcmp.ne.f32.partialorder %v1591_v57, 0.0  ;;  %v2082_v57 = vld [vmem:[#allocation2 + $0x318] sm:$0xff] }
  0xa3   : > { %972 = vperm.xlu1 %6690, %v885_v60   ;;  %969 = vperm.xlu0 %6689, %v884_v61  }
  0xa7   : > { %978 = vperm.xlu1 %6690, %v887_v1   ;;  %975 = vperm.xlu0 %6689, %v886_v2   ;;  %v1643_v1 = vsel %vm1611_vm5, 1, %v8932_v0  ;;  %v1642_v2 = vsel %vm1610_vm6, 1, %v8932_v0  ;;  %vm2114_vm6 = vcmp.ne.f32.partialorder %v2082_v57, 0.0 }
  0xab   : > { %984 = vperm.xlu1 %6690, %v889_v5   ;;  %981 = vperm.xlu0 %6689, %v888_v6   ;;  %v1583_v5 = vld [vmem:[#allocation2 + $0x2b8] sm:$0xff]  ;;  %v1582_v6 = vld [vmem:[#allocation2 + $0x2b0] sm:$0xff] }
  0xac   : > { %vm1615_vm9 = vcmp.ne.f32.partialorder %v1583_v5, 0.0  ;;  %vm1614_vm10 = vcmp.ne.f32.partialorder %v1582_v6, 0.0 }
  0xae   : > { %v6888_v11 = vpop.permute.xlu1 %623  ;;  %v6890_v12 = vpop.permute.xlu0 %617 }
  0xaf   : > { %1660 = vperm.xlu1 %6690, %v1625_v9   ;;  %1657 = vperm.xlu0 %6689, %v1624_v10  }
  0xb2   : > { %v6894_v17 = vpop.permute.xlu1 %626  ;;  %v6896_v18 = vpop.permute.xlu0 %620 }
  0xb3   : > { %1666 = vperm.xlu1 %6690, %v1627_v15   ;;  %1663 = vperm.xlu0 %6689, %v1626_v16   ;;  %v1647_v15 = vsel %vm1615_vm9, 1, %v8932_v0  ;;  %v1646_v16 = vsel %vm1614_vm10, 1, %v8932_v0  ;;  %vm1068_vm10 = vcmask 31744  }
  0xb6   : > { %v6907_v24 = vpop.permute.xlu1 %632  ;;  %v6909_v25 = vpop.permute.xlu0 %629 }
  0xb7   : > { %1672 = vperm.xlu1 %6690, %v1629_v22   ;;  %1669 = vperm.xlu0 %6689, %v1628_v23   ;;  %v1587_v22 = vld [vmem:[#allocation2 + $0x2d8] sm:$0xff]  ;;  %v1586_v23 = vld [vmem:[#allocation2 + $0x2d0] sm:$0xff] }
  0xb8   : > { %vm1619_vm13 = vcmp.ne.f32.partialorder %v1587_v22, 0.0  ;;  %vm1618_vm14 = vcmp.ne.f32.partialorder %v1586_v23, 0.0 }
  0xb9   : > { %v1650_v50 = vsel %vm1618_vm14, 1, %v8932_v0 }
  0xba   : > { %v6913_v30 = vpop.permute.xlu1 %638  ;;  %v6915_v31 = vpop.permute.xlu0 %635 }
  0xbb   : > { %1678 = vperm.xlu1 %6690, %v1631_v28   ;;  %1675 = vperm.xlu0 %6689, %v1630_v29   ;;  %v1649_v28 = vsel %vm1617_vm11, 1, %v8932_v0  ;;  %v1648_v29 = vsel %vm1616_vm12, 1, %v8932_v0 }
  0xbe   : > { %v6919_v36 = vpop.permute.xlu1 %644  ;;  %v6921_v37 = vpop.permute.xlu0 %641 }
  0xbf   : > { %1684 = vperm.xlu1 %6690, %v1633_v34   ;;  %1681 = vperm.xlu0 %6689, %v1632_v35   ;;  %v1589_v35 = vld [vmem:[#allocation2 + $0x2e8] sm:$0xff] }
  0xc0   : > { %vm1621_vm15 = vcmp.ne.f32.partialorder %v1589_v35, 0.0  ;;  %v5927_v35 = vld [vmem:[%s6971_s24 + $0x18] sm:$0xff]  }
  0xc2   : > { %v6925_v42 = vpop.permute.xlu1 %650  ;;  %v6927_v43 = vpop.permute.xlu0 %647 }
  0xc3   : > { %1690 = vperm.xlu1 %6690, %v1635_v40   ;;  %1687 = vperm.xlu0 %6689, %v1634_v41   ;;  %v5924_v40 = vunpack.c.h.bf16 %v5939_v27  ;;  %v6989_v41 = vld [vmem:[%s8924_s1] ss:$0 sm:$0xff] }
  0xc4   : > { %v380_v5 = vmul.f32 %v5923_v45, %v6989_v41  ;;  %v352_v13 = vmul.f32 %v5867_v51, %v6989_v41  ;;  %v2079_v27 = vld [vmem:[#allocation2 + $0x300] sm:$0xff] }
  0xc5   : > { %v381_v62 = vmul.f32 %v5924_v40, %v6989_v41  ;;  %v1655_v40 = vsel %vm1623_vm1, 1, %v8932_v0  ;;  %vm2111_vm5 = vcmp.ne.f32.partialorder %v2079_v27, 0.0 }
  0xc6   : > { %v6931_v48 = vpop.permute.xlu1 %656  ;;  %v6933_v49 = vpop.permute.xlu0 %653 }
  0xc7   : > { %1696 = vperm.xlu1 %6690, %v1637_v46   ;;  %1693 = vperm.xlu0 %6689, %v1636_v47   ;;  %v5864_v46 = vunpack.c.h.bf16 %v5862_v26  ;;  %v1651_v47 = vsel %vm1619_vm13, 1, %v8932_v0  ;;  %v2080_v26 = vld [vmem:[#allocation2 + $0x308] sm:$0xff] }
  0xc8   : > { %vm2112_vm4 = vcmp.ne.f32.partialorder %v2080_v26, 0.0 }
  0xc9   : > { %v351_v6 = vmul.f32 %v5864_v46, %v6989_v41 }
  0xca   : > { %v6937_v54 = vpop.permute.xlu1 %662  ;;  %v6939_v55 = vpop.permute.xlu0 %659 }
  0xcb   : > { %9144 = vst [vmem:[#allocation5_spill] sm:$0xff] %v6937_v54  ;;  %9145 = vst [vmem:[#allocation6_spill] sm:$0xff] %v6939_v55  ;;  %1702 = vperm.xlu1 %6690, %v1639_v52   ;;  %1699 = vperm.xlu0 %6689, %v1638_v53   ;;  %v5868_v52 = vunpack.c.h.bf16 %v5925_v32  ;;  %v379_v32 = vmul.f32 %v5920_v63, %v6989_v41  ;;  %v2081_v63 = vld [vmem:[#allocation2 + $0x310] sm:$0xff] }
  0xcc   : > { %vm2113_vm7 = vcmp.ne.f32.partialorder %v2081_v63, 0.0  ;;  %v2086_v63 = vld [vmem:[#allocation2 + $0x338] sm:$0xff] }
  0xcd   : > { %v353_v14 = vmul.f32 %v5868_v52, %v6989_v41  ;;  %v5875_v52 = vunpack.c.l.bf16 %v5927_v35 }
  0xce   : > { %v6944_v60 = vpop.permute.xlu1 %668  ;;  %v6946_v61 = vpop.permute.xlu0 %665 }
  0xcf   : > { %9146 = vst [vmem:[#allocation7_spill] sm:$0xff] %v6944_v60  ;;  %9147 = vst [vmem:[#allocation8_spill] sm:$0xff] %v6946_v61  ;;  %1708 = vperm.xlu1 %6690, %v1641_v58   ;;  %1705 = vperm.xlu0 %6689, %v1640_v59   ;;  %v1590_v58 = vld [vmem:[#allocation2 + $0x2f0] sm:$0xff]  ;;  %v350_v59 = vmul.f32 %v5863_v39, %v6989_v41  ;;  %v2099_v60 = vld [vmem:[#allocation2 + $0x3a0] sm:$0xff] }
  0xd0   : > { %vm1622_vm3 = vcmp.ne.f32.partialorder %v1590_v58, 0.0  ;;  %v2083_v58 = vld [vmem:[#allocation2 + $0x320] sm:$0xff] }
  0xd1   : > { %v1654_v45 = vsel %vm1622_vm3, 1, %v8932_v0  ;;  %vm2115_vm12 = vcmp.ne.f32.partialorder %v2083_v58, 0.0 }
  0xd2   : > { %v6953_v3 = vpop.permute.xlu1 %674  ;;  %v6955_v4 = vpop.permute.xlu0 %671 }
  0xd3   : > { %9148 = vst [vmem:[#allocation9_spill] sm:$0xff] %v6953_v3  ;;  %9149 = vst [vmem:[#allocation10_spill] sm:$0xff] %v6955_v4  ;;  %1714 = vperm.xlu1 %6690, %v1643_v1   ;;  %1711 = vperm.xlu0 %6689, %v1642_v2   ;;  %v5926_v1 = vld [vmem:[%s6971_s24 + $0x10] sm:$0xff]   ;;  %v7007_v2 = vld [vmem:[%s8925_s2] ss:$0 sm:$0xff] }
  0xd4   : > { %v419_v38 = vadd.f32 %v7007_v2, %v380_v5  ;;  %v390_v39 = vadd.f32 %v7007_v2, %v351_v6  ;;  %v391_v46 = vadd.f32 %v7007_v2, %v352_v13  ;;  %v7042_v6 = vadd.f32 %v7007_v2, %v379_v32  ;;  %v5928_v13 = vld [vmem:[%s6971_s24 + $0x20] sm:$0xff]   ;;  %v2097_v3 = vld [vmem:[#allocation2 + $0x390] sm:$0xff] }
  0xd5   : > { %v5879_v27 = vunpack.c.l.bf16 %v5928_v13 }
  0xd6   : > { %v6960_v9 = vpop.permute.xlu1 %680  ;;  %v6962_v10 = vpop.permute.xlu0 %677 }
  0xd7   : > { %9150 = vst [vmem:[#allocation11_spill] sm:$0xff] %v6960_v9  ;;  %9151 = vst [vmem:[#allocation12_spill] sm:$0xff] %v6962_v10  ;;  %1720 = vperm.xlu1 %6690, %v1645_v7   ;;  %1717 = vperm.xlu0 %6689, %v1644_v8   ;;  %v1653_v7 = vsel %vm1621_vm15, 1, %v8932_v0  ;;  %v1652_v8 = vsel %vm1620_vm0, 1, %v8932_v0  ;;  %vm2118_vm15 = vcmp.ne.f32.partialorder %v2086_v63, 0.0  ;;  %v2090_v63 = vld [vmem:[#allocation2 + $0x358] sm:$0xff] }
  0xd8   : > { %v7141_v9 = vld [vmem:[%s6971_s24 + $0x48] sm:$0xff]  }
  0xda   : > { %v6973_v19 = vpop.permute.xlu1 %686  ;;  %v6975_v20 = vpop.permute.xlu0 %683 }
  0xdb   : > { %9152 = vst [vmem:[#allocation13_spill] sm:$0xff] %v6973_v19  ;;  %9153 = vst [vmem:[#allocation14_spill] sm:$0xff] %v6975_v20  ;;  %1726 = vperm.xlu1 %6690, %v1647_v15   ;;  %1723 = vperm.xlu0 %6689, %v1646_v16   ;;  %v5871_v15 = vunpack.c.l.bf16 %v5926_v1  ;;  %v5872_v16 = vunpack.c.h.bf16 %v5926_v1  ;;  %v2091_v20 = vld [vmem:[#allocation2 + $0x360] sm:$0xff] }
  0xdd   : > { %v355_v51 = vmul.f32 %v5872_v16, %v6989_v41  ;;  %v7053_v16 = vmax.f32 %v391_v46, 0.0  ;;  %v5929_v46 = vld [vmem:[%s6971_s24 + $0x28] sm:$0xff]  }
  0xde   : > { %v6982_v33 = vpop.permute.xlu1 %692  ;;  %v6984_v34 = vpop.permute.xlu0 %689 }
  0xdf   : > { %9154 = vst [vmem:[#allocation15_spill] sm:$0xff] %v6982_v33  ;;  %9155 = vst [vmem:[#allocation16_spill] sm:$0xff] %v6984_v34  ;;  %1732 = vperm.xlu1 %6690, %v1649_v28   ;;  %1729 = vperm.xlu0 %6689, %v1648_v29   ;;  %v389_v28 = vadd.f32 %v7007_v2, %v350_v59  ;;  %v420_v29 = vadd.f32 %v7007_v2, %v381_v62  ;;  %v2089_v34 = vld [vmem:[#allocation2 + $0x350] sm:$0xff] }
  0xe0   : > { %9166 = vst [vmem:[#allocation27_spill] sm:$0xff] %v7053_v16  ;;  %v394_v32 = vadd.f32 %v7007_v2, %v355_v51 }
  0xe1   : > { %v7037_v1 = vmax.f32 %v389_v28, 0.0  ;;  %v7039_v5 = vmax.f32 %v420_v29, 0.0 }
  0xe2   : > { %v6996_v53 = vpop.permute.xlu1 %698  ;;  %v6998_v56 = vpop.permute.xlu0 %695 }
  0xe3   : > { %9156 = vst [vmem:[#allocation17_spill] sm:$0xff] %v6996_v53  ;;  %9157 = vst [vmem:[#allocation18_spill] sm:$0xff] %v6998_v56  ;;  %1738 = vperm.xlu1 %6690, %v1651_v47   ;;  %1735 = vperm.xlu0 %6689, %v1650_v50   ;;  %v392_v47 = vadd.f32 %v7007_v2, %v353_v14  ;;  %v354_v50 = vmul.f32 %v5871_v15, %v6989_v41  ;;  %v2144_v14 = vsel %vm2112_vm4, 1, %v8932_v0  ;;  %v2087_v56 = vld [vmem:[#allocation2 + $0x340] sm:$0xff] }
  0xe4   : > { %9162 = vst [vmem:[#allocation23_spill] sm:$0xff] %v7037_v1  ;;  %9163 = vst [vmem:[#allocation24_spill] sm:$0xff] %v7039_v5  ;;  %v2143_v15 = vsel %vm2111_vm5, 1, %v8932_v0  ;;  %v5880_v0 = vunpack.c.h.bf16 %v5928_v13  ;;  %vm2119_vm5 = vcmp.ne.f32.partialorder %v2087_v56, 0.0 }
  0xe5   : > { %v7055_v28 = vmax.f32 %v392_v47, 0.0  ;;  %v393_v29 = vadd.f32 %v7007_v2, %v354_v50  ;;  %v9168_v47 = vmov 0  }
  0xe6   : > { %v7015_v22 = vpop.permute.xlu1 %704  ;;  %v7017_v23 = vpop.permute.xlu0 %701  ;;  %v2145_v50 = vsel %vm2113_vm7, 1, %v9168_v47 }
  0xe7   : > { %9158 = vst [vmem:[#allocation19_spill] sm:$0xff] %v7015_v22  ;;  %9159 = vst [vmem:[#allocation20_spill] sm:$0xff] %v7017_v23  ;;  %1744 = vperm.xlu1 %6690, %v1653_v7   ;;  %1741 = vperm.xlu0 %6689, %v1652_v8   ;;  %v7044_v7 = vmax.f32 %v419_v38, 0.0  ;;  %v7046_v8 = vmax.f32 %v390_v39, 0.0  ;;  %v5876_v38 = vunpack.c.h.bf16 %v5927_v35  ;;  %v356_v39 = vmul.f32 %v5875_v52, %v6989_v41 }
  0xe8   : > { %9167 = vst [vmem:[#allocation28_spill] sm:$0xff] %v7055_v28  ;;  %v7067_v13 = vmax.f32 %v393_v29, 0.0  ;;  %v358_v23 = vmul.f32 %v5879_v27, %v6989_v41  ;;  %v5883_v22 = vunpack.c.l.bf16 %v5929_v46  ;;  %v359_v27 = vmul.f32 %v5880_v0, %v6989_v41  ;;  %v5930_v0 = vld [vmem:[%s6971_s24 + $0x30] sm:$0xff]  }
  0xe9   : > { %9164 = vst [vmem:[#allocation25_spill] sm:$0xff] %v7044_v7  ;;  %9165 = vst [vmem:[#allocation26_spill] sm:$0xff] %v7046_v8  ;;  %v395_v57 = vadd.f32 %v7007_v2, %v356_v39  ;;  %v2147_v39 = vsel %vm2115_vm12, 1, %v9168_v47 }
  0xea   : > { %v7033_v59 = vpop.permute.xlu1 %710  ;;  %v7035_v62 = vpop.permute.xlu0 %707  ;;  %9169 = vst [vmem:[#allocation29_spill] sm:$0xff] %v7067_v13  ;;  %v397_v58 = vadd.f32 %v7007_v2, %v358_v23  ;;  %v360_v53 = vmul.f32 %v5883_v22, %v6989_v41  ;;  %v398_v23 = vadd.f32 %v7007_v2, %v359_v27 }
  0xeb   : > { %9160 = vst [vmem:[#allocation21_spill] sm:$0xff] %v7033_v59  ;;  %9161 = vst [vmem:[#allocation22_spill] sm:$0xff] %v7035_v62  ;;  %1750 = vperm.xlu1 %6690, %v1655_v40   ;;  %1747 = vperm.xlu0 %6689, %v1654_v45   ;;  %v2084_v45 = vld [vmem:[#allocation2 + $0x328] sm:$0xff]  ;;  %v2146_v62 = vsel %vm2114_vm6, 1, %v9168_v47  ;;  %v2085_v59 = vld [vmem:[#allocation2 + $0x330] sm:$0xff] }
  0xec   : > { %vm2116_vm11 = vcmp.ne.f32.partialorder %v2084_v45, 0.0  ;;  %vm2117_vm0 = vcmp.ne.f32.partialorder %v2085_v59, 0.0  ;;  %v1331_v45 = vsel %vm1117_vm2, %v6901_v21, 0  ;;  %v2150_v21 = vsel %vm2118_vm15, 1, %v9168_v47 }
  0xed   : > { %v2149_v22 = vsel %vm2117_vm0, 1, %v9168_v47  ;;  %v7108_v59 = vmax.f32 %v397_v58, 0.0  ;;  %v399_v27 = vadd.f32 %v7007_v2, %v360_v53  ;;  %v2151_v58 = vsel %vm2119_vm5, 1, %v9168_v47 }
  0xee   : > { %v895_v40 = vpop.permute.xlu1 %894  ;;  %v892_v26 = vpop.permute.xlu0 %891 }
  0xef   : > { %vm987_vm8 = vcmp.eq.s32.totalorder %v895_v40, 1  ;;  %vm986_vm9 = vcmp.eq.s32.totalorder %v892_v26, 1  ;;  %2179 = vperm.xlu1 %6690, %v2144_v14   ;;  %2176 = vperm.xlu0 %6689, %v2143_v15   ;;  %v7069_v40 = vmax.f32 %v394_v32, 0.0  ;;  %v357_v14 = vmul.f32 %v5876_v38, %v6989_v41  ;;  %9173 = vst [vmem:[#allocation33_spill] sm:$0xff] %v7108_v59 }
  0xf0   : > { %v1018_v35 = vsel %vm986_vm9, %v7044_v7, 0.0  ;;  %v1019_v51 = vsel %vm987_vm8, %v7039_v5, 0.0  ;;  %v2148_v38 = vsel %vm2116_vm11, 1, %v9168_v47  ;;  %vm2122_vm8 = vcmp.ne.f32.partialorder %v2090_v63, 0.0  ;;  %v2094_v63 = vld [vmem:[#allocation2 + $0x378] sm:$0xff] }
  0xf1   : > { %v1050_v52 = vpack.c.bf16 %v1019_v51, %v1018_v35  ;;  %9170 = vst [vmem:[#allocation30_spill] sm:$0xff] %v7069_v40  ;;  %v5884_v51 = vunpack.c.h.bf16 %v5929_v46  ;;  %v7093_v46 = vld [vmem:[%s8926_s3 + $0x4] sm:$0x3]  ;;  %vm2121_vm9 = vcmp.ne.f32.partialorder %v2089_v34, 0.0  ;;  %v7125_v19 = vmax.f32 %v399_v27, 0.0 }
  0xf2   : > { %v901_v15 = vpop.permute.xlu1 %900  ;;  %v898_v26 = vpop.permute.xlu0 %897 }
  0xf3   : > { %vm989_vm13 = vcmp.eq.s32.totalorder %v901_v15, 1  ;;  %vm988_vm14 = vcmp.eq.s32.totalorder %v898_v26, 1  ;;  %2185 = vperm.xlu1 %6690, %v2146_v62   ;;  %2182 = vperm.xlu0 %6689, %v2145_v50   ;;  %v396_v62 = vadd.f32 %v7007_v2, %v357_v14  ;;  %v7083_v50 = vmax.f32 %v395_v57, 0.0  ;;  %9175 = vst [vmem:[#allocation35_spill] sm:$0xff] %v7125_v19 }
  0xf4   : > { %v1021_v29 = vsel %vm989_vm13, %v7046_v8, 0.0  ;;  %v1020_v32 = vsel %vm988_vm14, %v7037_v1, 0.0  ;;  %6095 = vmatprep.mubr.msk.bf16.mxu1 %vm1068_vm10, %v1050_v52  ;;  %v2088_v52 = vld [vmem:[#allocation2 + $0x348] sm:$0xff]  ;;  %vm2123_vm14 = vcmp.ne.f32.partialorder %v2091_v20, 0.0 }
  0xf5   : > { %v1051_v35 = vpack.c.bf16 %v1021_v29, %v1020_v32  ;;  %9171 = vst [vmem:[#allocation31_spill] sm:$0xff] %v7083_v50  ;;  %vm2120_vm4 = vcmp.ne.f32.partialorder %v2088_v52, 0.0  ;;  %v7103_v32 = vmax.f32 %v396_v62, 0.0  ;;  %v2092_v52 = vld [vmem:[#allocation2 + $0x368] sm:$0xff] }
  0xf6   : > { %v907_v15 = vpop.permute.xlu1 %906  ;;  %v904_v26 = vpop.permute.xlu0 %903  ;;  %vm2124_vm13 = vcmp.ne.f32.partialorder %v2092_v52, 0.0 }
  0xf7   : > { %vm991_vm1 = vcmp.eq.s32.totalorder %v907_v15, 1  ;;  %vm990_vm3 = vcmp.eq.s32.totalorder %v904_v26, 1  ;;  %2191 = vperm.xlu1 %6690, %v2148_v38   ;;  %2188 = vperm.xlu0 %6689, %v2147_v39   ;;  %9172 = vst [vmem:[#allocation32_spill] sm:$0xff] %v7103_v32  ;;  %v361_v38 = vmul.f32 %v5884_v51, %v6989_v41  ;;  %v5887_v39 = vunpack.c.l.bf16 %v5930_v0 }
  0xf8   : > { %v1023_v14 = vsel %vm991_vm1, %v7055_v28, 0.0  ;;  %v1022_v57 = vsel %vm990_vm3, %v7053_v16, 0.0  ;;  %6096 = vmatmul.mubr.msk.bf16.vlgmr.msra.gmra.mrb[0].mxu1 %vm1068_vm10, %v1051_v35  ;;  %v5888_v15 = vunpack.c.h.bf16 %v5930_v0  ;;  %v7119_v0 = vmax.f32 %v398_v23, 0.0 }
  0xf9   : > { %v1052_v29 = vpack.c.bf16 %v1023_v14, %v1022_v57  ;;  %6128 = vmatpush3.bf16.msra.mxu1 %v1331_v45  ;;  %v5931_v14 = vld [vmem:[%s6971_s24 + $0x38] sm:$0xff]   ;;  %v2152_v45 = vsel %vm2120_vm4, 1, %v9168_v47  ;;  %v400_v57 = vadd.f32 %v7007_v2, %v361_v38  ;;  %vm2126_vm1 = vcmp.ne.f32.partialorder %v2094_v63, 0.0 }
  0xfa   : > { %v913_v35 = vpop.permute.xlu1 %912  ;;  %v910_v26 = vpop.permute.xlu0 %909  ;;  %6659 = vmatprep.subr.msk.bf16.mxu1 %vm1117_vm2, %v7093_v46  ;;  %9174 = vst [vmem:[#allocation34_spill] sm:$0xff] %v7119_v0  ;;  %v5892_v56 = vunpack.c.h.bf16 %v5931_v14 }
  0xfb   : > { %vm993_vm6 = vcmp.eq.s32.totalorder %v913_v35, 1  ;;  %vm992_vm7 = vcmp.eq.s32.totalorder %v910_v26, 1  ;;  %2197 = vperm.xlu1 %6690, %v2150_v21   ;;  %2194 = vperm.xlu0 %6689, %v2149_v22   ;;  %v362_v21 = vmul.f32 %v5887_v39, %v6989_v41  ;;  %v363_v22 = vmul.f32 %v5888_v15, %v6989_v41  ;;  %v5932_v26 = vld [vmem:[%s6971_s24 + $0x40] sm:$0xff]  }
  0xfc   : > { %v1025_v62 = vsel %vm993_vm6, %v7069_v40, 0.0  ;;  %v1024_v51 = vsel %vm992_vm7, %v7067_v13, 0.0  ;;  %6099 = vmatprep.mubr.msk.bf16.mxu1 %vm1068_vm10, %v1052_v29  ;;  %v5891_v35 = vunpack.c.l.bf16 %v5931_v14  ;;  %v2154_v39 = vsel %vm2122_vm8, 1, %v9168_v47 }
  0xfd   : > { %v1053_v53 = vpack.c.bf16 %v1025_v62, %v1024_v51  ;;  %v2153_v15 = vsel %vm2121_vm9, 1, %v9168_v47  ;;  %v5895_v27 = vunpack.c.l.bf16 %v5932_v26  ;;  %v401_v14 = vadd.f32 %v7007_v2, %v362_v21 }
  0xfe   : > { %v919_v29 = vpop.permute.xlu1 %918  ;;  %v916_v33 = vpop.permute.xlu0 %915  ;;  %v402_v51 = vadd.f32 %v7007_v2, %v363_v22  ;;  %v365_v34 = vmul.f32 %v5892_v56, %v6989_v41  ;;  %v5896_v10 = vunpack.c.h.bf16 %v5932_v26  ;;  %v2156_v22 = vsel %vm2124_vm13, 1, %v9168_v47 }
  0xff   : > { %vm995_vm11 = vcmp.eq.s32.totalorder %v919_v29, 1  ;;  %vm994_vm12 = vcmp.eq.s32.totalorder %v916_v33, 1  ;;  %2203 = vperm.xlu1 %6690, %v2152_v45   ;;  %2200 = vperm.xlu0 %6689, %v2151_v58   ;;  %v7134_v33 = vmax.f32 %v400_v57, 0.0  ;;  %v364_v45 = vmul.f32 %v5891_v35, %v6989_v41  ;;  %v2093_v29 = vld [vmem:[#allocation2 + $0x370] sm:$0xff] }
 0x100   : > { %v1027_v23 = vsel %vm995_vm11, %v7103_v32, 0.0  ;;  %v1026_v38 = vsel %vm994_vm12, %v7083_v50, 0.0  ;;  %6100 = vmatmul.mubr.msk.bf16.gmra.mrb[4].mxu1 %vm1068_vm10, %v1053_v53  ;;  %v2155_v35 = vsel %vm2123_vm14, 1, %v9168_v47  ;;  %v366_v26 = vmul.f32 %v5895_v27, %v6989_v41  ;;  %v7160_v27 = vld [vmem:[%s6971_s24 + $0x50] sm:$0xff]  }
 0x101   : > { %v1054_v62 = vpack.c.bf16 %v1027_v23, %v1026_v38  ;;  %9176 = vst [vmem:[#allocation36_spill] sm:$0xff] %v7134_v33  ;;  %vm2125_vm3 = vcmp.ne.f32.partialorder %v2093_v29, 0.0  ;;  %v7151_v23 = vmax.f32 %v401_v14, 0.0  ;;  %v7153_v38 = vmax.f32 %v402_v51, 0.0 }
 0x102   : > { %v925_v58 = vpop.permute.xlu1 %924  ;;  %v922_v53 = vpop.permute.xlu0 %921  ;;  %v404_v20 = vadd.f32 %v7007_v2, %v365_v34  ;;  %v367_v4 = vmul.f32 %v5896_v10, %v6989_v41  ;;  %v2157_v34 = vsel %vm2125_vm3, 1, %v9168_v47  ;;  %v405_v10 = vadd.f32 %v7007_v2, %v366_v26 }
 0x103   : > { %vm997_vm15 = vcmp.eq.s32.totalorder %v925_v58, 1  ;;  %vm996_vm0 = vcmp.eq.s32.totalorder %v922_v53, 1  ;;  %2209 = vperm.xlu1 %6690, %v2154_v39   ;;  %2206 = vperm.xlu0 %6689, %v2153_v15   ;;  %9177 = vst [vmem:[#allocation37_spill] sm:$0xff] %v7151_v23  ;;  %9178 = vst [vmem:[#allocation38_spill] sm:$0xff] %v7153_v38  ;;  %v403_v39 = vadd.f32 %v7007_v2, %v364_v45  ;;  %v5899_v15 = vunpack.c.l.bf16 %v7141_v9  ;;  %v2096_v58 = vld [vmem:[#allocation2 + $0x388] sm:$0xff]  ;;  %v2095_v53 = vld [vmem:[#allocation2 + $0x380] sm:$0xff] }
 0x104   : > { %v1029_v57 = vsel %vm997_vm15, %v7119_v0, 0.0  ;;  %v1028_v21 = vsel %vm996_vm0, %v7108_v59, 0.0  ;;  %6103 = vmatprep.mubr.msk.bf16.mxu1 %vm1068_vm10, %v1054_v62  ;;  %v2158_v45 = vsel %vm2126_vm1, 1, %v9168_v47  ;;  %vm2128_vm6 = vcmp.ne.f32.partialorder %v2096_v58, 0.0 }
 0x105   : > { %v1055_v56 = vpack.c.bf16 %v1029_v57, %v1028_v21  ;;  %vm2127_vm7 = vcmp.ne.f32.partialorder %v2095_v53, 0.0  ;;  %v7170_v21 = vmax.f32 %v403_v39, 0.0  ;;  %v7175_v29 = vmax.f32 %v404_v20, 0.0  ;;  %v5935_v39 = vld [vmem:[%s6971_s24 + $0x58] sm:$0xff]  }
 0x106   : > { %v931_v62 = vpop.permute.xlu1 %930  ;;  %v928_v52 = vpop.permute.xlu0 %927  ;;  %v406_v26 = vadd.f32 %v7007_v2, %v367_v4  ;;  %v2159_v20 = vsel %vm2127_vm7, 1, %v9168_v47  ;;  %v7186_v61 = vmax.f32 %v405_v10, 0.0  ;;  %vm2129_vm12 = vcmp.ne.f32.partialorder %v2097_v3, 0.0 }
 0x107   : > { %vm999_vm4 = vcmp.eq.s32.totalorder %v931_v62, 1  ;;  %vm998_vm5 = vcmp.eq.s32.totalorder %v928_v52, 1  ;;  %2215 = vperm.xlu1 %6690, %v2156_v22   ;;  %2212 = vperm.xlu0 %6689, %v2155_v35   ;;  %9179 = vst [vmem:[#allocation39_spill] sm:$0xff] %v7170_v21  ;;  %v5900_v22 = vunpack.c.h.bf16 %v7141_v9  ;;  %v368_v35 = vmul.f32 %v5899_v15, %v6989_v41  ;;  %v2098_v52 = vld [vmem:[#allocation2 + $0x398] sm:$0xff]  ;;  %9180 = vst [vmem:[#allocation40_spill] sm:$0xff] %v7175_v29 }
 0x108   : > { %v1031_v14 = vsel %vm999_vm4, %v7134_v33, 0.0  ;;  %v1030_v51 = vsel %vm998_vm5, %v7125_v19, 0.0  ;;  %6104 = vmatmul.mubr.msk.bf16.gmra.mrb[8].mxu1 %vm1068_vm10, %v1055_v56  ;;  %v5903_v56 = vunpack.c.l.bf16 %v7160_v27  ;;  %v2160_v15 = vsel %vm2128_vm6, 1, %v9168_v47  ;;  %9181 = vst [vmem:[#allocation41_spill] sm:$0xff] %v7186_v61 }
 0x109   : > { %v1056_v57 = vpack.c.bf16 %v1031_v14, %v1030_v51  ;;  %v2100_v51 = vld [vmem:[#allocation2 + $0x3a8] sm:$0xff]  ;;  %vm2130_vm11 = vcmp.ne.f32.partialorder %v2098_v52, 0.0  ;;  %v5907_v55 = vunpack.c.l.bf16 %v5935_v39  ;;  %vm2131_vm0 = vcmp.ne.f32.partialorder %v2099_v60, 0.0 }
 0x10a   : > { %v937_v62 = vpop.permute.xlu1 %936  ;;  %v934_v63 = vpop.permute.xlu0 %933  ;;  %vm2132_vm15 = vcmp.ne.f32.partialorder %v2100_v51, 0.0 }
 0x10b   : > { %vm1001_vm8 = vcmp.eq.s32.totalorder %v937_v62, 1  ;;  %vm1000_vm9 = vcmp.eq.s32.totalorder %v934_v63, 1  ;;  %2221 = vperm.xlu1 %6690, %v2158_v45   ;;  %2218 = vperm.xlu0 %6689, %v2157_v34   ;;  %v369_v45 = vmul.f32 %v5900_v22, %v6989_v41  ;;  %v407_v34 = vadd.f32 %v7007_v2, %v368_v35 }
 0x10c   : > { %v1033_v14 = vsel %vm1001_vm8, %v7153_v38, 0.0  ;;  %v1032_v9 = vsel %vm1000_vm9, %v7151_v23, 0.0  ;;  %6107 = vmatprep.mubr.msk.bf16.mxu1 %vm1068_vm10, %v1056_v57  ;;  %v5904_v62 = vunpack.c.h.bf16 %v7160_v27  ;;  %v370_v57 = vmul.f32 %v5903_v56, %v6989_v41 }
 0x10d   : > { %v1057_v4 = vpack.c.bf16 %v1033_v14, %v1032_v9  ;;  %v2162_v27 = vsel %vm2130_vm11, 1, %v9168_v47  ;;  %v2161_v22 = vsel %vm2129_vm12, 1, %v9168_v47  ;;  %v7199_v35 = vmax.f32 %v406_v26, 0.0  ;;  %v2102_v9 = vld [vmem:[#allocation2 + $0x3b8] sm:$0xff] }
 0x10e   : > { %v943_v63 = vpop.permute.xlu1 %942  ;;  %v940_v58 = vpop.permute.xlu0 %939  ;;  %v5908_v56 = vunpack.c.h.bf16 %v5935_v39  ;;  %v372_v3 = vmul.f32 %v5907_v55, %v6989_v41  ;;  %v2164_v26 = vsel %vm2132_vm15, 1, %v9168_v47  ;;  %vm2134_vm4 = vcmp.ne.f32.partialorder %v2102_v9, 0.0 }
 0x10f   : > { %vm1003_vm13 = vcmp.eq.s32.totalorder %v943_v63, 1  ;;  %vm1002_vm14 = vcmp.eq.s32.totalorder %v940_v58, 1  ;;  %2227 = vperm.xlu1 %6690, %v2160_v15   ;;  %2224 = vperm.xlu0 %6689, %v2159_v20   ;;  %9182 = vst [vmem:[#allocation42_spill] sm:$0xff] %v7199_v35  ;;  %v408_v15 = vadd.f32 %v7007_v2, %v369_v45  ;;  %v7202_v20 = vmax.f32 %v407_v34, 0.0  ;;  %v5936_v58 = vld [vmem:[%s6971_s24 + $0x60] sm:$0xff]  }
 0x110   : > { %v1035_v53 = vsel %vm1003_vm13, %v7175_v29, 0.0  ;;  %v1034_v10 = vsel %vm1002_vm14, %v7170_v21, 0.0  ;;  %6108 = vmatmul.mubr.msk.bf16.gmra.mrb[12].mxu1 %vm1068_vm10, %v1057_v4  ;;  %v371_v63 = vmul.f32 %v5904_v62, %v6989_v41  ;;  %v409_v4 = vadd.f32 %v7007_v2, %v370_v57  ;;  %v2101_v29 = vld [vmem:[#allocation2 + $0x3b0] sm:$0xff]  ;;  %v2104_v57 = vld [vmem:[#allocation2 + $0x3c8] sm:$0xff] }
 0x111   : > { %v1058_v14 = vpack.c.bf16 %v1035_v53, %v1034_v10  ;;  %9183 = vst [vmem:[#allocation43_spill] sm:$0xff] %v7202_v20  ;;  %v2163_v34 = vsel %vm2131_vm0, 1, %v9168_v47  ;;  %v373_v55 = vmul.f32 %v5908_v56, %v6989_v41  ;;  %v5911_v62 = vunpack.c.l.bf16 %v5936_v58 }
 0x112   : > { %v949_v52 = vpop.permute.xlu1 %948  ;;  %v946_v54 = vpop.permute.xlu0 %945  ;;  %vm2133_vm5 = vcmp.ne.f32.partialorder %v2101_v29, 0.0  ;;  %v7216_v53 = vmax.f32 %v408_v15, 0.0  ;;  %v410_v51 = vadd.f32 %v7007_v2, %v371_v63  ;;  %v7219_v10 = vmax.f32 %v409_v4, 0.0 }
 0x113   : > { %vm1005_vm1 = vcmp.eq.s32.totalorder %v949_v52, 1  ;;  %vm1004_vm3 = vcmp.eq.s32.totalorder %v946_v54, 1  ;;  %2233 = vperm.xlu1 %6690, %v2162_v27   ;;  %2230 = vperm.xlu0 %6689, %v2161_v22   ;;  %v5912_v27 = vunpack.c.h.bf16 %v5936_v58  ;;  %v2103_v52 = vld [vmem:[#allocation2 + $0x3c0] sm:$0xff]  ;;  %v411_v60 = vadd.f32 %v7007_v2, %v372_v3 }
 0x114   : > { %v1037_v39 = vsel %vm1005_vm1, %v7199_v35, 0.0  ;;  %v1036_v45 = vsel %vm1004_vm3, %v7186_v61, 0.0  ;;  %6111 = vmatprep.mubr.msk.bf16.mxu1 %vm1068_vm10, %v1058_v14  ;;  %9184 = vst [vmem:[#allocation44_spill] sm:$0xff] %v7216_v53  ;;  %9185 = vst [vmem:[#allocation45_spill] sm:$0xff] %v7219_v10  ;;  %v5937_v35 = vld [vmem:[%s6971_s24 + $0x68] sm:$0xff]   ;;  %v2166_v56 = vsel %vm2134_vm4, 1, %v9168_v47  ;;  %v412_v58 = vadd.f32 %v7007_v2, %v373_v55  ;;  %s8764_s24 = scalar_lea.vmem %s8928_s5, %s5827_s19 }
 0x115   : > { %v1059_v54 = vpack.c.bf16 %v1037_v39, %v1036_v45  ;;  %v2165_v4 = vsel %vm2133_vm5, 1, %v9168_v47  ;;  %vm2136_vm8 = vcmp.ne.f32.partialorder %v2104_v57, 0.0  ;;  %v374_v3 = vmul.f32 %v5911_v62, %v6989_v41  ;;  %s5638_s19 = sshll.u32 %s9442_s22, 3 }
 0x116   : > { %v955_v22 = vpop.permute.xlu1 %954  ;;  %v952_v14 = vpop.permute.xlu0 %951  ;;  %vm2135_vm9 = vcmp.ne.f32.partialorder %v2103_v52, 0.0  ;;  %v7232_v45 = vmax.f32 %v410_v51, 0.0  ;;  %v375_v9 = vmul.f32 %v5912_v27, %v6989_v41  ;;  %v2168_v29 = vsel %vm2136_vm8, 1, %v9168_v47  ;;  %v2107_v52 = vld [vmem:[#allocation2 + $0x3e0] sm:$0xff]  ;;  %s277_s27 = scalar_lea.vmem %s8929_s6, %s5638_s19 }
 0x117   : > { %vm1007_vm6 = vcmp.eq.s32.totalorder %v955_v22, 1  ;;  %vm1006_vm7 = vcmp.eq.s32.totalorder %v952_v14, 1  ;;  %2239 = vperm.xlu1 %6690, %v2164_v26   ;;  %2236 = vperm.xlu0 %6689, %v2163_v34   ;;  %v2106_v26 = vld [vmem:[#allocation2 + $0x3d8] sm:$0xff]  ;;  %v5915_v34 = vunpack.c.l.bf16 %v5937_v35  ;;  %v5916_v22 = vunpack.c.h.bf16 %v5937_v35 }
 0x118   : > { %v1039_v15 = vsel %vm1007_vm6, %v7216_v53, 0.0  ;;  %v1038_v63 = vsel %vm1006_vm7, %v7202_v20, 0.0  ;;  %6112 = vmatmul.mubr.msk.bf16.gmra.mrb[16].mxu1 %vm1068_vm10, %v1059_v54  ;;  %9186 = vst [vmem:[#allocation46_spill] sm:$0xff] %v7232_v45  ;;  %v2105_v54 = vld [vmem:[#allocation2 + $0x3d0] sm:$0xff]  ;;  %v7235_v20 = vmax.f32 %v411_v60, 0.0  ;;  %v2167_v35 = vsel %vm2135_vm9, 1, %v9168_v47 }
 0x119   : > { %v1060_v39 = vpack.c.bf16 %v1039_v15, %v1038_v63  ;;  %vm2138_vm13 = vcmp.ne.f32.partialorder %v2106_v26, 0.0  ;;  %v7244_v51 = vmax.f32 %v412_v58, 0.0  ;;  %v413_v27 = vadd.f32 %v7007_v2, %v374_v3  ;;  %v2108_v60 = vld [vmem:[#allocation2 + $0x3e8] sm:$0xff] }
 0x11a   : > { %v961_v14 = vpop.permute.xlu1 %960  ;;  %v958_v53 = vpop.permute.xlu0 %957  ;;  %9187 = vst [vmem:[#allocation47_spill] sm:$0xff] %v7235_v20  ;;  %vm2137_vm14 = vcmp.ne.f32.partialorder %v2105_v54, 0.0  ;;  %v414_v57 = vadd.f32 %v7007_v2, %v375_v9  ;;  %v377_v15 = vmul.f32 %v5916_v22, %v6989_v41  ;;  %v5919_v63 = vunpack.c.l.bf16 %v6992_v44 }
 0x11b   : > { %vm1009_vm11 = vcmp.eq.s32.totalorder %v961_v14, 1  ;;  %vm1008_vm12 = vcmp.eq.s32.totalorder %v958_v53, 1  ;;  %2245 = vperm.xlu1 %6690, %v2166_v56   ;;  %2242 = vperm.xlu0 %6689, %v2165_v4   ;;  %9188 = vst [vmem:[#allocation48_spill] sm:$0xff] %v7244_v51  ;;  %v376_v56 = vmul.f32 %v5915_v34, %v6989_v41  ;;  %v9189_v14 = vlaneseq }
 0x11c   : > { %v1041_v55 = vsel %vm1009_vm11, %v7232_v45, 0.0  ;;  %v1040_v62 = vsel %vm1008_vm12, %v7219_v10, 0.0  ;;  %6115 = vmatprep.mubr.msk.bf16.mxu1 %vm1068_vm10, %v1060_v39  ;;  %v2170_v58 = vsel %vm2138_vm13, 1, %v9168_v47  ;;  %v2169_v44 = vsel %vm2137_vm14, 1, %v9168_v47 }
 0x11d   : > { %v1061_v53 = vpack.c.bf16 %v1041_v55, %v1040_v62  ;;  %v7252_v45 = vshrl.u32 %v9189_v14, 7  ;;  %vm2140_vm1 = vcmp.ne.f32.partialorder %v2108_v60, 0.0  ;;  %v7262_v34 = vmax.f32 %v7042_v6, 0.0  ;;  %v2110_v55 = vld [vmem:[#allocation2 + $0x3f8] sm:$0xff]  ;;  %v2599_v14 = vld [vmem:[#allocation2 + $0x408] sm:$0xff] }
 0x11e   : > { %v967_v4 = vpop.permute.xlu1 %966  ;;  %v964_v39 = vpop.permute.xlu0 %963  ;;  %v7264_v22 = vmax.f32 %v413_v27, 0.0  ;;  %vm2139_vm3 = vcmp.ne.f32.partialorder %v2107_v52, 0.0  ;;  %v7266_v26 = vmax.f32 %v414_v57, 0.0  ;;  %v415_v62 = vadd.f32 %v7007_v2, %v376_v56  ;;  %v2598_v52 = vld [vmem:[#allocation2 + $0x400] sm:$0xff] }
 0x11f   : > { %9190 = vst [vmem:[#allocation49_spill] sm:$0xff] %v7252_v45  ;;  %vm1011_vm15 = vcmp.eq.s32.totalorder %v967_v4, 1  ;;  %vm1010_vm0 = vcmp.eq.s32.totalorder %v964_v39, 1  ;;  %2251 = vperm.xlu1 %6690, %v2168_v29   ;;  %2248 = vperm.xlu0 %6689, %v2167_v35   ;;  %9191 = vst [vmem:[#allocation50_spill] sm:$0xff] %v7262_v34  ;;  %v416_v35 = vadd.f32 %v7007_v2, %v377_v15  ;;  %v2109_v39 = vld [vmem:[#allocation2 + $0x3f0] sm:$0xff]  ;;  %vm487_vm4 = vcmp.lt.s32.totalorder %v7252_v45, 1 }
 0x120   : > { %v1043_v3 = vsel %vm1011_vm15, %v7244_v51, 0.0  ;;  %v1042_v9 = vsel %vm1010_vm0, %v7235_v20, 0.0  ;;  %6116 = vmatmul.mubr.msk.bf16.gmra.mrb[20].mxu1 %vm1068_vm10, %v1061_v53  ;;  %9192 = vst [vmem:[#allocation51_spill] sm:$0xff] %v7264_v22  ;;  %9193 = vst [vmem:[#allocation52_spill] sm:$0xff] %v7266_v26  ;;  %v378_v53 = vmul.f32 %v5919_v63, %v6989_v41  ;;  %v2172_v6 = vsel %vm2140_vm1, 1, %v9168_v47  ;;  %v2602_v56 = vld [vmem:[#allocation2 + $0x420] sm:$0xff] }
 0x121   : > { %v1062_v29 = vpack.c.bf16 %v1043_v3, %v1042_v9  ;;  %v2171_v41 = vsel %vm2139_vm3, 1, %v9168_v47  ;;  %vm2142_vm7 = vcmp.ne.f32.partialorder %v2110_v55, 0.0  ;;  %v8962_v15 = vrot.slane %v7262_v34, 7 }
 0x122   : > { %v973_v4 = vpop.permute.xlu1 %972  ;;  %v970_v54 = vpop.permute.xlu0 %969  ;;  %vm2141_vm8 = vcmp.ne.f32.partialorder %v2109_v39, 0.0  ;;  %v483_v60 = vrot.slane %v7044_v7, 7  ;;  %v7284_v3 = vmax.f32 %v416_v35, 0.0  ;;  %v417_v9 = vadd.f32 %v7007_v2, %v378_v53 }
 0x123   : > { %vm1013_vm5 = vcmp.eq.s32.totalorder %v973_v4, 1  ;;  %vm1012_vm6 = vcmp.eq.s32.totalorder %v970_v54, 1  ;;  %2257 = vperm.xlu1 %6690, %v2170_v58   ;;  %2254 = vperm.xlu0 %6689, %v2169_v44   ;;  %v7282_v58 = vmax.f32 %v415_v62, 0.0  ;;  %v484_v4 = vrot.slane %v7039_v5, 7 }
 0x124   : > { %v1045_v27 = vsel %vm1013_vm5, %v7266_v26, 0.0  ;;  %v1044_v57 = vsel %vm1012_vm6, %v7264_v22, 0.0  ;;  %6119 = vmatprep.mubr.msk.bf16.mxu1 %vm1068_vm10, %v1062_v29  ;;  %9195 = vst [vmem:[#allocation54_spill] sm:$0xff] %v7284_v3  ;;  %v2174_v54 = vsel %vm2142_vm7, 1, %v9168_v47  ;;  %v2173_v2 = vsel %vm2141_vm8, 1, %v9168_v47 }
 0x125   : > { %v1063_v63 = vpack.c.bf16 %v1045_v27, %v1044_v57  ;;  %9194 = vst [vmem:[#allocation53_spill] sm:$0xff] %v7282_v58  ;;  %vm2631_vm12 = vcmp.ne.f32.partialorder %v2599_v14, 0.0  ;;  %v7297_v35 = vsel %vm487_vm4, %v483_v60, %v484_v4  ;;  %vm713_vm13 = vcmp.eq.s32.totalorder %v6896_v18, 1  ;;  %v2603_v14 = vld [vmem:[#allocation2 + $0x428] sm:$0xff] }
 0x126   : > { %v979_v44 = vpop.permute.xlu1 %978  ;;  %v976_v29 = vpop.permute.xlu0 %975  ;;  %9196 = vst [vmem:[#allocation55_spill] sm:$0xff] %v7297_v35  ;;  %vm2630_vm14 = vcmp.ne.f32.partialorder %v2598_v52, 0.0  ;;  %v7304_v55 = vsel %vm487_vm4, %v8962_v15, %v483_v60  ;;  %v455_v39 = vrot.slane %v7053_v16, 7  ;;  %v7308_v57 = vmax.f32 %v417_v9, 0.0 }
 0x127   : > { %vm1015_vm9 = vcmp.eq.s32.totalorder %v979_v44, 1  ;;  %vm1014_vm11 = vcmp.eq.s32.totalorder %v976_v29, 1  ;;  %2263 = vperm.xlu1 %6690, %v2172_v6   ;;  %2260 = vperm.xlu0 %6689, %v2171_v41   ;;  %9197 = vst [vmem:[#allocation56_spill] sm:$0xff] %v7304_v55  ;;  %v454_v6 = vrot.slane %v7046_v8, 7  ;;  %v2601_v44 = vld [vmem:[#allocation2 + $0x418] sm:$0xff]  ;;  %v2600_v29 = vld [vmem:[#allocation2 + $0x410] sm:$0xff] }
 0x128   : > { %v1047_v27 = vsel %vm1015_vm9, %v7284_v3, 0.0  ;;  %v1046_v62 = vsel %vm1014_vm11, %v7282_v58, 0.0  ;;  %6120 = vmatmul.mubr.msk.bf16.gmra.mrb[24].mxu1 %vm1068_vm10, %v1063_v63  ;;  %9198 = vst [vmem:[#allocation57_spill] sm:$0xff] %v7308_v57  ;;  %vm712_vm15 = vcmp.eq.s32.totalorder %v6890_v12, 1  ;;  %v2663_v60 = vsel %vm2631_vm12, 1, %v9168_v47 }
 0x129   : > { %v1064_v53 = vpack.c.bf16 %v1047_v27, %v1046_v62  ;;  %v745_v27 = vsel %vm713_vm13, %v7297_v35, 0.0  ;;  %v2662_v15 = vsel %vm2630_vm14, 1, %v9168_v47  ;;  %vm2633_vm3 = vcmp.ne.f32.partialorder %v2601_v44, 0.0 }
 0x12a   : > { %v985_v41 = vpop.permute.xlu1 %984  ;;  %v982_v63 = vpop.permute.xlu0 %981  ;;  %vm2632_vm5 = vcmp.ne.f32.partialorder %v2600_v29, 0.0  ;;  %v744_v18 = vsel %vm712_vm15, %v7304_v55, 0.0  ;;  %v7337_v44 = vsel %vm487_vm4, %v454_v6, %v455_v39  ;;  %vm715_vm6 = vcmp.eq.s32.totalorder %v6894_v17, 1  ;;  %v7373_v55 = vld [vmem:[%s8926_s3 + $0x8] sm:$0x3] }
 0x12b   : > { %vm1017_vm0 = vcmp.eq.s32.totalorder %v985_v41, 1  ;;  %vm1016_vm1 = vcmp.eq.s32.totalorder %v982_v63, 1  ;;  %2269 = vperm.xlu1 %6690, %v2174_v54   ;;  %2266 = vperm.xlu0 %6689, %v2173_v2   ;;  %v456_v41 = vrot.slane %v7055_v28, 7  ;;  %v776_v35 = vpack.c.bf16 %v745_v27, %v744_v18  ;;  %9201 = vst [vmem:[#allocation59_spill] sm:$0xff] %v7337_v44  ;;  %v2604_v18 = vld [vmem:[#allocation2 + $0x430] sm:$0xff]  ;;  %9205 = vst [vmem:[#allocation62_spill] sm:$0xff] %v7373_v55 }
 0x12c   : > { %v1049_v9 = vsel %vm1017_vm0, %v7262_v34, 0.0  ;;  %v1048_v62 = vsel %vm1016_vm1, %v7308_v57, 0.0  ;;  %6123 = vmatprep.mubr.msk.bf16.mxu1 %vm1068_vm10, %v1064_v53  ;;  %v9199_v53 = vrot.slane %v7037_v1, 7  ;;  %v2665_v12 = vsel %vm2633_vm3, 1, %v9168_v47  ;;  %6661 = vmatprep.subr.msk.bf16.mxu0 %vm1117_vm2, %v7373_v55 }
 0x12d   : > { %v1065_v54 = vpack.c.bf16 %v1049_v9, %v1048_v62  ;;  %v2664_v29 = vsel %vm2632_vm5, 1, %v9168_v47  ;;  %vm2635_vm7 = vcmp.ne.f32.partialorder %v2603_v14, 0.0  ;;  %v7345_v9 = vsel %vm487_vm4, %v455_v39, %v456_v41 }
 0x12e   : > { %v7325_v2 = vpop.permute.xlu1 %1660  ;;  %v7327_v63 = vpop.permute.xlu0 %1657  ;;  %v7333_v52 = vsel %vm487_vm4, %v9199_v53, %v454_v6  ;;  %9202 = vst [vmem:[#allocation60_spill] sm:$0xff] %v7345_v9  ;;  %vm717_vm8 = vcmp.eq.s32.totalorder %v6907_v24, 1  ;;  %vm716_vm9 = vcmp.eq.s32.totalorder %v6909_v25, 1  ;;  %vm2634_vm11 = vcmp.ne.f32.partialorder %v2602_v56, 0.0 }
 0x12f   : > { %9200 = vst [vmem:[#allocation58_spill] sm:$0xff] %v7333_v52  ;;  %2698 = vperm.xlu1 %6690, %v2663_v60   ;;  %2695 = vperm.xlu0 %6689, %v2662_v15   ;;  %v9203_v15 = vmov %v9199_v53  ;;  %vm714_vm12 = vcmp.eq.s32.totalorder %v6888_v11, 1  ;;  %v457_v60 = vrot.slane %v7067_v13, 7  ;;  %v458_v39 = vrot.slane %v7069_v40, 7  ;;  %v2606_v11 = vld [vmem:[#allocation2 + $0x440] sm:$0xff] }
 0x130   : > { %6124 = vmatmul.mubr.msk.bf16.gmra.mrb[28].mxu1 %vm1068_vm10, %v1065_v54  ;;  %v7354_v6 = vsel %vm487_vm4, %v484_v4, %v9203_v15  ;;  %v2605_v54 = vld [vmem:[#allocation2 + $0x438] sm:$0xff]  ;;  %v459_v53 = vrot.slane %v7083_v50, 7  ;;  %v460_v4 = vrot.slane %v7103_v32, 7  ;;  %v2667_v15 = vsel %vm2635_vm7, 1, %v9168_v47 }
 0x131   : > { %6129 = vmatprep.mubr.msk.bf16.mxu1 %vm1068_vm10, %v776_v35  ;;  %9204 = vst [vmem:[#allocation61_spill] sm:$0xff] %v7354_v6  ;;  %v747_v35 = vsel %vm715_vm6, %v7333_v52, 0.0  ;;  %v749_v40 = vsel %vm717_vm8, %v7345_v9, 0.0  ;;  %v748_v17 = vsel %vm716_vm9, %v7337_v44, 0.0  ;;  %v7387_v14 = vsel %vm1117_vm2, %v7373_v55, 0  ;;  %v2607_v52 = vld [vmem:[#allocation2 + $0x448] sm:$0xff] }
 0x132   : > { %v7359_v27 = vpop.permute.xlu1 %1666  ;;  %v7361_v62 = vpop.permute.xlu0 %1663  ;;  %9206 = vst [vmem:[#allocation63_spill] sm:$0xff] %v7387_v14  ;;  %vm2637_vm13 = vcmp.ne.f32.partialorder %v2605_v54, 0.0  ;;  %vm2636_vm14 = vcmp.ne.f32.partialorder %v2604_v18, 0.0  ;;  %6230 = vmatpush3.bf16.msra.mxu0 %v7387_v14  ;;  %v7395_v25 = vsel %vm487_vm4, %v457_v60, %v458_v39  ;;  %v7399_v56 = vsel %vm487_vm4, %v456_v41, %v457_v60  ;;  %v7418_v41 = vld [vmem:[%s8926_s3 + $0x6] sm:$0x3]  ;;  %v2608_v18 = vld [vmem:[#allocation2 + $0x450] sm:$0xff] }
 0x133   : > { %2704 = vperm.xlu1 %6690, %v2665_v12   ;;  %2701 = vperm.xlu0 %6689, %v2664_v29   ;;  %v2666_v12 = vsel %vm2634_vm11, 1, %v9168_v47  ;;  %v746_v29 = vsel %vm714_vm12, %v7354_v6, 0.0  ;;  %9207 = vst [vmem:[#allocation64_spill] sm:$0xff] %v7395_v25  ;;  %9208 = vst [vmem:[#allocation65_spill] sm:$0xff] %v7399_v56  ;;  %v1883_v6 = vsel %vm1117_vm2, %v7093_v46, 0  ;;  %v778_v55 = vpack.c.bf16 %v749_v40, %v748_v17 }
 0x134   : > { %v777_v24 = vpack.c.bf16 %v747_v35, %v746_v29  ;;  %v7409_v35 = vsel %vm487_vm4, %v459_v53, %v460_v4  ;;  %v7413_v29 = vsel %vm487_vm4, %v458_v39, %v459_v53  ;;  %vm719_vm15 = vcmp.eq.s32.totalorder %v6913_v30, 1 }
 0x135   : > { %9209 = vst [vmem:[#allocation66_spill] sm:$0xff] %v7409_v35  ;;  %9210 = vst [vmem:[#allocation67_spill] sm:$0xff] %v7413_v29  ;;  %vm718_vm0 = vcmp.eq.s32.totalorder %v6915_v31, 1  ;;  %v2669_v40 = vsel %vm2637_vm13, 1, %v9168_v47  ;;  %v2668_v46 = vsel %vm2636_vm14, 1, %v9168_v47  ;;  %vm721_vm1 = vcmp.eq.s32.totalorder %v6919_v36, 1 }
 0x136   : > { %v7401_v44 = vpop.permute.xlu1 %1672  ;;  %v7403_v9 = vpop.permute.xlu0 %1669  ;;  %vm720_vm3 = vcmp.eq.s32.totalorder %v6921_v37, 1  ;;  %vm2639_vm5 = vcmp.ne.f32.partialorder %v2607_v52, 0.0  ;;  %vm2638_vm6 = vcmp.ne.f32.partialorder %v2606_v11, 0.0  ;;  %v461_v60 = vrot.slane %v7108_v59, 7  ;;  %v2611_v52 = vld [vmem:[#allocation2 + $0x468] sm:$0xff] }
 0x137   : > { %2710 = vperm.xlu1 %6690, %v2667_v15   ;;  %2707 = vperm.xlu0 %6689, %v2666_v12   ;;  %v462_v39 = vrot.slane %v7119_v0, 7  ;;  %v2609_v15 = vld [vmem:[#allocation2 + $0x458] sm:$0xff]  ;;  %v463_v17 = vrot.slane %v7125_v19, 7  ;;  %v464_v12 = vrot.slane %v7134_v33, 7  ;;  %v752_v14 = vsel %vm720_vm3, %v7413_v29, 0.0  ;;  %v2610_v29 = vld [vmem:[#allocation2 + $0x460] sm:$0xff] }
 0x138   : > { %6130 = vmatmul.mubr.msk.bf16.vlgmr.msra.gmra.mrb[0].mxu1 %vm1068_vm10, %v777_v24  ;;  %v753_v24 = vsel %vm721_vm1, %v7409_v35, 0.0  ;;  %v2671_v30 = vsel %vm2639_vm5, 1, %v9168_v47  ;;  %v2670_v31 = vsel %vm2638_vm6, 1, %v9168_v47  ;;  %vm2641_vm7 = vcmp.ne.f32.partialorder %v2609_v15, 0.0  ;;  %v2613_v15 = vld [vmem:[#allocation2 + $0x478] sm:$0xff] }
 0x139   : > { %6133 = vmatprep.mubr.msk.bf16.mxu1 %vm1068_vm10, %v778_v55  ;;  %6162 = vmatpush3.bf16.msra.mxu1 %v1883_v6  ;;  %v751_v55 = vsel %vm719_vm15, %v7395_v25, 0.0  ;;  %v750_v6 = vsel %vm718_vm0, %v7399_v56, 0.0  ;;  %vm2640_vm8 = vcmp.ne.f32.partialorder %v2608_v18, 0.0  ;;  %v7462_v36 = vsel %vm487_vm4, %v460_v4, %v461_v60 }
 0x13a   : > { %v7432_v53 = vpop.permute.xlu1 %1678  ;;  %v7434_v54 = vpop.permute.xlu0 %1675  ;;  %6660 = vmatprep.subr.msk.bf16.mxu1 %vm1117_vm2, %v7418_v41  ;;  %v779_v56 = vpack.c.bf16 %v751_v55, %v750_v6  ;;  %9212 = vst [vmem:[#allocation69_spill] sm:$0xff] %v7462_v36  ;;  %v780_v35 = vpack.c.bf16 %v753_v24, %v752_v14  ;;  %v7470_v11 = vsel %vm487_vm4, %v463_v17, %v464_v12  ;;  %vm723_vm9 = vcmp.eq.s32.totalorder %v6925_v42, 1 }
 0x13b   : > { %2716 = vperm.xlu1 %6690, %v2669_v40   ;;  %2713 = vperm.xlu0 %6689, %v2668_v46   ;;  %v7458_v40 = vsel %vm487_vm4, %v461_v60, %v462_v39  ;;  %9213 = vst [vmem:[#allocation70_spill] sm:$0xff] %v7470_v11  ;;  %v7474_v55 = vsel %vm487_vm4, %v462_v39, %v463_v17  ;;  %vm722_vm11 = vcmp.eq.s32.totalorder %v6927_v43, 1  ;;  %v2673_v4 = vsel %vm2641_vm7, 1, %v9168_v47  ;;  %v2612_v17 = vld [vmem:[#allocation2 + $0x470] sm:$0xff] }
 0x13c   : > { %9211 = vst [vmem:[#allocation68_spill] sm:$0xff] %v7458_v40  ;;  %9214 = vst [vmem:[#allocation71_spill] sm:$0xff] %v7474_v55  ;;  %v2672_v14 = vsel %vm2640_vm8, 1, %v9168_v47  ;;  %vm725_vm12 = vcmp.eq.s32.totalorder %v6931_v48, 1  ;;  %vm724_vm13 = vcmp.eq.s32.totalorder %v6933_v49, 1  ;;  %vm2643_vm14 = vcmp.ne.f32.partialorder %v2611_v52, 0.0 }
 0x13d   : > { %vm2642_vm15 = vcmp.ne.f32.partialorder %v2610_v29, 0.0  ;;  %v465_v60 = vrot.slane %v7151_v23, 7  ;;  %v466_v39 = vrot.slane %v7153_v38, 7  ;;  %v755_v18 = vsel %vm723_vm9, %v7458_v40, 0.0  ;;  %v2615_v52 = vld [vmem:[#allocation2 + $0x488] sm:$0xff]  ;;  %v9225_v40 = vld [vmem:[#allocation8_spill] sm:$0xff] }
 0x13e   : > { %v7464_v46 = vpop.permute.xlu1 %1684  ;;  %v7466_v37 = vpop.permute.xlu0 %1681  ;;  %v467_v24 = vrot.slane %v7170_v21, 7  ;;  %v757_v25 = vsel %vm725_vm12, %v7470_v11, 0.0  ;;  %v756_v38 = vsel %vm724_vm13, %v7474_v55, 0.0  ;;  %v2675_v42 = vsel %vm2643_vm14, 1, %v9168_v47  ;;  %v2614_v55 = vld [vmem:[#allocation2 + $0x480] sm:$0xff]  ;;  %v9228_v21 = vld [vmem:[#allocation43_spill] sm:$0xff] }
 0x13f   : > { %2722 = vperm.xlu1 %6690, %v2671_v30   ;;  %2719 = vperm.xlu0 %6689, %v2670_v31   ;;  %v9215_v30 = vld [vmem:[#allocation40_spill] sm:$0xff]  ;;  %v2674_v43 = vsel %vm2642_vm15, 1, %v9168_v47  ;;  %vm2645_vm0 = vcmp.ne.f32.partialorder %v2613_v15, 0.0  ;;  %vm2644_vm1 = vcmp.ne.f32.partialorder %v2612_v17, 0.0  ;;  %v7516_v48 = vsel %vm487_vm4, %v464_v12, %v465_v60  ;;  %v9223_v12 = vld [vmem:[#allocation6_spill] sm:$0xff] }
 0x140   : > { %6134 = vmatmul.mubr.msk.bf16.gmra.mrb[4].mxu1 %vm1068_vm10, %v779_v56  ;;  %v468_v31 = vrot.slane %v9215_v30, 7  ;;  %9217 = vst [vmem:[#allocation73_spill] sm:$0xff] %v7516_v48  ;;  %v782_v11 = vpack.c.bf16 %v757_v25, %v756_v38  ;;  %vm726_vm5 = vcmp.eq.s32.totalorder %v9223_v12, 1  ;;  %v2676_v38 = vsel %vm2644_vm1, 1, %v9168_v47  ;;  %v9224_v25 = vld [vmem:[#allocation7_spill] sm:$0xff]  ;;  %v2617_v15 = vld [vmem:[#allocation2 + $0x498] sm:$0xff] }
 0x141   : > { %6137 = vmatprep.mubr.msk.bf16.mxu1 %vm1068_vm10, %v780_v35  ;;  %v754_v35 = vsel %vm722_vm11, %v7462_v36, 0.0  ;;  %vm729_vm6 = vcmp.eq.s32.totalorder %v9224_v25, 1  ;;  %vm728_vm7 = vcmp.eq.s32.totalorder %v9225_v40, 1  ;;  %vm2647_vm8 = vcmp.ne.f32.partialorder %v2615_v52, 0.0  ;;  %v2616_v30 = vld [vmem:[#allocation2 + $0x490] sm:$0xff]  ;;  %v3117_v52 = vld [vmem:[#allocation2 + $0x500] sm:$0xff] }
 0x142   : > { %v7488_v6 = vpop.permute.xlu1 %1690  ;;  %v7490_v56 = vpop.permute.xlu0 %1687  ;;  %v781_v36 = vpack.c.bf16 %v755_v18, %v754_v35  ;;  %v7524_v29 = vsel %vm487_vm4, %v467_v24, %v468_v31  ;;  %v7528_v18 = vsel %vm487_vm4, %v466_v39, %v467_v24  ;;  %v9222_v35 = vld [vmem:[#allocation5_spill] sm:$0xff]  ;;  %vm2646_vm9 = vcmp.ne.f32.partialorder %v2614_v55, 0.0  ;;  %v9226_v24 = vld [vmem:[#allocation42_spill] sm:$0xff] }
 0x143   : > { %2728 = vperm.xlu1 %6690, %v2673_v4   ;;  %2725 = vperm.xlu0 %6689, %v2672_v14   ;;  %v7512_v4 = vsel %vm487_vm4, %v465_v60, %v466_v39  ;;  %9220 = vst [vmem:[#allocation76_spill] sm:$0xff] %v7524_v29  ;;  %9221 = vst [vmem:[#allocation77_spill] sm:$0xff] %v7528_v18  ;;  %vm727_vm3 = vcmp.eq.s32.totalorder %v9222_v35, 1  ;;  %v2677_v60 = vsel %vm2645_vm0, 1, %v9168_v47  ;;  %v469_v39 = vrot.slane %v7186_v61, 7 }
 0x144   : > { %9216 = vst [vmem:[#allocation72_spill] sm:$0xff] %v7512_v4  ;;  %v759_v17 = vsel %vm727_vm3, %v7512_v4, 0.0  ;;  %v2679_v35 = vsel %vm2647_vm8, 1, %v9168_v47  ;;  %v2678_v12 = vsel %vm2646_vm9, 1, %v9168_v47  ;;  %vm2649_vm11 = vcmp.ne.f32.partialorder %v2617_v15, 0.0  ;;  %v9237_v4 = vld [vmem:[#allocation12_spill] sm:$0xff] }
 0x145   : > { %vm2648_vm12 = vcmp.ne.f32.partialorder %v2616_v30, 0.0  ;;  %vm732_vm0 = vcmp.eq.s32.totalorder %v9237_v4, 1  ;;  %vm3149_vm1 = vcmp.ne.f32.partialorder %v3117_v52, 0.0  ;;  %v3119_v15 = vld [vmem:[#allocation2 + $0x510] sm:$0xff] }
 0x146   : > { %v7518_v14 = vpop.permute.xlu1 %1696  ;;  %v7520_v49 = vpop.permute.xlu0 %1693 }
 0x147   : > { %9218 = vst [vmem:[#allocation74_spill] sm:$0xff] %v7518_v14  ;;  %9219 = vst [vmem:[#allocation75_spill] sm:$0xff] %v7520_v49  ;;  %2734 = vperm.xlu1 %6690, %v2675_v42   ;;  %2731 = vperm.xlu0 %6689, %v2674_v43   ;;  %v470_v42 = vrot.slane %v9226_v24, 7  ;;  %v471_v49 = vrot.slane %v9228_v21, 7  ;;  %v9229_v14 = vld [vmem:[#allocation44_spill] sm:$0xff]  ;;  %v761_v24 = vsel %vm729_vm6, %v7524_v29, 0.0 }
 0x148   : > { %6138 = vmatmul.mubr.msk.bf16.gmra.mrb[8].mxu1 %vm1068_vm10, %v781_v36  ;;  %v472_v61 = vrot.slane %v9229_v14, 7  ;;  %v3118_v14 = vld [vmem:[#allocation2 + $0x508] sm:$0xff]  ;;  %v475_v21 = vrot.slane %v7235_v20, 7 }
 0x149   : > { %6141 = vmatprep.mubr.msk.bf16.mxu1 %vm1068_vm10, %v782_v11  ;;  %v758_v11 = vsel %vm726_vm5, %v7516_v48, 0.0  ;;  %vm3151_vm5 = vcmp.ne.f32.partialorder %v3119_v15, 0.0  ;;  %vm3150_vm6 = vcmp.ne.f32.partialorder %v3118_v14, 0.0  ;;  %v3123_v15 = vld [vmem:[#allocation2 + $0x530] sm:$0xff] }
 0x14a   : > { %v7542_v43 = vpop.permute.xlu1 %1702  ;;  %v7544_v36 = vpop.permute.xlu0 %1699  ;;  %v783_v48 = vpack.c.bf16 %v759_v17, %v758_v11  ;;  %v7578_v55 = vsel %vm487_vm4, %v471_v49, %v472_v61  ;;  %v7582_v17 = vsel %vm487_vm4, %v470_v42, %v471_v49  ;;  %v9234_v11 = vld [vmem:[#allocation9_spill] sm:$0xff]  ;;  %v473_v49 = vrot.slane %v7219_v10, 7 }
 0x14b   : > { %9227 = vst [vmem:[#allocation5_spill] sm:$0xff] %v7544_v36  ;;  %2740 = vperm.xlu1 %6690, %v2677_v60   ;;  %2737 = vperm.xlu0 %6689, %v2676_v38   ;;  %v760_v36 = vsel %vm728_vm7, %v7528_v18, 0.0  ;;  %v7566_v60 = vsel %vm487_vm4, %v469_v39, %v470_v42  ;;  %v7570_v38 = vsel %vm487_vm4, %v468_v31, %v469_v39  ;;  %v2618_v18 = vld [vmem:[#allocation2 + $0x4a0] sm:$0xff]  ;;  %9232 = vst [vmem:[#allocation8_spill] sm:$0xff] %v7578_v55  ;;  %v9235_v31 = vld [vmem:[#allocation10_spill] sm:$0xff] }
 0x14c   : > { %9230 = vst [vmem:[#allocation6_spill] sm:$0xff] %v7566_v60  ;;  %9231 = vst [vmem:[#allocation7_spill] sm:$0xff] %v7570_v38  ;;  %v784_v29 = vpack.c.bf16 %v761_v24, %v760_v36  ;;  %vm731_vm13 = vcmp.eq.s32.totalorder %v9234_v11, 1  ;;  %vm730_vm14 = vcmp.eq.s32.totalorder %v9235_v31, 1  ;;  %v2681_v39 = vsel %vm2649_vm11, 1, %v9168_v47  ;;  %v9236_v36 = vld [vmem:[#allocation11_spill] sm:$0xff] }
 0x14d   : > { %9233 = vst [vmem:[#allocation78_spill] sm:$0xff] %v7582_v17  ;;  %v2680_v24 = vsel %vm2648_vm12, 1, %v9168_v47  ;;  %vm733_vm15 = vcmp.eq.s32.totalorder %v9236_v36, 1  ;;  %vm2650_vm3 = vcmp.ne.f32.partialorder %v2618_v18, 0.0  ;;  %v9238_v42 = vld [vmem:[#allocation46_spill] sm:$0xff]  ;;  %v763_v30 = vsel %vm731_vm13, %v7566_v60, 0.0 }
 0x14e   : > { %v7572_v25 = vpop.permute.xlu1 %1708  ;;  %v7574_v40 = vpop.permute.xlu0 %1705  ;;  %v476_v10 = vrot.slane %v7244_v51, 7  ;;  %v3181_v11 = vsel %vm3149_vm1, 1, %v9168_v47  ;;  %v2682_v31 = vsel %vm2650_vm3, 1, %v9168_v47  ;;  %v7629_v4 = vsel %vm487_vm4, %v472_v61, %v473_v49  ;;  %v9245_v61 = vld [vmem:[#allocation13_spill] sm:$0xff] }
 0x14f   : > { %2746 = vperm.xlu1 %6690, %v2679_v35   ;;  %2743 = vperm.xlu0 %6689, %v2678_v12   ;;  %v474_v35 = vrot.slane %v9238_v42, 7  ;;  %v765_v42 = vsel %vm733_vm15, %v7578_v55, 0.0  ;;  %9242 = vst [vmem:[#allocation12_spill] sm:$0xff] %v7629_v4  ;;  %v3120_v55 = vld [vmem:[#allocation2 + $0x518] sm:$0xff]  ;;  %vm735_vm7 = vcmp.eq.s32.totalorder %v9245_v61, 1  ;;  %v3183_v60 = vsel %vm3151_vm5, 1, %v9168_v47 }
 0x150   : > { %6142 = vmatmul.mubr.msk.bf16.gmra.mrb[12].mxu1 %vm1068_vm10, %v783_v48  ;;  %vm3152_vm13 = vcmp.ne.f32.partialorder %v3120_v55, 0.0  ;;  %v479_v51 = vrot.slane %v7282_v58, 7 }
 0x151   : > { %6145 = vmatprep.mubr.msk.bf16.mxu1 %vm1068_vm10, %v784_v29  ;;  %v762_v29 = vsel %vm730_vm14, %v7570_v38, 0.0  ;;  %v7625_v36 = vsel %vm487_vm4, %v473_v49, %v474_v35  ;;  %v9246_v49 = vld [vmem:[#allocation14_spill] sm:$0xff]  ;;  %vm3155_vm14 = vcmp.ne.f32.partialorder %v3123_v15, 0.0 }
 0x152   : > { %v7596_v12 = vpop.permute.xlu1 %1714  ;;  %v7598_v48 = vpop.permute.xlu0 %1711  ;;  %9241 = vst [vmem:[#allocation11_spill] sm:$0xff] %v7625_v36  ;;  %vm734_vm8 = vcmp.eq.s32.totalorder %v9246_v49, 1  ;;  %v767_v14 = vsel %vm735_vm7, %v7625_v36, 0.0  ;;  %v3184_v49 = vsel %vm3152_vm13, 1, %v9168_v47  ;;  %v9257_v36 = vld [vmem:[#allocation20_spill] sm:$0xff]  ;;  %vm1753_vm13 = vcmp.eq.s32.totalorder %v7325_v2, 1 }
 0x153   : > { %9239 = vst [vmem:[#allocation9_spill] sm:$0xff] %v7598_v48  ;;  %2752 = vperm.xlu1 %6690, %v2681_v39   ;;  %2749 = vperm.xlu0 %6689, %v2680_v24   ;;  %v764_v48 = vsel %vm732_vm0, %v7582_v17, 0.0  ;;  %v7621_v39 = vld [vmem:[%s8926_s3 + $0xa] sm:$0x3]  ;;  %v785_v24 = vpack.c.bf16 %v763_v30, %v762_v29  ;;  %v3121_v17 = vld [vmem:[#allocation2 + $0x520] sm:$0xff]  ;;  %v7639_v30 = vsel %vm487_vm4, %v475_v21, %v476_v10  ;;  %vm740_vm5 = vcmp.eq.s32.totalorder %v9257_v36, 1 }
 0x154   : > { %9240 = vst [vmem:[#allocation10_spill] sm:$0xff] %v7621_v39  ;;  %6663 = vmatprep.subr.msk.bf16.mxu0 %vm1117_vm2, %v7621_v39  ;;  %v786_v38 = vpack.c.bf16 %v765_v42, %v764_v48  ;;  %9243 = vst [vmem:[#allocation79_spill] sm:$0xff] %v7639_v30  ;;  %v7643_v29 = vsel %vm487_vm4, %v474_v35, %v475_v21  ;;  %v3182_v42 = vsel %vm3150_vm6, 1, %v9168_v47  ;;  %v9247_v48 = vld [vmem:[#allocation15_spill] sm:$0xff]  ;;  %v9248_v39 = vld [vmem:[#allocation16_spill] sm:$0xff]  ;;  %vm3153_vm12 = vcmp.ne.f32.partialorder %v3121_v17, 0.0 }
 0x155   : > { %9244 = vst [vmem:[#allocation80_spill] sm:$0xff] %v7643_v29  ;;  %vm737_vm9 = vcmp.eq.s32.totalorder %v9247_v48, 1  ;;  %vm736_vm11 = vcmp.eq.s32.totalorder %v9248_v39, 1  ;;  %v477_v21 = vrot.slane %v7264_v22, 7  ;;  %v478_v35 = vrot.slane %v7266_v26, 7  ;;  %v3125_v17 = vld [vmem:[#allocation2 + $0x540] sm:$0xff] }
 0x156   : > { %v7631_v52 = vpop.permute.xlu1 %1720  ;;  %v7633_v18 = vpop.permute.xlu0 %1717  ;;  %v480_v22 = vrot.slane %v7284_v3, 7  ;;  %v769_v26 = vsel %vm737_vm9, %v7639_v30, 0.0  ;;  %v3185_v61 = vsel %vm3153_vm12, 1, %v9168_v47  ;;  %vm3157_vm6 = vcmp.ne.f32.partialorder %v3125_v17, 0.0  ;;  %v3129_v3 = vld [vmem:[#allocation2 + $0x560] sm:$0xff] }
 0x157   : > { %3214 = vperm.xlu1 %6690, %v3181_v11   ;;  %2755 = vperm.xlu0 %6689, %v2682_v31  }
 0x158   : > { %6146 = vmatmul.mubr.msk.bf16.gmra.mrb[16].mxu1 %vm1068_vm10, %v785_v24  ;;  %v3122_v24 = vld [vmem:[#allocation2 + $0x528] sm:$0xff]  ;;  %v7693_v55 = vsel %vm487_vm4, %v479_v51, %v480_v22 }
 0x159   : > { %6149 = vmatprep.mubr.msk.bf16.mxu1 %vm1068_vm10, %v786_v38  ;;  %v766_v38 = vsel %vm734_vm8, %v7629_v4, 0.0  ;;  %vm3154_vm15 = vcmp.ne.f32.partialorder %v3122_v24, 0.0  ;;  %9252 = vst [vmem:[#allocation16_spill] sm:$0xff] %v7693_v55  ;;  %vm1526_vm8 = vcmp.lt.s32.totalorder %v7252_v45, 7  ;;  %v3127_v24 = vld [vmem:[#allocation2 + $0x550] sm:$0xff] }
 0x15a   : > { %v7657_v11 = vpop.permute.xlu1 %1726  ;;  %v7659_v31 = vpop.permute.xlu0 %1723  ;;  %v787_v4 = vpack.c.bf16 %v767_v14, %v766_v38  ;;  %v7697_v14 = vsel %vm487_vm4, %v478_v35, %v479_v51  ;;  %v9254_v38 = vld [vmem:[#allocation17_spill] sm:$0xff]  ;;  %v481_v51 = vrot.slane %v7308_v57, 7  ;;  %v1525_v57 = vrot.slane %v7039_v5, 1 }
 0x15b   : > { %9249 = vst [vmem:[#allocation13_spill] sm:$0xff] %v7659_v31  ;;  %3220 = vperm.xlu1 %6690, %v3183_v60   ;;  %3217 = vperm.xlu0 %6689, %v3182_v42   ;;  %v768_v31 = vsel %vm736_vm11, %v7643_v29, 0.0  ;;  %v7681_v60 = vsel %vm487_vm4, %v477_v21, %v478_v35  ;;  %v7685_v42 = vsel %vm487_vm4, %v476_v10, %v477_v21  ;;  %v3124_v29 = vld [vmem:[#allocation2 + $0x538] sm:$0xff]  ;;  %9253 = vst [vmem:[#allocation81_spill] sm:$0xff] %v7697_v14  ;;  %v9255_v10 = vld [vmem:[#allocation18_spill] sm:$0xff] }
 0x15c   : > { %9250 = vst [vmem:[#allocation14_spill] sm:$0xff] %v7681_v60  ;;  %9251 = vst [vmem:[#allocation15_spill] sm:$0xff] %v7685_v42  ;;  %v788_v30 = vpack.c.bf16 %v769_v26, %v768_v31  ;;  %vm739_vm0 = vcmp.eq.s32.totalorder %v9254_v38, 1  ;;  %vm738_vm1 = vcmp.eq.s32.totalorder %v9255_v10, 1  ;;  %v3187_v21 = vsel %vm3155_vm14, 1, %v9168_v47  ;;  %v9256_v31 = vld [vmem:[#allocation19_spill] sm:$0xff] }
 0x15d   : > { %v3186_v26 = vsel %vm3154_vm15, 1, %v9168_v47  ;;  %vm741_vm3 = vcmp.eq.s32.totalorder %v9256_v31, 1  ;;  %vm3156_vm7 = vcmp.ne.f32.partialorder %v3124_v29, 0.0  ;;  %v3189_v38 = vsel %vm3157_vm6, 1, %v9168_v47  ;;  %v3128_v29 = vld [vmem:[#allocation2 + $0x558] sm:$0xff] }
 0x15e   : > { %v7687_v48 = vpop.permute.xlu1 %1732  ;;  %v7689_v39 = vpop.permute.xlu0 %1729  ;;  %v3188_v10 = vsel %vm3156_vm7, 1, %v9168_v47  ;;  %vm3159_vm9 = vcmp.ne.f32.partialorder %v3127_v24, 0.0  ;;  %v7742_v31 = vsel %vm487_vm4, %v480_v22, %v481_v51  ;;  %v9265_v22 = vld [vmem:[#allocation21_spill] sm:$0xff]  ;;  %vm1752_vm14 = vcmp.eq.s32.totalorder %v7327_v63, 1  ;;  %v3131_v24 = vld [vmem:[#allocation2 + $0x570] sm:$0xff] }
 0x15f   : > { %3226 = vperm.xlu1 %6690, %v3185_v61   ;;  %3223 = vperm.xlu0 %6689, %v3184_v49   ;;  %v3126_v61 = vld [vmem:[#allocation2 + $0x548] sm:$0xff]  ;;  %v771_v49 = vsel %vm739_vm0, %v7681_v60, 0.0  ;;  %9261 = vst [vmem:[#allocation19_spill] sm:$0xff] %v7742_v31  ;;  %vm3161_vm15 = vcmp.ne.f32.partialorder %v3129_v3, 0.0  ;;  %vm3160_vm0 = vcmp.ne.f32.partialorder %v3128_v29, 0.0  ;;  %v3133_v3 = vld [vmem:[#allocation2 + $0x580] sm:$0xff] }
 0x160   : > { %6150 = vmatmul.mubr.msk.bf16.gmra.mrb[20].mxu1 %vm1068_vm10, %v787_v4  ;;  %v1494_v4 = vrot.slane %v7037_v1, 1  ;;  %v773_v1 = vsel %vm741_vm3, %v7693_v55, 0.0  ;;  %vm3158_vm11 = vcmp.ne.f32.partialorder %v3126_v61, 0.0  ;;  %v1497_v55 = vrot.slane %v7055_v28, 1 }
 0x161   : > { %6153 = vmatprep.mubr.msk.bf16.mxu1 %vm1068_vm10, %v788_v30  ;;  %v770_v30 = vsel %vm738_vm1, %v7685_v42, 0.0  ;;  %v1498_v42 = vrot.slane %v7067_v13, 1  ;;  %vm3163_vm1 = vcmp.ne.f32.partialorder %v3131_v24, 0.0  ;;  %vm1754_vm6 = vcmp.eq.s32.totalorder %v7361_v62, 1  ;;  %v3135_v24 = vld [vmem:[#allocation2 + $0x590] sm:$0xff] }
 0x162   : > { %v7712_v35 = vpop.permute.xlu1 %1738  ;;  %v7714_v15 = vpop.permute.xlu0 %1735  ;;  %v789_v5 = vpack.c.bf16 %v771_v49, %v770_v30  ;;  %v7750_v49 = vsel %vm1526_vm8, %v1525_v57, %v1494_v4  ;;  %v9263_v30 = vrot.slane %v7044_v7, 1  ;;  %vm1757_vm7 = vcmp.eq.s32.totalorder %v7401_v44, 1 }
 0x163   : > { %9258 = vst [vmem:[#allocation17_spill] sm:$0xff] %v7714_v15  ;;  %3232 = vperm.xlu1 %6690, %v3187_v21   ;;  %3229 = vperm.xlu0 %6689, %v3186_v26   ;;  %v772_v15 = vsel %vm740_vm5, %v7697_v14, 0.0  ;;  %v9259_v21 = vrot.slane %v7262_v34, 7  ;;  %9262 = vst [vmem:[#allocation20_spill] sm:$0xff] %v7750_v49  ;;  %v1785_v60 = vsel %vm1753_vm13, %v7750_v49, 0.0  ;;  %v3132_v49 = vld [vmem:[#allocation2 + $0x578] sm:$0xff]  ;;  %v7806_v29 = vsel %vm1526_vm8, %v1497_v55, %v1498_v42 }
 0x164   : > { %v790_v14 = vpack.c.bf16 %v773_v1, %v772_v15  ;;  %v3191_v1 = vsel %vm3159_vm9, 1, %v9168_v47  ;;  %v3190_v15 = vsel %vm3158_vm11, 1, %v9168_v47  ;;  %9269 = vst [vmem:[#allocation83_spill] sm:$0xff] %v7806_v29  ;;  %vm1755_vm5 = vcmp.eq.s32.totalorder %v7359_v27, 1 }
 0x165   : > { %v7738_v26 = vsel %vm487_vm4, %v481_v51, %v9259_v21  ;;  %v7756_v21 = vsel %vm1526_vm8, %v9263_v30, %v1525_v57  ;;  %vm743_vm4 = vcmp.eq.s32.totalorder %v9265_v22, 1  ;;  %v9266_v51 = vld [vmem:[#allocation22_spill] sm:$0xff]  ;;  %v1495_v57 = vrot.slane %v7046_v8, 1 }
 0x166   : > { %9260 = vst [vmem:[#allocation18_spill] sm:$0xff] %v7738_v26  ;;  %v7744_v36 = vpop.permute.xlu1 %1744  ;;  %v7746_v17 = vpop.permute.xlu0 %1741  ;;  %9264 = vst [vmem:[#allocation82_spill] sm:$0xff] %v7756_v21  ;;  %vm742_vm12 = vcmp.eq.s32.totalorder %v9266_v51, 1  ;;  %v3130_v30 = vld [vmem:[#allocation2 + $0x568] sm:$0xff]  ;;  %v775_v61 = vsel %vm743_vm4, %v7738_v26, 0.0  ;;  %v3193_v22 = vsel %vm3161_vm15, 1, %v9168_v47 }
 0x167   : > { %3238 = vperm.xlu1 %6690, %v3189_v38   ;;  %3235 = vperm.xlu0 %6689, %v3188_v10   ;;  %v1496_v38 = vrot.slane %v7053_v16, 1  ;;  %v1784_v16 = vsel %vm1752_vm14, %v7756_v21, 0.0  ;;  %v3192_v51 = vsel %vm3160_vm0, 1, %v9168_v47  ;;  %vm3162_vm3 = vcmp.ne.f32.partialorder %v3130_v30, 0.0 }
 0x168   : > { %6154 = vmatmul.mubr.msk.bf16.gmra.mrb[24].mxu1 %vm1068_vm10, %v789_v5  ;;  %v7798_v2 = vsel %vm1526_vm8, %v1494_v4, %v1495_v57  ;;  %v1816_v21 = vpack.c.bf16 %v1785_v60, %v1784_v16  ;;  %v3195_v4 = vsel %vm3163_vm1, 1, %v9168_v47  ;;  %v3194_v16 = vsel %vm3162_vm3, 1, %v9168_v47  ;;  %v9271_v60 = vld [vmem:[#allocation30_spill] sm:$0xff] }
 0x169   : > { %6157 = vmatprep.mubr.msk.bf16.mxu1 %vm1068_vm10, %v790_v14  ;;  %v774_v14 = vsel %vm742_vm12, %v7742_v31, 0.0  ;;  %9268 = vst [vmem:[#allocation22_spill] sm:$0xff] %v7798_v2  ;;  %vm1756_vm9 = vcmp.eq.s32.totalorder %v7403_v9, 1  ;;  %vm3165_vm11 = vcmp.ne.f32.partialorder %v3133_v3, 0.0  ;;  %vm3164_vm4 = vcmp.ne.f32.partialorder %v3132_v49, 0.0  ;;  %v3137_v3 = vld [vmem:[#allocation2 + $0x5a0] sm:$0xff] }
 0x16a   : > { %v7770_v10 = vpop.permute.xlu1 %1750  ;;  %v7772_v5 = vpop.permute.xlu0 %1747  ;;  %v791_v31 = vpack.c.bf16 %v775_v61, %v774_v14  ;;  %v7810_v61 = vsel %vm1526_vm8, %v1496_v38, %v1497_v55  ;;  %v1499_v55 = vrot.slane %v9271_v60, 1  ;;  %v3134_v14 = vld [vmem:[#allocation2 + $0x588] sm:$0xff]  ;;  %v1789_v26 = vsel %vm1757_vm7, %v7806_v29, 0.0  ;;  %v3136_v29 = vld [vmem:[#allocation2 + $0x598] sm:$0xff] }
 0x16b   : > { %3244 = vperm.xlu1 %6690, %v3191_v1   ;;  %3241 = vperm.xlu0 %6689, %v3190_v15   ;;  %v7794_v1 = vsel %vm1526_vm8, %v1495_v57, %v1496_v38  ;;  %9270 = vst [vmem:[#allocation84_spill] sm:$0xff] %v7810_v61  ;;  %v1500_v57 = vrot.slane %v7083_v50, 1  ;;  %v1788_v50 = vsel %vm1756_vm9, %v7810_v61, 0.0  ;;  %v3197_v27 = vsel %vm3165_vm11, 1, %v9168_v47 }
 0x16c   : > { %9267 = vst [vmem:[#allocation21_spill] sm:$0xff] %v7794_v1  ;;  %v1787_v30 = vsel %vm1755_vm5, %v7794_v1, 0.0  ;;  %v3196_v62 = vsel %vm3164_vm4, 1, %v9168_v47  ;;  %vm3167_vm12 = vcmp.ne.f32.partialorder %v3135_v24, 0.0  ;;  %vm3166_vm13 = vcmp.ne.f32.partialorder %v3134_v14, 0.0  ;;  %v3138_v24 = vld [vmem:[#allocation2 + $0x5a8] sm:$0xff] }
 0x16d   : > { %v7852_v44 = vsel %vm1526_vm8, %v1498_v42, %v1499_v55  ;;  %v2402_v49 = vsel %vm1117_vm2, %v7418_v41, 0  ;;  %v1818_v61 = vpack.c.bf16 %v1789_v26, %v1788_v50  ;;  %vm1759_vm14 = vcmp.eq.s32.totalorder %v7432_v53, 1  ;;  %v9276_v14 = vld [vmem:[#allocation62_spill] sm:$0xff] }
 0x16e   : > { %v7800_v15 = vpop.permute.xlu1 %2179  ;;  %v7802_v63 = vpop.permute.xlu0 %2176  ;;  %9273 = vst [vmem:[#allocation86_spill] sm:$0xff] %v7852_v44  ;;  %vm1758_vm15 = vcmp.eq.s32.totalorder %v7434_v54, 1  ;;  %v3199_v41 = vsel %vm3167_vm12, 1, %v9168_v47  ;;  %v3198_v50 = vsel %vm3166_vm13, 1, %v9168_v47  ;;  %vm1761_vm0 = vcmp.eq.s32.totalorder %v7464_v46, 1 }
 0x16f   : > { %3250 = vperm.xlu1 %6690, %v3193_v22   ;;  %3247 = vperm.xlu0 %6689, %v3192_v51   ;;  %v1501_v22 = vrot.slane %v7103_v32, 1  ;;  %v1502_v51 = vrot.slane %v7108_v59, 1  ;;  %vm1760_vm1 = vcmp.eq.s32.totalorder %v7466_v37, 1  ;;  %vm3169_vm3 = vcmp.ne.f32.partialorder %v3137_v3, 0.0  ;;  %v3141_v3 = vld [vmem:[#allocation2 + $0x5c0] sm:$0xff] }
 0x170   : > { %6158 = vmatmul.mubr.msk.bf16.gmra.mrb[28].mxu1 %vm1068_vm10, %v791_v31  ;;  %vm3168_vm5 = vcmp.ne.f32.partialorder %v3136_v29, 0.0  ;;  %v1503_v42 = vrot.slane %v7119_v0, 1  ;;  %v1504_v26 = vrot.slane %v7125_v19, 1  ;;  %v3201_v53 = vsel %vm3169_vm3, 1, %v9168_v47  ;;  %v9286_v19 = vld [vmem:[#allocation41_spill] sm:$0xff] }
 0x171   : > { %6163 = vmatprep.mubr.msk.bf16.mxu1 %vm1068_vm10, %v1816_v21  ;;  %v1786_v21 = vsel %vm1754_vm6, %v7798_v2, 0.0  ;;  %v3200_v54 = vsel %vm3168_vm5, 1, %v9168_v47  ;;  %vm3170_vm7 = vcmp.ne.f32.partialorder %v3138_v24, 0.0  ;;  %vm1763_vm9 = vcmp.eq.s32.totalorder %v7488_v6, 1  ;;  %v9285_v2 = vld [vmem:[#allocation40_spill] sm:$0xff] }
 0x172   : > { %v7824_v38 = vpop.permute.xlu1 %2185  ;;  %v7826_v31 = vpop.permute.xlu0 %2182  ;;  %v1817_v1 = vpack.c.bf16 %v1787_v30, %v1786_v21  ;;  %v7862_v30 = vsel %vm1526_vm8, %v1501_v22, %v1502_v51  ;;  %v7866_v21 = vsel %vm1526_vm8, %v1500_v57, %v1501_v22  ;;  %v1790_v22 = vsel %vm1758_vm15, %v7852_v44, 0.0  ;;  %v3142_v44 = vld [vmem:[#allocation2 + $0x5c8] sm:$0xff] }
 0x173   : > { %3256 = vperm.xlu1 %6690, %v3195_v4   ;;  %3253 = vperm.xlu0 %6689, %v3194_v16   ;;  %v7848_v4 = vsel %vm1526_vm8, %v1499_v55, %v1500_v57  ;;  %9274 = vst [vmem:[#allocation87_spill] sm:$0xff] %v7862_v30  ;;  %9275 = vst [vmem:[#allocation88_spill] sm:$0xff] %v7866_v21  ;;  %v3139_v57 = vld [vmem:[#allocation2 + $0x5b0] sm:$0xff]  ;;  %v7910_v46 = vsel %vm1526_vm8, %v1502_v51, %v1503_v42  ;;  %vm1762_vm11 = vcmp.eq.s32.totalorder %v7490_v56, 1 }
 0x174   : > { %9272 = vst [vmem:[#allocation85_spill] sm:$0xff] %v7848_v4  ;;  %vm3171_vm6 = vcmp.ne.f32.partialorder %v3139_v57, 0.0  ;;  %9278 = vst [vmem:[#allocation89_spill] sm:$0xff] %v7910_v46  ;;  %vm3173_vm13 = vcmp.ne.f32.partialorder %v3141_v3, 0.0  ;;  %v3143_v57 = vld [vmem:[#allocation2 + $0x5d0] sm:$0xff]  ;;  %v3145_v3 = vld [vmem:[#allocation2 + $0x5e0] sm:$0xff] }
 0x175   : > { %v3203_v51 = vsel %vm3171_vm6, 1, %v9168_v47  ;;  %v3205_v6 = vsel %vm3173_vm13, 1, %v9168_v47  ;;  %vm3175_vm15 = vcmp.ne.f32.partialorder %v3143_v57, 0.0  ;;  %vm1769_vm5 = vcmp.eq.s32.totalorder %v7572_v25, 1  ;;  %v3147_v57 = vld [vmem:[#allocation2 + $0x5f0] sm:$0xff] }
 0x176   : > { %v7854_v16 = vpop.permute.xlu1 %2191  ;;  %v7856_v9 = vpop.permute.xlu0 %2188  ;;  %vm1768_vm6 = vcmp.eq.s32.totalorder %v7574_v40, 1 }
 0x177   : > { %3262 = vperm.xlu1 %6690, %v3197_v27   ;;  %3259 = vperm.xlu0 %6689, %v3196_v62   ;;  %v1505_v27 = vrot.slane %v7134_v33, 1  ;;  %v1506_v62 = vrot.slane %v7151_v23, 1  ;;  %v1509_v23 = vrot.slane %v9285_v2, 1  ;;  %v9296_v2 = vld [vmem:[#allocation45_spill] sm:$0xff] }
 0x178   : > { %6164 = vmatmul.mubr.msk.bf16.vlgmr.msra.gmra.mrb[0].mxu1 %vm1068_vm10, %v1817_v1 }
 0x179   : > { %6167 = vmatprep.mubr.msk.bf16.mxu1 %vm1068_vm10, %v1818_v61  ;;  %6196 = vmatpush3.bf16.msra.mxu1 %v2402_v49  ;;  %v1791_v61 = vsel %vm1759_vm14, %v7848_v4, 0.0  ;;  %v1793_v49 = vsel %vm1761_vm0, %v7862_v30, 0.0  ;;  %v3140_v30 = vld [vmem:[#allocation2 + $0x5b8] sm:$0xff]  ;;  %v7918_v29 = vsel %vm1526_vm8, %v1505_v27, %v1506_v62  ;;  %vm3174_vm0 = vcmp.ne.f32.partialorder %v3142_v44, 0.0 }
 0x17a   : > { %v7880_v1 = vpop.permute.xlu1 %2197  ;;  %v7882_v55 = vpop.permute.xlu0 %2194  ;;  %6662 = vmatprep.subr.msk.bf16.mxu1 %vm1117_vm2, %v9276_v14  ;;  %v1792_v14 = vsel %vm1760_vm1, %v7866_v21, 0.0  ;;  %v1819_v4 = vpack.c.bf16 %v1791_v61, %v1790_v22  ;;  %9279 = vst [vmem:[#allocation90_spill] sm:$0xff] %v7918_v29  ;;  %v7922_v61 = vsel %vm1526_vm8, %v1504_v26, %v1505_v27  ;;  %v9281_v22 = vld [vmem:[#allocation74_spill] sm:$0xff]  ;;  %vm3172_vm14 = vcmp.ne.f32.partialorder %v3140_v30, 0.0 }
 0x17b   : > { %3268 = vperm.xlu1 %6690, %v3199_v41   ;;  %3265 = vperm.xlu0 %6689, %v3198_v50   ;;  %v7906_v41 = vsel %vm1526_vm8, %v1503_v42, %v1504_v26  ;;  %v1820_v21 = vpack.c.bf16 %v1793_v49, %v1792_v14  ;;  %9280 = vst [vmem:[#allocation91_spill] sm:$0xff] %v7922_v61  ;;  %v3202_v42 = vsel %vm3170_vm7, 1, %v9168_v47  ;;  %vm1765_vm4 = vcmp.eq.s32.totalorder %v9281_v22, 1  ;;  %v9282_v49 = vld [vmem:[#allocation75_spill] sm:$0xff]  ;;  %v9283_v26 = vld [vmem:[#allocation38_spill] sm:$0xff] }
 0x17c   : > { %9277 = vst [vmem:[#allocation62_spill] sm:$0xff] %v7906_v41  ;;  %vm1764_vm12 = vcmp.eq.s32.totalorder %v9282_v49, 1  ;;  %v1507_v27 = vrot.slane %v9283_v26, 1  ;;  %v9284_v14 = vld [vmem:[#allocation39_spill] sm:$0xff]  ;;  %v1795_v24 = vsel %vm1763_vm9, %v7906_v41, 0.0  ;;  %v1510_v26 = vrot.slane %v9286_v19, 1 }
 0x17d   : > { %v1796_v33 = vsel %vm1764_vm12, %v7922_v61, 0.0  ;;  %v3204_v56 = vsel %vm3172_vm14, 1, %v9168_v47  ;;  %vm1767_vm1 = vcmp.eq.s32.totalorder %v7542_v43, 1  ;;  %vm3177_vm7 = vcmp.ne.f32.partialorder %v3145_v3, 0.0  ;;  %v3636_v3 = vld [vmem:[#allocation2 + $0x600] sm:$0xff] }
 0x17e   : > { %v7912_v50 = vpop.permute.xlu1 %2203  ;;  %v7914_v37 = vpop.permute.xlu0 %2200  ;;  %v7972_v30 = vsel %vm1526_vm8, %v1509_v23, %v1510_v26  ;;  %v3209_v43 = vsel %vm3177_vm7, 1, %v9168_v47  ;;  %vm1771_vm12 = vcmp.eq.s32.totalorder %v7596_v12, 1  ;;  %vm1773_vm14 = vcmp.eq.s32.totalorder %v7631_v52, 1 }
 0x17f   : > { %3274 = vperm.xlu1 %6690, %v3201_v53   ;;  %3271 = vperm.xlu0 %6689, %v3200_v54   ;;  %v1508_v53 = vrot.slane %v9284_v14, 1  ;;  %v1797_v14 = vsel %vm1765_vm4, %v7918_v29, 0.0  ;;  %v3144_v29 = vld [vmem:[#allocation2 + $0x5d8] sm:$0xff]  ;;  %9289 = vst [vmem:[#allocation92_spill] sm:$0xff] %v7972_v30 }
 0x180   : > { %6168 = vmatmul.mubr.msk.bf16.gmra.mrb[4].mxu1 %vm1068_vm10, %v1819_v4  ;;  %v1822_v61 = vpack.c.bf16 %v1797_v14, %v1796_v33  ;;  %v3206_v33 = vsel %vm3174_vm0, 1, %v9168_v47  ;;  %vm3176_vm9 = vcmp.ne.f32.partialorder %v3144_v29, 0.0  ;;  %vm3668_vm0 = vcmp.ne.f32.partialorder %v3636_v3, 0.0  ;;  %v3640_v3 = vld [vmem:[#allocation2 + $0x620] sm:$0xff] }
 0x181   : > { %6171 = vmatprep.mubr.msk.bf16.mxu1 %vm1068_vm10, %v1820_v21  ;;  %v1794_v21 = vsel %vm1762_vm11, %v7910_v46, 0.0  ;;  %v9295_v46 = vld [vmem:[#allocation44_spill] sm:$0xff]  ;;  %vm3179_vm11 = vcmp.ne.f32.partialorder %v3147_v57, 0.0  ;;  %v3638_v57 = vld [vmem:[#allocation2 + $0x610] sm:$0xff]  ;;  %v3700_v12 = vsel %vm3668_vm0, 1, %v9168_v47 }
 0x182   : > { %v7936_v54 = vpop.permute.xlu1 %2209  ;;  %v7938_v4 = vpop.permute.xlu0 %2206  ;;  %v1821_v41 = vpack.c.bf16 %v1795_v24, %v1794_v21  ;;  %v7976_v24 = vsel %vm1526_vm8, %v1508_v53, %v1509_v23  ;;  %v9292_v23 = vld [vmem:[#allocation42_spill] sm:$0xff]  ;;  %v1513_v19 = vrot.slane %v9295_v46, 1 }
 0x183   : > { %3280 = vperm.xlu1 %6690, %v3203_v51   ;;  %3277 = vperm.xlu0 %6689, %v3202_v42   ;;  %v7960_v51 = vsel %vm1526_vm8, %v1507_v27, %v1508_v53  ;;  %v7964_v42 = vsel %vm1526_vm8, %v1506_v62, %v1507_v27  ;;  %9290 = vst [vmem:[#allocation93_spill] sm:$0xff] %v7976_v24  ;;  %v9291_v62 = vld [vmem:[#allocation5_spill] sm:$0xff]  ;;  %v3207_v27 = vsel %vm3175_vm15, 1, %v9168_v47  ;;  %v1511_v14 = vrot.slane %v9292_v23, 1  ;;  %v9293_v53 = vld [vmem:[#allocation43_spill] sm:$0xff] }
 0x184   : > { %9287 = vst [vmem:[#allocation74_spill] sm:$0xff] %v7960_v51  ;;  %9288 = vst [vmem:[#allocation75_spill] sm:$0xff] %v7964_v42  ;;  %vm1766_vm3 = vcmp.eq.s32.totalorder %v9291_v62, 1  ;;  %v1512_v21 = vrot.slane %v9293_v53, 1  ;;  %v1799_v44 = vsel %vm1767_vm1, %v7960_v51, 0.0  ;;  %v1514_v23 = vrot.slane %v9296_v2, 1 }
 0x185   : > { %v1801_v53 = vsel %vm1769_vm5, %v7972_v30, 0.0  ;;  %v3208_v62 = vsel %vm3176_vm9, 1, %v9168_v47  ;;  %v8018_v25 = vsel %vm1526_vm8, %v1510_v26, %v1511_v14  ;;  %v3148_v2 = vld [vmem:[#allocation2 + $0x5f8] sm:$0xff]  ;;  %v9301_v26 = vld [vmem:[#allocation9_spill] sm:$0xff]  ;;  %vm1772_vm15 = vcmp.eq.s32.totalorder %v7633_v18, 1 }
 0x186   : > { %v7966_v22 = vpop.permute.xlu1 %2215  ;;  %v7968_v49 = vpop.permute.xlu0 %2212  ;;  %9298 = vst [vmem:[#allocation95_spill] sm:$0xff] %v8018_v25  ;;  %v8026_v29 = vsel %vm1526_vm8, %v1513_v19, %v1514_v23  ;;  %vm1770_vm13 = vcmp.eq.s32.totalorder %v9301_v26, 1  ;;  %vm3180_vm1 = vcmp.ne.f32.partialorder %v3148_v2, 0.0  ;;  %vm1777_vm9 = vcmp.eq.s32.totalorder %v7687_v48, 1 }
 0x187   : > { %3286 = vperm.xlu1 %6690, %v3205_v6   ;;  %3283 = vperm.xlu0 %6689, %v3204_v56   ;;  %v3146_v56 = vld [vmem:[#allocation2 + $0x5e8] sm:$0xff]  ;;  %9299 = vst [vmem:[#allocation96_spill] sm:$0xff] %v8026_v29  ;;  %v3212_v26 = vsel %vm3180_vm1, 1, %v9168_v47  ;;  %vm1781_vm1 = vcmp.eq.s32.totalorder %v7744_v36, 1 }
 0x188   : > { %6172 = vmatmul.mubr.msk.bf16.gmra.mrb[8].mxu1 %vm1068_vm10, %v1821_v41  ;;  %vm3178_vm4 = vcmp.ne.f32.partialorder %v3146_v56, 0.0 }
 0x189   : > { %6175 = vmatprep.mubr.msk.bf16.mxu1 %vm1068_vm10, %v1822_v61  ;;  %v1798_v61 = vsel %vm1766_vm3, %v7964_v42, 0.0  ;;  %v9304_v42 = vld [vmem:[#allocation51_spill] sm:$0xff]  ;;  %vm3670_vm3 = vcmp.ne.f32.partialorder %v3638_v57, 0.0 }
 0x18a   : > { %v7990_v6 = vpop.permute.xlu1 %2221  ;;  %v7992_v41 = vpop.permute.xlu0 %2218  ;;  %v1823_v51 = vpack.c.bf16 %v1799_v44, %v1798_v61  ;;  %v8030_v44 = vsel %vm1526_vm8, %v1512_v21, %v1513_v19  ;;  %v9302_v19 = vld [vmem:[#allocation46_spill] sm:$0xff]  ;;  %v3642_v57 = vld [vmem:[#allocation2 + $0x630] sm:$0xff] }
 0x18b   : > { %9294 = vst [vmem:[#allocation5_spill] sm:$0xff] %v7992_v41  ;;  %3292 = vperm.xlu1 %6690, %v3207_v27   ;;  %3289 = vperm.xlu0 %6689, %v3206_v33   ;;  %v1800_v41 = vsel %vm1768_vm6, %v7976_v24, 0.0  ;;  %v8014_v27 = vsel %vm1526_vm8, %v1511_v14, %v1512_v21  ;;  %9300 = vst [vmem:[#allocation97_spill] sm:$0xff] %v8030_v44  ;;  %v3211_v14 = vsel %vm3179_vm11, 1, %v9168_v47  ;;  %v1515_v21 = vrot.slane %v9302_v19, 1 }
 0x18c   : > { %9297 = vst [vmem:[#allocation94_spill] sm:$0xff] %v8014_v27  ;;  %v1824_v30 = vpack.c.bf16 %v1801_v53, %v1800_v41  ;;  %v3210_v53 = vsel %vm3178_vm4, 1, %v9168_v47  ;;  %v1516_v41 = vrot.slane %v7235_v20, 1  ;;  %v1803_v56 = vsel %vm1771_vm12, %v8014_v27, 0.0  ;;  %v9310_v27 = vld [vmem:[#allocation57_spill] sm:$0xff] }
 0x18d   : > { %v1518_v19 = vrot.slane %v9304_v42, 1  ;;  %v1805_v20 = vsel %vm1773_vm14, %v8026_v29, 0.0  ;;  %v1804_v46 = vsel %vm1772_vm15, %v8030_v44, 0.0  ;;  %v8072_v52 = vsel %vm1526_vm8, %v1514_v23, %v1515_v21  ;;  %v3639_v42 = vld [vmem:[#allocation2 + $0x618] sm:$0xff]  ;;  %v9307_v23 = vld [vmem:[#allocation13_spill] sm:$0xff] }
 0x18e   : > { %v8020_v33 = vpop.permute.xlu1 %2227  ;;  %v8022_v40 = vpop.permute.xlu0 %2224  ;;  %v1826_v29 = vpack.c.bf16 %v1805_v20, %v1804_v46  ;;  %vm1775_vm6 = vcmp.eq.s32.totalorder %v7657_v11, 1  ;;  %vm1774_vm7 = vcmp.eq.s32.totalorder %v9307_v23, 1  ;;  %vm1776_vm11 = vcmp.eq.s32.totalorder %v7689_v39, 1  ;;  %v9308_v46 = vld [vmem:[#allocation52_spill] sm:$0xff] }
 0x18f   : > { %3298 = vperm.xlu1 %6690, %v3209_v43   ;;  %3295 = vperm.xlu0 %6689, %v3208_v62   ;;  %v3637_v43 = vld [vmem:[#allocation2 + $0x608] sm:$0xff]  ;;  %v9303_v62 = vld [vmem:[#allocation48_spill] sm:$0xff]  ;;  %vm3672_vm4 = vcmp.ne.f32.partialorder %v3640_v3, 0.0  ;;  %vm3671_vm12 = vcmp.ne.f32.partialorder %v3639_v42, 0.0  ;;  %v3644_v3 = vld [vmem:[#allocation2 + $0x640] sm:$0xff]  ;;  %vm1779_vm15 = vcmp.eq.s32.totalorder %v7712_v35, 1 }
 0x190   : > { %6176 = vmatmul.mubr.msk.bf16.gmra.mrb[12].mxu1 %vm1068_vm10, %v1823_v51  ;;  %v1517_v24 = vrot.slane %v9303_v62, 1  ;;  %vm3669_vm5 = vcmp.ne.f32.partialorder %v3637_v43, 0.0  ;;  %v3704_v11 = vsel %vm3672_vm4, 1, %v9168_v47  ;;  %v3703_v23 = vsel %vm3671_vm12, 1, %v9168_v47 }
 0x191   : > { %6179 = vmatprep.mubr.msk.bf16.mxu1 %vm1068_vm10, %v1824_v30  ;;  %v1802_v30 = vsel %vm1770_vm13, %v8018_v25, 0.0  ;;  %v3701_v20 = vsel %vm3669_vm5, 1, %v9168_v47  ;;  %vm3674_vm13 = vcmp.ne.f32.partialorder %v3642_v57, 0.0  ;;  %vm3676_vm5 = vcmp.ne.f32.partialorder %v3644_v3, 0.0  ;;  %v3648_v3 = vld [vmem:[#allocation2 + $0x660] sm:$0xff] }
 0x192   : > { %v8044_v61 = vpop.permute.xlu1 %2233  ;;  %v8046_v51 = vpop.permute.xlu0 %2230  ;;  %v1825_v62 = vpack.c.bf16 %v1803_v56, %v1802_v30  ;;  %v8080_v2 = vsel %vm1526_vm8, %v1517_v24, %v1518_v19  ;;  %v8084_v56 = vsel %vm1526_vm8, %v1516_v41, %v1517_v24  ;;  %v1519_v24 = vrot.slane %v9308_v46, 1 }
 0x193   : > { %3304 = vperm.xlu1 %6690, %v3211_v14   ;;  %3301 = vperm.xlu0 %6689, %v3210_v53   ;;  %v8068_v14 = vsel %vm1526_vm8, %v1515_v21, %v1516_v41  ;;  %9306 = vst [vmem:[#allocation98_spill] sm:$0xff] %v8080_v2  ;;  %v3702_v21 = vsel %vm3670_vm3, 1, %v9168_v47  ;;  %v1520_v41 = vrot.slane %v7282_v58, 1  ;;  %v1522_v46 = vrot.slane %v9310_v27, 1  ;;  %v3643_v27 = vld [vmem:[#allocation2 + $0x638] sm:$0xff] }
 0x194   : > { %9305 = vst [vmem:[#allocation9_spill] sm:$0xff] %v8068_v14  ;;  %v1807_v43 = vsel %vm1775_vm6, %v8068_v14, 0.0  ;;  %v1809_v58 = vsel %vm1777_vm9, %v8080_v2, 0.0  ;;  %v1808_v25 = vsel %vm1776_vm11, %v8084_v56, 0.0  ;;  %v8126_v48 = vsel %vm1526_vm8, %v1518_v19, %v1519_v24  ;;  %v9313_v19 = vld [vmem:[#allocation17_spill] sm:$0xff] }
 0x195   : > { %9311 = vst [vmem:[#allocation13_spill] sm:$0xff] %v8126_v48  ;;  %v1828_v2 = vpack.c.bf16 %v1809_v58, %v1808_v25  ;;  %vm1778_vm0 = vcmp.eq.s32.totalorder %v9313_v19, 1  ;;  %vm1780_vm3 = vcmp.eq.s32.totalorder %v7746_v17, 1  ;;  %vm3675_vm6 = vcmp.ne.f32.partialorder %v3643_v27, 0.0  ;;  %v3647_v19 = vld [vmem:[#allocation2 + $0x658] sm:$0xff] }
 0x196   : > { %v8074_v53 = vpop.permute.xlu1 %2239  ;;  %v8076_v18 = vpop.permute.xlu0 %2236  ;;  %v3708_v27 = vsel %vm3676_vm5, 1, %v9168_v47  ;;  %vm1783_vm11 = vcmp.eq.s32.totalorder %v7770_v10, 1  ;;  %vm1782_vm4 = vcmp.eq.s32.totalorder %v7772_v5, 1  ;;  %vm2272_vm12 = vcmp.eq.s32.totalorder %v7800_v15, 1  ;;  %v9317_v15 = vld [vmem:[#allocation58_spill] sm:$0xff] }
 0x197   : > { %3733 = vperm.xlu1 %6690, %v3700_v12   ;;  %3307 = vperm.xlu0 %6689, %v3212_v26   ;;  %v3641_v12 = vld [vmem:[#allocation2 + $0x628] sm:$0xff] }
 0x198   : > { %6180 = vmatmul.mubr.msk.bf16.gmra.mrb[16].mxu1 %vm1068_vm10, %v1825_v62  ;;  %v9309_v26 = vld [vmem:[#allocation54_spill] sm:$0xff]  ;;  %vm3673_vm14 = vcmp.ne.f32.partialorder %v3641_v12, 0.0  ;;  %v1523_v12 = vrot.slane %v7262_v34, 1 }
 0x199   : > { %6183 = vmatprep.mubr.msk.bf16.mxu1 %vm1068_vm10, %v1826_v29  ;;  %v1806_v29 = vsel %vm1774_vm7, %v8072_v52, 0.0  ;;  %v1521_v44 = vrot.slane %v9309_v26, 1  ;;  %v3705_v58 = vsel %vm3673_vm14, 1, %v9168_v47  ;;  %vm3679_vm14 = vcmp.ne.f32.partialorder %v3647_v19, 0.0 }
 0x19a   : > { %v8098_v30 = vpop.permute.xlu1 %2245  ;;  %v8100_v62 = vpop.permute.xlu0 %2242  ;;  %v1827_v26 = vpack.c.bf16 %v1807_v43, %v1806_v29  ;;  %v1810_v29 = vsel %vm1778_vm0, %v8126_v48, 0.0 }
 0x19b   : > { %3739 = vperm.xlu1 %6690, %v3702_v21   ;;  %3736 = vperm.xlu0 %6689, %v3701_v20   ;;  %v8122_v21 = vsel %vm1526_vm8, %v1519_v24, %v1520_v41  ;;  %v8134_v42 = vsel %vm1526_vm8, %v1521_v44, %v1522_v46  ;;  %v8138_v43 = vsel %vm1526_vm8, %v1520_v41, %v1521_v44  ;;  %v3706_v24 = vsel %vm3674_vm13, 1, %v9168_v47  ;;  %v3646_v44 = vld [vmem:[#allocation2 + $0x650] sm:$0xff]  ;;  %v3645_v41 = vld [vmem:[#allocation2 + $0x648] sm:$0xff] }
 0x19c   : > { %9312 = vst [vmem:[#allocation99_spill] sm:$0xff] %v8134_v42  ;;  %v1811_v57 = vsel %vm1779_vm15, %v8122_v21, 0.0  ;;  %v1813_v36 = vsel %vm1781_vm1, %v8134_v42, 0.0  ;;  %v1812_v17 = vsel %vm1780_vm3, %v8138_v43, 0.0  ;;  %vm3678_vm7 = vcmp.ne.f32.partialorder %v3646_v44, 0.0 }
 0x19d   : > { %vm3677_vm9 = vcmp.ne.f32.partialorder %v3645_v41, 0.0  ;;  %v1830_v34 = vpack.c.bf16 %v1813_v36, %v1812_v17  ;;  %v8173_v42 = vsel %vm1526_vm8, %v1522_v46, %v1523_v12  ;;  %v3710_v44 = vsel %vm3678_vm7, 1, %v9168_v47  ;;  %v3652_v36 = vld [vmem:[#allocation2 + $0x680] sm:$0xff] }
 0x19e   : > { %v8128_v20 = vpop.permute.xlu1 %2251  ;;  %v8130_v39 = vpop.permute.xlu0 %2248  ;;  %9316 = vst [vmem:[#allocation100_spill] sm:$0xff] %v8173_v42  ;;  %v3709_v41 = vsel %vm3677_vm9, 1, %v9168_v47  ;;  %vm2271_vm13 = vcmp.eq.s32.totalorder %v7802_v63, 1  ;;  %v2304_v17 = vsel %vm2272_vm12, %v9317_v15, 0.0  ;;  %v9318_v63 = vld [vmem:[#allocation61_spill] sm:$0xff]  ;;  %vm3684_vm1 = vcmp.ne.f32.partialorder %v3652_v36, 0.0 }
 0x19f   : > { %3745 = vperm.xlu1 %6690, %v3704_v11   ;;  %3742 = vperm.xlu0 %6689, %v3703_v23   ;;  %vm2274_vm7 = vcmp.eq.s32.totalorder %v7824_v38, 1  ;;  %vm2273_vm9 = vcmp.eq.s32.totalorder %v7826_v31, 1  ;;  %v3716_v38 = vsel %vm3684_vm1, 1, %v9168_v47  ;;  %v9323_v36 = vld [vmem:[#allocation65_spill] sm:$0xff]  ;;  %v9324_v15 = vld [vmem:[#allocation27_spill] sm:$0xff] }
 0x1a0   : > { %6184 = vmatmul.mubr.msk.bf16.gmra.mrb[20].mxu1 %vm1068_vm10, %v1827_v26  ;;  %v1829_v26 = vpack.c.bf16 %v1811_v57, %v1810_v29  ;;  %v3650_v57 = vld [vmem:[#allocation2 + $0x670] sm:$0xff]  ;;  %v3649_v29 = vld [vmem:[#allocation2 + $0x668] sm:$0xff] }
 0x1a1   : > { %6187 = vmatprep.mubr.msk.bf16.mxu1 %vm1068_vm10, %v1828_v2  ;;  %v3707_v2 = vsel %vm3675_vm6, 1, %v9168_v47  ;;  %vm3682_vm15 = vcmp.ne.f32.partialorder %v3650_v57, 0.0  ;;  %vm3681_vm0 = vcmp.ne.f32.partialorder %v3649_v29, 0.0  ;;  %v3654_v57 = vld [vmem:[#allocation2 + $0x690] sm:$0xff]  ;;  %v3653_v29 = vld [vmem:[#allocation2 + $0x688] sm:$0xff] }
 0x1a2   : > { %v8150_v25 = vpop.permute.xlu1 %2257  ;;  %v8152_v35 = vpop.permute.xlu0 %2254  ;;  %v3714_v45 = vsel %vm3682_vm15, 1, %v9168_v47  ;;  %vm3686_vm12 = vcmp.ne.f32.partialorder %v3654_v57, 0.0  ;;  %v8226_v57 = vld [vmem:[%s8926_s3 + $0xc] sm:$0x3] }
 0x1a3   : > { %3751 = vperm.xlu1 %6690, %v3706_v24   ;;  %3748 = vperm.xlu0 %6689, %v3705_v58   ;;  %v9314_v24 = vrot.slane %v7044_v7, 1 }
 0x1a5   : > { %v8169_v58 = vsel %vm1526_vm8, %v1523_v12, %v9314_v24  ;;  %vm3680_vm8 = vcmp.ne.f32.partialorder %v3648_v3, 0.0  ;;  %v1814_v12 = vsel %vm1782_vm4, %v8173_v42, 0.0  ;;  %vm2275_vm4 = vcmp.eq.s32.totalorder %v7856_v9, 1  ;;  %v9325_v9 = vld [vmem:[#allocation10_spill] sm:$0xff] }
 0x1a6   : > { %v8161_v11 = vpop.permute.xlu1 %2263  ;;  %v8163_v23 = vpop.permute.xlu0 %2260  ;;  %9315 = vst [vmem:[#allocation17_spill] sm:$0xff] %v8169_v58  ;;  %v1815_v5 = vsel %vm1783_vm11, %v8169_v58, 0.0  ;;  %vm2276_vm11 = vcmp.eq.s32.totalorder %v7854_v16, 1 }
 0x1a7   : > { %3757 = vperm.xlu1 %6690, %v3708_v27   ;;  %3754 = vperm.xlu0 %6689, %v3707_v2   ;;  %v2303_v27 = vsel %vm2271_vm13, %v9318_v63, 0.0  ;;  %v3711_v2 = vsel %vm3679_vm14, 1, %v9168_v47  ;;  %v1831_v3 = vpack.c.bf16 %v1815_v5, %v1814_v12  ;;  %v9319_v5 = vld [vmem:[#allocation23_spill] sm:$0xff]  ;;  %vm3685_vm13 = vcmp.ne.f32.partialorder %v3653_v29, 0.0 }
 0x1a8   : > { %6188 = vmatmul.mubr.msk.bf16.gmra.mrb[24].mxu1 %vm1068_vm10, %v1829_v26  ;;  %v3651_v26 = vld [vmem:[#allocation2 + $0x678] sm:$0xff] }
 0x1a9   : > { %6191 = vmatprep.mubr.msk.bf16.mxu1 %vm1068_vm10, %v1830_v34  ;;  %v3712_v34 = vsel %vm3680_vm8, 1, %v9168_v47  ;;  %vm3683_vm6 = vcmp.ne.f32.partialorder %v3651_v26, 0.0 }
 0x1aa   : > { %v8183_v46 = vpop.permute.xlu1 %2269  ;;  %v8185_v10 = vpop.permute.xlu0 %2266  ;;  %v3715_v31 = vsel %vm3683_vm6, 1, %v9168_v47  ;;  %vm2277_vm6 = vcmp.eq.s32.totalorder %v7882_v55, 1  ;;  %v3659_v55 = vld [vmem:[#allocation2 + $0x6b8] sm:$0xff] }
 0x1ab   : > { %3763 = vperm.xlu1 %6690, %v3710_v44   ;;  %3760 = vperm.xlu0 %6689, %v3709_v41   ;;  %v3713_v44 = vsel %vm3681_vm0, 1, %v9168_v47  ;;  %v2335_v41 = vpack.c.bf16 %v2304_v17, %v2303_v27 }
 0x1ae   : > { %v2699_v19 = vpop.permute.xlu1 %2698  ;;  %v2696_v24 = vpop.permute.xlu0 %2695 }
 0x1af   : > { %vm2791_vm3 = vcmp.eq.s32.totalorder %v2699_v19, 1  ;;  %vm2790_vm5 = vcmp.eq.s32.totalorder %v2696_v24, 1  ;;  %3769 = vperm.xlu1 %6690, %v3712_v34   ;;  %3766 = vperm.xlu0 %6689, %v3711_v2   ;;  %v9320_v2 = vld [vmem:[#allocation60_spill] sm:$0xff]  ;;  %v3656_v24 = vld [vmem:[#allocation2 + $0x6a0] sm:$0xff] }
 0x1b0   : > { %6192 = vmatmul.mubr.msk.bf16.gmra.mrb[28].mxu1 %vm1068_vm10, %v1831_v3  ;;  %v2822_v12 = vsel %vm2790_vm5, %v9319_v5, 0.0  ;;  %v2823_v7 = vsel %vm2791_vm3, %v7046_v8, 0.0  ;;  %v2306_v26 = vsel %vm2274_vm7, %v9320_v2, 0.0  ;;  %v9321_v3 = vld [vmem:[#allocation59_spill] sm:$0xff]  ;;  %v2307_v8 = vsel %vm2275_vm4, %v9323_v36, 0.0 }
 0x1b1   : > { %6197 = vmatprep.mubr.msk.bf16.mxu1 %vm1068_vm10, %v2335_v41  ;;  %v2854_v17 = vpack.c.bf16 %v2823_v7, %v2822_v12  ;;  %v2305_v19 = vsel %vm2273_vm9, %v9321_v3, 0.0  ;;  %v3655_v41 = vld [vmem:[#allocation2 + $0x698] sm:$0xff]  ;;  %vm3688_vm15 = vcmp.ne.f32.partialorder %v3656_v24, 0.0  ;;  %v3440_v36 = vsel %vm1117_vm2, %v9325_v9, 0  ;;  %v3660_v24 = vld [vmem:[#allocation2 + $0x6c0] sm:$0xff] }
 0x1b2   : > { %v2705_v27 = vpop.permute.xlu1 %2704  ;;  %v2702_v34 = vpop.permute.xlu0 %2701  ;;  %v9322_v7 = vld [vmem:[#allocation64_spill] sm:$0xff]  ;;  %vm3687_vm0 = vcmp.ne.f32.partialorder %v3655_v41, 0.0  ;;  %vm2278_vm5 = vcmp.eq.s32.totalorder %v7880_v1, 1  ;;  %vm2280_vm7 = vcmp.eq.s32.totalorder %v7912_v50, 1  ;;  %vm2279_vm9 = vcmp.eq.s32.totalorder %v7914_v37, 1 }
 0x1b3   : > { %vm2793_vm8 = vcmp.eq.s32.totalorder %v2705_v27, 1  ;;  %vm2792_vm14 = vcmp.eq.s32.totalorder %v2702_v34, 1  ;;  %3775 = vperm.xlu1 %6690, %v3714_v45   ;;  %3772 = vperm.xlu0 %6689, %v3713_v44   ;;  %v2308_v12 = vsel %vm2276_vm11, %v9322_v7, 0.0  ;;  %v3718_v45 = vsel %vm3686_vm12, 1, %v9168_v47  ;;  %v9329_v41 = vld [vmem:[#allocation68_spill] sm:$0xff] }
 0x1b4   : > { %v2825_v5 = vsel %vm2793_vm8, %v7055_v28, 0.0  ;;  %v2824_v63 = vsel %vm2792_vm14, %v9324_v15, 0.0  ;;  %6231 = vmatprep.mubr.msk.bf16.mxu0 %vm1068_vm10, %v2854_v17  ;;  %v3717_v44 = vsel %vm3685_vm13, 1, %v9168_v47  ;;  %v2336_v34 = vpack.c.bf16 %v2306_v26, %v2305_v19 }
 0x1b5   : > { %v2855_v27 = vpack.c.bf16 %v2825_v5, %v2824_v63  ;;  %v2337_v28 = vpack.c.bf16 %v2308_v12, %v2307_v8  ;;  %v3658_v63 = vld [vmem:[#allocation2 + $0x6b0] sm:$0xff]  ;;  %v3657_v5 = vld [vmem:[#allocation2 + $0x6a8] sm:$0xff]  ;;  %v3720_v26 = vsel %vm3688_vm15, 1, %v9168_v47  ;;  %v3719_v19 = vsel %vm3687_vm0, 1, %v9168_v47 }
 0x1b6   : > { %v2711_v16 = vpop.permute.xlu1 %2710  ;;  %v2708_v7 = vpop.permute.xlu0 %2707  ;;  %vm3690_vm11 = vcmp.ne.f32.partialorder %v3658_v63, 0.0  ;;  %vm3689_vm4 = vcmp.ne.f32.partialorder %v3657_v5, 0.0  ;;  %v9327_v12 = vld [vmem:[#allocation66_spill] sm:$0xff]  ;;  %vm3692_vm8 = vcmp.ne.f32.partialorder %v3660_v24, 0.0  ;;  %vm3691_vm0 = vcmp.ne.f32.partialorder %v3659_v55, 0.0  ;;  %v9334_v24 = vld [vmem:[#allocation72_spill] sm:$0xff] }
 0x1b7   : > { %vm2795_vm1 = vcmp.eq.s32.totalorder %v2711_v16, 1  ;;  %vm2794_vm3 = vcmp.eq.s32.totalorder %v2708_v7, 1  ;;  %3781 = vperm.xlu1 %6690, %v3716_v38   ;;  %3778 = vperm.xlu0 %6689, %v3715_v31   ;;  %v9326_v7 = vld [vmem:[#allocation63_spill] sm:$0xff]  ;;  %v9330_v16 = vld [vmem:[#allocation69_spill] sm:$0xff]  ;;  %v3721_v50 = vsel %vm3689_vm4, 1, %v9168_v47 }
 0x1b8   : > { %v2827_v29 = vsel %vm2795_vm1, %v9271_v60, 0.0  ;;  %v2826_v17 = vsel %vm2794_vm3, %v7067_v13, 0.0  ;;  %6198 = vmatmul.mubr.msk.bf16.vlgmr.msra.gmra.mrb[0].mxu1 %vm1068_vm10, %v2336_v34  ;;  %6232 = vmatmul.mubr.msk.bf16.vlgmr.msra.gmra.mrb[0].mxu0 %vm1068_vm10, %v2855_v27  ;;  %v2312_v34 = vsel %vm2280_vm7, %v9329_v41, 0.0  ;;  %v2311_v9 = vsel %vm2279_vm9, %v9330_v16, 0.0 }
 0x1b9   : > { %v2856_v8 = vpack.c.bf16 %v2827_v29, %v2826_v17  ;;  %6201 = vmatprep.mubr.msk.bf16.mxu1 %vm1068_vm10, %v2337_v28  ;;  %6264 = vmatpush3.bf16.msra.mxu0 %v3440_v36  ;;  %v2310_v28 = vsel %vm2278_vm5, %v9327_v12, 0.0  ;;  %v9328_v36 = vld [vmem:[#allocation67_spill] sm:$0xff]  ;;  %v2339_v37 = vpack.c.bf16 %v2312_v34, %v2311_v9  ;;  %vm2282_vm1 = vcmp.eq.s32.totalorder %v7936_v54, 1  ;;  %v9332_v9 = vld [vmem:[#allocation70_spill] sm:$0xff] }
 0x1ba   : > { %v2717_v38 = vpop.permute.xlu1 %2716  ;;  %v2714_v31 = vpop.permute.xlu0 %2713  ;;  %6400 = vmatpush3.bf16.msra.mxu1 %v9326_v7  ;;  %6664 = vmatprep.subr.msk.bf16.mxu0 %vm1117_vm2, %v8226_v57  ;;  %v2309_v27 = vsel %vm2277_vm6, %v9328_v36, 0.0  ;;  %v9331_v29 = vld [vmem:[#allocation31_spill] sm:$0xff]  ;;  %v3722_v7 = vsel %vm3690_vm11, 1, %v9168_v47  ;;  %vm2281_vm3 = vcmp.eq.s32.totalorder %v7938_v4, 1  ;;  %vm2284_vm5 = vcmp.eq.s32.totalorder %v7966_v22, 1  ;;  %v3663_v4 = vld [vmem:[#allocation2 + $0x6d8] sm:$0xff] }
 0x1bb   : > { %vm2797_vm12 = vcmp.eq.s32.totalorder %v2717_v38, 1  ;;  %vm2796_vm13 = vcmp.eq.s32.totalorder %v2714_v31, 1  ;;  %3787 = vperm.xlu1 %6690, %v3718_v45   ;;  %3784 = vperm.xlu0 %6689, %v3717_v44   ;;  %v2338_v31 = vpack.c.bf16 %v2310_v28, %v2309_v27  ;;  %vm2283_vm6 = vcmp.eq.s32.totalorder %v7968_v49, 1 }
 0x1bc   : > { %v2829_v1 = vsel %vm2797_vm12, %v7103_v32, 0.0  ;;  %v2828_v17 = vsel %vm2796_vm13, %v9331_v29, 0.0  ;;  %6235 = vmatprep.mubr.msk.bf16.mxu0 %vm1068_vm10, %v2856_v8  ;;  %v3662_v32 = vld [vmem:[#allocation2 + $0x6d0] sm:$0xff]  ;;  %v3661_v8 = vld [vmem:[#allocation2 + $0x6c8] sm:$0xff]  ;;  %v3724_v27 = vsel %vm3692_vm8, 1, %v9168_v47  ;;  %v3723_v34 = vsel %vm3691_vm0, 1, %v9168_v47 }
 0x1bd   : > { %v2857_v38 = vpack.c.bf16 %v2829_v1, %v2828_v17  ;;  %vm3694_vm7 = vcmp.ne.f32.partialorder %v3662_v32, 0.0  ;;  %vm3693_vm9 = vcmp.ne.f32.partialorder %v3661_v8, 0.0  ;;  %v2314_v1 = vsel %vm2282_vm1, %v9332_v9, 0.0  ;;  %v9333_v17 = vld [vmem:[#allocation71_spill] sm:$0xff] }
 0x1be   : > { %v2723_v45 = vpop.permute.xlu1 %2722  ;;  %v2720_v44 = vpop.permute.xlu0 %2719  ;;  %v2316_v55 = vsel %vm2284_vm5, %v9334_v24, 0.0  ;;  %v3725_v22 = vsel %vm3693_vm9, 1, %v9168_v47  ;;  %vm2288_vm1 = vcmp.eq.s32.totalorder %v8020_v33, 1  ;;  %v4155_v33 = vld [vmem:[#allocation2 + $0x700] sm:$0xff] }
 0x1bf   : > { %vm2799_vm14 = vcmp.eq.s32.totalorder %v2723_v45, 1  ;;  %vm2798_vm15 = vcmp.eq.s32.totalorder %v2720_v44, 1  ;;  %3793 = vperm.xlu1 %6690, %v3720_v26   ;;  %3790 = vperm.xlu0 %6689, %v3719_v19   ;;  %v9335_v45 = vld [vmem:[#allocation73_spill] sm:$0xff] }
 0x1c0   : > { %v2831_v28 = vsel %vm2799_vm14, %v7119_v0, 0.0  ;;  %v2830_v63 = vsel %vm2798_vm15, %v7108_v59, 0.0  ;;  %6202 = vmatmul.mubr.msk.bf16.gmra.mrb[4].mxu1 %vm1068_vm10, %v2338_v31  ;;  %6236 = vmatmul.mubr.msk.bf16.gmra.mrb[4].mxu0 %vm1068_vm10, %v2857_v38  ;;  %v2313_v38 = vsel %vm2281_vm3, %v9333_v17, 0.0  ;;  %v3664_v31 = vld [vmem:[#allocation2 + $0x6e0] sm:$0xff]  ;;  %v2315_v44 = vsel %vm2283_vm6, %v9335_v45, 0.0  ;;  %v4162_v59 = vld [vmem:[#allocation2 + $0x738] sm:$0xff] }
 0x1c1   : > { %v2858_v5 = vpack.c.bf16 %v2831_v28, %v2830_v63  ;;  %6205 = vmatprep.mubr.msk.bf16.mxu1 %vm1068_vm10, %v2339_v37  ;;  %v9336_v37 = vld [vmem:[#allocation36_spill] sm:$0xff]  ;;  %v9337_v28 = vld [vmem:[#allocation35_spill] sm:$0xff]  ;;  %v3726_v0 = vsel %vm3694_vm7, 1, %v9168_v47  ;;  %vm3696_vm12 = vcmp.ne.f32.partialorder %v3664_v31, 0.0  ;;  %v2341_v49 = vpack.c.bf16 %v2316_v55, %v2315_v44 }
 0x1c2   : > { %v2729_v26 = vpop.permute.xlu1 %2728  ;;  %v2726_v19 = vpop.permute.xlu0 %2725  ;;  %vm3695_vm14 = vcmp.ne.f32.partialorder %v3663_v4, 0.0  ;;  %vm2286_vm15 = vcmp.eq.s32.totalorder %v7990_v6, 1  ;;  %vm2287_vm3 = vcmp.eq.s32.totalorder %v8022_v40, 1  ;;  %v3666_v44 = vld [vmem:[#allocation2 + $0x6f0] sm:$0xff]  ;;  %v3665_v4 = vld [vmem:[#allocation2 + $0x6e8] sm:$0xff] }
 0x1c3   : > { %vm2801_vm11 = vcmp.eq.s32.totalorder %v2729_v26, 1  ;;  %vm2800_vm4 = vcmp.eq.s32.totalorder %v2726_v19, 1  ;;  %3799 = vperm.xlu1 %6690, %v3722_v7   ;;  %3796 = vperm.xlu0 %6689, %v3721_v50   ;;  %v2340_v19 = vpack.c.bf16 %v2314_v1, %v2313_v38  ;;  %v9339_v1 = vld [vmem:[#allocation38_spill] sm:$0xff]  ;;  %v3727_v55 = vsel %vm3695_vm14, 1, %v9168_v47  ;;  %v9346_v6 = vld [vmem:[#allocation39_spill] sm:$0xff] }
 0x1c4   : > { %v2833_v54 = vsel %vm2801_vm11, %v9336_v37, 0.0  ;;  %v2832_v63 = vsel %vm2800_vm4, %v9337_v28, 0.0  ;;  %6239 = vmatprep.mubr.msk.bf16.mxu0 %vm1068_vm10, %v2858_v5  ;;  %v9338_v5 = vld [vmem:[#allocation5_spill] sm:$0xff]  ;;  %vm3698_vm7 = vcmp.ne.f32.partialorder %v3666_v44, 0.0  ;;  %vm3697_vm9 = vcmp.ne.f32.partialorder %v3665_v4, 0.0  ;;  %v9348_v44 = vld [vmem:[#allocation78_spill] sm:$0xff] }
 0x1c5   : > { %v2859_v26 = vpack.c.bf16 %v2833_v54, %v2832_v63  ;;  %vm2285_vm0 = vcmp.eq.s32.totalorder %v9338_v5, 1  ;;  %v9340_v54 = vld [vmem:[#allocation37_spill] sm:$0xff]  ;;  %vm2290_vm11 = vcmp.eq.s32.totalorder %v8044_v61, 1  ;;  %vm2289_vm4 = vcmp.eq.s32.totalorder %v8046_v51, 1  ;;  %v4157_v51 = vld [vmem:[#allocation2 + $0x710] sm:$0xff] }
 0x1c6   : > { %v2735_v7 = vpop.permute.xlu1 %2734  ;;  %v2732_v50 = vpop.permute.xlu0 %2731  ;;  %v3730_v40 = vsel %vm3698_vm7, 1, %v9168_v47  ;;  %v2321_v4 = vsel %vm2289_vm4, %v9348_v44, 0.0  ;;  %vm2296_vm7 = vcmp.eq.s32.totalorder %v8128_v20, 1  ;;  %v9354_v20 = vld [vmem:[#allocation14_spill] sm:$0xff] }
 0x1c7   : > { %vm2803_vm13 = vcmp.eq.s32.totalorder %v2735_v7, 1  ;;  %vm2802_vm8 = vcmp.eq.s32.totalorder %v2732_v50, 1  ;;  %3805 = vperm.xlu1 %6690, %v3724_v27   ;;  %3802 = vperm.xlu0 %6689, %v3723_v34   ;;  %v3728_v34 = vsel %vm3696_vm12, 1, %v9168_v47  ;;  %v9341_v7 = vld [vmem:[#allocation76_spill] sm:$0xff]  ;;  %vm2292_vm12 = vcmp.eq.s32.totalorder %v8074_v53, 1 }
 0x1c8   : > { %v2835_v38 = vsel %vm2803_vm13, %v9339_v1, 0.0  ;;  %v2834_v63 = vsel %vm2802_vm8, %v9340_v54, 0.0  ;;  %6206 = vmatmul.mubr.msk.bf16.gmra.mrb[8].mxu1 %vm1068_vm10, %v2340_v19  ;;  %6240 = vmatmul.mubr.msk.bf16.gmra.mrb[8].mxu0 %vm1068_vm10, %v2859_v26  ;;  %v2318_v26 = vsel %vm2286_vm15, %v9341_v7, 0.0  ;;  %v9342_v19 = vld [vmem:[#allocation77_spill] sm:$0xff]  ;;  %v9345_v1 = vld [vmem:[#allocation40_spill] sm:$0xff]  ;;  %vm2291_vm13 = vcmp.eq.s32.totalorder %v8076_v18, 1 }
 0x1c9   : > { %v2860_v32 = vpack.c.bf16 %v2835_v38, %v2834_v63  ;;  %6209 = vmatprep.mubr.msk.bf16.mxu1 %vm1068_vm10, %v2341_v49  ;;  %v2317_v50 = vsel %vm2285_vm0, %v9342_v19, 0.0  ;;  %v9343_v49 = vld [vmem:[#allocation6_spill] sm:$0xff]  ;;  %v9344_v38 = vld [vmem:[#allocation7_spill] sm:$0xff]  ;;  %vm4187_vm8 = vcmp.ne.f32.partialorder %v4155_v33, 0.0  ;;  %vm4189_vm15 = vcmp.ne.f32.partialorder %v4157_v51, 0.0 }
 0x1ca   : > { %v2741_v8 = vpop.permute.xlu1 %2740  ;;  %v2738_v27 = vpop.permute.xlu0 %2737  ;;  %v2320_v31 = vsel %vm2288_vm1, %v9343_v49, 0.0  ;;  %v2319_v63 = vsel %vm2287_vm3, %v9344_v38, 0.0 }
 0x1cb   : > { %vm2805_vm5 = vcmp.eq.s32.totalorder %v2741_v8, 1  ;;  %vm2804_vm6 = vcmp.eq.s32.totalorder %v2738_v27, 1  ;;  %3811 = vperm.xlu1 %6690, %v3726_v0   ;;  %3808 = vperm.xlu0 %6689, %v3725_v22   ;;  %v2342_v8 = vpack.c.bf16 %v2318_v26, %v2317_v50  ;;  %v3667_v27 = vld [vmem:[#allocation2 + $0x6f8] sm:$0xff]  ;;  %v2343_v28 = vpack.c.bf16 %v2320_v31, %v2319_v63  ;;  %v9349_v26 = vld [vmem:[#allocation11_spill] sm:$0xff]  ;;  %v4159_v63 = vld [vmem:[#allocation2 + $0x720] sm:$0xff] }
 0x1cc   : > { %v2837_v54 = vsel %vm2805_vm5, %v9345_v1, 0.0  ;;  %v2836_v37 = vsel %vm2804_vm6, %v9346_v6, 0.0  ;;  %6243 = vmatprep.mubr.msk.bf16.mxu0 %vm1068_vm10, %v2860_v32  ;;  %vm3699_vm14 = vcmp.ne.f32.partialorder %v3667_v27, 0.0  ;;  %v4156_v32 = vld [vmem:[#allocation2 + $0x708] sm:$0xff]  ;;  %v2324_v53 = vsel %vm2292_vm12, %v9349_v26, 0.0  ;;  %v9350_v50 = vld [vmem:[#allocation12_spill] sm:$0xff] }
 0x1cd   : > { %v2861_v5 = vpack.c.bf16 %v2837_v54, %v2836_v37  ;;  %v3729_v37 = vsel %vm3697_vm9, 1, %v9168_v47  ;;  %v2323_v18 = vsel %vm2291_vm13, %v9350_v50, 0.0  ;;  %v3731_v31 = vsel %vm3699_vm14, 1, %v9168_v47  ;;  %v4163_v6 = vld [vmem:[#allocation2 + $0x740] sm:$0xff] }
 0x1ce   : > { %v8322_v0 = vpop.permute.xlu1 %2746  ;;  %v8324_v22 = vpop.permute.xlu0 %2743  ;;  %vm4188_vm0 = vcmp.ne.f32.partialorder %v4156_v32, 0.0  ;;  %v2345_v1 = vpack.c.bf16 %v2324_v53, %v2323_v18  ;;  %vm4191_vm1 = vcmp.ne.f32.partialorder %v4159_v63, 0.0  ;;  %vm2294_vm5 = vcmp.eq.s32.totalorder %v8098_v30, 1  ;;  %v4160_v32 = vld [vmem:[#allocation2 + $0x728] sm:$0xff]  ;;  %v9352_v53 = vld [vmem:[#allocation79_spill] sm:$0xff] }
 0x1cf   : > { %3817 = vperm.xlu1 %6690, %v3728_v34   ;;  %3814 = vperm.xlu0 %6689, %v3727_v55   ;;  %v9347_v34 = vld [vmem:[#allocation8_spill] sm:$0xff]  ;;  %vm2293_vm6 = vcmp.eq.s32.totalorder %v8100_v62, 1  ;;  %v4220_v51 = vsel %vm4188_vm0, 1, %v9168_v47  ;;  %vm2295_vm9 = vcmp.eq.s32.totalorder %v8130_v39, 1  ;;  %v4223_v30 = vsel %vm4191_vm1, 1, %v9168_v47  ;;  %v9355_v63 = vld [vmem:[#allocation15_spill] sm:$0xff] }
 0x1d0   : > { %6210 = vmatmul.mubr.msk.bf16.gmra.mrb[12].mxu1 %vm1068_vm10, %v2342_v8  ;;  %6244 = vmatmul.mubr.msk.bf16.gmra.mrb[12].mxu0 %vm1068_vm10, %v2861_v5  ;;  %v2322_v55 = vsel %vm2290_vm11, %v9347_v34, 0.0  ;;  %v4158_v5 = vld [vmem:[#allocation2 + $0x718] sm:$0xff]  ;;  %v2326_v18 = vsel %vm2294_vm5, %v9352_v53, 0.0  ;;  %vm4192_vm13 = vcmp.ne.f32.partialorder %v4160_v32, 0.0  ;;  %v2328_v39 = vsel %vm2296_vm7, %v9354_v20, 0.0 }
 0x1d1   : > { %6213 = vmatprep.mubr.msk.bf16.mxu1 %vm1068_vm10, %v2343_v28  ;;  %v4219_v28 = vsel %vm4187_vm8, 1, %v9168_v47  ;;  %v2344_v8 = vpack.c.bf16 %v2322_v55, %v2321_v4  ;;  %vm4190_vm3 = vcmp.ne.f32.partialorder %v4158_v5, 0.0  ;;  %v2327_v5 = vsel %vm2295_vm9, %v9355_v63, 0.0 }
 0x1d2   : > { %v8335_v54 = vpop.permute.xlu1 %2752  ;;  %v8337_v61 = vpop.permute.xlu0 %2749  ;;  %v4222_v62 = vsel %vm4190_vm3, 1, %v9168_v47  ;;  %v2347_v32 = vpack.c.bf16 %v2328_v39, %v2327_v5  ;;  %vm4194_vm0 = vcmp.ne.f32.partialorder %v4162_v59, 0.0  ;;  %vm2298_vm1 = vcmp.eq.s32.totalorder %v8150_v25, 1  ;;  %v8391_v59 = vld [vmem:[%s8926_s3 + $0xe] sm:$0x3] }
 0x1d3   : > { %3823 = vperm.xlu1 %6690, %v3730_v40   ;;  %3820 = vperm.xlu0 %6689, %v3729_v37   ;;  %v4161_v40 = vld [vmem:[#allocation2 + $0x730] sm:$0xff]  ;;  %v4221_v37 = vsel %vm4189_vm15, 1, %v9168_v47  ;;  %vm4195_vm15 = vcmp.ne.f32.partialorder %v4163_v6, 0.0  ;;  %vm2297_vm3 = vcmp.eq.s32.totalorder %v8152_v35, 1  ;;  %vm2300_vm5 = vcmp.eq.s32.totalorder %v8161_v11, 1  ;;  %v9362_v6 = vld [vmem:[#allocation18_spill] sm:$0xff] }
 0x1d4   : > { %vm4193_vm4 = vcmp.ne.f32.partialorder %v4161_v40, 0.0  ;;  %v4164_v40 = vld [vmem:[#allocation2 + $0x748] sm:$0xff]  ;;  %v4226_v39 = vsel %vm4194_vm0, 1, %v9168_v47  ;;  %vm2301_vm0 = vcmp.eq.s32.totalorder %v8185_v10, 1 }
 0x1d6   : > { %v3215_v33 = vpop.permute.xlu1 %3214  ;;  %v8345_v27 = vpop.permute.xlu0 %2755 }
 0x1d7   : > { %9351 = vst [vmem:[#allocation60_spill] sm:$0xff] %v8345_v27  ;;  %4252 = vperm.xlu1 %6690, %v4219_v28   ;;  %3826 = vperm.xlu0 %6689, %v3731_v31   ;;  %vm3309_vm11 = vcmp.eq.s32.totalorder %v3215_v33, 1  ;;  %v9353_v28 = vld [vmem:[#allocation80_spill] sm:$0xff]  ;;  %v9357_v33 = vld [vmem:[#allocation21_spill] sm:$0xff] }
 0x1d8   : > { %6214 = vmatmul.mubr.msk.bf16.gmra.mrb[16].mxu1 %vm1068_vm10, %v2344_v8  ;;  %v2325_v31 = vsel %vm2293_vm6, %v9353_v28, 0.0  ;;  %vm2299_vm6 = vcmp.eq.s32.totalorder %v8163_v23, 1 }
 0x1d9   : > { %6217 = vmatprep.mubr.msk.bf16.mxu1 %vm1068_vm10, %v2345_v1  ;;  %v9356_v1 = vld [vmem:[#allocation22_spill] sm:$0xff]  ;;  %v2346_v60 = vpack.c.bf16 %v2326_v18, %v2325_v31  ;;  %v9359_v31 = vld [vmem:[#allocation83_spill] sm:$0xff] }
 0x1da   : > { %v3221_v55 = vpop.permute.xlu1 %3220  ;;  %v3218_v4 = vpop.permute.xlu0 %3217  ;;  %v3341_v8 = vsel %vm3309_vm11, %v9356_v1, 0.0  ;;  %v9361_v1 = vld [vmem:[#allocation81_spill] sm:$0xff] }
 0x1db   : > { %vm3310_vm12 = vcmp.eq.s32.totalorder %v3218_v4, 1  ;;  %4258 = vperm.xlu1 %6690, %v4221_v37   ;;  %4255 = vperm.xlu0 %6689, %v4220_v51   ;;  %vm3311_vm8 = vcmp.eq.s32.totalorder %v3221_v55, 1  ;;  %v4225_v37 = vsel %vm4193_vm4, 1, %v9168_v47  ;;  %v4224_v51 = vsel %vm4192_vm13, 1, %v9168_v47  ;;  %v4165_v4 = vld [vmem:[#allocation2 + $0x750] sm:$0xff] }
 0x1dc   : > { %v3342_v27 = vsel %vm3310_vm12, %v9357_v33, 0.0  ;;  %v4227_v55 = vsel %vm4195_vm15, 1, %v9168_v47  ;;  %vm4197_vm9 = vcmp.ne.f32.partialorder %v4165_v4, 0.0  ;;  %vm4196_vm4 = vcmp.ne.f32.partialorder %v4164_v40, 0.0  ;;  %v4166_v33 = vld [vmem:[#allocation2 + $0x758] sm:$0xff] }
 0x1dd   : > { %v3373_v29 = vpack.c.bf16 %v3342_v27, %v3341_v8  ;;  %v9358_v27 = vld [vmem:[#allocation84_spill] sm:$0xff]  ;;  %v4228_v23 = vsel %vm4196_vm4, 1, %v9168_v47  ;;  %vm2302_vm15 = vcmp.eq.s32.totalorder %v8183_v46, 1 }
 0x1de   : > { %v3227_v13 = vpop.permute.xlu1 %3226  ;;  %v3224_v15 = vpop.permute.xlu0 %3223  ;;  %v3343_v18 = vsel %vm3311_vm8, %v9358_v27, 0.0 }
 0x1df   : > { %vm3312_vm14 = vcmp.eq.s32.totalorder %v3224_v15, 1  ;;  %4264 = vperm.xlu1 %6690, %v4223_v30   ;;  %4261 = vperm.xlu0 %6689, %v4222_v62   ;;  %vm3313_vm7 = vcmp.eq.s32.totalorder %v3227_v13, 1 }
 0x1e0   : > { %v3344_v8 = vsel %vm3312_vm14, %v9359_v31, 0.0  ;;  %6218 = vmatmul.mubr.msk.bf16.gmra.mrb[20].mxu1 %vm1068_vm10, %v2346_v60  ;;  %6265 = vmatprep.mubr.msk.bf16.mxu0 %vm1068_vm10, %v3373_v29  ;;  %v3959_v60 = vsel %vm1117_vm2, %v8226_v57, 0  ;;  %v9360_v29 = vld [vmem:[#allocation16_spill] sm:$0xff]  ;;  %v2332_v57 = vsel %vm2300_vm5, %v9362_v6, 0.0  ;;  %v4229_v6 = vsel %vm4197_vm9, 1, %v9168_v47 }
 0x1e1   : > { %v3374_v15 = vpack.c.bf16 %v3344_v8, %v3343_v18  ;;  %6221 = vmatprep.mubr.msk.bf16.mxu1 %vm1068_vm10, %v2347_v32  ;;  %v2330_v5 = vsel %vm2298_vm1, %v9360_v29, 0.0  ;;  %v2329_v32 = vsel %vm2297_vm3, %v9361_v1, 0.0  ;;  %v9363_v18 = vld [vmem:[#allocation19_spill] sm:$0xff]  ;;  %v9364_v8 = vld [vmem:[#allocation86_spill] sm:$0xff]  ;;  %vm4198_vm14 = vcmp.ne.f32.partialorder %v4166_v33, 0.0 }
 0x1e2   : > { %v3233_v30 = vpop.permute.xlu1 %3232  ;;  %v3230_v62 = vpop.permute.xlu0 %3229  ;;  %v2331_v25 = vsel %vm2299_vm6, %v9363_v18, 0.0  ;;  %v3345_v35 = vsel %vm3313_vm7, %v9364_v8, 0.0  ;;  %v2348_v27 = vpack.c.bf16 %v2330_v5, %v2329_v32  ;;  %v9367_v5 = vld [vmem:[#allocation87_spill] sm:$0xff]  ;;  %v4168_v32 = vld [vmem:[#allocation2 + $0x768] sm:$0xff]  ;;  %vm2807_vm1 = vcmp.eq.s32.totalorder %v8322_v0, 1 }
 0x1e3   : > { %vm3314_vm11 = vcmp.eq.s32.totalorder %v3230_v62, 1  ;;  %4270 = vperm.xlu1 %6690, %v4225_v37   ;;  %4267 = vperm.xlu0 %6689, %v4224_v51   ;;  %v9365_v62 = vld [vmem:[#allocation85_spill] sm:$0xff]  ;;  %vm3315_vm12 = vcmp.eq.s32.totalorder %v3233_v30, 1  ;;  %v2349_v13 = vpack.c.bf16 %v2332_v57, %v2331_v25  ;;  %vm2806_vm3 = vcmp.eq.s32.totalorder %v8324_v22, 1 }
 0x1e4   : > { %v3346_v37 = vsel %vm3314_vm11, %v9365_v62, 0.0  ;;  %6266 = vmatmul.mubr.msk.bf16.vlgmr.msra.gmra.mrb[0].mxu0 %vm1068_vm10, %v3374_v15  ;;  %v4167_v51 = vld [vmem:[#allocation2 + $0x760] sm:$0xff]  ;;  %v4169_v15 = vld [vmem:[#allocation2 + $0x770] sm:$0xff]  ;;  %v4230_v25 = vsel %vm4198_vm14, 1, %v9168_v47  ;;  %vm4200_vm9 = vcmp.ne.f32.partialorder %v4168_v32, 0.0  ;;  %v4170_v62 = vld [vmem:[#allocation2 + $0x778] sm:$0xff] }
 0x1e5   : > { %v3375_v31 = vpack.c.bf16 %v3346_v37, %v3345_v35  ;;  %6298 = vmatpush3.bf16.msra.mxu0 %v3959_v60  ;;  %vm4199_vm8 = vcmp.ne.f32.partialorder %v4167_v51, 0.0  ;;  %v9366_v60 = vld [vmem:[#allocation88_spill] sm:$0xff]  ;;  %vm4201_vm6 = vcmp.ne.f32.partialorder %v4169_v15, 0.0 }
 0x1e6   : > { %v3239_v29 = vpop.permute.xlu1 %3238  ;;  %v3236_v11 = vpop.permute.xlu0 %3235  ;;  %6665 = vmatprep.subr.msk.bf16.mxu0 %vm1117_vm2, %v8391_v59  ;;  %v3347_v4 = vsel %vm3315_vm12, %v9366_v60, 0.0  ;;  %v4231_v30 = vsel %vm4199_vm8, 1, %v9168_v47  ;;  %v9369_v35 = vld [vmem:[#allocation56_spill] sm:$0xff]  ;;  %v4171_v60 = vld [vmem:[#allocation2 + $0x780] sm:$0xff]  ;;  %v4233_v22 = vsel %vm4201_vm6, 1, %v9168_v47  ;;  %vm2809_vm12 = vcmp.eq.s32.totalorder %v8335_v54, 1 }
 0x1e7   : > { %vm3316_vm13 = vcmp.eq.s32.totalorder %v3236_v11, 1  ;;  %4276 = vperm.xlu1 %6690, %v4227_v55   ;;  %4273 = vperm.xlu0 %6689, %v4226_v39   ;;  %vm3317_vm5 = vcmp.eq.s32.totalorder %v3239_v29, 1  ;;  %v2333_v37 = vsel %vm2301_vm0, %v9369_v35, 0.0  ;;  %v9370_v11 = vld [vmem:[#allocation42_spill] sm:$0xff]  ;;  %v4232_v29 = vsel %vm4200_vm9, 1, %v9168_v47 }
 0x1e8   : > { %v3348_v40 = vsel %vm3316_vm13, %v9367_v5, 0.0  ;;  %6222 = vmatmul.mubr.msk.bf16.gmra.mrb[24].mxu1 %vm1068_vm10, %v2348_v27  ;;  %6269 = vmatprep.mubr.msk.bf16.mxu0 %vm1068_vm10, %v3375_v31  ;;  %v9368_v27 = vld [vmem:[#allocation55_spill] sm:$0xff]  ;;  %v2839_v51 = vsel %vm2807_vm1, %v9370_v11, 0.0  ;;  %vm2808_vm13 = vcmp.eq.s32.totalorder %v8337_v61, 1  ;;  %vm4203_vm14 = vcmp.ne.f32.partialorder %v4171_v60, 0.0  ;;  %v4172_v54 = vld [vmem:[#allocation2 + $0x788] sm:$0xff] }
 0x1e9   : > { %v3376_v55 = vpack.c.bf16 %v3348_v40, %v3347_v4  ;;  %6225 = vmatprep.mubr.msk.bf16.mxu1 %vm1068_vm10, %v2349_v13  ;;  %v2334_v31 = vsel %vm2302_vm15, %v9368_v27, 0.0  ;;  %v9371_v13 = vld [vmem:[#allocation41_spill] sm:$0xff]  ;;  %v9373_v40 = vld [vmem:[#allocation62_spill] sm:$0xff]  ;;  %vm4202_vm15 = vcmp.ne.f32.partialorder %v4170_v62, 0.0  ;;  %v4235_v60 = vsel %vm4203_vm14, 1, %v9168_v47 }
 0x1ea   : > { %v3245_v39 = vpop.permute.xlu1 %3244  ;;  %v3242_v57 = vpop.permute.xlu0 %3241  ;;  %v2838_v33 = vsel %vm2806_vm3, %v9371_v13, 0.0  ;;  %v9372_v4 = vld [vmem:[#allocation89_spill] sm:$0xff]  ;;  %v4234_v62 = vsel %vm4202_vm15, 1, %v9168_v47 }
 0x1eb   : > { %vm3318_vm7 = vcmp.eq.s32.totalorder %v3242_v57, 1  ;;  %4282 = vperm.xlu1 %6690, %v4229_v6   ;;  %4279 = vperm.xlu0 %6689, %v4228_v23   ;;  %v3349_v46 = vsel %vm3317_vm5, %v9372_v4, 0.0  ;;  %vm3319_vm11 = vcmp.eq.s32.totalorder %v3245_v39, 1  ;;  %v2350_v6 = vpack.c.bf16 %v2334_v31, %v2333_v37  ;;  %v9375_v39 = vld [vmem:[#allocation90_spill] sm:$0xff]  ;;  %v9376_v37 = vld [vmem:[#allocation44_spill] sm:$0xff] }
 0x1ec   : > { %v3350_v5 = vsel %vm3318_vm7, %v9373_v40, 0.0  ;;  %6270 = vmatmul.mubr.msk.bf16.gmra.mrb[4].mxu0 %vm1068_vm10, %v3376_v55  ;;  %v2862_v0 = vpack.c.bf16 %v2839_v51, %v2838_v33  ;;  %v2841_v61 = vsel %vm2809_vm12, %v9376_v37, 0.0  ;;  %v9377_v51 = vld [vmem:[#allocation43_spill] sm:$0xff]  ;;  %vm4204_vm5 = vcmp.ne.f32.partialorder %v4172_v54, 0.0 }
 0x1ed   : > { %v3377_v10 = vpack.c.bf16 %v3350_v5, %v3349_v46  ;;  %v9374_v5 = vld [vmem:[#allocation91_spill] sm:$0xff]  ;;  %v2840_v33 = vsel %vm2808_vm13, %v9377_v51, 0.0 }
 0x1ee   : > { %v3251_v23 = vpop.permute.xlu1 %3250  ;;  %v3248_v57 = vpop.permute.xlu0 %3247  ;;  %v3351_v55 = vsel %vm3319_vm11, %v9374_v5, 0.0  ;;  %v9378_v46 = vld [vmem:[#allocation75_spill] sm:$0xff] }
 0x1ef   : > { %vm3320_vm4 = vcmp.eq.s32.totalorder %v3248_v57, 1  ;;  %4288 = vperm.xlu1 %6690, %v4231_v30   ;;  %4285 = vperm.xlu0 %6689, %v4230_v25   ;;  %vm3321_vm8 = vcmp.eq.s32.totalorder %v3251_v23, 1  ;;  %v4173_v25 = vld [vmem:[#allocation2 + $0x790] sm:$0xff] }
 0x1f0   : > { %v3352_v31 = vsel %vm3320_vm4, %v9375_v39, 0.0  ;;  %6226 = vmatmul.mubr.msk.bf16.gmra.mrb[28].mxu1 %vm1068_vm10, %v2350_v6  ;;  %6273 = vmatprep.mubr.msk.bf16.mxu0 %vm1068_vm10, %v3377_v10  ;;  %v3353_v6 = vsel %vm3321_vm8, %v9378_v46, 0.0  ;;  %v9379_v10 = vld [vmem:[#allocation74_spill] sm:$0xff]  ;;  %vm4205_vm3 = vcmp.ne.f32.partialorder %v4173_v25, 0.0  ;;  %v9381_v46 = vld [vmem:[#allocation92_spill] sm:$0xff]  ;;  %v4236_v25 = vsel %vm4204_vm5, 1, %v9168_v47 }
 0x1f1   : > { %v3378_v30 = vpack.c.bf16 %v3352_v31, %v3351_v55  ;;  %6247 = vmatprep.mubr.msk.bf16.mxu1 %vm1068_vm10, %v2862_v0  ;;  %v2863_v0 = vpack.c.bf16 %v2841_v61, %v2840_v33 }
 0x1f2   : > { %v3257_v15 = vpop.permute.xlu1 %3256  ;;  %v3254_v32 = vpop.permute.xlu0 %3253 }
 0x1f3   : > { %vm3322_vm0 = vcmp.eq.s32.totalorder %v3254_v32, 1  ;;  %4294 = vperm.xlu1 %6690, %v4233_v22   ;;  %4291 = vperm.xlu0 %6689, %v4232_v29   ;;  %vm3323_vm1 = vcmp.eq.s32.totalorder %v3257_v15, 1  ;;  %v4175_v32 = vld [vmem:[#allocation2 + $0x7a0] sm:$0xff]  ;;  %v4174_v22 = vld [vmem:[#allocation2 + $0x798] sm:$0xff]  ;;  %v4237_v15 = vsel %vm4205_vm3, 1, %v9168_v47 }
 0x1f4   : > { %v3354_v23 = vsel %vm3322_vm0, %v9379_v10, 0.0  ;;  %6274 = vmatmul.mubr.msk.bf16.gmra.mrb[8].mxu0 %vm1068_vm10, %v3378_v30  ;;  %v9380_v29 = vld [vmem:[#allocation93_spill] sm:$0xff]  ;;  %vm4207_vm9 = vcmp.ne.f32.partialorder %v4175_v32, 0.0  ;;  %vm4206_vm11 = vcmp.ne.f32.partialorder %v4174_v22, 0.0 }
 0x1f5   : > { %v3379_v57 = vpack.c.bf16 %v3354_v23, %v3353_v6  ;;  %v3355_v10 = vsel %vm3323_vm1, %v9380_v29, 0.0  ;;  %v4177_v6 = vld [vmem:[#allocation2 + $0x7b0] sm:$0xff]  ;;  %v4176_v23 = vld [vmem:[#allocation2 + $0x7a8] sm:$0xff] }
 0x1f6   : > { %v3263_v55 = vpop.permute.xlu1 %3262  ;;  %v3260_v31 = vpop.permute.xlu0 %3259  ;;  %vm4209_vm13 = vcmp.ne.f32.partialorder %v4177_v6, 0.0  ;;  %vm4208_vm8 = vcmp.ne.f32.partialorder %v4176_v23, 0.0 }
 0x1f7   : > { %vm3324_vm6 = vcmp.eq.s32.totalorder %v3260_v31, 1  ;;  %4300 = vperm.xlu1 %6690, %v4235_v60   ;;  %4297 = vperm.xlu0 %6689, %v4234_v62   ;;  %vm3325_vm7 = vcmp.eq.s32.totalorder %v3263_v55, 1  ;;  %v9382_v60 = vld [vmem:[#allocation95_spill] sm:$0xff]  ;;  %v4238_v55 = vsel %vm4206_vm11, 1, %v9168_v47 }
 0x1f8   : > { %v3356_v30 = vsel %vm3324_vm6, %v9381_v46, 0.0  ;;  %6248 = vmatmul.mubr.msk.bf16.vlgmr.msra.gmra.mrb[16].mxu1 %vm1068_vm10, %v2863_v0  ;;  %6277 = vmatprep.mubr.msk.bf16.mxu0 %vm1068_vm10, %v3379_v57  ;;  %v3357_v62 = vsel %vm3325_vm7, %v9382_v60, 0.0  ;;  %v9383_v0 = vld [vmem:[#allocation94_spill] sm:$0xff]  ;;  %v4239_v57 = vsel %vm4207_vm9, 1, %v9168_v47 }
 0x1f9   : > { %v3380_v54 = vpack.c.bf16 %v3356_v30, %v3355_v10  ;;  %v4179_v30 = vld [vmem:[#allocation2 + $0x7c0] sm:$0xff] }
 0x1fa   : > { %v3269_v61 = vpop.permute.xlu1 %3268  ;;  %v3266_v33 = vpop.permute.xlu0 %3265  ;;  %vm4211_vm0 = vcmp.ne.f32.partialorder %v4179_v30, 0.0 }
 0x1fb   : > { %vm3326_vm4 = vcmp.eq.s32.totalorder %v3266_v33, 1  ;;  %4306 = vperm.xlu1 %6690, %v4237_v15   ;;  %4303 = vperm.xlu0 %6689, %v4236_v25   ;;  %vm3327_vm12 = vcmp.eq.s32.totalorder %v3269_v61, 1  ;;  %v4178_v33 = vld [vmem:[#allocation2 + $0x7b8] sm:$0xff]  ;;  %v9384_v15 = vld [vmem:[#allocation97_spill] sm:$0xff]  ;;  %v4240_v61 = vsel %vm4208_vm8, 1, %v9168_v47 }
 0x1fc   : > { %v3358_v31 = vsel %vm3326_vm4, %v9383_v0, 0.0  ;;  %6278 = vmatmul.mubr.msk.bf16.gmra.mrb[12].mxu0 %vm1068_vm10, %v3380_v54  ;;  %v3359_v25 = vsel %vm3327_vm12, %v9384_v15, 0.0  ;;  %v9385_v0 = vld [vmem:[#allocation96_spill] sm:$0xff]  ;;  %v4241_v54 = vsel %vm4209_vm13, 1, %v9168_v47  ;;  %vm4210_vm1 = vcmp.ne.f32.partialorder %v4178_v33, 0.0 }
 0x1fd   : > { %v3381_v10 = vpack.c.bf16 %v3358_v31, %v3357_v62  ;;  %v4181_v31 = vld [vmem:[#allocation2 + $0x7d0] sm:$0xff] }
 0x1fe   : > { %v3275_v32 = vpop.permute.xlu1 %3274  ;;  %v3272_v22 = vpop.permute.xlu0 %3271  ;;  %vm4213_vm6 = vcmp.ne.f32.partialorder %v4181_v31, 0.0 }
 0x1ff   : > { %vm3328_vm14 = vcmp.eq.s32.totalorder %v3272_v22, 1  ;;  %4312 = vperm.xlu1 %6690, %v4239_v57   ;;  %4309 = vperm.xlu0 %6689, %v4238_v55   ;;  %vm3329_vm15 = vcmp.eq.s32.totalorder %v3275_v32, 1  ;;  %v4180_v22 = vld [vmem:[#allocation2 + $0x7c8] sm:$0xff]  ;;  %v4242_v32 = vsel %vm4210_vm1, 1, %v9168_v47 }
 0x200   : > { %v3360_v60 = vsel %vm3328_vm14, %v9385_v0, 0.0  ;;  %6281 = vmatprep.mubr.msk.bf16.mxu0 %vm1068_vm10, %v3381_v10  ;;  %v3361_v57 = vsel %vm3329_vm15, %v8072_v52, 0.0  ;;  %v4243_v10 = vsel %vm4211_vm0, 1, %v9168_v47  ;;  %vm4212_vm7 = vcmp.ne.f32.partialorder %v4180_v22, 0.0 }
 0x201   : > { %v3382_v6 = vpack.c.bf16 %v3360_v60, %v3359_v25  ;;  %v4183_v25 = vld [vmem:[#allocation2 + $0x7e0] sm:$0xff] }
 0x202   : > { %v3281_v23 = vpop.permute.xlu1 %3280  ;;  %v3278_v62 = vpop.permute.xlu0 %3277  ;;  %vm4215_vm4 = vcmp.ne.f32.partialorder %v4183_v25, 0.0 }
 0x203   : > { %vm3330_vm3 = vcmp.eq.s32.totalorder %v3278_v62, 1  ;;  %4318 = vperm.xlu1 %6690, %v4241_v54   ;;  %4315 = vperm.xlu0 %6689, %v4240_v61   ;;  %vm3331_vm5 = vcmp.eq.s32.totalorder %v3281_v23, 1  ;;  %v4182_v62 = vld [vmem:[#allocation2 + $0x7d8] sm:$0xff]  ;;  %v9386_v61 = vld [vmem:[#allocation98_spill] sm:$0xff]  ;;  %v4244_v23 = vsel %vm4212_vm7, 1, %v9168_v47 }
 0x204   : > { %v3362_v55 = vsel %vm3330_vm3, %v8068_v14, 0.0  ;;  %6282 = vmatmul.mubr.msk.bf16.gmra.mrb[16].mxu0 %vm1068_vm10, %v3382_v6  ;;  %v3363_v54 = vsel %vm3331_vm5, %v8084_v56, 0.0  ;;  %v4245_v6 = vsel %vm4213_vm6, 1, %v9168_v47  ;;  %vm4214_vm12 = vcmp.ne.f32.partialorder %v4182_v62, 0.0 }
 0x205   : > { %v3383_v60 = vpack.c.bf16 %v3362_v55, %v3361_v57  ;;  %v4185_v55 = vld [vmem:[#allocation2 + $0x7f0] sm:$0xff] }
 0x206   : > { %v3287_v30 = vpop.permute.xlu1 %3286  ;;  %v3284_v33 = vpop.permute.xlu0 %3283  ;;  %vm4217_vm14 = vcmp.ne.f32.partialorder %v4185_v55, 0.0 }
 0x207   : > { %vm3332_vm9 = vcmp.eq.s32.totalorder %v3284_v33, 1  ;;  %4324 = vperm.xlu1 %6690, %v4243_v10   ;;  %4321 = vperm.xlu0 %6689, %v4242_v32   ;;  %vm3333_vm11 = vcmp.eq.s32.totalorder %v3287_v30, 1  ;;  %v4184_v33 = vld [vmem:[#allocation2 + $0x7e8] sm:$0xff]  ;;  %v4246_v30 = vsel %vm4214_vm12, 1, %v9168_v47 }
 0x208   : > { %v3364_v14 = vsel %vm3332_vm9, %v9386_v61, 0.0  ;;  %6285 = vmatprep.mubr.msk.bf16.mxu0 %vm1068_vm10, %v3383_v60  ;;  %v3365_v10 = vsel %vm3333_vm11, %v8126_v48, 0.0  ;;  %v4247_v60 = vsel %vm4215_vm4, 1, %v9168_v47  ;;  %vm4216_vm15 = vcmp.ne.f32.partialorder %v4184_v33, 0.0 }
 0x209   : > { %v3384_v31 = vpack.c.bf16 %v3364_v14, %v3363_v54  ;;  %v4674_v54 = vld [vmem:[#allocation2 + $0x800] sm:$0xff] }
 0x20a   : > { %v3293_v22 = vpop.permute.xlu1 %3292  ;;  %v3290_v57 = vpop.permute.xlu0 %3289  ;;  %vm4706_vm3 = vcmp.ne.f32.partialorder %v4674_v54, 0.0 }
 0x20b   : > { %vm3334_vm13 = vcmp.eq.s32.totalorder %v3290_v57, 1  ;;  %4330 = vperm.xlu1 %6690, %v4245_v6   ;;  %4327 = vperm.xlu0 %6689, %v4244_v23   ;;  %vm3335_vm8 = vcmp.eq.s32.totalorder %v3293_v22, 1  ;;  %v4186_v57 = vld [vmem:[#allocation2 + $0x7f8] sm:$0xff]  ;;  %v9387_v23 = vld [vmem:[#allocation99_spill] sm:$0xff]  ;;  %v4248_v22 = vsel %vm4216_vm15, 1, %v9168_v47 }
 0x20c   : > { %v3366_v32 = vsel %vm3334_vm13, %v8122_v21, 0.0  ;;  %6286 = vmatmul.mubr.msk.bf16.gmra.mrb[20].mxu0 %vm1068_vm10, %v3384_v31  ;;  %v3367_v6 = vsel %vm3335_vm8, %v8138_v43, 0.0  ;;  %v4249_v31 = vsel %vm4217_vm14, 1, %v9168_v47  ;;  %vm4218_vm5 = vcmp.ne.f32.partialorder %v4186_v57, 0.0 }
 0x20d   : > { %v3385_v14 = vpack.c.bf16 %v3366_v32, %v3365_v10  ;;  %v4676_v32 = vld [vmem:[#allocation2 + $0x810] sm:$0xff] }
 0x20e   : > { %v3299_v25 = vpop.permute.xlu1 %3298  ;;  %v3296_v62 = vpop.permute.xlu0 %3295  ;;  %vm4708_vm9 = vcmp.ne.f32.partialorder %v4676_v32, 0.0 }
 0x20f   : > { %vm3336_vm0 = vcmp.eq.s32.totalorder %v3296_v62, 1  ;;  %4336 = vperm.xlu1 %6690, %v4247_v60   ;;  %4333 = vperm.xlu0 %6689, %v4246_v30   ;;  %vm3337_vm1 = vcmp.eq.s32.totalorder %v3299_v25, 1  ;;  %v4675_v62 = vld [vmem:[#allocation2 + $0x808] sm:$0xff]  ;;  %v4250_v25 = vsel %vm4218_vm5, 1, %v9168_v47 }
 0x210   : > { %v3368_v48 = vsel %vm3336_vm0, %v9387_v23, 0.0  ;;  %6289 = vmatprep.mubr.msk.bf16.mxu0 %vm1068_vm10, %v3385_v14  ;;  %v3369_v60 = vsel %vm3337_vm1, %v8173_v42, 0.0  ;;  %v4738_v14 = vsel %vm4706_vm3, 1, %v9168_v47  ;;  %vm4707_vm11 = vcmp.ne.f32.partialorder %v4675_v62, 0.0  ;;  %v9389_v42 = vld [vmem:[#allocation20_spill] sm:$0xff] }
 0x211   : > { %v3386_v55 = vpack.c.bf16 %v3368_v48, %v3367_v6  ;;  %v4678_v6 = vld [vmem:[#allocation2 + $0x820] sm:$0xff] }
 0x212   : > { %v3305_v33 = vpop.permute.xlu1 %3304  ;;  %v3302_v10 = vpop.permute.xlu0 %3301  ;;  %vm4710_vm13 = vcmp.ne.f32.partialorder %v4678_v6, 0.0 }
 0x213   : > { %vm3338_vm6 = vcmp.eq.s32.totalorder %v3302_v10, 1  ;;  %4342 = vperm.xlu1 %6690, %v4249_v31   ;;  %4339 = vperm.xlu0 %6689, %v4248_v22   ;;  %vm3339_vm7 = vcmp.eq.s32.totalorder %v3305_v33, 1  ;;  %v4677_v10 = vld [vmem:[#allocation2 + $0x818] sm:$0xff]  ;;  %v9388_v31 = vld [vmem:[#allocation82_spill] sm:$0xff]  ;;  %v4739_v33 = vsel %vm4707_vm11, 1, %v9168_v47 }
 0x214   : > { %v3370_v30 = vsel %vm3338_vm6, %v8169_v58, 0.0  ;;  %6290 = vmatmul.mubr.msk.bf16.gmra.mrb[24].mxu0 %vm1068_vm10, %v3386_v55  ;;  %v3371_v22 = vsel %vm3339_vm7, %v9388_v31, 0.0  ;;  %v4740_v55 = vsel %vm4708_vm9, 1, %v9168_v47  ;;  %vm4709_vm8 = vcmp.ne.f32.partialorder %v4677_v10, 0.0 }
 0x215   : > { %v3387_v48 = vpack.c.bf16 %v3370_v30, %v3369_v60  ;;  %v4680_v30 = vld [vmem:[#allocation2 + $0x830] sm:$0xff] }
 0x216   : > { %v3734_v54 = vpop.permute.xlu1 %3733  ;;  %v3308_v57 = vpop.permute.xlu0 %3307  ;;  %vm4712_vm0 = vcmp.ne.f32.partialorder %v4680_v30, 0.0 }
 0x217   : > { %vm3340_vm4 = vcmp.eq.s32.totalorder %v3308_v57, 1  ;;  %4771 = vperm.xlu1 %6690, %v4738_v14   ;;  %4345 = vperm.xlu0 %6689, %v4250_v25   ;;  %vm3828_vm12 = vcmp.eq.s32.totalorder %v3734_v54, 1  ;;  %v4679_v57 = vld [vmem:[#allocation2 + $0x828] sm:$0xff]  ;;  %v4741_v54 = vsel %vm4709_vm8, 1, %v9168_v47 }
 0x218   : > { %v3372_v58 = vsel %vm3340_vm4, %v9389_v42, 0.0  ;;  %6293 = vmatprep.mubr.msk.bf16.mxu0 %vm1068_vm10, %v3387_v48  ;;  %v3860_v14 = vsel %vm3828_vm12, %v9321_v3, 0.0  ;;  %v4742_v48 = vsel %vm4710_vm13, 1, %v9168_v47  ;;  %vm4711_vm1 = vcmp.ne.f32.partialorder %v4679_v57, 0.0  ;;  %v9390_v3 = vld [vmem:[#allocation65_spill] sm:$0xff] }
 0x219   : > { %v3388_v32 = vpack.c.bf16 %v3372_v58, %v3371_v22  ;;  %v4682_v22 = vld [vmem:[#allocation2 + $0x840] sm:$0xff] }
 0x21a   : > { %v3740_v62 = vpop.permute.xlu1 %3739  ;;  %v3737_v60 = vpop.permute.xlu0 %3736  ;;  %vm4714_vm6 = vcmp.ne.f32.partialorder %v4682_v22, 0.0 }
 0x21b   : > { %vm3829_vm14 = vcmp.eq.s32.totalorder %v3737_v60, 1  ;;  %4777 = vperm.xlu1 %6690, %v4740_v55   ;;  %4774 = vperm.xlu0 %6689, %v4739_v33   ;;  %vm3830_vm15 = vcmp.eq.s32.totalorder %v3740_v62, 1  ;;  %v4681_v60 = vld [vmem:[#allocation2 + $0x838] sm:$0xff]  ;;  %v4743_v62 = vsel %vm4711_vm1, 1, %v9168_v47  ;;  %v4746_v22 = vsel %vm4714_vm6, 1, %v9168_v47 }
 0x21c   : > { %v3861_v25 = vsel %vm3829_vm14, %v9320_v2, 0.0  ;;  %6294 = vmatmul.mubr.msk.bf16.gmra.mrb[28].mxu0 %vm1068_vm10, %v3388_v32  ;;  %v3862_v55 = vsel %vm3830_vm15, %v9390_v3, 0.0  ;;  %v9391_v2 = vld [vmem:[#allocation64_spill] sm:$0xff]  ;;  %v4744_v32 = vsel %vm4712_vm0, 1, %v9168_v47  ;;  %vm4713_vm7 = vcmp.ne.f32.partialorder %v4681_v60, 0.0 }
 0x21d   : > { %v3892_v58 = vpack.c.bf16 %v3861_v25, %v3860_v14  ;;  %v4684_v25 = vld [vmem:[#allocation2 + $0x850] sm:$0xff]  ;;  %v4745_v60 = vsel %vm4713_vm7, 1, %v9168_v47 }
 0x21e   : > { %v3746_v6 = vpop.permute.xlu1 %3745  ;;  %v3743_v10 = vpop.permute.xlu0 %3742  ;;  %vm4716_vm4 = vcmp.ne.f32.partialorder %v4684_v25, 0.0  ;;  %v4688_v25 = vld [vmem:[#allocation2 + $0x870] sm:$0xff] }
 0x21f   : > { %vm3831_vm3 = vcmp.eq.s32.totalorder %v3743_v10, 1  ;;  %4783 = vperm.xlu1 %6690, %v4742_v48   ;;  %4780 = vperm.xlu0 %6689, %v4741_v54   ;;  %vm3832_vm5 = vcmp.eq.s32.totalorder %v3746_v6, 1  ;;  %v4683_v10 = vld [vmem:[#allocation2 + $0x848] sm:$0xff]  ;;  %v4478_v48 = vsel %vm1117_vm2, %v8391_v59, 0  ;;  %v8518_v54 = vld [vmem:[%s8926_s3 + $0x10] sm:$0x3] }
 0x220   : > { %v3863_v33 = vsel %vm3831_vm3, %v9391_v2, 0.0  ;;  %6299 = vmatprep.mubr.msk.bf16.mxu0 %vm1068_vm10, %v3892_v58  ;;  %v3864_v58 = vsel %vm3832_vm5, %v9328_v36, 0.0  ;;  %vm4715_vm12 = vcmp.ne.f32.partialorder %v4683_v10, 0.0  ;;  %v4686_v2 = vld [vmem:[#allocation2 + $0x860] sm:$0xff]  ;;  %v4687_v10 = vld [vmem:[#allocation2 + $0x868] sm:$0xff]  ;;  %vm4720_vm3 = vcmp.ne.f32.partialorder %v4688_v25, 0.0 }
 0x221   : > { %v3893_v30 = vpack.c.bf16 %v3863_v33, %v3862_v55  ;;  %v4685_v33 = vld [vmem:[#allocation2 + $0x858] sm:$0xff]  ;;  %vm4718_vm14 = vcmp.ne.f32.partialorder %v4686_v2, 0.0  ;;  %vm4719_vm5 = vcmp.ne.f32.partialorder %v4687_v10, 0.0 }
 0x222   : > { %v3752_v57 = vpop.permute.xlu1 %3751  ;;  %v3749_v14 = vpop.permute.xlu0 %3748  ;;  %vm4717_vm15 = vcmp.ne.f32.partialorder %v4685_v33, 0.0  ;;  %v4751_v2 = vsel %vm4719_vm5, 1, %v9168_v47 }
 0x223   : > { %vm3833_vm9 = vcmp.eq.s32.totalorder %v3749_v14, 1  ;;  %4789 = vperm.xlu1 %6690, %v4744_v32   ;;  %4786 = vperm.xlu0 %6689, %v4743_v62   ;;  %vm3834_vm11 = vcmp.eq.s32.totalorder %v3752_v57, 1  ;;  %v4748_v32 = vsel %vm4716_vm4, 1, %v9168_v47  ;;  %v4747_v62 = vsel %vm4715_vm12, 1, %v9168_v47 }
 0x224   : > { %v3865_v6 = vsel %vm3833_vm9, %v9327_v12, 0.0  ;;  %6300 = vmatmul.mubr.msk.bf16.vlgmr.msra.gmra.mrb[0].mxu0 %vm1068_vm10, %v3893_v30  ;;  %v3866_v12 = vsel %vm3834_vm11, %v9330_v16, 0.0 }
 0x225   : > { %v3894_v59 = vpack.c.bf16 %v3865_v6, %v3864_v58  ;;  %6332 = vmatpush3.bf16.msra.mxu0 %v4478_v48  ;;  %v4750_v48 = vsel %vm4718_vm14, 1, %v9168_v47  ;;  %v4749_v58 = vsel %vm4717_vm15, 1, %v9168_v47 }
 0x226   : > { %v3758_v3 = vpop.permute.xlu1 %3757  ;;  %v3755_v55 = vpop.permute.xlu0 %3754  ;;  %6666 = vmatprep.subr.msk.bf16.mxu0 %vm1117_vm2, %v8518_v54 }
 0x227   : > { %vm3835_vm13 = vcmp.eq.s32.totalorder %v3755_v55, 1  ;;  %4795 = vperm.xlu1 %6690, %v4746_v22   ;;  %4792 = vperm.xlu0 %6689, %v4745_v60   ;;  %vm3836_vm8 = vcmp.eq.s32.totalorder %v3758_v3, 1  ;;  %v4689_v3 = vld [vmem:[#allocation2 + $0x878] sm:$0xff]  ;;  %v4752_v55 = vsel %vm4720_vm3, 1, %v9168_v47 }
 0x228   : > { %v3867_v36 = vsel %vm3835_vm13, %v9329_v41, 0.0  ;;  %6303 = vmatprep.mubr.msk.bf16.mxu0 %vm1068_vm10, %v3894_v59  ;;  %v3868_v16 = vsel %vm3836_vm8, %v9333_v17, 0.0  ;;  %v4690_v59 = vld [vmem:[#allocation2 + $0x880] sm:$0xff]  ;;  %vm4721_vm11 = vcmp.ne.f32.partialorder %v4689_v3, 0.0 }
 0x229   : > { %v3895_v30 = vpack.c.bf16 %v3867_v36, %v3866_v12  ;;  %vm4722_vm9 = vcmp.ne.f32.partialorder %v4690_v59, 0.0  ;;  %v4695_v59 = vld [vmem:[#allocation2 + $0x8a8] sm:$0xff]  ;;  %v4694_v3 = vld [vmem:[#allocation2 + $0x8a0] sm:$0xff] }
 0x22a   : > { %v3764_v57 = vpop.permute.xlu1 %3763  ;;  %v3761_v14 = vpop.permute.xlu0 %3760 }
 0x22b   : > { %vm3837_vm0 = vcmp.eq.s32.totalorder %v3761_v14, 1  ;;  %4801 = vperm.xlu1 %6690, %v4748_v32   ;;  %4798 = vperm.xlu0 %6689, %v4747_v62   ;;  %vm3838_vm1 = vcmp.eq.s32.totalorder %v3764_v57, 1  ;;  %v4692_v32 = vld [vmem:[#allocation2 + $0x890] sm:$0xff]  ;;  %v4691_v62 = vld [vmem:[#allocation2 + $0x888] sm:$0xff]  ;;  %v4753_v57 = vsel %vm4721_vm11, 1, %v9168_v47 }
 0x22c   : > { %v3869_v41 = vsel %vm3837_vm0, %v9332_v9, 0.0  ;;  %6304 = vmatmul.mubr.msk.bf16.gmra.mrb[4].mxu0 %vm1068_vm10, %v3895_v30  ;;  %v3870_v17 = vsel %vm3838_vm1, %v9335_v45, 0.0  ;;  %v4754_v30 = vsel %vm4722_vm9, 1, %v9168_v47  ;;  %vm4724_vm13 = vcmp.ne.f32.partialorder %v4692_v32, 0.0 }
 0x22d   : > { %v3896_v6 = vpack.c.bf16 %v3869_v41, %v3868_v16  ;;  %vm4723_vm8 = vcmp.ne.f32.partialorder %v4691_v62, 0.0  ;;  %v2619_v16 = vld [vmem:[#allocation2 + $0x4a8] sm:$0xff]  ;;  %v4693_v41 = vld [vmem:[#allocation2 + $0x898] sm:$0xff] }
 0x22e   : > { %v3770_v22 = vpop.permute.xlu1 %3769  ;;  %v3767_v60 = vpop.permute.xlu0 %3766  ;;  %vm2651_vm0 = vcmp.ne.f32.partialorder %v2619_v16, 0.0  ;;  %vm4725_vm1 = vcmp.ne.f32.partialorder %v4693_v41, 0.0 }
 0x22f   : > { %vm3839_vm6 = vcmp.eq.s32.totalorder %v3767_v60, 1  ;;  %4807 = vperm.xlu1 %6690, %v4750_v48   ;;  %4804 = vperm.xlu0 %6689, %v4749_v58   ;;  %vm3840_vm7 = vcmp.eq.s32.totalorder %v3770_v22, 1  ;;  %v4756_v48 = vsel %vm4724_vm13, 1, %v9168_v47  ;;  %v4755_v58 = vsel %vm4723_vm8, 1, %v9168_v47 }
 0x230   : > { %v3871_v9 = vsel %vm3839_vm6, %v9334_v24, 0.0  ;;  %6307 = vmatprep.mubr.msk.bf16.mxu0 %vm1068_vm10, %v3896_v6  ;;  %v3872_v45 = vsel %vm3840_vm7, %v9342_v19, 0.0  ;;  %vm4727_vm6 = vcmp.ne.f32.partialorder %v4695_v59, 0.0  ;;  %vm4726_vm7 = vcmp.ne.f32.partialorder %v4694_v3, 0.0  ;;  %v4699_v3 = vld [vmem:[#allocation2 + $0x8c8] sm:$0xff] }
 0x231   : > { %v3897_v33 = vpack.c.bf16 %v3871_v9, %v3870_v17  ;;  %v2683_v17 = vsel %vm2651_vm0, 1, %v9168_v47  ;;  %v4757_v9 = vsel %vm4725_vm1, 1, %v9168_v47  ;;  %v4759_v32 = vsel %vm4727_vm6, 1, %v9168_v47 }
 0x232   : > { %v3776_v12 = vpop.permute.xlu1 %3775  ;;  %v3773_v36 = vpop.permute.xlu0 %3772  ;;  %v4758_v62 = vsel %vm4726_vm7, 1, %v9168_v47 }
 0x233   : > { %vm3841_vm4 = vcmp.eq.s32.totalorder %v3773_v36, 1  ;;  %4813 = vperm.xlu1 %6690, %v4752_v55   ;;  %4810 = vperm.xlu0 %6689, %v4751_v2   ;;  %vm3842_vm12 = vcmp.eq.s32.totalorder %v3776_v12, 1  ;;  %v2621_v12 = vld [vmem:[#allocation2 + $0x4b8] sm:$0xff]  ;;  %v2620_v36 = vld [vmem:[#allocation2 + $0x4b0] sm:$0xff] }
 0x234   : > { %v3873_v24 = vsel %vm3841_vm4, %v9341_v7, 0.0  ;;  %6308 = vmatmul.mubr.msk.bf16.gmra.mrb[8].mxu0 %vm1068_vm10, %v3897_v33  ;;  %v3874_v19 = vsel %vm3842_vm12, %v9344_v38, 0.0  ;;  %vm2653_vm4 = vcmp.ne.f32.partialorder %v2621_v12, 0.0  ;;  %vm2652_vm12 = vcmp.ne.f32.partialorder %v2620_v36, 0.0  ;;  %v2625_v12 = vld [vmem:[#allocation2 + $0x4d8] sm:$0xff]  ;;  %v2624_v36 = vld [vmem:[#allocation2 + $0x4d0] sm:$0xff] }
 0x235   : > { %v3898_v14 = vpack.c.bf16 %v3873_v24, %v3872_v45 }
 0x236   : > { %v3782_v25 = vpop.permute.xlu1 %3781  ;;  %v3779_v10 = vpop.permute.xlu0 %3778 }
 0x237   : > { %vm3843_vm14 = vcmp.eq.s32.totalorder %v3779_v10, 1  ;;  %4819 = vperm.xlu1 %6690, %v4754_v30   ;;  %4816 = vperm.xlu0 %6689, %v4753_v57   ;;  %vm3844_vm15 = vcmp.eq.s32.totalorder %v3782_v25, 1  ;;  %v4697_v57 = vld [vmem:[#allocation2 + $0x8b8] sm:$0xff]  ;;  %v2685_v25 = vsel %vm2653_vm4, 1, %v9168_v47  ;;  %v2684_v10 = vsel %vm2652_vm12, 1, %v9168_v47 }
 0x238   : > { %v3875_v7 = vsel %vm3843_vm14, %v9343_v49, 0.0  ;;  %6311 = vmatprep.mubr.msk.bf16.mxu0 %vm1068_vm10, %v3898_v14  ;;  %v3876_v38 = vsel %vm3844_vm15, %v9348_v44, 0.0  ;;  %v4696_v14 = vld [vmem:[#allocation2 + $0x8b0] sm:$0xff]  ;;  %vm4729_vm14 = vcmp.ne.f32.partialorder %v4697_v57, 0.0  ;;  %v4701_v57 = vld [vmem:[#allocation2 + $0x8d8] sm:$0xff] }
 0x239   : > { %v3899_v6 = vpack.c.bf16 %v3875_v7, %v3874_v19  ;;  %vm4728_vm15 = vcmp.ne.f32.partialorder %v4696_v14, 0.0  ;;  %v2623_v7 = vld [vmem:[#allocation2 + $0x4c8] sm:$0xff]  ;;  %v4700_v14 = vld [vmem:[#allocation2 + $0x8d0] sm:$0xff] }
 0x23a   : > { %v3788_v22 = vpop.permute.xlu1 %3787  ;;  %v3785_v60 = vpop.permute.xlu0 %3784 }
 0x23b   : > { %vm3845_vm3 = vcmp.eq.s32.totalorder %v3785_v60, 1  ;;  %4825 = vperm.xlu1 %6690, %v4756_v48   ;;  %4822 = vperm.xlu0 %6689, %v4755_v58   ;;  %vm3846_vm5 = vcmp.eq.s32.totalorder %v3788_v22, 1  ;;  %v2622_v48 = vld [vmem:[#allocation2 + $0x4c0] sm:$0xff]  ;;  %v4761_v58 = vsel %vm4729_vm14, 1, %v9168_v47 }
 0x23c   : > { %v3877_v49 = vsel %vm3845_vm3, %v9347_v34, 0.0  ;;  %6312 = vmatmul.mubr.msk.bf16.gmra.mrb[12].mxu0 %vm1068_vm10, %v3899_v6  ;;  %v3878_v44 = vsel %vm3846_vm5, %v9350_v50, 0.0  ;;  %v4760_v6 = vsel %vm4728_vm15, 1, %v9168_v47  ;;  %vm2655_vm3 = vcmp.ne.f32.partialorder %v2623_v7, 0.0  ;;  %v2626_v7 = vld [vmem:[#allocation2 + $0x4e0] sm:$0xff] }
 0x23d   : > { %v3900_v55 = vpack.c.bf16 %v3877_v49, %v3876_v38  ;;  %vm2654_vm5 = vcmp.ne.f32.partialorder %v2622_v48, 0.0  ;;  %v4698_v38 = vld [vmem:[#allocation2 + $0x8c0] sm:$0xff] }
 0x23e   : > { %v3794_v2 = vpop.permute.xlu1 %3793  ;;  %v3791_v33 = vpop.permute.xlu0 %3790 }
 0x23f   : > { %vm3847_vm9 = vcmp.eq.s32.totalorder %v3791_v33, 1  ;;  %2758 = vperm.xlu1 %6690, %v2683_v17   ;;  %4828 = vperm.xlu0 %6689, %v4757_v9   ;;  %vm3848_vm11 = vcmp.eq.s32.totalorder %v3794_v2, 1  ;;  %v2687_v17 = vsel %vm2655_vm3, 1, %v9168_v47  ;;  %v2686_v9 = vsel %vm2654_vm5, 1, %v9168_v47 }
 0x240   : > { %v3879_v34 = vsel %vm3847_vm9, %v9349_v26, 0.0  ;;  %6315 = vmatprep.mubr.msk.bf16.mxu0 %vm1068_vm10, %v3900_v55  ;;  %v3880_v50 = vsel %vm3848_vm11, %v9353_v28, 0.0  ;;  %vm4731_vm9 = vcmp.ne.f32.partialorder %v4699_v3, 0.0  ;;  %vm4730_vm11 = vcmp.ne.f32.partialorder %v4698_v38, 0.0  ;;  %v4702_v3 = vld [vmem:[#allocation2 + $0x8e0] sm:$0xff]  ;;  %v9396_v38 = vld [vmem:[#allocation27_spill] sm:$0xff] }
 0x241   : > { %v3901_v45 = vpack.c.bf16 %v3879_v34, %v3878_v44  ;;  %v9393_v44 = vld [vmem:[#allocation18_spill] sm:$0xff] }
 0x242   : > { %v3800_v24 = vpop.permute.xlu1 %3799  ;;  %v3797_v30 = vpop.permute.xlu0 %3796 }
 0x243   : > { %vm3849_vm13 = vcmp.eq.s32.totalorder %v3797_v30, 1  ;;  %4834 = vperm.xlu1 %6690, %v4759_v32   ;;  %4831 = vperm.xlu0 %6689, %v4758_v62   ;;  %vm3850_vm8 = vcmp.eq.s32.totalorder %v3800_v24, 1  ;;  %v4763_v32 = vsel %vm4731_vm9, 1, %v9168_v47  ;;  %v4762_v62 = vsel %vm4730_vm11, 1, %v9168_v47 }
 0x244   : > { %v3881_v26 = vsel %vm3849_vm13, %v9352_v53, 0.0  ;;  %6316 = vmatmul.mubr.msk.bf16.gmra.mrb[16].mxu0 %vm1068_vm10, %v3901_v45  ;;  %v3882_v28 = vsel %vm3850_vm8, %v9355_v63, 0.0  ;;  %vm2657_vm13 = vcmp.ne.f32.partialorder %v2625_v12, 0.0  ;;  %vm2656_vm8 = vcmp.ne.f32.partialorder %v2624_v36, 0.0  ;;  %v2629_v12 = vld [vmem:[#allocation2 + $0x4f8] sm:$0xff]  ;;  %v2628_v36 = vld [vmem:[#allocation2 + $0x4f0] sm:$0xff] }
 0x245   : > { %v3902_v16 = vpack.c.bf16 %v3881_v26, %v3880_v50  ;;  %v2689_v26 = vsel %vm2657_vm13, 1, %v9168_v47 }
 0x246   : > { %v3806_v41 = vpop.permute.xlu1 %3805  ;;  %v3803_v19 = vpop.permute.xlu0 %3802 }
 0x247   : > { %vm3851_vm0 = vcmp.eq.s32.totalorder %v3803_v19, 1  ;;  %2764 = vperm.xlu1 %6690, %v2685_v25   ;;  %2761 = vperm.xlu0 %6689, %v2684_v10   ;;  %vm3852_vm1 = vcmp.eq.s32.totalorder %v3806_v41, 1  ;;  %v2688_v25 = vsel %vm2656_vm8, 1, %v9168_v47  ;;  %v2627_v19 = vld [vmem:[#allocation2 + $0x4e8] sm:$0xff] }
 0x248   : > { %v3883_v53 = vsel %vm3851_vm0, %v9354_v20, 0.0  ;;  %6319 = vmatprep.mubr.msk.bf16.mxu0 %vm1068_vm10, %v3902_v16  ;;  %v3884_v63 = vsel %vm3852_vm1, %v9361_v1, 0.0  ;;  %v9392_v20 = vld [vmem:[#allocation16_spill] sm:$0xff]  ;;  %vm4733_vm0 = vcmp.ne.f32.partialorder %v4701_v57, 0.0  ;;  %vm4732_vm1 = vcmp.ne.f32.partialorder %v4700_v14, 0.0 }
 0x249   : > { %v3903_v22 = vpack.c.bf16 %v3883_v53, %v3882_v28  ;;  %v4765_v53 = vsel %vm4733_vm0, 1, %v9168_v47  ;;  %v4705_v14 = vld [vmem:[#allocation2 + $0x8f8] sm:$0xff] }
 0x24a   : > { %v3812_v60 = vpop.permute.xlu1 %3811  ;;  %v3809_v59 = vpop.permute.xlu0 %3808 }
 0x24b   : > { %vm3853_vm6 = vcmp.eq.s32.totalorder %v3809_v59, 1  ;;  %4840 = vperm.xlu1 %6690, %v4761_v58   ;;  %4837 = vperm.xlu0 %6689, %v4760_v6   ;;  %vm3854_vm7 = vcmp.eq.s32.totalorder %v3812_v60, 1  ;;  %v4764_v58 = vsel %vm4732_vm1, 1, %v9168_v47  ;;  %v4703_v59 = vld [vmem:[#allocation2 + $0x8e8] sm:$0xff] }
 0x24c   : > { %v3885_v49 = vsel %vm3853_vm6, %v9392_v20, 0.0  ;;  %6320 = vmatmul.mubr.msk.bf16.gmra.mrb[20].mxu0 %vm1068_vm10, %v3903_v22  ;;  %v3886_v1 = vsel %vm3854_vm7, %v9363_v18, 0.0  ;;  %vm2659_vm6 = vcmp.ne.f32.partialorder %v2627_v19, 0.0  ;;  %vm2658_vm7 = vcmp.ne.f32.partialorder %v2626_v7, 0.0  ;;  %v9397_v20 = vld [vmem:[#allocation28_spill] sm:$0xff] }
 0x24d   : > { %v3904_v55 = vpack.c.bf16 %v3885_v49, %v3884_v63 }
 0x24e   : > { %v3818_v2 = vpop.permute.xlu1 %3817  ;;  %v3815_v33 = vpop.permute.xlu0 %3814 }
 0x24f   : > { %vm3855_vm4 = vcmp.eq.s32.totalorder %v3815_v33, 1  ;;  %2770 = vperm.xlu1 %6690, %v2687_v17   ;;  %2767 = vperm.xlu0 %6689, %v2686_v9   ;;  %vm3856_vm12 = vcmp.eq.s32.totalorder %v3818_v2, 1  ;;  %v2691_v17 = vsel %vm2659_vm6, 1, %v9168_v47  ;;  %v2690_v9 = vsel %vm2658_vm7, 1, %v9168_v47 }
 0x250   : > { %v3887_v34 = vsel %vm3855_vm4, %v9393_v44, 0.0  ;;  %6323 = vmatprep.mubr.msk.bf16.mxu0 %vm1068_vm10, %v3904_v55  ;;  %v3888_v18 = vsel %vm3856_vm12, %v9369_v35, 0.0  ;;  %v9394_v35 = vld [vmem:[#allocation61_spill] sm:$0xff]  ;;  %vm4735_vm4 = vcmp.ne.f32.partialorder %v4703_v59, 0.0  ;;  %vm4734_vm12 = vcmp.ne.f32.partialorder %v4702_v3, 0.0  ;;  %v9404_v3 = vld [vmem:[#allocation35_spill] sm:$0xff] }
 0x251   : > { %v3905_v45 = vpack.c.bf16 %v3887_v34, %v3886_v1  ;;  %v9398_v1 = vld [vmem:[#allocation29_spill] sm:$0xff]  ;;  %v9399_v34 = vld [vmem:[#allocation30_spill] sm:$0xff] }
 0x252   : > { %v3824_v24 = vpop.permute.xlu1 %3823  ;;  %v3821_v30 = vpop.permute.xlu0 %3820 }
 0x253   : > { %vm3857_vm14 = vcmp.eq.s32.totalorder %v3821_v30, 1  ;;  %4846 = vperm.xlu1 %6690, %v4763_v32   ;;  %4843 = vperm.xlu0 %6689, %v4762_v62   ;;  %vm3858_vm15 = vcmp.eq.s32.totalorder %v3824_v24, 1  ;;  %v4767_v62 = vsel %vm4735_vm4, 1, %v9168_v47 }
 0x254   : > { %v3889_v50 = vsel %vm3857_vm14, %v9368_v27, 0.0  ;;  %6324 = vmatmul.mubr.msk.bf16.gmra.mrb[24].mxu0 %vm1068_vm10, %v3905_v45  ;;  %v3890_v48 = vsel %vm3858_vm15, %v9394_v35, 0.0  ;;  %v9395_v27 = vld [vmem:[#allocation58_spill] sm:$0xff]  ;;  %v4766_v45 = vsel %vm4734_vm12, 1, %v9168_v47  ;;  %vm2661_vm14 = vcmp.ne.f32.partialorder %v2629_v12, 0.0 }
 0x255   : > { %v3906_v10 = vpack.c.bf16 %v3889_v50, %v3888_v18  ;;  %vm2660_vm15 = vcmp.ne.f32.partialorder %v2628_v36, 0.0  ;;  %v4704_v18 = vld [vmem:[#allocation2 + $0x8f0] sm:$0xff]  ;;  %v4997_v50 = vsel %vm1117_vm2, %v8518_v54, 0 }
 0x256   : > { %v4253_v16 = vpop.permute.xlu1 %4252  ;;  %v3827_v41 = vpop.permute.xlu0 %3826  ;;  %v2692_v19 = vsel %vm2660_vm15, 1, %v9168_v47 }
 0x257   : > { %vm3859_vm3 = vcmp.eq.s32.totalorder %v3827_v41, 1  ;;  %2776 = vperm.xlu1 %6690, %v2689_v26   ;;  %2773 = vperm.xlu0 %6689, %v2688_v25   ;;  %vm4347_vm5 = vcmp.eq.s32.totalorder %v4253_v16, 1  ;;  %v9400_v26 = vld [vmem:[#allocation31_spill] sm:$0xff]  ;;  %v2693_v41 = vsel %vm2661_vm14, 1, %v9168_v47 }
 0x258   : > { %v3891_v28 = vsel %vm3859_vm3, %v9395_v27, 0.0  ;;  %6327 = vmatprep.mubr.msk.bf16.mxu0 %vm1068_vm10, %v3906_v10  ;;  %v4379_v63 = vsel %vm4347_vm5, %v9396_v38, 0.0  ;;  %v9401_v10 = vld [vmem:[#allocation32_spill] sm:$0xff]  ;;  %vm4737_vm3 = vcmp.ne.f32.partialorder %v4705_v14, 0.0  ;;  %vm4736_vm5 = vcmp.ne.f32.partialorder %v4704_v18, 0.0 }
 0x259   : > { %v3907_v6 = vpack.c.bf16 %v3891_v28, %v3890_v48  ;;  %v9402_v48 = vld [vmem:[#allocation33_spill] sm:$0xff]  ;;  %v9403_v28 = vld [vmem:[#allocation34_spill] sm:$0xff] }
 0x25a   : > { %v4259_v22 = vpop.permute.xlu1 %4258  ;;  %v4256_v60 = vpop.permute.xlu0 %4255 }
 0x25b   : > { %vm4348_vm9 = vcmp.eq.s32.totalorder %v4256_v60, 1  ;;  %4852 = vperm.xlu1 %6690, %v4765_v53   ;;  %4849 = vperm.xlu0 %6689, %v4764_v58   ;;  %vm4349_vm11 = vcmp.eq.s32.totalorder %v4259_v22, 1  ;;  %v4769_v58 = vsel %vm4737_vm3, 1, %v9168_v47 }
 0x25c   : > { %v4380_v49 = vsel %vm4348_vm9, %v9397_v20, 0.0  ;;  %6328 = vmatmul.mubr.msk.bf16.gmra.mrb[28].mxu0 %vm1068_vm10, %v3907_v6  ;;  %v4381_v44 = vsel %vm4349_vm11, %v9398_v1, 0.0  ;;  %v4768_v6 = vsel %vm4736_vm5, 1, %v9168_v47  ;;  %v9406_v47 = vld [vmem:[#allocation37_spill] sm:$0xff] }
 0x25d   : > { %v4411_v55 = vpack.c.bf16 %v4380_v49, %v4379_v63  ;;  %v9405_v63 = vld [vmem:[#allocation36_spill] sm:$0xff] }
 0x25e   : > { %v4265_v2 = vpop.permute.xlu1 %4264  ;;  %v4262_v33 = vpop.permute.xlu0 %4261 }
 0x25f   : > { %vm4350_vm13 = vcmp.eq.s32.totalorder %v4262_v33, 1  ;;  %2782 = vperm.xlu1 %6690, %v2691_v17   ;;  %2779 = vperm.xlu0 %6689, %v2690_v9   ;;  %vm4351_vm8 = vcmp.eq.s32.totalorder %v4265_v2, 1  ;;  %v9407_v2 = vld [vmem:[#allocation38_spill] sm:$0xff] }
 0x260   : > { %v4382_v32 = vsel %vm4350_vm13, %v9399_v34, 0.0  ;;  %6333 = vmatprep.mubr.msk.bf16.mxu0 %vm1068_vm10, %v4411_v55  ;;  %v4383_v25 = vsel %vm4351_vm8, %v9400_v26, 0.0 }
 0x261   : > { %v4412_v24 = vpack.c.bf16 %v4382_v32, %v4381_v44  ;;  %v9408_v44 = vld [vmem:[#allocation39_spill] sm:$0xff]  ;;  %v9409_v32 = vld [vmem:[#allocation40_spill] sm:$0xff] }
 0x262   : > { %v4271_v30 = vpop.permute.xlu1 %4270  ;;  %v4268_v57 = vpop.permute.xlu0 %4267 }
 0x263   : > { %vm4352_vm0 = vcmp.eq.s32.totalorder %v4268_v57, 1  ;;  %4858 = vperm.xlu1 %6690, %v4767_v62   ;;  %4855 = vperm.xlu0 %6689, %v4766_v45   ;;  %vm4353_vm1 = vcmp.eq.s32.totalorder %v4271_v30, 1 }
 0x264   : > { %v4384_v16 = vsel %vm4352_vm0, %v9401_v10, 0.0  ;;  %6334 = vmatmul.mubr.msk.bf16.vlgmr.msra.gmra.mrb[0].mxu0 %vm1068_vm10, %v4412_v24  ;;  %v4385_v27 = vsel %vm4353_vm1, %v9402_v48, 0.0 }
 0x265   : > { %v4413_v7 = vpack.c.bf16 %v4384_v16, %v4383_v25  ;;  %6366 = vmatpush3.bf16.msra.mxu0 %v4997_v50 }
 0x266   : > { %v4277_v35 = vpop.permute.xlu1 %4276  ;;  %v4274_v54 = vpop.permute.xlu0 %4273 }
 0x267   : > { %vm4354_vm2 = vcmp.eq.s32.totalorder %v4274_v54, 1  ;;  %2788 = vperm.xlu1 %6690, %v2693_v41   ;;  %2785 = vperm.xlu0 %6689, %v2692_v19   ;;  %vm4355_vm6 = vcmp.eq.s32.totalorder %v4277_v35, 1 }
 0x268   : > { %v4386_v53 = vsel %vm4354_vm2, %v9403_v28, 0.0  ;;  %6337 = vmatprep.mubr.msk.bf16.mxu0 %vm1068_vm10, %v4413_v7  ;;  %v4387_v38 = vsel %vm4355_vm6, %v9404_v3, 0.0  ;;  %v9411_v7 = vld [vmem:[#allocation46_spill] sm:$0xff]  ;;  %v9413_v28 = vld [vmem:[#allocation48_spill] sm:$0xff] }
 0x269   : > { %v4414_v22 = vpack.c.bf16 %v4386_v53, %v4385_v27  ;;  %v9415_v3 = vld [vmem:[#allocation52_spill] sm:$0xff] }
 0x26a   : > { %v4283_v60 = vpop.permute.xlu1 %4282  ;;  %v4280_v59 = vpop.permute.xlu0 %4279 }
 0x26b   : > { %vm4356_vm7 = vcmp.eq.s32.totalorder %v4280_v59, 1  ;;  %4864 = vperm.xlu1 %6690, %v4769_v58   ;;  %4861 = vperm.xlu0 %6689, %v4768_v6   ;;  %vm4357_vm9 = vcmp.eq.s32.totalorder %v4283_v60, 1  ;;  %v9414_v60 = vld [vmem:[#allocation51_spill] sm:$0xff] }
 0x26c   : > { %v4388_v20 = vsel %vm4356_vm7, %v9405_v63, 0.0  ;;  %6338 = vmatmul.mubr.msk.bf16.gmra.mrb[4].mxu0 %vm1068_vm10, %v4414_v22  ;;  %v4389_v55 = vsel %vm4357_vm9, %v9406_v47, 0.0 }
 0x26d   : > { %v4415_v49 = vpack.c.bf16 %v4388_v20, %v4387_v38 }
 0x26e   : > { %v4289_v17 = vpop.permute.xlu1 %4288  ;;  %v4286_v9 = vpop.permute.xlu0 %4285 }
 0x26f   : > { %vm4358_vm11 = vcmp.eq.s32.totalorder %v4286_v9, 1  ;;  %6341 = vmatprep.mubr.msk.bf16.mxu0 %vm1068_vm10, %v4415_v49  ;;  %vm4359_vm4 = vcmp.eq.s32.totalorder %v4289_v17, 1  ;;  %v9416_v9 = vld [vmem:[#allocation53_spill] sm:$0xff] }
 0x270   : > { %v4390_v33 = vsel %vm4358_vm11, %v9407_v2, 0.0  ;;  %v4391_v34 = vsel %vm4359_vm4, %v9408_v44, 0.0 }
 0x271   : > { %v4416_v12 = vpack.c.bf16 %v4390_v33, %v4389_v55  ;;  %v9417_v55 = vld [vmem:[#allocation54_spill] sm:$0xff] }
 0x272   : > { %v4295_v36 = vpop.permute.xlu1 %4294  ;;  %v4292_v1 = vpop.permute.xlu0 %4291 }
 0x273   : > { %vm4360_vm12 = vcmp.eq.s32.totalorder %v4292_v1, 1  ;;  %vm4361_vm13 = vcmp.eq.s32.totalorder %v4295_v36, 1 }
 0x274   : > { %v4392_v62 = vsel %vm4360_vm12, %v9409_v32, 0.0  ;;  %6342 = vmatmul.mubr.msk.bf16.gmra.mrb[8].mxu0 %vm1068_vm10, %v4416_v12  ;;  %v4393_v57 = vsel %vm4361_vm13, %v9371_v13, 0.0  ;;  %v9410_v13 = vld [vmem:[#allocation45_spill] sm:$0xff] }
 0x275   : > { %v4417_v45 = vpack.c.bf16 %v4392_v62, %v4391_v34  ;;  %v9418_v32 = vld [vmem:[#allocation57_spill] sm:$0xff] }
 0x276   : > { %v4301_v24 = vpop.permute.xlu1 %4300  ;;  %v4298_v30 = vpop.permute.xlu0 %4297 }
 0x277   : > { %vm4362_vm8 = vcmp.eq.s32.totalorder %v4298_v30, 1  ;;  %6345 = vmatprep.mubr.msk.bf16.mxu0 %vm1068_vm10, %v4417_v45  ;;  %vm4363_vm14 = vcmp.eq.s32.totalorder %v4301_v24, 1  ;;  %v9419_v45 = vld [vmem:[#allocation50_spill] sm:$0xff] }
 0x278   : > { %v4394_v14 = vsel %vm4362_vm8, %v9370_v11, 0.0  ;;  %v4395_v25 = vsel %vm4363_vm14, %v9377_v51, 0.0  ;;  %v9412_v51 = vld [vmem:[#allocation47_spill] sm:$0xff] }
 0x279   : > { %v4418_v18 = vpack.c.bf16 %v4394_v14, %v4393_v57 }
 0x27a   : > { %v4307_v50 = vpop.permute.xlu1 %4306  ;;  %v4304_v26 = vpop.permute.xlu0 %4303 }
 0x27b   : > { %vm4364_vm15 = vcmp.eq.s32.totalorder %v4304_v26, 1  ;;  %vm4365_vm0 = vcmp.eq.s32.totalorder %v4307_v50, 1  ;;  %v9420_v26 = vld [vmem:[#allocation25_spill] sm:$0xff] }
 0x27c   : > { %v4396_v10 = vsel %vm4364_vm15, %v9376_v37, 0.0  ;;  %6346 = vmatmul.mubr.msk.bf16.gmra.mrb[12].mxu0 %vm1068_vm10, %v4418_v18  ;;  %v4397_v11 = vsel %vm4365_vm0, %v9410_v13, 0.0 }
 0x27d   : > { %v4419_v16 = vpack.c.bf16 %v4396_v10, %v4395_v25  ;;  %v9421_v10 = vld [vmem:[#allocation24_spill] sm:$0xff] }
 0x27e   : > { %v4313_v41 = vpop.permute.xlu1 %4312  ;;  %v4310_v19 = vpop.permute.xlu0 %4309 }
 0x27f   : > { %vm4366_vm1 = vcmp.eq.s32.totalorder %v4310_v19, 1  ;;  %6349 = vmatprep.mubr.msk.bf16.mxu0 %vm1068_vm10, %v4419_v16  ;;  %vm4367_vm3 = vcmp.eq.s32.totalorder %v4313_v41, 1 }
 0x280   : > { %v4398_v35 = vsel %vm4366_vm1, %v9411_v7, 0.0  ;;  %v4399_v37 = vsel %vm4367_vm3, %v9412_v51, 0.0 }
 0x281   : > { %v4420_v54 = vpack.c.bf16 %v4398_v35, %v4397_v11 }
 0x282   : > { %v4319_v48 = vpop.permute.xlu1 %4318  ;;  %v4316_v27 = vpop.permute.xlu0 %4315 }
 0x283   : > { %vm4368_vm5 = vcmp.eq.s32.totalorder %v4316_v27, 1  ;;  %vm4369_vm2 = vcmp.eq.s32.totalorder %v4319_v48, 1  ;;  %v9422_v48 = vld [vmem:[#allocation23_spill] sm:$0xff] }
 0x284   : > { %v4400_v53 = vsel %vm4368_vm5, %v9413_v28, 0.0  ;;  %6350 = vmatmul.mubr.msk.bf16.gmra.mrb[16].mxu0 %vm1068_vm10, %v4420_v54  ;;  %v4401_v59 = vsel %vm4369_vm2, %v9414_v60, 0.0 }
 0x285   : > { %v4421_v58 = vpack.c.bf16 %v4400_v53, %v4399_v37  ;;  %v9423_v37 = vld [vmem:[#allocation26_spill] sm:$0xff] }
 0x286   : > { %v4325_v6 = vpop.permute.xlu1 %4324  ;;  %v4322_v22 = vpop.permute.xlu0 %4321 }
 0x287   : > { %vm4370_vm6 = vcmp.eq.s32.totalorder %v4322_v22, 1  ;;  %6353 = vmatprep.mubr.msk.bf16.mxu0 %vm1068_vm10, %v4421_v58  ;;  %vm4371_vm7 = vcmp.eq.s32.totalorder %v4325_v6, 1 }
 0x288   : > { %v4402_v38 = vsel %vm4370_vm6, %v9415_v3, 0.0  ;;  %v4403_v47 = vsel %vm4371_vm7, %v9416_v9, 0.0 }
 0x289   : > { %v4422_v63 = vpack.c.bf16 %v4402_v38, %v4401_v59 }
 0x28a   : > { %v4331_v20 = vpop.permute.xlu1 %4330  ;;  %v4328_v49 = vpop.permute.xlu0 %4327 }
 0x28b   : > { %vm4372_vm9 = vcmp.eq.s32.totalorder %v4328_v49, 1  ;;  %v8638_v17 = vpop.f32.mrb[0].mxu1  ;;  %vm4373_vm11 = vcmp.eq.s32.totalorder %v4331_v20, 1  ;;  %v9425_v49 = vld [vmem:[#allocation83_spill] sm:$0xff] }
 0x28c   : > { %v4404_v2 = vsel %vm4372_vm9, %v9417_v55, 0.0  ;;  %v8642_v33 = vpop.f32.mrb[1].mxu1  ;;  %6354 = vmatmul.mubr.msk.bf16.gmra.mrb[20].mxu0 %vm1068_vm10, %v4422_v63  ;;  %v4405_v62 = vsel %vm4373_vm11, %v9418_v32, 0.0  ;;  %v9424_v63 = vld [vmem:[#allocation84_spill] sm:$0xff] }
 0x28d   : > { %v4423_v12 = vpack.c.bf16 %v4404_v2, %v4403_v47  ;;  %v8645_v36 = vpop.f32.mrb[2].mxu1 }
 0x28e   : > { %v8647_v1 = vpop.f32.mrb[3].mxu1  ;;  %v4337_v44 = vpop.permute.xlu1 %4336 }
 0x28f   : > { %v4334_v34 = vpop.permute.xlu0 %4333  ;;  %6357 = vmatprep.mubr.msk.bf16.mxu0 %vm1068_vm10, %v4423_v12  ;;  %vm4375_vm12 = vcmp.eq.s32.totalorder %v4337_v44, 1 }
 0x290   : > { %vm4374_vm4 = vcmp.eq.s32.totalorder %v4334_v34, 1  ;;  %v4407_v25 = vsel %vm4375_vm12, %v9420_v26, 0.0 }
 0x291   : > { %v4406_v24 = vsel %vm4374_vm4, %v9419_v45, 0.0 }
 0x292   : > { %v4424_v30 = vpack.c.bf16 %v4406_v24, %v4405_v62  ;;  %v4343_v57 = vpop.permute.xlu1 %4342 }
 0x293   : > { %v4340_v14 = vpop.permute.xlu0 %4339  ;;  %v8652_v18 = vpop.f32.mrb[4].mxu1  ;;  %vm4377_vm8 = vcmp.eq.s32.totalorder %v4343_v57, 1 }
 0x294   : > { %vm4376_vm13 = vcmp.eq.s32.totalorder %v4340_v14, 1  ;;  %v8654_v50 = vpop.f32.mrb[5].mxu1  ;;  %6358 = vmatmul.mubr.msk.bf16.gmra.mrb[24].mxu0 %vm1068_vm10, %v4424_v30  ;;  %v4409_v27 = vsel %vm4377_vm8, %v9422_v48, 0.0  ;;  %v9426_v30 = vld [vmem:[#allocation85_spill] sm:$0xff] }
 0x295   : > { %v4408_v16 = vsel %vm4376_vm13, %v9421_v10, 0.0  ;;  %v8659_v41 = vpop.f32.mrb[6].mxu1 }
 0x296   : > { %v4425_v19 = vpack.c.bf16 %v4408_v16, %v4407_v25  ;;  %v8661_v11 = vpop.f32.mrb[7].mxu1  ;;  %v4772_v35 = vpop.permute.xlu1 %4771 }
 0x297   : > { %v4346_v54 = vpop.permute.xlu0 %4345  ;;  %vm4866_vm15 = vcmp.eq.s32.totalorder %v4772_v35, 1 }
 0x298   : > { %vm4378_vm14 = vcmp.eq.s32.totalorder %v4346_v54, 1  ;;  %6361 = vmatprep.mubr.msk.bf16.mxu0 %vm1068_vm10, %v4425_v19  ;;  %v4898_v20 = vsel %vm4866_vm15, %v9424_v63, 0.0  ;;  %v9427_v54 = vld [vmem:[#allocation88_spill] sm:$0xff] }
 0x299   : > { %v4410_v53 = vsel %vm4378_vm14, %v9423_v37, 0.0 }
 0x29a   : > { %v4426_v58 = vpack.c.bf16 %v4410_v53, %v4409_v27  ;;  %v4778_v6 = vpop.permute.xlu1 %4777  ;;  %v9428_v27 = vld [vmem:[#allocation87_spill] sm:$0xff] }
 0x29b   : > { %v4775_v22 = vpop.permute.xlu0 %4774  ;;  %v8666_v59 = vpop.f32.mrb[8].mxu1  ;;  %vm4868_vm1 = vcmp.eq.s32.totalorder %v4778_v6, 1 }
 0x29c   : > { %vm4867_vm0 = vcmp.eq.s32.totalorder %v4775_v22, 1  ;;  %v8668_v38 = vpop.f32.mrb[9].mxu1  ;;  %6362 = vmatmul.mubr.msk.bf16.gmra.mrb[28].mxu0 %vm1068_vm10, %v4426_v58  ;;  %v4900_v24 = vsel %vm4868_vm1, %v9364_v8, 0.0 }
 0x29d   : > { %v4899_v47 = vsel %vm4867_vm0, %v9425_v49, 0.0  ;;  %v8673_v2 = vpop.f32.mrb[10].mxu1 }
 0x29e   : > { %v4930_v12 = vpack.c.bf16 %v4899_v47, %v4898_v20  ;;  %v8675_v44 = vpop.f32.mrb[11].mxu1  ;;  %v4784_v34 = vpop.permute.xlu1 %4783 }
 0x29f   : > { %v4781_v62 = vpop.permute.xlu0 %4780  ;;  %vm4870_vm5 = vcmp.eq.s32.totalorder %v4784_v34, 1 }
 0x2a0   : > { %vm4869_vm3 = vcmp.eq.s32.totalorder %v4781_v62, 1  ;;  %6367 = vmatprep.mubr.msk.bf16.mxu0 %vm1068_vm10, %v4930_v12  ;;  %v4902_v48 = vsel %vm4870_vm5, %v9427_v54, 0.0 }
 0x2a1   : > { %v4901_v57 = vsel %vm4869_vm3, %v9426_v30, 0.0 }
 0x2a2   : > { %v4931_v14 = vpack.c.bf16 %v4901_v57, %v4900_v24  ;;  %v4790_v25 = vpop.permute.xlu1 %4789 }
 0x2a3   : > { %v4787_v16 = vpop.permute.xlu0 %4786  ;;  %v8680_v19 = vpop.f32.mrb[12].mxu1  ;;  %vm4872_vm6 = vcmp.eq.s32.totalorder %v4790_v25, 1 }
 0x2a4   : > { %vm4871_vm2 = vcmp.eq.s32.totalorder %v4787_v16, 1  ;;  %v8682_v35 = vpop.f32.mrb[13].mxu1  ;;  %6368 = vmatmul.mubr.msk.bf16.vlgmr.msra.gmra.mrb[0].mxu0 %vm1068_vm10, %v4931_v14  ;;  %v4904_v63 = vsel %vm4872_vm6, %v9372_v4, 0.0  ;;  %v9429_v4 = vld [vmem:[#allocation75_spill] sm:$0xff]  ;;  %v9430_v14 = vld [vmem:[#allocation74_spill] sm:$0xff] }
 0x2a5   : > { %v4903_v37 = vsel %vm4871_vm2, %v9428_v27, 0.0  ;;  %v8687_v53 = vpop.f32.mrb[14].mxu1 }
 0x2a6   : > { %v4932_v8 = vpack.c.bf16 %v4903_v37, %v4902_v48  ;;  %v8689_v58 = vpop.f32.mrb[15].mxu1  ;;  %v4796_v6 = vpop.permute.xlu1 %4795 }
 0x2a7   : > { %v4793_v22 = vpop.permute.xlu0 %4792  ;;  %vm4874_vm9 = vcmp.eq.s32.totalorder %v4796_v6, 1  ;;  %v9431_v6 = vld [vmem:[#allocation95_spill] sm:$0xff] }
 0x2a8   : > { %vm4873_vm7 = vcmp.eq.s32.totalorder %v4793_v22, 1  ;;  %6371 = vmatprep.mubr.msk.bf16.mxu0 %vm1068_vm10, %v4932_v8  ;;  %v4906_v34 = vsel %vm4874_vm9, %v9374_v5, 0.0 }
 0x2a9   : > { %v4905_v20 = vsel %vm4873_vm7, %v9373_v40, 0.0 }
 0x2aa   : > { %v4933_v49 = vpack.c.bf16 %v4905_v20, %v4904_v63  ;;  %v4802_v47 = vpop.permute.xlu1 %4801  ;;  %v9432_v63 = vld [vmem:[#allocation94_spill] sm:$0xff] }
 0x2ab   : > { %v4799_v12 = vpop.permute.xlu0 %4798  ;;  %vm4876_vm4 = vcmp.eq.s32.totalorder %v4802_v47, 1 }
 0x2ac   : > { %vm4875_vm11 = vcmp.eq.s32.totalorder %v4799_v12, 1  ;;  %6372 = vmatmul.mubr.msk.bf16.gmra.mrb[4].mxu0 %vm1068_vm10, %v4933_v49  ;;  %v4908_v40 = vsel %vm4876_vm4, %v9429_v4, 0.0 }
 0x2ad   : > { %v4907_v62 = vsel %vm4875_vm11, %v9375_v39, 0.0 }
 0x2ae   : > { %v4934_v24 = vpack.c.bf16 %v4907_v62, %v4906_v34  ;;  %v4808_v30 = vpop.permute.xlu1 %4807 }
 0x2af   : > { %v4805_v57 = vpop.permute.xlu0 %4804  ;;  %vm4878_vm13 = vcmp.eq.s32.totalorder %v4808_v30, 1 }
 0x2b0   : > { %vm4877_vm12 = vcmp.eq.s32.totalorder %v4805_v57, 1  ;;  %6375 = vmatprep.mubr.msk.bf16.mxu0 %vm1068_vm10, %v4934_v24  ;;  %v4910_v5 = vsel %vm4878_vm13, %v9380_v29, 0.0  ;;  %v9433_v29 = vld [vmem:[#allocation60_spill] sm:$0xff] }
 0x2b1   : > { %v4909_v25 = vsel %vm4877_vm12, %v9430_v14, 0.0  ;;  %vm2810_vm3 = vcmp.eq.s32.totalorder %v9433_v29, 1 }
 0x2b2   : > { %v4935_v16 = vpack.c.bf16 %v4909_v25, %v4908_v40  ;;  %v4814_v54 = vpop.permute.xlu1 %4813  ;;  %v2842_v57 = vsel %vm2810_vm3, %v9410_v13, 0.0  ;;  %v9434_v25 = vld [vmem:[#allocation9_spill] sm:$0xff] }
 0x2b3   : > { %v4811_v48 = vpop.permute.xlu0 %4810  ;;  %vm4880_vm14 = vcmp.eq.s32.totalorder %v4814_v54, 1 }
 0x2b4   : > { %vm4879_vm8 = vcmp.eq.s32.totalorder %v4811_v48, 1  ;;  %6376 = vmatmul.mubr.msk.bf16.gmra.mrb[8].mxu0 %vm1068_vm10, %v4935_v16  ;;  %v4912_v22 = vsel %vm4880_vm14, %v9431_v6, 0.0 }
 0x2b5   : > { %v4911_v39 = vsel %vm4879_vm8, %v9381_v46, 0.0 }
 0x2b6   : > { %v4936_v27 = vpack.c.bf16 %v4911_v39, %v4910_v5  ;;  %v4820_v37 = vpop.permute.xlu1 %4819 }
 0x2b7   : > { %v4817_v8 = vpop.permute.xlu0 %4816  ;;  %vm4882_vm0 = vcmp.eq.s32.totalorder %v4820_v37, 1 }
 0x2b8   : > { %vm4881_vm15 = vcmp.eq.s32.totalorder %v4817_v8, 1  ;;  %6379 = vmatprep.mubr.msk.bf16.mxu0 %vm1068_vm10, %v4936_v27  ;;  %v4914_v46 = vsel %vm4882_vm0, %v9384_v15, 0.0 }
 0x2b9   : > { %v4913_v20 = vsel %vm4881_vm15, %v9432_v63, 0.0  ;;  %v9435_v63 = vld [vmem:[#allocation13_spill] sm:$0xff] }
 0x2ba   : > { %v4937_v49 = vpack.c.bf16 %v4913_v20, %v4912_v22  ;;  %v4826_v47 = vpop.permute.xlu1 %4825 }
 0x2bb   : > { %v4823_v12 = vpop.permute.xlu0 %4822  ;;  %vm4884_vm5 = vcmp.eq.s32.totalorder %v4826_v47, 1 }
 0x2bc   : > { %vm4883_vm1 = vcmp.eq.s32.totalorder %v4823_v12, 1  ;;  %6380 = vmatmul.mubr.msk.bf16.gmra.mrb[12].mxu0 %vm1068_vm10, %v4937_v49  ;;  %v4916_v40 = vsel %vm4884_vm5, %v8072_v52, 0.0 }
 0x2bd   : > { %v4915_v34 = vsel %vm4883_vm1, %v9385_v0, 0.0 }
 0x2be   : > { %v4938_v62 = vpack.c.bf16 %v4915_v34, %v4914_v46  ;;  %v2759_v24 = vpop.permute.xlu1 %2758 }
 0x2bf   : > { %vm2811_vm2 = vcmp.eq.s32.totalorder %v2759_v24, 1  ;;  %v4829_v30 = vpop.permute.xlu0 %4828 }
 0x2c0   : > { %v2843_v4 = vsel %vm2811_vm2, %v9411_v7, 0.0  ;;  %vm4885_vm6 = vcmp.eq.s32.totalorder %v4829_v30, 1  ;;  %6383 = vmatprep.mubr.msk.bf16.mxu0 %vm1068_vm10, %v4938_v62 }
 0x2c1   : > { %v2864_v14 = vpack.c.bf16 %v2843_v4, %v2842_v57  ;;  %v4917_v16 = vsel %vm4885_vm6, %v9434_v25, 0.0 }
 0x2c2   : > { %v4939_v15 = vpack.c.bf16 %v4917_v16, %v4916_v40  ;;  %v4835_v54 = vpop.permute.xlu1 %4834  ;;  %v9436_v16 = vld [vmem:[#allocation17_spill] sm:$0xff] }
 0x2c3   : > { %vm4887_vm7 = vcmp.eq.s32.totalorder %v4835_v54, 1  ;;  %v4832_v0 = vpop.permute.xlu0 %4831  ;;  %6251 = vmatprep.mubr.msk.bf16.mxu1 %vm1068_vm10, %v2864_v14 }
 0x2c4   : > { %v4919_v48 = vsel %vm4887_vm7, %v9386_v61, 0.0  ;;  %vm4886_vm9 = vcmp.eq.s32.totalorder %v4832_v0, 1  ;;  %6384 = vmatmul.mubr.msk.bf16.gmra.mrb[16].mxu0 %vm1068_vm10, %v4939_v15 }
 0x2c5   : > { %v4918_v13 = vsel %vm4886_vm9, %v8084_v56, 0.0 }
 0x2c6   : > { %v4940_v7 = vpack.c.bf16 %v4919_v48, %v4918_v13  ;;  %v2765_v5 = vpop.permute.xlu1 %2764 }
 0x2c7   : > { %vm2813_vm11 = vcmp.eq.s32.totalorder %v2765_v5, 1  ;;  %v2762_v52 = vpop.permute.xlu0 %2761 }
 0x2c8   : > { %v2845_v39 = vsel %vm2813_vm11, %v9413_v28, 0.0  ;;  %vm2812_vm4 = vcmp.eq.s32.totalorder %v2762_v52, 1  ;;  %6387 = vmatprep.mubr.msk.bf16.mxu0 %vm1068_vm10, %v4940_v7 }
 0x2c9   : > { %v2844_v27 = vsel %vm2812_vm4, %v9412_v51, 0.0 }
 0x2ca   : > { %v2865_v37 = vpack.c.bf16 %v2845_v39, %v2844_v27  ;;  %v4841_v8 = vpop.permute.xlu1 %4840 }
 0x2cb   : > { %vm4889_vm12 = vcmp.eq.s32.totalorder %v4841_v8, 1  ;;  %v4838_v61 = vpop.permute.xlu0 %4837  ;;  %v8722_v6 = vpop.f32.mrb[16].mxu1 }
 0x2cc   : > { %v4921_v22 = vsel %vm4889_vm12, %v8122_v21, 0.0  ;;  %vm4888_vm13 = vcmp.eq.s32.totalorder %v4838_v61, 1  ;;  %v8725_v56 = vpop.f32.mrb[17].mxu1  ;;  %6252 = vmatmul.mubr.msk.bf16.gmra.mrb[20].mxu1 %vm1068_vm10, %v2865_v37 }
 0x2cd   : > { %v4920_v28 = vsel %vm4888_vm13, %v9435_v63, 0.0  ;;  %v8729_v20 = vpop.f32.mrb[18].mxu1 }
 0x2ce   : > { %v4941_v49 = vpack.c.bf16 %v4921_v22, %v4920_v28  ;;  %v8731_v47 = vpop.f32.mrb[19].mxu1  ;;  %v2771_v51 = vpop.permute.xlu1 %2770  ;;  %v9438_v28 = vld [vmem:[#allocation21_spill] sm:$0xff] }
 0x2cf   : > { %vm2815_vm8 = vcmp.eq.s32.totalorder %v2771_v51, 1  ;;  %v2768_v12 = vpop.permute.xlu0 %2767 }
 0x2d0   : > { %v2847_v29 = vsel %vm2815_vm8, %v9415_v3, 0.0  ;;  %vm2814_vm14 = vcmp.eq.s32.totalorder %v2768_v12, 1  ;;  %6388 = vmatmul.mubr.msk.bf16.gmra.mrb[20].mxu0 %vm1068_vm10, %v4941_v49 }
 0x2d1   : > { %v2846_v21 = vsel %vm2814_vm14, %v9414_v60, 0.0  ;;  %vm5496_vm14 = vcmask 27648  }
 0x2d2   : > { %v2866_v46 = vpack.c.bf16 %v2847_v29, %v2846_v21  ;;  %v4847_v34 = vpop.permute.xlu1 %4846 }
 0x2d3   : > { %vm4891_vm15 = vcmp.eq.s32.totalorder %v4847_v34, 1  ;;  %v4844_v62 = vpop.permute.xlu0 %4843 }
 0x2d4   : > { %v4923_v24 = vsel %vm4891_vm15, %v9387_v23, 0.0  ;;  %vm4890_vm0 = vcmp.eq.s32.totalorder %v4844_v62, 1  ;;  %6255 = vmatprep.mubr.msk.bf16.mxu1 %vm1068_vm10, %v2866_v46 }
 0x2d5   : > { %v4922_v30 = vsel %vm4890_vm0, %v8138_v43, 0.0  ;;  %v9437_v43 = vld [vmem:[#allocation100_spill] sm:$0xff] }
 0x2d6   : > { %v4942_v57 = vpack.c.bf16 %v4923_v24, %v4922_v30  ;;  %v2777_v4 = vpop.permute.xlu1 %2776 }
 0x2d7   : > { %vm2817_vm1 = vcmp.eq.s32.totalorder %v2777_v4, 1  ;;  %v2774_v3 = vpop.permute.xlu0 %2773 }
 0x2d8   : > { %v2849_v40 = vsel %vm2817_vm1, %v9417_v55, 0.0  ;;  %vm2816_vm3 = vcmp.eq.s32.totalorder %v2774_v3, 1  ;;  %6391 = vmatprep.mubr.msk.bf16.mxu0 %vm1068_vm10, %v4942_v57 }
 0x2d9   : > { %v2848_v60 = vsel %vm2816_vm3, %v9416_v9, 0.0 }
 0x2da   : > { %v2867_v14 = vpack.c.bf16 %v2849_v40, %v2848_v60  ;;  %v4853_v25 = vpop.permute.xlu1 %4852 }
 0x2db   : > { %vm4893_vm5 = vcmp.eq.s32.totalorder %v4853_v25, 1  ;;  %v4850_v23 = vpop.permute.xlu0 %4849 }
 0x2dc   : > { %v4925_v15 = vsel %vm4893_vm5, %v9436_v16, 0.0  ;;  %vm4892_vm2 = vcmp.eq.s32.totalorder %v4850_v23, 1  ;;  %6256 = vmatmul.mubr.msk.bf16.gmra.mrb[24].mxu1 %vm1068_vm10, %v2867_v14 }
 0x2dd   : > { %v4924_v54 = vsel %vm4892_vm2, %v9437_v43, 0.0 }
 0x2de   : > { %v4943_v0 = vpack.c.bf16 %v4925_v15, %v4924_v54  ;;  %v2783_v48 = vpop.permute.xlu1 %2782 }
 0x2df   : > { %vm2819_vm6 = vcmp.eq.s32.totalorder %v2783_v48, 1  ;;  %v2780_v55 = vpop.permute.xlu0 %2779 }
 0x2e0   : > { %v2851_v13 = vsel %vm2819_vm6, %v9419_v45, 0.0  ;;  %vm2818_vm7 = vcmp.eq.s32.totalorder %v2780_v55, 1  ;;  %6392 = vmatmul.mubr.msk.bf16.gmra.mrb[24].mxu0 %vm1068_vm10, %v4943_v0 }
 0x2e1   : > { %v2850_v9 = vsel %vm2818_vm7, %v9418_v32, 0.0 }
 0x2e2   : > { %v2868_v7 = vpack.c.bf16 %v2851_v13, %v2850_v9  ;;  %v4859_v5 = vpop.permute.xlu1 %4858 }
 0x2e3   : > { %vm4895_vm9 = vcmp.eq.s32.totalorder %v4859_v5, 1  ;;  %v4856_v52 = vpop.permute.xlu0 %4855 }
 0x2e4   : > { %v4927_v39 = vsel %vm4895_vm9, %v9389_v42, 0.0  ;;  %vm4894_vm11 = vcmp.eq.s32.totalorder %v4856_v52, 1  ;;  %6259 = vmatprep.mubr.msk.bf16.mxu1 %vm1068_vm10, %v2868_v7 }
 0x2e5   : > { %v4926_v27 = vsel %vm4894_vm11, %v9388_v31, 0.0  ;;  %v9439_v31 = vld [vmem:[#allocation22_spill] sm:$0xff] }
 0x2e6   : > { %v4944_v37 = vpack.c.bf16 %v4927_v39, %v4926_v27  ;;  %v2789_v8 = vpop.permute.xlu1 %2788 }
 0x2e7   : > { %vm2821_vm4 = vcmp.eq.s32.totalorder %v2789_v8, 1  ;;  %v2786_v45 = vpop.permute.xlu0 %2785 }
 0x2e8   : > { %v2853_v61 = vsel %vm2821_vm4, %v9421_v10, 0.0  ;;  %vm2820_vm12 = vcmp.eq.s32.totalorder %v2786_v45, 1  ;;  %6395 = vmatprep.mubr.msk.bf16.mxu0 %vm1068_vm10, %v4944_v37 }
 0x2e9   : > { %v2852_v32 = vsel %vm2820_vm12, %v9420_v26, 0.0 }
 0x2ea   : > { %v2869_v22 = vpack.c.bf16 %v2853_v61, %v2852_v32  ;;  %v4865_v63 = vpop.permute.xlu1 %4864 }
 0x2eb   : > { %vm4897_vm13 = vcmp.eq.s32.totalorder %v4865_v63, 1  ;;  %v4862_v42 = vpop.permute.xlu0 %4861 }
 0x2ec   : > { %v4929_v49 = vsel %vm4897_vm13, %v9438_v28, 0.0  ;;  %vm4896_vm8 = vcmp.eq.s32.totalorder %v4862_v42, 1  ;;  %6260 = vmatmul.mubr.msk.bf16.gmra.mrb[28].mxu1 %vm1068_vm10, %v2869_v22 }
 0x2ed   : > { %v4928_v51 = vsel %vm4896_vm8, %v9439_v31, 0.0 }
 0x2ee   : > { %v4945_v12 = vpack.c.bf16 %v4929_v49, %v4928_v51 }
 0x2f0   : > { %6396 = vmatmul.mubr.msk.bf16.gmra.mrb[28].mxu0 %vm1068_vm10, %v4945_v12 }
 0x377   : > { %v6369_v10 = vpop.f32.mrb[0].mxu0 }
 0x378   : > { %v6401_v29 = vadd.f32 %v6369_v10, %v8638_v17  ;;  %v5033_v21 = vpop.f32.mrb[1].mxu0 }
 0x379   : > { %v6402_v26 = vadd.f32 %v5033_v21, %v8642_v33  ;;  %v6370_v46 = vpop.f32.mrb[2].mxu0 }
 0x37a   : > { %v5831_v34 = vpack.c.bf16 %v6401_v29, %v6401_v29  ;;  %v6403_v62 = vadd.f32 %v6370_v46, %v8645_v36  ;;  %v5036_v24 = vpop.f32.mrb[3].mxu0  ;;  %v5263_v4 = vmul.f32 %v6401_v29, %v6401_v29  ;;  %v5195_v23 = vsel %vm1068_vm10, %v6401_v29, 0.0 }
 0x37b   : > { %v5261_v30 = vmul.f32 %v6402_v26, %v6402_v26  ;;  %v5829_v17 = vpack.c.bf16 %v6402_v26, %v6402_v26  ;;  %v6404_v57 = vadd.f32 %v5036_v24, %v8647_v1  ;;  %v5192_v40 = vsel %vm1068_vm10, %v6402_v26, 0.0 }
 0x37c   : > { %5499 = vst.msk [vmem:[%s8764_s24 + $0x8] sm:$0xf] %vm5496_vm14, %v5831_v34  ;;  %v5832_v3 = vpack.c.bf16 %v6403_v62, %v6403_v62  ;;  %v5264_v25 = vmul.f32 %v6403_v62, %v6403_v62  ;;  %v5296_v55 = vsel %vm1068_vm10, %v5263_v4, 0.0  ;;  %v5197_v7 = vsel %vm1068_vm10, %v6403_v62, 0.0 }
 0x37d   : > { %5497 = vst.msk [vmem:[%s8764_s24] sm:$0xf] %vm5496_vm14, %v5829_v17  ;;  %v5193_v33 = vsel %vm1068_vm10, %v6404_v57, 0.0  ;;  %v5262_v60 = vmul.f32 %v6404_v57, %v6404_v57  ;;  %v5830_v14 = vpack.c.bf16 %v6404_v57, %v6404_v57  ;;  %v5293_v1 = vsel %vm1068_vm10, %v5261_v30, 0.0 }
 0x37e   : > { %5500 = vst.msk [vmem:[%s8764_s24 + $0xc] sm:$0xf] %vm5496_vm14, %v5832_v3  ;;  %v5194_v36 = vadd.f32 %v5193_v33, %v5192_v40  ;;  %v5298_v5 = vsel %vm1068_vm10, %v5264_v25, 0.0 }
 0x37f   : > { %v5294_v16 = vsel %vm1068_vm10, %v5262_v60, 0.0  ;;  %5498 = vst.msk [vmem:[%s8764_s24 + $0x4] sm:$0xf] %vm5496_vm14, %v5830_v14  ;;  %v6373_v15 = vpop.f32.mrb[4].mxu0 }
 0x380   : > { %v5196_v43 = vadd.f32 %v5195_v23, %v5194_v36  ;;  %v5295_v54 = vadd.f32 %v5294_v16, %v5293_v1  ;;  %v6405_v0 = vadd.f32 %v6373_v15, %v8652_v18  ;;  %v5049_v48 = vpop.f32.mrb[5].mxu0 }
 0x381   : > { %v6406_v13 = vadd.f32 %v5049_v48, %v8654_v50  ;;  %v6374_v9 = vpop.f32.mrb[6].mxu0 }
 0x382   : > { %v5297_v52 = vadd.f32 %v5296_v55, %v5295_v54  ;;  %v5835_v39 = vpack.c.bf16 %v6405_v0, %v6405_v0  ;;  %v5052_v27 = vpop.f32.mrb[7].mxu0  ;;  %v5198_v37 = vadd.f32 %v5197_v7, %v5196_v43  ;;  %v6407_v50 = vadd.f32 %v6374_v9, %v8659_v41 }
 0x383   : > { %v5199_v8 = vsel %vm1068_vm10, %v6406_v13, 0.0  ;;  %v5265_v45 = vmul.f32 %v6406_v13, %v6406_v13  ;;  %v5833_v18 = vpack.c.bf16 %v6406_v13, %v6406_v13  ;;  %v6408_v32 = vadd.f32 %v5052_v27, %v8661_v11 }
 0x384   : > { %5503 = vst.msk [vmem:[%s8764_s24 + $0x18] sm:$0xf] %vm5496_vm14, %v5835_v39  ;;  %v5299_v61 = vadd.f32 %v5298_v5, %v5297_v52  ;;  %v5200_v22 = vadd.f32 %v5199_v8, %v5198_v37  ;;  %v5267_v42 = vmul.f32 %v6405_v0, %v6405_v0  ;;  %v5836_v49 = vpack.c.bf16 %v6407_v50, %v6407_v50 }
 0x385   : > { %v5300_v63 = vsel %vm1068_vm10, %v5265_v45, 0.0  ;;  %5501 = vst.msk [vmem:[%s8764_s24 + $0x10] sm:$0xf] %vm5496_vm14, %v5833_v18  ;;  %v5201_v31 = vsel %vm1068_vm10, %v6408_v32, 0.0  ;;  %v5266_v51 = vmul.f32 %v6408_v32, %v6408_v32  ;;  %v5834_v12 = vpack.c.bf16 %v6408_v32, %v6408_v32 }
 0x386   : > { %v5301_v28 = vadd.f32 %v5300_v63, %v5299_v61  ;;  %5504 = vst.msk [vmem:[%s8764_s24 + $0x1c] sm:$0xf] %vm5496_vm14, %v5836_v49  ;;  %v5202_v29 = vadd.f32 %v5201_v31, %v5200_v22  ;;  %v5203_v21 = vsel %vm1068_vm10, %v6405_v0, 0.0  ;;  %v5268_v26 = vmul.f32 %v6407_v50, %v6407_v50 }
 0x387   : > { %v6377_v10 = vpop.f32.mrb[8].mxu0  ;;  %v5302_v46 = vsel %vm1068_vm10, %v5266_v51, 0.0  ;;  %5502 = vst.msk [vmem:[%s8764_s24 + $0x14] sm:$0xf] %vm5496_vm14, %v5834_v12  ;;  %v5304_v24 = vsel %vm1068_vm10, %v5267_v42, 0.0  ;;  %v5205_v30 = vsel %vm1068_vm10, %v6407_v50, 0.0 }
 0x388   : > { %v6409_v41 = vadd.f32 %v6377_v10, %v8666_v59  ;;  %v5065_v11 = vpop.f32.mrb[9].mxu0  ;;  %v5204_v17 = vadd.f32 %v5203_v21, %v5202_v29  ;;  %v5303_v57 = vadd.f32 %v5302_v46, %v5301_v28 }
 0x389   : > { %v6410_v34 = vadd.f32 %v5065_v11, %v8668_v38  ;;  %v6378_v62 = vpop.f32.mrb[10].mxu0  ;;  %v5306_v38 = vsel %vm1068_vm10, %v5268_v26, 0.0 }
 0x38a   : > { %v5068_v59 = vpop.f32.mrb[11].mxu0  ;;  %v5839_v4 = vpack.c.bf16 %v6409_v41, %v6409_v41  ;;  %v5305_v60 = vadd.f32 %v5304_v24, %v5303_v57  ;;  %v5206_v14 = vadd.f32 %v5205_v30, %v5204_v17  ;;  %v6411_v25 = vadd.f32 %v6378_v62, %v8673_v2 }
 0x38b   : > { %v5207_v3 = vsel %vm1068_vm10, %v6410_v34, 0.0  ;;  %v5269_v40 = vmul.f32 %v6410_v34, %v6410_v34  ;;  %v5837_v33 = vpack.c.bf16 %v6410_v34, %v6410_v34  ;;  %v6412_v23 = vadd.f32 %v5068_v59, %v8675_v44 }
 0x38c   : > { %5507 = vst.msk [vmem:[%s8764_s24 + $0x28] sm:$0xf] %vm5496_vm14, %v5839_v4  ;;  %v5271_v1 = vmul.f32 %v6409_v41, %v6409_v41  ;;  %v5208_v16 = vadd.f32 %v5207_v3, %v5206_v14  ;;  %v5307_v15 = vadd.f32 %v5306_v38, %v5305_v60  ;;  %v5840_v43 = vpack.c.bf16 %v6411_v25, %v6411_v25 }
 0x38d   : > { %v5308_v36 = vsel %vm1068_vm10, %v5269_v40, 0.0  ;;  %5505 = vst.msk [vmem:[%s8764_s24 + $0x20] sm:$0xf] %vm5496_vm14, %v5837_v33  ;;  %v5209_v54 = vsel %vm1068_vm10, %v6412_v23, 0.0  ;;  %v5270_v0 = vmul.f32 %v6412_v23, %v6412_v23  ;;  %v5838_v2 = vpack.c.bf16 %v6412_v23, %v6412_v23 }
 0x38e   : > { %v5309_v55 = vadd.f32 %v5308_v36, %v5307_v15  ;;  %v5210_v13 = vadd.f32 %v5209_v54, %v5208_v16  ;;  %v5211_v5 = vsel %vm1068_vm10, %v6409_v41, 0.0  ;;  %v5272_v52 = vmul.f32 %v6411_v25, %v6411_v25  ;;  %5508 = vst.msk [vmem:[%s8764_s24 + $0x2c] sm:$0xf] %vm5496_vm14, %v5840_v43 }
 0x38f   : > { %v6381_v48 = vpop.f32.mrb[12].mxu0  ;;  %v5310_v44 = vsel %vm1068_vm10, %v5270_v0, 0.0  ;;  %5506 = vst.msk [vmem:[%s8764_s24 + $0x24] sm:$0xf] %vm5496_vm14, %v5838_v2  ;;  %v5312_v37 = vsel %vm1068_vm10, %v5271_v1, 0.0  ;;  %v5213_v8 = vsel %vm1068_vm10, %v6411_v25, 0.0 }
 0x390   : > { %v6413_v9 = vadd.f32 %v6381_v48, %v8680_v19  ;;  %v5081_v7 = vpop.f32.mrb[13].mxu0  ;;  %v5212_v19 = vadd.f32 %v5211_v5, %v5210_v13  ;;  %v5311_v45 = vadd.f32 %v5310_v44, %v5309_v55 }
 0x391   : > { %v6414_v39 = vadd.f32 %v5081_v7, %v8682_v35  ;;  %v6382_v27 = vpop.f32.mrb[14].mxu0  ;;  %v5314_v35 = vsel %vm1068_vm10, %v5272_v52, 0.0 }
 0x392   : > { %v5084_v18 = vpop.f32.mrb[15].mxu0  ;;  %v5843_v61 = vpack.c.bf16 %v6413_v9, %v6413_v9  ;;  %v5313_v63 = vadd.f32 %v5312_v37, %v5311_v45  ;;  %v5214_v42 = vadd.f32 %v5213_v8, %v5212_v19  ;;  %v6415_v28 = vadd.f32 %v6382_v27, %v8687_v53 }
 0x393   : > { %v5215_v50 = vsel %vm1068_vm10, %v6414_v39, 0.0  ;;  %v5273_v32 = vmul.f32 %v6414_v39, %v6414_v39  ;;  %v5841_v22 = vpack.c.bf16 %v6414_v39, %v6414_v39  ;;  %v6416_v31 = vadd.f32 %v5084_v18, %v8689_v58 }
 0x394   : > { %5511 = vst.msk [vmem:[%s8764_s24 + $0x38] sm:$0xf] %vm5496_vm14, %v5843_v61  ;;  %v5275_v51 = vmul.f32 %v6413_v9, %v6413_v9  ;;  %v5216_v12 = vadd.f32 %v5215_v50, %v5214_v42  ;;  %v5315_v10 = vadd.f32 %v5314_v35, %v5313_v63  ;;  %v5844_v29 = vpack.c.bf16 %v6415_v28, %v6415_v28 }
 0x395   : > { %v5316_v49 = vsel %vm1068_vm10, %v5273_v32, 0.0  ;;  %5509 = vst.msk [vmem:[%s8764_s24 + $0x30] sm:$0xf] %vm5496_vm14, %v5841_v22  ;;  %v5217_v41 = vsel %vm1068_vm10, %v6416_v31, 0.0  ;;  %v5274_v11 = vmul.f32 %v6416_v31, %v6416_v31  ;;  %v5842_v53 = vpack.c.bf16 %v6416_v31, %v6416_v31 }
 0x396   : > { %v5317_v26 = vadd.f32 %v5316_v49, %v5315_v10  ;;  %v5218_v46 = vadd.f32 %v5217_v41, %v5216_v12  ;;  %v5219_v24 = vsel %vm1068_vm10, %v6413_v9, 0.0  ;;  %v5276_v30 = vmul.f32 %v6415_v28, %v6415_v28  ;;  %5512 = vst.msk [vmem:[%s8764_s24 + $0x3c] sm:$0xf] %vm5496_vm14, %v5844_v29 }
 0x397   : > { %v6385_v21 = vpop.f32.mrb[16].mxu0  ;;  %v5318_v58 = vsel %vm1068_vm10, %v5274_v11, 0.0  ;;  %5510 = vst.msk [vmem:[%s8764_s24 + $0x34] sm:$0xf] %vm5496_vm14, %v5842_v53  ;;  %v5320_v59 = vsel %vm1068_vm10, %v5275_v51, 0.0  ;;  %v5221_v4 = vsel %vm1068_vm10, %v6415_v28, 0.0 }
 0x398   : > { %v6417_v34 = vadd.f32 %v6385_v21, %v8722_v6  ;;  %v5097_v62 = vpop.f32.mrb[17].mxu0  ;;  %v5220_v6 = vadd.f32 %v5219_v24, %v5218_v46  ;;  %v5319_v3 = vadd.f32 %v5318_v58, %v5317_v26 }
 0x399   : > { %v6418_v17 = vadd.f32 %v5097_v62, %v8725_v56  ;;  %v6386_v57 = vpop.f32.mrb[18].mxu0  ;;  %v5322_v56 = vsel %vm1068_vm10, %v5276_v30, 0.0 }
 0x39a   : > { %v5100_v40 = vpop.f32.mrb[19].mxu0  ;;  %v5847_v33 = vpack.c.bf16 %v6417_v34, %v6417_v34  ;;  %v5321_v38 = vadd.f32 %v5320_v59, %v5319_v3  ;;  %v5222_v36 = vadd.f32 %v5221_v4, %v5220_v6  ;;  %v6419_v23 = vadd.f32 %v6386_v57, %v8729_v20 }
 0x39b   : > { %v5223_v60 = vsel %vm1068_vm10, %v6418_v17, 0.0  ;;  %v5277_v14 = vmul.f32 %v6418_v17, %v6418_v17  ;;  %v5845_v25 = vpack.c.bf16 %v6418_v17, %v6418_v17  ;;  %v6420_v16 = vadd.f32 %v5100_v40, %v8731_v47 }
 0x39c   : > { %5515 = vst.msk [vmem:[%s8764_s24 + $0x48] sm:$0xf] %vm5496_vm14, %v5847_v33  ;;  %v5279_v15 = vmul.f32 %v6417_v34, %v6417_v34  ;;  %v5224_v43 = vadd.f32 %v5223_v60, %v5222_v36  ;;  %v5323_v54 = vadd.f32 %v5322_v56, %v5321_v38  ;;  %v5848_v0 = vpack.c.bf16 %v6419_v23, %v6419_v23 }
 0x39d   : > { %v5324_v1 = vsel %vm1068_vm10, %v5277_v14, 0.0  ;;  %5513 = vst.msk [vmem:[%s8764_s24 + $0x40] sm:$0xf] %vm5496_vm14, %v5845_v25  ;;  %v5225_v2 = vsel %vm1068_vm10, %v6420_v16, 0.0  ;;  %v5278_v48 = vmul.f32 %v6420_v16, %v6420_v16  ;;  %v5846_v20 = vpack.c.bf16 %v6420_v16, %v6420_v16 }
 0x39e   : > { %v5325_v13 = vadd.f32 %v5324_v1, %v5323_v54  ;;  %v5226_v9 = vadd.f32 %v5225_v2, %v5224_v43  ;;  %v5227_v5 = vsel %vm1068_vm10, %v6417_v34, 0.0  ;;  %v5280_v52 = vmul.f32 %v6419_v23, %v6419_v23  ;;  %5516 = vst.msk [vmem:[%s8764_s24 + $0x4c] sm:$0xf] %vm5496_vm14, %v5848_v0 }
 0x39f   : > { %v6253_v55 = vpop.f32.mrb[20].mxu1  ;;  %v5326_v47 = vsel %vm1068_vm10, %v5278_v48, 0.0  ;;  %5514 = vst.msk [vmem:[%s8764_s24 + $0x44] sm:$0xf] %vm5496_vm14, %v5846_v20  ;;  %v5328_v8 = vsel %vm1068_vm10, %v5279_v15, 0.0  ;;  %v5229_v19 = vsel %vm1068_vm10, %v6419_v23, 0.0 }
 0x3a0   : > { %v3037_v7 = vpop.f32.mrb[21].mxu1  ;;  %v5228_v39 = vadd.f32 %v5227_v5, %v5226_v9  ;;  %v5327_v27 = vadd.f32 %v5326_v47, %v5325_v13  ;;  %v5330_v22 = vsel %vm1068_vm10, %v5280_v52, 0.0 }
 0x3a1   : > { %v6254_v44 = vpop.f32.mrb[22].mxu1 }
 0x3a2   : > { %v3040_v37 = vpop.f32.mrb[23].mxu1  ;;  %v5329_v18 = vadd.f32 %v5328_v8, %v5327_v27  ;;  %v5230_v32 = vadd.f32 %v5229_v19, %v5228_v39 }
 0x3a3   : > { %v6389_v45 = vpop.f32.mrb[20].mxu0 }
 0x3a4   : > { %v6421_v61 = vadd.f32 %v6389_v45, %v6253_v55  ;;  %v5113_v50 = vpop.f32.mrb[21].mxu0  ;;  %v5331_v35 = vadd.f32 %v5330_v22, %v5329_v18 }
 0x3a5   : > { %v6422_v63 = vadd.f32 %v5113_v50, %v3037_v7  ;;  %v6390_v42 = vpop.f32.mrb[22].mxu0 }
 0x3a6   : > { %v5851_v28 = vpack.c.bf16 %v6421_v61, %v6421_v61  ;;  %v5116_v49 = vpop.f32.mrb[23].mxu0  ;;  %v6423_v10 = vadd.f32 %v6390_v42, %v6254_v44  ;;  %v5283_v11 = vmul.f32 %v6421_v61, %v6421_v61  ;;  %v5235_v30 = vsel %vm1068_vm10, %v6421_v61, 0.0 }
 0x3a7   : > { %v5231_v31 = vsel %vm1068_vm10, %v6422_v63, 0.0  ;;  %v5281_v51 = vmul.f32 %v6422_v63, %v6422_v63  ;;  %v5849_v12 = vpack.c.bf16 %v6422_v63, %v6422_v63  ;;  %v6424_v41 = vadd.f32 %v5116_v49, %v3040_v37 }
 0x3a8   : > { %5519 = vst.msk [vmem:[%s8764_s24 + $0x58] sm:$0xf] %vm5496_vm14, %v5851_v28  ;;  %v5232_v29 = vadd.f32 %v5231_v31, %v5230_v32  ;;  %v5852_v21 = vpack.c.bf16 %v6423_v10, %v6423_v10  ;;  %v5284_v58 = vmul.f32 %v6423_v10, %v6423_v10  ;;  %v5336_v4 = vsel %vm1068_vm10, %v5283_v11, 0.0 }
 0x3a9   : > { %v5332_v53 = vsel %vm1068_vm10, %v5281_v51, 0.0  ;;  %5517 = vst.msk [vmem:[%s8764_s24 + $0x50] sm:$0xf] %vm5496_vm14, %v5849_v12  ;;  %v5233_v46 = vsel %vm1068_vm10, %v6424_v41, 0.0  ;;  %v5282_v34 = vmul.f32 %v6424_v41, %v6424_v41  ;;  %v5850_v62 = vpack.c.bf16 %v6424_v41, %v6424_v41 }
 0x3aa   : > { %v5333_v26 = vadd.f32 %v5332_v53, %v5331_v35  ;;  %5520 = vst.msk [vmem:[%s8764_s24 + $0x5c] sm:$0xf] %vm5496_vm14, %v5852_v21  ;;  %v5234_v24 = vadd.f32 %v5233_v46, %v5232_v29  ;;  %v5237_v6 = vsel %vm1068_vm10, %v6423_v10, 0.0  ;;  %v5338_v60 = vsel %vm1068_vm10, %v5284_v58, 0.0 }
 0x3ab   : > { %v5334_v17 = vsel %vm1068_vm10, %v5282_v34, 0.0  ;;  %5518 = vst.msk [vmem:[%s8764_s24 + $0x54] sm:$0xf] %vm5496_vm14, %v5850_v62 }
 0x3ac   : > { %v5236_v57 = vadd.f32 %v5235_v30, %v5234_v24  ;;  %v5335_v59 = vadd.f32 %v5334_v17, %v5333_v26 }
 0x3ae   : > { %v5337_v3 = vadd.f32 %v5336_v4, %v5335_v59  ;;  %v5238_v33 = vadd.f32 %v5237_v6, %v5236_v57 }
 0x3af   : > { %v6257_v40 = vpop.f32.mrb[24].mxu1 }
 0x3b0   : > { %v3053_v14 = vpop.f32.mrb[25].mxu1  ;;  %v5339_v38 = vadd.f32 %v5338_v60, %v5337_v3 }
 0x3b1   : > { %v6258_v25 = vpop.f32.mrb[26].mxu1 }
 0x3b2   : > { %v3056_v36 = vpop.f32.mrb[27].mxu1 }
 0x3b3   : > { %v6393_v23 = vpop.f32.mrb[24].mxu0 }
 0x3b4   : > { %v6425_v56 = vadd.f32 %v6393_v23, %v6257_v40  ;;  %v5129_v1 = vpop.f32.mrb[25].mxu0 }
 0x3b5   : > { %v6426_v16 = vadd.f32 %v5129_v1, %v3053_v14  ;;  %v6394_v15 = vpop.f32.mrb[26].mxu0 }
 0x3b6   : > { %v5855_v43 = vpack.c.bf16 %v6425_v56, %v6425_v56  ;;  %v6427_v54 = vadd.f32 %v6394_v15, %v6258_v25  ;;  %v5132_v0 = vpop.f32.mrb[27].mxu0  ;;  %v5287_v13 = vmul.f32 %v6425_v56, %v6425_v56  ;;  %v5243_v37 = vsel %vm1068_vm10, %v6425_v56, 0.0 }
 0x3b7   : > { %v5239_v2 = vsel %vm1068_vm10, %v6426_v16, 0.0  ;;  %v5285_v48 = vmul.f32 %v6426_v16, %v6426_v16  ;;  %v5853_v20 = vpack.c.bf16 %v6426_v16, %v6426_v16  ;;  %v6428_v55 = vadd.f32 %v5132_v0, %v3056_v36 }
 0x3b8   : > { %5523 = vst.msk [vmem:[%s8764_s24 + $0x68] sm:$0xf] %vm5496_vm14, %v5855_v43  ;;  %v5240_v9 = vadd.f32 %v5239_v2, %v5238_v33  ;;  %v5856_v5 = vpack.c.bf16 %v6427_v54, %v6427_v54  ;;  %v5288_v8 = vmul.f32 %v6427_v54, %v6427_v54  ;;  %v5344_v61 = vsel %vm1068_vm10, %v5287_v13, 0.0 }
 0x3b9   : > { %v5340_v7 = vsel %vm1068_vm10, %v5285_v48, 0.0  ;;  %5521 = vst.msk [vmem:[%s8764_s24 + $0x60] sm:$0xf] %vm5496_vm14, %v5853_v20  ;;  %v5241_v52 = vsel %vm1068_vm10, %v6428_v55, 0.0  ;;  %v5286_v47 = vmul.f32 %v6428_v55, %v6428_v55  ;;  %v5854_v27 = vpack.c.bf16 %v6428_v55, %v6428_v55 }
 0x3ba   : > { %v5341_v44 = vadd.f32 %v5340_v7, %v5339_v38  ;;  %v5242_v39 = vadd.f32 %v5241_v52, %v5240_v9  ;;  %5524 = vst.msk [vmem:[%s8764_s24 + $0x6c] sm:$0xf] %vm5496_vm14, %v5856_v5  ;;  %v5245_v50 = vsel %vm1068_vm10, %v6427_v54, 0.0  ;;  %v5346_v63 = vsel %vm1068_vm10, %v5288_v8, 0.0  ;;  %v9440_v5 = vld [vmem:[#allocation49_spill] sm:$0xff] }
 0x3bb   : > { %v5342_v19 = vsel %vm1068_vm10, %v5286_v47, 0.0  ;;  %5522 = vst.msk [vmem:[%s8764_s24 + $0x64] sm:$0xf] %vm5496_vm14, %v5854_v27  ;;  %vm5362_vm15 = vcmp.eq.s32.totalorder %v9440_v5, 0  ;;  %vm5364_vm0 = vcmp.eq.s32.totalorder %v9440_v5, 1 }
 0x3bc   : > { %v5244_v45 = vadd.f32 %v5243_v37, %v5242_v39  ;;  %v5343_v18 = vadd.f32 %v5342_v19, %v5341_v44 }
 0x3be   : > { %v5345_v32 = vadd.f32 %v5344_v61, %v5343_v18  ;;  %v5246_v22 = vadd.f32 %v5245_v50, %v5244_v45 }
 0x3bf   : > { %v6261_v42 = vpop.f32.mrb[28].mxu1 }
 0x3c0   : > { %v3069_v28 = vpop.f32.mrb[29].mxu1  ;;  %v5347_v35 = vadd.f32 %v5346_v63, %v5345_v32 }
 0x3c1   : > { %v6262_v49 = vpop.f32.mrb[30].mxu1 }
 0x3c2   : > { %v3072_v31 = vpop.f32.mrb[31].mxu1 }
 0x3c3   : > { %v6397_v51 = vpop.f32.mrb[28].mxu0 }
 0x3c4   : > { %v6429_v12 = vadd.f32 %v6397_v51, %v6261_v42  ;;  %v5145_v10 = vpop.f32.mrb[29].mxu0 }
 0x3c5   : > { %v6430_v29 = vadd.f32 %v5145_v10, %v3069_v28  ;;  %v6398_v41 = vpop.f32.mrb[30].mxu0 }
 0x3c6   : > { %v5859_v11 = vpack.c.bf16 %v6429_v12, %v6429_v12  ;;  %v6431_v53 = vadd.f32 %v6398_v41, %v6262_v49  ;;  %v5148_v21 = vpop.f32.mrb[31].mxu0  ;;  %v5291_v24 = vmul.f32 %v6429_v12, %v6429_v12  ;;  %v5251_v40 = vsel %vm1068_vm10, %v6429_v12, 0.0 }
 0x3c7   : > { %v5247_v26 = vsel %vm1068_vm10, %v6430_v29, 0.0  ;;  %v5289_v46 = vmul.f32 %v6430_v29, %v6430_v29  ;;  %v5857_v34 = vpack.c.bf16 %v6430_v29, %v6430_v29  ;;  %v6432_v62 = vadd.f32 %v5148_v21, %v3072_v31 }
 0x3c8   : > { %5527 = vst.msk [vmem:[%s8764_s24 + $0x78] sm:$0xf] %vm5496_vm14, %v5859_v11  ;;  %v5248_v30 = vadd.f32 %v5247_v26, %v5246_v22  ;;  %v5860_v17 = vpack.c.bf16 %v6431_v53, %v6431_v53  ;;  %v5292_v33 = vmul.f32 %v6431_v53, %v6431_v53  ;;  %v5352_v38 = vsel %vm1068_vm10, %v5291_v24, 0.0 }
 0x3c9   : > { %v5348_v58 = vsel %vm1068_vm10, %v5289_v46, 0.0  ;;  %5525 = vst.msk [vmem:[%s8764_s24 + $0x70] sm:$0xf] %vm5496_vm14, %v5857_v34  ;;  %v5249_v57 = vsel %vm1068_vm10, %v6432_v62, 0.0  ;;  %v5290_v59 = vmul.f32 %v6432_v62, %v6432_v62  ;;  %v5858_v3 = vpack.c.bf16 %v6432_v62, %v6432_v62 }
 0x3ca   : > { %v5349_v4 = vadd.f32 %v5348_v58, %v5347_v35  ;;  %v5250_v6 = vadd.f32 %v5249_v57, %v5248_v30  ;;  %5528 = vst.msk [vmem:[%s8764_s24 + $0x7c] sm:$0xf] %vm5496_vm14, %v5860_v17  ;;  %v5253_v36 = vsel %vm1068_vm10, %v6431_v53, 0.0  ;;  %v5354_v1 = vsel %vm1068_vm10, %v5292_v33, 0.0 }
 0x3cb   : > { %v5350_v60 = vsel %vm1068_vm10, %v5290_v59, 0.0  ;;  %5526 = vst.msk [vmem:[%s8764_s24 + $0x74] sm:$0xf] %vm5496_vm14, %v5858_v3 }
 0x3cc   : > { %v5252_v14 = vadd.f32 %v5251_v40, %v5250_v6  ;;  %v5351_v25 = vadd.f32 %v5350_v60, %v5349_v4 }
 0x3ce   : > { %v5254_v23 = vadd.f32 %v5253_v36, %v5252_v14  ;;  %v5353_v56 = vadd.f32 %v5352_v38, %v5351_v25 }
 0x3d0   : > { %v5255_v16 = vrot.slane %v5254_v23, 4  ;;  %v5355_v15 = vadd.f32 %v5354_v1, %v5353_v56 }
 0x3d2   : > { %v5256_v43 = vadd.f32 %v5255_v16, %v5254_v23  ;;  %v5356_v54 = vrot.slane %v5355_v15, 4 }
 0x3d4   : > { %v5257_v0 = vrot.slane %v5256_v43, 2  ;;  %v5357_v2 = vadd.f32 %v5356_v54, %v5355_v15 }
 0x3d6   : > { %v5258_v48 = vadd.f32 %v5257_v0, %v5256_v43  ;;  %v5358_v20 = vrot.slane %v5357_v2, 2 }
 0x3d8   : > { %v5259_v55 = vrot.slane %v5258_v48, 1  ;;  %v5359_v13 = vadd.f32 %v5358_v20, %v5357_v2 }
 0x3da   : > { %v5260_v9 = vadd.f32 %v5259_v55, %v5258_v48  ;;  %v5360_v7 = vrot.slane %v5359_v13, 1 }
 0x3dc   : > { %v5361_v52 = vadd.f32 %v5360_v7, %v5359_v13  ;;  %v5363_v47 = vsel %vm5362_vm15, %v5260_v9, 0.0 }
 0x3de   : > { %v5365_v44 = vsel %vm5364_vm0, %v5361_v52, 0.0 }
 0x3df   : > { %v5366_v39 = vadd.f32 %v5365_v44, %v5363_v47 }
 0x3e1   : > { %5367 = vst.msk [vmem:[%s277_s27] sm:$0xff] %vm1068_vm10, %v5366_v39 }
 0x3e2 PF: > { %s18_s21 = sadd.s32 1, %s6729_s21  }
 0x3e3   : > { %p15_p3 = scmp.ge.s32.totalorder %s18_s21, 4  }
 0x3e5   :  { %17 = sbr.rel (!%p15_p3) target bundleno = 1 (0x1), region = 103 }
 0x3ec   :  { %5564 = vsyncpa [#allocation3], 1 }
 0x3ed   :  { %5566 = vsyncpa [#allocation3 + $0x1], 1 }

</bundles_post_ra>
